<compile_context>
chip_gen: v7x
topology: tpu7x:2x2x1
jax: 0.10.0
libtpu: 0.0.40
codegen_flags: <defaults>
</compile_context>

<pallas_src>
import functools

import jax
import jax.numpy as jnp
from jax import lax
from jax.experimental import pallas as pl
from jax.experimental.pallas import tpu as pltpu

_NEG = -1e30
_LANES = 128


# ----------------------------------------------------------------------------
# Host-side parameter packing: all weights/biases of one block go into a single
# lane-padded [rows, 128] f32 slab so the kernel sees ONE input DMA per block.
# `layout` maps name -> (row_offset, rows, cols) and is static metadata.
# ----------------------------------------------------------------------------
def _pack_slab(named, width=_LANES, align=8):
    layout = {}
    blocks = []
    off = 0
    for name, arr in named:
        a = jnp.asarray(arr, jnp.float32)
        if a.ndim == 1:
            a = a.reshape(1, -1)
        r, c = a.shape
        rpad = (-r) % align                       # sublane-aligned row offsets
        layout[name] = (off, r, c)
        blocks.append(jnp.pad(a, ((0, rpad), (0, width - c))))
        off += r + rpad
    return jnp.concatenate(blocks, axis=0), layout


def _take(slab_ref, layout, name):
    off, r, c = layout[name]
    return slab_ref[off:off + r, 0:c]             # static slice -> single load


# ----------------------------------------------------------------------------
# Single fused kernel: graph construction + 2x GATv2 + node attention
# ----------------------------------------------------------------------------
def _fused_forward_kernel(x_ref, l1_ref, l2_ref, mlp_ref, out_ref, *,
                          B, L, D, k_sel, threshold,
                          meta1, meta2, mlp_layout, out_cols):
    neg = jnp.float32(_NEG)
    N = B * L
    x = x_ref[...]                                              # [N, D]

    # ---- graph-structure constants generated in-kernel (no [N,N] input DMAs)
    row = lax.broadcasted_iota(jnp.int32, (N, N), 0).astype(jnp.float32)
    col = lax.broadcasted_iota(jnp.int32, (N, N), 1).astype(jnp.float32)
    same_b = jnp.floor((row + 0.5) / L) == jnp.floor((col + 0.5) / L)
    penalty = jnp.where(same_b, jnp.exp((-3.0 / L) * jnp.abs(row - col)), 0.0)
    eye_m = row == col

    # ---------------- GraphConstructor (dynamic_graph=True, self_loop) ------
    # cosine similarity via pre-normalised rows (rsqrt on EUP) -> one MXU matmul
    xn = x * lax.rsqrt(jnp.sum(x * x, axis=1, keepdims=True) + 1e-12)
    sim = lax.dot_general(xn, xn, (((1,), (1,)), ((), ())),
                          preferred_element_type=jnp.float32)
    sim = sim * penalty                                         # time penalty

    # top-k non-self neighbours per source row (first-occurrence tie-break)
    work0 = jnp.where(eye_m, neg, sim)
    sel0 = jnp.zeros((N, N), jnp.float32)

    def topk_body(_, carry):
        work, selected = carry
        rmax = jnp.max(work, axis=1, keepdims=True)
        cand = jnp.where(work >= rmax, col, jnp.float32(N))     # first-max index
        amin = jnp.min(cand, axis=1, keepdims=True)
        pick = col == amin
        return jnp.where(pick, neg, work), jnp.where(pick, 1.0, selected)

    _, selected = lax.fori_loop(0, k_sel, topk_body, (work0, sel0), unroll=True)

    keep = jnp.logical_and(selected > 0.0, sim > threshold)
    adj = jnp.where(keep, 1.0, 0.0)
    ew = jnp.where(keep, sim, 0.0)
    adj = jnp.where(eye_m, 1.0, adj)                            # self loops, weight 1.0
    ew = jnp.where(eye_m, 1.0, ew)

    # lane-dense output slab: [h2 | attn | adj | ew | zero pad]
    out_ref[...] = jnp.zeros((N, out_cols), jnp.float32)
    out_ref[:, D + 1:D + 1 + N] = adj
    out_ref[:, D + 1 + N:D + 1 + 2 * N] = ew

    # target-major copies shared by both GAT layers (hoisted out of head loops)
    ew_t3 = jnp.transpose(ew)[:, :, None]                       # [T, S, 1]
    mask_t = jnp.transpose(adj) > 0.0                           # [T, S]

    # ---------------- dense GATv2 + ELU + LayerNorm + residual ---------------
    def gat_block(h, slab_ref, meta):
        lay = meta["layout"]
        H, C, concat = meta["heads"], meta["chead"], meta["concat"]
        wl = _take(slab_ref, lay, "wl"); bl = _take(slab_ref, lay, "bl")
        wr = _take(slab_ref, lay, "wr"); br = _take(slab_ref, lay, "br")
        we = _take(slab_ref, lay, "we")
        att = _take(slab_ref, lay, "att")                        # [H, C]
        bc = _take(slab_ref, lay, "bc")
        gamma = _take(slab_ref, lay, "gamma"); beta = _take(slab_ref, lay, "beta")
        wres = _take(slab_ref, lay, "wres"); bres = _take(slab_ref, lay, "bres")

        xl = jnp.dot(h, wl, preferred_element_type=jnp.float32) + bl   # [S, HC]
        xr = jnp.dot(h, wr, preferred_element_type=jnp.float32) + br   # [T, HC]

        parts = []
        for hi in range(H):                      # static unroll, H is tiny
            lo = hi * C
            xl_h = xl[:, lo:lo + C]              # [S, C] contiguous lane slice
            xr_h = xr[:, lo:lo + C]              # [T, C]
            we_h = we[:, lo:lo + C].reshape(1, 1, C)
            att_h = att[hi:hi + 1, :].reshape(1, 1, C)
            # z[t, s, c] = xl[s, c] + xr[t, c] + ew[s, t] * we[c]
            z = xl_h[None, :, :] + xr_h[:, None, :] + ew_t3 * we_h     # [T, S, C]
            z = jnp.where(z > 0.0, z, 0.2 * z)                         # LeakyReLU
            sc = jnp.sum(z * att_h, axis=-1)                           # [T, S]
            sc = jnp.where(mask_t, sc, neg)
            m = jnp.max(sc, axis=-1, keepdims=True)                    # [T, 1]
            p = jnp.exp(sc - m)                  # masked lanes underflow to 0
            alpha = p * pl.reciprocal(jnp.sum(p, axis=-1, keepdims=True),
                                      approx=True)
            # neighbour aggregation on the MXU: [T, S] x [S, C] -> [T, C]
            parts.append(jnp.dot(alpha, xl_h,
                                 preferred_element_type=jnp.float32))
        if concat:
            conv = jnp.concatenate(parts, axis=1)        # [T, H*C] head-major
        else:
            acc = parts[0]
            for t in parts[1:]:
                acc = acc + t
            conv = acc * (1.0 / H)                       # mean over heads
        conv = conv + bc
        # ELU; exp argument clamped at 0 so the dead branch never overflows.
        act = jnp.where(conv > 0.0, conv,
                        jnp.exp(jnp.minimum(conv, 0.0)) - 1.0)
        mu = jnp.mean(act, axis=1, keepdims=True)                       # LayerNorm
        var = jnp.mean((act - mu) ** 2, axis=1, keepdims=True)
        normed = (act - mu) * lax.rsqrt(var + 1e-5) * gamma + beta
        res = jnp.dot(h, wres, preferred_element_type=jnp.float32) + bres
        return normed + res

    h1 = gat_block(x, l1_ref, meta1)
    h2 = gat_block(h1, l2_ref, meta2)

    # ---------------- node attention MLP + softmax over nodes ----------------
    wa1 = _take(mlp_ref, mlp_layout, "wa1"); ba1 = _take(mlp_ref, mlp_layout, "ba1")
    wa2 = _take(mlp_ref, mlp_layout, "wa2"); ba2 = _take(mlp_ref, mlp_layout, "ba2")
    s = jnp.tanh(jnp.dot(h2, wa1, preferred_element_type=jnp.float32) + ba1)
    s = jnp.dot(s, wa2, preferred_element_type=jnp.float32) + ba2       # [N, 1]
    e = jnp.exp(s - jnp.max(s, axis=0, keepdims=True))
    attn = e / jnp.sum(e, axis=0, keepdims=True)

    out_ref[:, 0:D] = h2
    out_ref[:, D:D + 1] = attn


# ----------------------------------------------------------------------------
# Wrapper: one pallas_call, no grid, everything VMEM-resident
# ----------------------------------------------------------------------------
def make_forward(packed, k_neighbors=5, threshold=0.5):
    slab1, meta1, slab2, meta2, slabm, mlp_layout = packed

    def forward(x):                                  # x: [B, L, D]
        B, L, D = x.shape
        N = B * L
        x_flat = x.reshape(N, D)
        out_cols = ((D + 1 + 2 * N + _LANES - 1) // _LANES) * _LANES
        k_sel = min(k_neighbors, N - 1)

        kern = functools.partial(
            _fused_forward_kernel, B=B, L=L, D=D, k_sel=k_sel,
            threshold=float(threshold), meta1=meta1, meta2=meta2,
            mlp_layout=mlp_layout, out_cols=out_cols)

        inputs = [x_flat, slab1, slab2, slabm]
        in_bytes = sum(int(a.size) * 4 for a in inputs)
        out_bytes = N * out_cols * 4
        H1, C1 = meta1["heads"], meta1["chead"]
        H2, C2 = meta2["heads"], meta2["chead"]
        flops = int(2 * N * N * D
                    + 12 * N * N * (H1 * C1 + H2 * C2)       # z / score / aggregation
                    + 6 * N * D * H1 * C1 + 6 * N * H1 * C1 * H2 * C2
                    + 12 * N * (H1 * C1 + C2) + 4 * N * D)
        transcend = int(N * N * (1 + 2 * (H1 + H2)) + 4 * N)
        work = in_bytes + out_bytes + 4 * N * N * (8 + 3 * max(C1, C2))
        vmem_limit = int(min(100 * 1024 * 1024, max(8 * 1024 * 1024, 8 * work)))

        vmem = pltpu.MemorySpace.VMEM
        out = pl.pallas_call(
            kern,
            in_specs=[pl.BlockSpec(memory_space=vmem) for _ in inputs],
            out_specs=pl.BlockSpec(memory_space=vmem),
            out_shape=jax.ShapeDtypeStruct((N, out_cols), jnp.float32),
            compiler_params=pltpu.CompilerParams(vmem_limit_bytes=vmem_limit),
            cost_estimate=pl.CostEstimate(flops=flops, transcendentals=transcend,
                                          bytes_accessed=in_bytes + out_bytes),
        )(*inputs)

        h2 = out[:, 0:D].reshape(B, L, D)
        attn = out[:, D:D + 1].reshape(B, L, 1)
        adj = out[:, D + 1:D + 1 + N]
        ew = out[:, D + 1 + N:D + 1 + 2 * N]
        return h2, adj, ew, attn

    return forward


# ----------------------------------------------------------------------------
# Deterministic parameter construction (packed, pre-transposed layouts)
# ----------------------------------------------------------------------------
def _uniform(key, shape, scale):
    return jax.random.uniform(key, shape, jnp.float32, -scale, scale)


def _linear_params(key, in_f, out_f):
    """Weights stored pre-transposed as [in_f, out_f]; bias [1, out_f]."""
    kw, kb = jax.random.split(key)
    s = 1.0 / (in_f ** 0.5)
    return _uniform(kw, (in_f, out_f), s), _uniform(kb, (1, out_f), s)


def init_gat_layer(key, in_f, out_per_head, heads, concat):
    H, C = heads, out_per_head
    HC = H * C
    out_dim = HC if concat else C
    keys = jax.random.split(key, 5)
    wl, bl = _linear_params(keys[0], in_f, HC)            # lin_l (source)
    wr, br = _linear_params(keys[1], in_f, HC)            # lin_r (target)
    we = _uniform(keys[2], (1, HC), 1.0)                  # lin_edge (edge_dim=1)
    att = _uniform(keys[3], (H, C), 1.0 / (C ** 0.5))     # per-head attention vec
    wres, bres = _linear_params(keys[4], in_f, out_dim)   # residual projection
    named = [("wl", wl), ("wr", wr), ("wres", wres), ("att", att),
             ("bl", bl), ("br", br), ("we", we),
             ("bc", jnp.zeros((1, out_dim), jnp.float32)),
             ("gamma", jnp.ones((1, out_dim), jnp.float32)),
             ("beta", jnp.zeros((1, out_dim), jnp.float32)),
             ("bres", bres)]
    slab, layout = _pack_slab(named)
    meta = dict(layout=layout, heads=H, chead=C, concat=concat)
    return slab, meta


def init_attention_head(key, d):
    ka, kb = jax.random.split(key)
    hid = max(d // 2, 1)
    wa1, ba1 = _linear_params(ka, d, hid)
    wa2, ba2 = _linear_params(kb, hid, 1)
    return _pack_slab([("wa1", wa1), ("ba1", ba1), ("wa2", wa2), ("ba2", ba2)])


if __name__ == "__main__":
    B, L, D = 2, 8, 4            # batch=2, win_size=8, in_channels=4
    hidden_channels, heads = 8, 4

    key = jax.random.PRNGKey(0)
    kx, k1, k2, k3 = jax.random.split(key, 4)
    x = jax.random.normal(kx, (B, L, D), jnp.float32)

    # encoder layer 0: GATv2(4 -> 8, heads=4, concat=True)   => hidden dim 32
    slab1, meta1 = init_gat_layer(k1, D, hidden_channels, heads, concat=True)
    # encoder layer 1: GATv2(32 -> 4, heads=4, concat=False) => out dim D
    slab2, meta2 = init_gat_layer(k2, hidden_channels * heads, D, heads,
                                  concat=False)
    # attention head: Linear(D, D//2) -> Tanh -> Linear(D//2, 1) -> softmax
    slabm, mlp_layout = init_attention_head(k3, D)

    forward = jax.jit(make_forward(
        (slab1, meta1, slab2, meta2, slabm, mlp_layout),
        k_neighbors=5, threshold=0.5))
    out, adj, ew, attn = forward(x)
    jax.block_until_ready((out, adj, ew, attn))

    assert out.shape == (B, L, D)
    assert adj.shape == (B * L, B * L) and ew.shape == (B * L, B * L)
    assert attn.shape == (B, L, 1)
    assert bool(jnp.all(jnp.isfinite(out))) and bool(jnp.all(jnp.isfinite(attn)))
    assert bool(jnp.all(jnp.isfinite(adj))) and bool(jnp.all(jnp.isfinite(ew)))
    assert bool(jnp.all(jnp.diagonal(adj) == 1.0))   # self loops present
    print("KERNEL_OK")
</pallas_src>

<mosaic_0001>
module attributes {stable_mosaic.version = 11 : i64} {
  func.func @_fused_forward_kernel(%arg0: memref<16x4xf32, #tpu.memory_space<vmem>>, %arg1: memref<88x128xf32, #tpu.memory_space<vmem>>, %arg2: memref<160x128xf32, #tpu.memory_space<vmem>>, %arg3: memref<32x128xf32, #tpu.memory_space<vmem>>, %arg4: memref<16x128xf32, #tpu.memory_space<vmem>>) attributes {dimension_semantics = [], scalar_prefetch = 0 : i64, scratch_operands = 0 : i64, tpu.core_type = #tpu.core_type<tc>} {
    %c0 = arith.constant 0 : index
    %c0_0 = arith.constant 0 : index
    %0 = vector.load %arg0[%c0, %c0_0] : memref<16x4xf32, #tpu.memory_space<vmem>>, vector<16x4xf32>
    %1 = tpu.iota {dimensions = array<i32: 0>} : vector<16x16xi32>
    %2 = arith.sitofp %1 : vector<16x16xi32> to vector<16x16xf32>
    %3 = tpu.iota {dimensions = array<i32: 1>} : vector<16x16xi32>
    %4 = arith.sitofp %3 : vector<16x16xi32> to vector<16x16xf32>
    %cst = arith.constant 5.000000e-01 : f32
    %5 = vector.broadcast %cst : f32 to vector<16x16xf32>
    %6 = arith.addf %2, %5 : vector<16x16xf32>
    %cst_1 = arith.constant 8.000000e+00 : f32
    %7 = vector.broadcast %cst_1 : f32 to vector<16x16xf32>
    %8 = arith.divf %6, %7 : vector<16x16xf32>
    %9 = math.floor %8 : vector<16x16xf32>
    %cst_2 = arith.constant 5.000000e-01 : f32
    %10 = vector.broadcast %cst_2 : f32 to vector<16x16xf32>
    %11 = arith.addf %4, %10 : vector<16x16xf32>
    %cst_3 = arith.constant 8.000000e+00 : f32
    %12 = vector.broadcast %cst_3 : f32 to vector<16x16xf32>
    %13 = arith.divf %11, %12 : vector<16x16xf32>
    %14 = math.floor %13 : vector<16x16xf32>
    %15 = arith.cmpf oeq, %9, %14 : vector<16x16xf32>
    %16 = arith.subf %2, %4 : vector<16x16xf32>
    %17 = math.absf %16 : vector<16x16xf32>
    %cst_4 = arith.constant -3.750000e-01 : f32
    %18 = vector.broadcast %cst_4 : f32 to vector<16x16xf32>
    %19 = arith.mulf %18, %17 : vector<16x16xf32>
    %20 = math.exp %19 : vector<16x16xf32>
    %cst_5 = arith.constant 0.000000e+00 : f32
    %21 = vector.broadcast %cst_5 : f32 to vector<16x16xf32>
    %22 = arith.select %15, %20, %21 : vector<16x16xi1>, vector<16x16xf32>
    %23 = arith.cmpf oeq, %2, %4 : vector<16x16xf32>
    %24 = arith.mulf %0, %0 : vector<16x4xf32>
    %cst_6 = arith.constant dense<0.000000e+00> : vector<16xf32>
    %25 = vector.multi_reduction <add>, %24, %cst_6 [1] : vector<16x4xf32> to vector<16xf32>
    %26 = vector.shape_cast %25 : vector<16xf32> to vector<16x1xf32>
    %cst_7 = arith.constant 9.99999996E-13 : f32
    %27 = vector.broadcast %cst_7 : f32 to vector<16x1xf32>
    %28 = arith.addf %26, %27 : vector<16x1xf32>
    %29 = math.rsqrt %28 : vector<16x1xf32>
    %30 = vector.broadcast %29 : vector<16x1xf32> to vector<16x4xf32>
    %31 = arith.mulf %0, %30 : vector<16x4xf32>
    %cst_8 = arith.constant dense<0.000000e+00> : vector<16x16xf32>
    %32 = tpu.matmul %31, %31, %cst_8 {dimension_numbers = #tpu.dot_dimension_numbers<[1], [1], [0], [0], [0, 0, 1, 0], [], []>} : vector<16x4xf32>, vector<16x4xf32>, vector<16x16xf32> -> vector<16x16xf32>
    %33 = arith.mulf %32, %22 : vector<16x16xf32>
    %cst_9 = arith.constant -1.000000e+30 : f32
    %34 = vector.broadcast %cst_9 : f32 to vector<16x16xf32>
    %35 = arith.select %23, %34, %33 : vector<16x16xi1>, vector<16x16xf32>
    %cst_10 = arith.constant 0.000000e+00 : f32
    %36 = vector.broadcast %cst_10 : f32 to vector<16x16xf32>
    %cst_11 = arith.constant -1.000000e+30 : f32
    %c0_i32 = arith.constant 0 : i32
    %cst_12 = arith.constant dense<0xFF800000> : vector<16xf32>
    %37 = vector.multi_reduction <maximumf>, %35, %cst_12 [1] : vector<16x16xf32> to vector<16xf32>
    %38 = vector.shape_cast %37 : vector<16xf32> to vector<16x1xf32>
    %39 = vector.broadcast %38 : vector<16x1xf32> to vector<16x16xf32>
    %40 = arith.cmpf oge, %35, %39 : vector<16x16xf32>
    %cst_13 = arith.constant 1.600000e+01 : f32
    %41 = vector.broadcast %cst_13 : f32 to vector<16x16xf32>
    %42 = arith.select %40, %4, %41 : vector<16x16xi1>, vector<16x16xf32>
    %cst_14 = arith.constant dense<0x7F800000> : vector<16xf32>
    %43 = vector.multi_reduction <minimumf>, %42, %cst_14 [1] : vector<16x16xf32> to vector<16xf32>
    %44 = vector.shape_cast %43 : vector<16xf32> to vector<16x1xf32>
    %45 = vector.broadcast %44 : vector<16x1xf32> to vector<16x16xf32>
    %46 = arith.cmpf oeq, %4, %45 : vector<16x16xf32>
    %47 = vector.broadcast %cst_11 : f32 to vector<16x16xf32>
    %48 = arith.select %46, %47, %35 : vector<16x16xi1>, vector<16x16xf32>
    %cst_15 = arith.constant 1.000000e+00 : f32
    %49 = vector.broadcast %cst_15 : f32 to vector<16x16xf32>
    %50 = arith.select %46, %49, %36 : vector<16x16xi1>, vector<16x16xf32>
    %c1_i32 = arith.constant 1 : i32
    %cst_16 = arith.constant dense<0xFF800000> : vector<16xf32>
    %51 = vector.multi_reduction <maximumf>, %48, %cst_16 [1] : vector<16x16xf32> to vector<16xf32>
    %52 = vector.shape_cast %51 : vector<16xf32> to vector<16x1xf32>
    %53 = vector.broadcast %52 : vector<16x1xf32> to vector<16x16xf32>
    %54 = arith.cmpf oge, %48, %53 : vector<16x16xf32>
    %cst_17 = arith.constant 1.600000e+01 : f32
    %55 = vector.broadcast %cst_17 : f32 to vector<16x16xf32>
    %56 = arith.select %54, %4, %55 : vector<16x16xi1>, vector<16x16xf32>
    %cst_18 = arith.constant dense<0x7F800000> : vector<16xf32>
    %57 = vector.multi_reduction <minimumf>, %56, %cst_18 [1] : vector<16x16xf32> to vector<16xf32>
    %58 = vector.shape_cast %57 : vector<16xf32> to vector<16x1xf32>
    %59 = vector.broadcast %58 : vector<16x1xf32> to vector<16x16xf32>
    %60 = arith.cmpf oeq, %4, %59 : vector<16x16xf32>
    %61 = vector.broadcast %cst_11 : f32 to vector<16x16xf32>
    %62 = arith.select %60, %61, %48 : vector<16x16xi1>, vector<16x16xf32>
    %cst_19 = arith.constant 1.000000e+00 : f32
    %63 = vector.broadcast %cst_19 : f32 to vector<16x16xf32>
    %64 = arith.select %60, %63, %50 : vector<16x16xi1>, vector<16x16xf32>
    %c2_i32 = arith.constant 2 : i32
    %cst_20 = arith.constant dense<0xFF800000> : vector<16xf32>
    %65 = vector.multi_reduction <maximumf>, %62, %cst_20 [1] : vector<16x16xf32> to vector<16xf32>
    %66 = vector.shape_cast %65 : vector<16xf32> to vector<16x1xf32>
    %67 = vector.broadcast %66 : vector<16x1xf32> to vector<16x16xf32>
    %68 = arith.cmpf oge, %62, %67 : vector<16x16xf32>
    %cst_21 = arith.constant 1.600000e+01 : f32
    %69 = vector.broadcast %cst_21 : f32 to vector<16x16xf32>
    %70 = arith.select %68, %4, %69 : vector<16x16xi1>, vector<16x16xf32>
    %cst_22 = arith.constant dense<0x7F800000> : vector<16xf32>
    %71 = vector.multi_reduction <minimumf>, %70, %cst_22 [1] : vector<16x16xf32> to vector<16xf32>
    %72 = vector.shape_cast %71 : vector<16xf32> to vector<16x1xf32>
    %73 = vector.broadcast %72 : vector<16x1xf32> to vector<16x16xf32>
    %74 = arith.cmpf oeq, %4, %73 : vector<16x16xf32>
    %75 = vector.broadcast %cst_11 : f32 to vector<16x16xf32>
    %76 = arith.select %74, %75, %62 : vector<16x16xi1>, vector<16x16xf32>
    %cst_23 = arith.constant 1.000000e+00 : f32
    %77 = vector.broadcast %cst_23 : f32 to vector<16x16xf32>
    %78 = arith.select %74, %77, %64 : vector<16x16xi1>, vector<16x16xf32>
    %c3_i32 = arith.constant 3 : i32
    %cst_24 = arith.constant dense<0xFF800000> : vector<16xf32>
    %79 = vector.multi_reduction <maximumf>, %76, %cst_24 [1] : vector<16x16xf32> to vector<16xf32>
    %80 = vector.shape_cast %79 : vector<16xf32> to vector<16x1xf32>
    %81 = vector.broadcast %80 : vector<16x1xf32> to vector<16x16xf32>
    %82 = arith.cmpf oge, %76, %81 : vector<16x16xf32>
    %cst_25 = arith.constant 1.600000e+01 : f32
    %83 = vector.broadcast %cst_25 : f32 to vector<16x16xf32>
    %84 = arith.select %82, %4, %83 : vector<16x16xi1>, vector<16x16xf32>
    %cst_26 = arith.constant dense<0x7F800000> : vector<16xf32>
    %85 = vector.multi_reduction <minimumf>, %84, %cst_26 [1] : vector<16x16xf32> to vector<16xf32>
    %86 = vector.shape_cast %85 : vector<16xf32> to vector<16x1xf32>
    %87 = vector.broadcast %86 : vector<16x1xf32> to vector<16x16xf32>
    %88 = arith.cmpf oeq, %4, %87 : vector<16x16xf32>
    %89 = vector.broadcast %cst_11 : f32 to vector<16x16xf32>
    %90 = arith.select %88, %89, %76 : vector<16x16xi1>, vector<16x16xf32>
    %cst_27 = arith.constant 1.000000e+00 : f32
    %91 = vector.broadcast %cst_27 : f32 to vector<16x16xf32>
    %92 = arith.select %88, %91, %78 : vector<16x16xi1>, vector<16x16xf32>
    %c4_i32 = arith.constant 4 : i32
    %cst_28 = arith.constant dense<0xFF800000> : vector<16xf32>
    %93 = vector.multi_reduction <maximumf>, %90, %cst_28 [1] : vector<16x16xf32> to vector<16xf32>
    %94 = vector.shape_cast %93 : vector<16xf32> to vector<16x1xf32>
    %95 = vector.broadcast %94 : vector<16x1xf32> to vector<16x16xf32>
    %96 = arith.cmpf oge, %90, %95 : vector<16x16xf32>
    %cst_29 = arith.constant 1.600000e+01 : f32
    %97 = vector.broadcast %cst_29 : f32 to vector<16x16xf32>
    %98 = arith.select %96, %4, %97 : vector<16x16xi1>, vector<16x16xf32>
    %cst_30 = arith.constant dense<0x7F800000> : vector<16xf32>
    %99 = vector.multi_reduction <minimumf>, %98, %cst_30 [1] : vector<16x16xf32> to vector<16xf32>
    %100 = vector.shape_cast %99 : vector<16xf32> to vector<16x1xf32>
    %101 = vector.broadcast %100 : vector<16x1xf32> to vector<16x16xf32>
    %102 = arith.cmpf oeq, %4, %101 : vector<16x16xf32>
    %103 = vector.broadcast %cst_11 : f32 to vector<16x16xf32>
    %104 = arith.select %102, %103, %90 : vector<16x16xi1>, vector<16x16xf32>
    %cst_31 = arith.constant 1.000000e+00 : f32
    %105 = vector.broadcast %cst_31 : f32 to vector<16x16xf32>
    %106 = arith.select %102, %105, %92 : vector<16x16xi1>, vector<16x16xf32>
    %cst_32 = arith.constant 0.000000e+00 : f32
    %107 = vector.broadcast %cst_32 : f32 to vector<16x16xf32>
    %108 = arith.cmpf ogt, %106, %107 : vector<16x16xf32>
    %cst_33 = arith.constant 5.000000e-01 : f32
    %109 = vector.broadcast %cst_33 : f32 to vector<16x16xf32>
    %110 = arith.cmpf ogt, %33, %109 : vector<16x16xf32>
    %111 = arith.andi %108, %110 : vector<16x16xi1>
    %cst_34 = arith.constant 1.000000e+00 : f32
    %cst_35 = arith.constant 0.000000e+00 : f32
    %112 = vector.broadcast %cst_34 : f32 to vector<16x16xf32>
    %113 = vector.broadcast %cst_35 : f32 to vector<16x16xf32>
    %114 = arith.select %111, %112, %113 : vector<16x16xi1>, vector<16x16xf32>
    %cst_36 = arith.constant 0.000000e+00 : f32
    %115 = vector.broadcast %cst_36 : f32 to vector<16x16xf32>
    %116 = arith.select %111, %33, %115 : vector<16x16xi1>, vector<16x16xf32>
    %cst_37 = arith.constant 1.000000e+00 : f32
    %117 = vector.broadcast %cst_37 : f32 to vector<16x16xf32>
    %118 = arith.select %23, %117, %114 : vector<16x16xi1>, vector<16x16xf32>
    %cst_38 = arith.constant 1.000000e+00 : f32
    %119 = vector.broadcast %cst_38 : f32 to vector<16x16xf32>
    %120 = arith.select %23, %119, %116 : vector<16x16xi1>, vector<16x16xf32>
    %cst_39 = arith.constant 0.000000e+00 : f32
    %121 = vector.broadcast %cst_39 : f32 to vector<16x128xf32>
    %c0_40 = arith.constant 0 : index
    %c0_41 = arith.constant 0 : index
    %122 = vector.load %arg4[%c0_40, %c0_41] : memref<16x128xf32, #tpu.memory_space<vmem>>, vector<16x128xf32>
    tpu.vector_store %arg4[%c0_40, %c0_41], %121 {strides = array<i32>} : memref<16x128xf32, #tpu.memory_space<vmem>>, vector<16x128xf32>,
    %c0_42 = arith.constant 0 : index
    %c5 = arith.constant 5 : index
    %123 = vector.load %arg4[%c0_42, %c5] : memref<16x128xf32, #tpu.memory_space<vmem>>, vector<16x16xf32>
    tpu.vector_store %arg4[%c0_42, %c5], %118 {strides = array<i32>} : memref<16x128xf32, #tpu.memory_space<vmem>>, vector<16x16xf32>,
    %c0_43 = arith.constant 0 : index
    %c21 = arith.constant 21 : index
    %124 = vector.load %arg4[%c0_43, %c21] : memref<16x128xf32, #tpu.memory_space<vmem>>, vector<16x16xf32>
    tpu.vector_store %arg4[%c0_43, %c21], %120 {strides = array<i32>} : memref<16x128xf32, #tpu.memory_space<vmem>>, vector<16x16xf32>,
    %125 = tpu.transpose %120, [1, 0] : vector<16x16xf32> -> vector<16x16xf32>
    %126 = vector.shape_cast %125 : vector<16x16xf32> to vector<16x16x1xf32>
    %127 = tpu.transpose %118, [1, 0] : vector<16x16xf32> -> vector<16x16xf32>
    %cst_44 = arith.constant 0.000000e+00 : f32
    %128 = vector.broadcast %cst_44 : f32 to vector<16x16xf32>
    %129 = arith.cmpf ogt, %127, %128 : vector<16x16xf32>
    %c0_45 = arith.constant 0 : index
    %c0_46 = arith.constant 0 : index
    %130 = vector.load %arg1[%c0_45, %c0_46] : memref<88x128xf32, #tpu.memory_space<vmem>>, vector<4x32xf32>
    %c32 = arith.constant 32 : index
    %c0_47 = arith.constant 0 : index
    %131 = vector.load %arg1[%c32, %c0_47] : memref<88x128xf32, #tpu.memory_space<vmem>>, vector<1x32xf32>
    %c8 = arith.constant 8 : index
    %c0_48 = arith.constant 0 : index
    %132 = vector.load %arg1[%c8, %c0_48] : memref<88x128xf32, #tpu.memory_space<vmem>>, vector<4x32xf32>
    %c40 = arith.constant 40 : index
    %c0_49 = arith.constant 0 : index
    %133 = vector.load %arg1[%c40, %c0_49] : memref<88x128xf32, #tpu.memory_space<vmem>>, vector<1x32xf32>
    %c48 = arith.constant 48 : index
    %c0_50 = arith.constant 0 : index
    %134 = vector.load %arg1[%c48, %c0_50] : memref<88x128xf32, #tpu.memory_space<vmem>>, vector<1x32xf32>
    %c24 = arith.constant 24 : index
    %c0_51 = arith.constant 0 : index
    %135 = vector.load %arg1[%c24, %c0_51] : memref<88x128xf32, #tpu.memory_space<vmem>>, vector<4x8xf32>
    %c56 = arith.constant 56 : index
    %c0_52 = arith.constant 0 : index
    %136 = vector.load %arg1[%c56, %c0_52] : memref<88x128xf32, #tpu.memory_space<vmem>>, vector<1x32xf32>
    %c64 = arith.constant 64 : index
    %c0_53 = arith.constant 0 : index
    %137 = vector.load %arg1[%c64, %c0_53] : memref<88x128xf32, #tpu.memory_space<vmem>>, vector<1x32xf32>
    %c72 = arith.constant 72 : index
    %c0_54 = arith.constant 0 : index
    %138 = vector.load %arg1[%c72, %c0_54] : memref<88x128xf32, #tpu.memory_space<vmem>>, vector<1x32xf32>
    %c16 = arith.constant 16 : index
    %c0_55 = arith.constant 0 : index
    %139 = vector.load %arg1[%c16, %c0_55] : memref<88x128xf32, #tpu.memory_space<vmem>>, vector<4x32xf32>
    %c80 = arith.constant 80 : index
    %c0_56 = arith.constant 0 : index
    %140 = vector.load %arg1[%c80, %c0_56] : memref<88x128xf32, #tpu.memory_space<vmem>>, vector<1x32xf32>
    %cst_57 = arith.constant dense<0.000000e+00> : vector<16x32xf32>
    %141 = tpu.matmul %0, %130, %cst_57 {dimension_numbers = #tpu.dot_dimension_numbers<[1], [0], [0], [1], [0, 0, 1, 1], [], []>} : vector<16x4xf32>, vector<4x32xf32>, vector<16x32xf32> -> vector<16x32xf32>
    %142 = vector.broadcast %131 : vector<1x32xf32> to vector<16x32xf32>
    %143 = arith.addf %141, %142 : vector<16x32xf32>
    %cst_58 = arith.constant dense<0.000000e+00> : vector<16x32xf32>
    %144 = tpu.matmul %0, %132, %cst_58 {dimension_numbers = #tpu.dot_dimension_numbers<[1], [0], [0], [1], [0, 0, 1, 1], [], []>} : vector<16x4xf32>, vector<4x32xf32>, vector<16x32xf32> -> vector<16x32xf32>
    %145 = vector.broadcast %133 : vector<1x32xf32> to vector<16x32xf32>
    %146 = arith.addf %144, %145 : vector<16x32xf32>
    %147 = vector.extract_strided_slice %143 {offsets = [0, 0], sizes = [16, 8], strides = [1, 1]} : vector<16x32xf32> to vector<16x8xf32>
    %148 = vector.extract_strided_slice %146 {offsets = [0, 0], sizes = [16, 8], strides = [1, 1]} : vector<16x32xf32> to vector<16x8xf32>
    %149 = vector.extract_strided_slice %134 {offsets = [0, 0], sizes = [1, 8], strides = [1, 1]} : vector<1x32xf32> to vector<1x8xf32>
    %150 = vector.shape_cast %149 : vector<1x8xf32> to vector<1x1x8xf32>
    %151 = vector.extract_strided_slice %135 {offsets = [0, 0], sizes = [1, 8], strides = [1, 1]} : vector<4x8xf32> to vector<1x8xf32>
    %152 = vector.shape_cast %151 : vector<1x8xf32> to vector<1x1x8xf32>
    %153 = vector.shape_cast %147 : vector<16x8xf32> to vector<1x16x8xf32>
    %154 = vector.shape_cast %148 : vector<16x8xf32> to vector<16x1x8xf32>
    %155 = vector.broadcast %153 : vector<1x16x8xf32> to vector<16x16x8xf32>
    %156 = vector.broadcast %154 : vector<16x1x8xf32> to vector<16x16x8xf32>
    %157 = arith.addf %155, %156 : vector<16x16x8xf32>
    %158 = vector.broadcast %126 : vector<16x16x1xf32> to vector<16x16x8xf32>
    %159 = vector.broadcast %150 : vector<1x1x8xf32> to vector<16x16x8xf32>
    %160 = arith.mulf %158, %159 : vector<16x16x8xf32>
    %161 = arith.addf %157, %160 : vector<16x16x8xf32>
    %cst_59 = arith.constant 0.000000e+00 : f32
    %162 = vector.broadcast %cst_59 : f32 to vector<16x16x8xf32>
    %163 = arith.cmpf ogt, %161, %162 : vector<16x16x8xf32>
    %cst_60 = arith.constant 2.000000e-01 : f32
    %164 = vector.broadcast %cst_60 : f32 to vector<16x16x8xf32>
    %165 = arith.mulf %164, %161 : vector<16x16x8xf32>
    %166 = arith.select %163, %161, %165 : vector<16x16x8xi1>, vector<16x16x8xf32>
    %167 = vector.broadcast %152 : vector<1x1x8xf32> to vector<16x16x8xf32>
    %168 = arith.mulf %166, %167 : vector<16x16x8xf32>
    %cst_61 = arith.constant dense<0.000000e+00> : vector<16x16xf32>
    %169 = vector.multi_reduction <add>, %168, %cst_61 [2] : vector<16x16x8xf32> to vector<16x16xf32>
    %cst_62 = arith.constant -1.000000e+30 : f32
    %170 = vector.broadcast %cst_62 : f32 to vector<16x16xf32>
    %171 = arith.select %129, %169, %170 : vector<16x16xi1>, vector<16x16xf32>
    %cst_63 = arith.constant dense<0xFF800000> : vector<16xf32>
    %172 = vector.multi_reduction <maximumf>, %171, %cst_63 [1] : vector<16x16xf32> to vector<16xf32>
    %173 = vector.shape_cast %172 : vector<16xf32> to vector<16x1xf32>
    %174 = vector.broadcast %173 : vector<16x1xf32> to vector<16x16xf32>
    %175 = arith.subf %171, %174 : vector<16x16xf32>
    %176 = math.exp %175 : vector<16x16xf32>
    %cst_64 = arith.constant dense<0.000000e+00> : vector<16xf32>
    %177 = vector.multi_reduction <add>, %176, %cst_64 [1] : vector<16x16xf32> to vector<16xf32>
    %178 = vector.shape_cast %177 : vector<16xf32> to vector<16x1xf32>
    %179 = tpu.reciprocal %178 {approx = true} : vector<16x1xf32> -> vector<16x1xf32>
    %180 = vector.broadcast %179 : vector<16x1xf32> to vector<16x16xf32>
    %181 = arith.mulf %176, %180 : vector<16x16xf32>
    %cst_65 = arith.constant dense<0.000000e+00> : vector<16x8xf32>
    %182 = tpu.matmul %181, %147, %cst_65 {dimension_numbers = #tpu.dot_dimension_numbers<[1], [0], [0], [1], [0, 0, 1, 1], [], []>} : vector<16x16xf32>, vector<16x8xf32>, vector<16x8xf32> -> vector<16x8xf32>
    %183 = vector.extract_strided_slice %143 {offsets = [0, 8], sizes = [16, 8], strides = [1, 1]} : vector<16x32xf32> to vector<16x8xf32>
    %184 = vector.extract_strided_slice %146 {offsets = [0, 8], sizes = [16, 8], strides = [1, 1]} : vector<16x32xf32> to vector<16x8xf32>
    %185 = vector.extract_strided_slice %134 {offsets = [0, 8], sizes = [1, 8], strides = [1, 1]} : vector<1x32xf32> to vector<1x8xf32>
    %186 = vector.shape_cast %185 : vector<1x8xf32> to vector<1x1x8xf32>
    %187 = vector.extract_strided_slice %135 {offsets = [1, 0], sizes = [1, 8], strides = [1, 1]} : vector<4x8xf32> to vector<1x8xf32>
    %188 = vector.shape_cast %187 : vector<1x8xf32> to vector<1x1x8xf32>
    %189 = vector.shape_cast %183 : vector<16x8xf32> to vector<1x16x8xf32>
    %190 = vector.shape_cast %184 : vector<16x8xf32> to vector<16x1x8xf32>
    %191 = vector.broadcast %189 : vector<1x16x8xf32> to vector<16x16x8xf32>
    %192 = vector.broadcast %190 : vector<16x1x8xf32> to vector<16x16x8xf32>
    %193 = arith.addf %191, %192 : vector<16x16x8xf32>
    %194 = vector.broadcast %126 : vector<16x16x1xf32> to vector<16x16x8xf32>
    %195 = vector.broadcast %186 : vector<1x1x8xf32> to vector<16x16x8xf32>
    %196 = arith.mulf %194, %195 : vector<16x16x8xf32>
    %197 = arith.addf %193, %196 : vector<16x16x8xf32>
    %cst_66 = arith.constant 0.000000e+00 : f32
    %198 = vector.broadcast %cst_66 : f32 to vector<16x16x8xf32>
    %199 = arith.cmpf ogt, %197, %198 : vector<16x16x8xf32>
    %cst_67 = arith.constant 2.000000e-01 : f32
    %200 = vector.broadcast %cst_67 : f32 to vector<16x16x8xf32>
    %201 = arith.mulf %200, %197 : vector<16x16x8xf32>
    %202 = arith.select %199, %197, %201 : vector<16x16x8xi1>, vector<16x16x8xf32>
    %203 = vector.broadcast %188 : vector<1x1x8xf32> to vector<16x16x8xf32>
    %204 = arith.mulf %202, %203 : vector<16x16x8xf32>
    %cst_68 = arith.constant dense<0.000000e+00> : vector<16x16xf32>
    %205 = vector.multi_reduction <add>, %204, %cst_68 [2] : vector<16x16x8xf32> to vector<16x16xf32>
    %cst_69 = arith.constant -1.000000e+30 : f32
    %206 = vector.broadcast %cst_69 : f32 to vector<16x16xf32>
    %207 = arith.select %129, %205, %206 : vector<16x16xi1>, vector<16x16xf32>
    %cst_70 = arith.constant dense<0xFF800000> : vector<16xf32>
    %208 = vector.multi_reduction <maximumf>, %207, %cst_70 [1] : vector<16x16xf32> to vector<16xf32>
    %209 = vector.shape_cast %208 : vector<16xf32> to vector<16x1xf32>
    %210 = vector.broadcast %209 : vector<16x1xf32> to vector<16x16xf32>
    %211 = arith.subf %207, %210 : vector<16x16xf32>
    %212 = math.exp %211 : vector<16x16xf32>
    %cst_71 = arith.constant dense<0.000000e+00> : vector<16xf32>
    %213 = vector.multi_reduction <add>, %212, %cst_71 [1] : vector<16x16xf32> to vector<16xf32>
    %214 = vector.shape_cast %213 : vector<16xf32> to vector<16x1xf32>
    %215 = tpu.reciprocal %214 {approx = true} : vector<16x1xf32> -> vector<16x1xf32>
    %216 = vector.broadcast %215 : vector<16x1xf32> to vector<16x16xf32>
    %217 = arith.mulf %212, %216 : vector<16x16xf32>
    %cst_72 = arith.constant dense<0.000000e+00> : vector<16x8xf32>
    %218 = tpu.matmul %217, %183, %cst_72 {dimension_numbers = #tpu.dot_dimension_numbers<[1], [0], [0], [1], [0, 0, 1, 1], [], []>} : vector<16x16xf32>, vector<16x8xf32>, vector<16x8xf32> -> vector<16x8xf32>
    %219 = vector.extract_strided_slice %143 {offsets = [0, 16], sizes = [16, 8], strides = [1, 1]} : vector<16x32xf32> to vector<16x8xf32>
    %220 = vector.extract_strided_slice %146 {offsets = [0, 16], sizes = [16, 8], strides = [1, 1]} : vector<16x32xf32> to vector<16x8xf32>
    %221 = vector.extract_strided_slice %134 {offsets = [0, 16], sizes = [1, 8], strides = [1, 1]} : vector<1x32xf32> to vector<1x8xf32>
    %222 = vector.shape_cast %221 : vector<1x8xf32> to vector<1x1x8xf32>
    %223 = vector.extract_strided_slice %135 {offsets = [2, 0], sizes = [1, 8], strides = [1, 1]} : vector<4x8xf32> to vector<1x8xf32>
    %224 = vector.shape_cast %223 : vector<1x8xf32> to vector<1x1x8xf32>
    %225 = vector.shape_cast %219 : vector<16x8xf32> to vector<1x16x8xf32>
    %226 = vector.shape_cast %220 : vector<16x8xf32> to vector<16x1x8xf32>
    %227 = vector.broadcast %225 : vector<1x16x8xf32> to vector<16x16x8xf32>
    %228 = vector.broadcast %226 : vector<16x1x8xf32> to vector<16x16x8xf32>
    %229 = arith.addf %227, %228 : vector<16x16x8xf32>
    %230 = vector.broadcast %126 : vector<16x16x1xf32> to vector<16x16x8xf32>
    %231 = vector.broadcast %222 : vector<1x1x8xf32> to vector<16x16x8xf32>
    %232 = arith.mulf %230, %231 : vector<16x16x8xf32>
    %233 = arith.addf %229, %232 : vector<16x16x8xf32>
    %cst_73 = arith.constant 0.000000e+00 : f32
    %234 = vector.broadcast %cst_73 : f32 to vector<16x16x8xf32>
    %235 = arith.cmpf ogt, %233, %234 : vector<16x16x8xf32>
    %cst_74 = arith.constant 2.000000e-01 : f32
    %236 = vector.broadcast %cst_74 : f32 to vector<16x16x8xf32>
    %237 = arith.mulf %236, %233 : vector<16x16x8xf32>
    %238 = arith.select %235, %233, %237 : vector<16x16x8xi1>, vector<16x16x8xf32>
    %239 = vector.broadcast %224 : vector<1x1x8xf32> to vector<16x16x8xf32>
    %240 = arith.mulf %238, %239 : vector<16x16x8xf32>
    %cst_75 = arith.constant dense<0.000000e+00> : vector<16x16xf32>
    %241 = vector.multi_reduction <add>, %240, %cst_75 [2] : vector<16x16x8xf32> to vector<16x16xf32>
    %cst_76 = arith.constant -1.000000e+30 : f32
    %242 = vector.broadcast %cst_76 : f32 to vector<16x16xf32>
    %243 = arith.select %129, %241, %242 : vector<16x16xi1>, vector<16x16xf32>
    %cst_77 = arith.constant dense<0xFF800000> : vector<16xf32>
    %244 = vector.multi_reduction <maximumf>, %243, %cst_77 [1] : vector<16x16xf32> to vector<16xf32>
    %245 = vector.shape_cast %244 : vector<16xf32> to vector<16x1xf32>
    %246 = vector.broadcast %245 : vector<16x1xf32> to vector<16x16xf32>
    %247 = arith.subf %243, %246 : vector<16x16xf32>
    %248 = math.exp %247 : vector<16x16xf32>
    %cst_78 = arith.constant dense<0.000000e+00> : vector<16xf32>
    %249 = vector.multi_reduction <add>, %248, %cst_78 [1] : vector<16x16xf32> to vector<16xf32>
    %250 = vector.shape_cast %249 : vector<16xf32> to vector<16x1xf32>
    %251 = tpu.reciprocal %250 {approx = true} : vector<16x1xf32> -> vector<16x1xf32>
    %252 = vector.broadcast %251 : vector<16x1xf32> to vector<16x16xf32>
    %253 = arith.mulf %248, %252 : vector<16x16xf32>
    %cst_79 = arith.constant dense<0.000000e+00> : vector<16x8xf32>
    %254 = tpu.matmul %253, %219, %cst_79 {dimension_numbers = #tpu.dot_dimension_numbers<[1], [0], [0], [1], [0, 0, 1, 1], [], []>} : vector<16x16xf32>, vector<16x8xf32>, vector<16x8xf32> -> vector<16x8xf32>
    %255 = vector.extract_strided_slice %143 {offsets = [0, 24], sizes = [16, 8], strides = [1, 1]} : vector<16x32xf32> to vector<16x8xf32>
    %256 = vector.extract_strided_slice %146 {offsets = [0, 24], sizes = [16, 8], strides = [1, 1]} : vector<16x32xf32> to vector<16x8xf32>
    %257 = vector.extract_strided_slice %134 {offsets = [0, 24], sizes = [1, 8], strides = [1, 1]} : vector<1x32xf32> to vector<1x8xf32>
    %258 = vector.shape_cast %257 : vector<1x8xf32> to vector<1x1x8xf32>
    %259 = vector.extract_strided_slice %135 {offsets = [3, 0], sizes = [1, 8], strides = [1, 1]} : vector<4x8xf32> to vector<1x8xf32>
    %260 = vector.shape_cast %259 : vector<1x8xf32> to vector<1x1x8xf32>
    %261 = vector.shape_cast %255 : vector<16x8xf32> to vector<1x16x8xf32>
    %262 = vector.shape_cast %256 : vector<16x8xf32> to vector<16x1x8xf32>
    %263 = vector.broadcast %261 : vector<1x16x8xf32> to vector<16x16x8xf32>
    %264 = vector.broadcast %262 : vector<16x1x8xf32> to vector<16x16x8xf32>
    %265 = arith.addf %263, %264 : vector<16x16x8xf32>
    %266 = vector.broadcast %126 : vector<16x16x1xf32> to vector<16x16x8xf32>
    %267 = vector.broadcast %258 : vector<1x1x8xf32> to vector<16x16x8xf32>
    %268 = arith.mulf %266, %267 : vector<16x16x8xf32>
    %269 = arith.addf %265, %268 : vector<16x16x8xf32>
    %cst_80 = arith.constant 0.000000e+00 : f32
    %270 = vector.broadcast %cst_80 : f32 to vector<16x16x8xf32>
    %271 = arith.cmpf ogt, %269, %270 : vector<16x16x8xf32>
    %cst_81 = arith.constant 2.000000e-01 : f32
    %272 = vector.broadcast %cst_81 : f32 to vector<16x16x8xf32>
    %273 = arith.mulf %272, %269 : vector<16x16x8xf32>
    %274 = arith.select %271, %269, %273 : vector<16x16x8xi1>, vector<16x16x8xf32>
    %275 = vector.broadcast %260 : vector<1x1x8xf32> to vector<16x16x8xf32>
    %276 = arith.mulf %274, %275 : vector<16x16x8xf32>
    %cst_82 = arith.constant dense<0.000000e+00> : vector<16x16xf32>
    %277 = vector.multi_reduction <add>, %276, %cst_82 [2] : vector<16x16x8xf32> to vector<16x16xf32>
    %cst_83 = arith.constant -1.000000e+30 : f32
    %278 = vector.broadcast %cst_83 : f32 to vector<16x16xf32>
    %279 = arith.select %129, %277, %278 : vector<16x16xi1>, vector<16x16xf32>
    %cst_84 = arith.constant dense<0xFF800000> : vector<16xf32>
    %280 = vector.multi_reduction <maximumf>, %279, %cst_84 [1] : vector<16x16xf32> to vector<16xf32>
    %281 = vector.shape_cast %280 : vector<16xf32> to vector<16x1xf32>
    %282 = vector.broadcast %281 : vector<16x1xf32> to vector<16x16xf32>
    %283 = arith.subf %279, %282 : vector<16x16xf32>
    %284 = math.exp %283 : vector<16x16xf32>
    %cst_85 = arith.constant dense<0.000000e+00> : vector<16xf32>
    %285 = vector.multi_reduction <add>, %284, %cst_85 [1] : vector<16x16xf32> to vector<16xf32>
    %286 = vector.shape_cast %285 : vector<16xf32> to vector<16x1xf32>
    %287 = tpu.reciprocal %286 {approx = true} : vector<16x1xf32> -> vector<16x1xf32>
    %288 = vector.broadcast %287 : vector<16x1xf32> to vector<16x16xf32>
    %289 = arith.mulf %284, %288 : vector<16x16xf32>
    %cst_86 = arith.constant dense<0.000000e+00> : vector<16x8xf32>
    %290 = tpu.matmul %289, %255, %cst_86 {dimension_numbers = #tpu.dot_dimension_numbers<[1], [0], [0], [1], [0, 0, 1, 1], [], []>} : vector<16x16xf32>, vector<16x8xf32>, vector<16x8xf32> -> vector<16x8xf32>
    %291 = tpu.concatenate %182, %218, %254, %290 in 1 : vector<16x8xf32>, vector<16x8xf32>, vector<16x8xf32>, vector<16x8xf32> -> vector<16x32xf32>
    %292 = vector.broadcast %136 : vector<1x32xf32> to vector<16x32xf32>
    %293 = arith.addf %291, %292 : vector<16x32xf32>
    %cst_87 = arith.constant 0.000000e+00 : f32
    %294 = vector.broadcast %cst_87 : f32 to vector<16x32xf32>
    %295 = arith.cmpf ogt, %293, %294 : vector<16x32xf32>
    %cst_88 = arith.constant 0.000000e+00 : f32
    %296 = vector.broadcast %cst_88 : f32 to vector<16x32xf32>
    %297 = arith.minimumf %293, %296 : vector<16x32xf32>
    %298 = math.exp %297 : vector<16x32xf32>
    %cst_89 = arith.constant 1.000000e+00 : f32
    %299 = vector.broadcast %cst_89 : f32 to vector<16x32xf32>
    %300 = arith.subf %298, %299 : vector<16x32xf32>
    %301 = arith.select %295, %293, %300 : vector<16x32xi1>, vector<16x32xf32>
    %cst_90 = arith.constant dense<0.000000e+00> : vector<16xf32>
    %302 = vector.multi_reduction <add>, %301, %cst_90 [1] : vector<16x32xf32> to vector<16xf32>
    %303 = vector.shape_cast %302 : vector<16xf32> to vector<16x1xf32>
    %cst_91 = arith.constant 3.200000e+01 : f32
    %304 = vector.broadcast %cst_91 : f32 to vector<16x1xf32>
    %305 = arith.divf %303, %304 : vector<16x1xf32>
    %306 = vector.broadcast %305 : vector<16x1xf32> to vector<16x32xf32>
    %307 = arith.subf %301, %306 : vector<16x32xf32>
    %308 = arith.mulf %307, %307 : vector<16x32xf32>
    %cst_92 = arith.constant dense<0.000000e+00> : vector<16xf32>
    %309 = vector.multi_reduction <add>, %308, %cst_92 [1] : vector<16x32xf32> to vector<16xf32>
    %310 = vector.shape_cast %309 : vector<16xf32> to vector<16x1xf32>
    %cst_93 = arith.constant 3.200000e+01 : f32
    %311 = vector.broadcast %cst_93 : f32 to vector<16x1xf32>
    %312 = arith.divf %310, %311 : vector<16x1xf32>
    %313 = vector.broadcast %305 : vector<16x1xf32> to vector<16x32xf32>
    %314 = arith.subf %301, %313 : vector<16x32xf32>
    %cst_94 = arith.constant 9.99999974E-6 : f32
    %315 = vector.broadcast %cst_94 : f32 to vector<16x1xf32>
    %316 = arith.addf %312, %315 : vector<16x1xf32>
    %317 = math.rsqrt %316 : vector<16x1xf32>
    %318 = vector.broadcast %317 : vector<16x1xf32> to vector<16x32xf32>
    %319 = arith.mulf %314, %318 : vector<16x32xf32>
    %320 = vector.broadcast %137 : vector<1x32xf32> to vector<16x32xf32>
    %321 = arith.mulf %319, %320 : vector<16x32xf32>
    %322 = vector.broadcast %138 : vector<1x32xf32> to vector<16x32xf32>
    %323 = arith.addf %321, %322 : vector<16x32xf32>
    %cst_95 = arith.constant dense<0.000000e+00> : vector<16x32xf32>
    %324 = tpu.matmul %0, %139, %cst_95 {dimension_numbers = #tpu.dot_dimension_numbers<[1], [0], [0], [1], [0, 0, 1, 1], [], []>} : vector<16x4xf32>, vector<4x32xf32>, vector<16x32xf32> -> vector<16x32xf32>
    %325 = vector.broadcast %140 : vector<1x32xf32> to vector<16x32xf32>
    %326 = arith.addf %324, %325 : vector<16x32xf32>
    %327 = arith.addf %323, %326 : vector<16x32xf32>
    %c0_96 = arith.constant 0 : index
    %c0_97 = arith.constant 0 : index
    %328 = vector.load %arg2[%c0_96, %c0_97] : memref<160x128xf32, #tpu.memory_space<vmem>>, vector<32x16xf32>
    %c104 = arith.constant 104 : index
    %c0_98 = arith.constant 0 : index
    %329 = vector.load %arg2[%c104, %c0_98] : memref<160x128xf32, #tpu.memory_space<vmem>>, vector<1x16xf32>
    %c32_99 = arith.constant 32 : index
    %c0_100 = arith.constant 0 : index
    %330 = vector.load %arg2[%c32_99, %c0_100] : memref<160x128xf32, #tpu.memory_space<vmem>>, vector<32x16xf32>
    %c112 = arith.constant 112 : index
    %c0_101 = arith.constant 0 : index
    %331 = vector.load %arg2[%c112, %c0_101] : memref<160x128xf32, #tpu.memory_space<vmem>>, vector<1x16xf32>
    %c120 = arith.constant 120 : index
    %c0_102 = arith.constant 0 : index
    %332 = vector.load %arg2[%c120, %c0_102] : memref<160x128xf32, #tpu.memory_space<vmem>>, vector<1x16xf32>
    %c96 = arith.constant 96 : index
    %c0_103 = arith.constant 0 : index
    %333 = vector.load %arg2[%c96, %c0_103] : memref<160x128xf32, #tpu.memory_space<vmem>>, vector<4x4xf32>
    %c128 = arith.constant 128 : index
    %c0_104 = arith.constant 0 : index
    %334 = vector.load %arg2[%c128, %c0_104] : memref<160x128xf32, #tpu.memory_space<vmem>>, vector<1x4xf32>
    %c136 = arith.constant 136 : index
    %c0_105 = arith.constant 0 : index
    %335 = vector.load %arg2[%c136, %c0_105] : memref<160x128xf32, #tpu.memory_space<vmem>>, vector<1x4xf32>
    %c144 = arith.constant 144 : index
    %c0_106 = arith.constant 0 : index
    %336 = vector.load %arg2[%c144, %c0_106] : memref<160x128xf32, #tpu.memory_space<vmem>>, vector<1x4xf32>
    %c64_107 = arith.constant 64 : index
    %c0_108 = arith.constant 0 : index
    %337 = vector.load %arg2[%c64_107, %c0_108] : memref<160x128xf32, #tpu.memory_space<vmem>>, vector<32x4xf32>
    %c152 = arith.constant 152 : index
    %c0_109 = arith.constant 0 : index
    %338 = vector.load %arg2[%c152, %c0_109] : memref<160x128xf32, #tpu.memory_space<vmem>>, vector<1x4xf32>
    %cst_110 = arith.constant dense<0.000000e+00> : vector<16x16xf32>
    %339 = tpu.matmul %327, %328, %cst_110 {dimension_numbers = #tpu.dot_dimension_numbers<[1], [0], [0], [1], [0, 0, 1, 1], [], []>} : vector<16x32xf32>, vector<32x16xf32>, vector<16x16xf32> -> vector<16x16xf32>
    %340 = vector.broadcast %329 : vector<1x16xf32> to vector<16x16xf32>
    %341 = arith.addf %339, %340 : vector<16x16xf32>
    %cst_111 = arith.constant dense<0.000000e+00> : vector<16x16xf32>
    %342 = tpu.matmul %327, %330, %cst_111 {dimension_numbers = #tpu.dot_dimension_numbers<[1], [0], [0], [1], [0, 0, 1, 1], [], []>} : vector<16x32xf32>, vector<32x16xf32>, vector<16x16xf32> -> vector<16x16xf32>
    %343 = vector.broadcast %331 : vector<1x16xf32> to vector<16x16xf32>
    %344 = arith.addf %342, %343 : vector<16x16xf32>
    %345 = vector.extract_strided_slice %341 {offsets = [0, 0], sizes = [16, 4], strides = [1, 1]} : vector<16x16xf32> to vector<16x4xf32>
    %346 = vector.extract_strided_slice %344 {offsets = [0, 0], sizes = [16, 4], strides = [1, 1]} : vector<16x16xf32> to vector<16x4xf32>
    %347 = vector.extract_strided_slice %332 {offsets = [0, 0], sizes = [1, 4], strides = [1, 1]} : vector<1x16xf32> to vector<1x4xf32>
    %348 = vector.shape_cast %347 : vector<1x4xf32> to vector<1x1x4xf32>
    %349 = vector.extract_strided_slice %333 {offsets = [0, 0], sizes = [1, 4], strides = [1, 1]} : vector<4x4xf32> to vector<1x4xf32>
    %350 = vector.shape_cast %349 : vector<1x4xf32> to vector<1x1x4xf32>
    %351 = vector.shape_cast %345 : vector<16x4xf32> to vector<1x16x4xf32>
    %352 = vector.shape_cast %346 : vector<16x4xf32> to vector<16x1x4xf32>
    %353 = vector.broadcast %351 : vector<1x16x4xf32> to vector<16x16x4xf32>
    %354 = vector.broadcast %352 : vector<16x1x4xf32> to vector<16x16x4xf32>
    %355 = arith.addf %353, %354 : vector<16x16x4xf32>
    %356 = vector.broadcast %126 : vector<16x16x1xf32> to vector<16x16x4xf32>
    %357 = vector.broadcast %348 : vector<1x1x4xf32> to vector<16x16x4xf32>
    %358 = arith.mulf %356, %357 : vector<16x16x4xf32>
    %359 = arith.addf %355, %358 : vector<16x16x4xf32>
    %cst_112 = arith.constant 0.000000e+00 : f32
    %360 = vector.broadcast %cst_112 : f32 to vector<16x16x4xf32>
    %361 = arith.cmpf ogt, %359, %360 : vector<16x16x4xf32>
    %cst_113 = arith.constant 2.000000e-01 : f32
    %362 = vector.broadcast %cst_113 : f32 to vector<16x16x4xf32>
    %363 = arith.mulf %362, %359 : vector<16x16x4xf32>
    %364 = arith.select %361, %359, %363 : vector<16x16x4xi1>, vector<16x16x4xf32>
    %365 = vector.broadcast %350 : vector<1x1x4xf32> to vector<16x16x4xf32>
    %366 = arith.mulf %364, %365 : vector<16x16x4xf32>
    %cst_114 = arith.constant dense<0.000000e+00> : vector<16x16xf32>
    %367 = vector.multi_reduction <add>, %366, %cst_114 [2] : vector<16x16x4xf32> to vector<16x16xf32>
    %cst_115 = arith.constant -1.000000e+30 : f32
    %368 = vector.broadcast %cst_115 : f32 to vector<16x16xf32>
    %369 = arith.select %129, %367, %368 : vector<16x16xi1>, vector<16x16xf32>
    %cst_116 = arith.constant dense<0xFF800000> : vector<16xf32>
    %370 = vector.multi_reduction <maximumf>, %369, %cst_116 [1] : vector<16x16xf32> to vector<16xf32>
    %371 = vector.shape_cast %370 : vector<16xf32> to vector<16x1xf32>
    %372 = vector.broadcast %371 : vector<16x1xf32> to vector<16x16xf32>
    %373 = arith.subf %369, %372 : vector<16x16xf32>
    %374 = math.exp %373 : vector<16x16xf32>
    %cst_117 = arith.constant dense<0.000000e+00> : vector<16xf32>
    %375 = vector.multi_reduction <add>, %374, %cst_117 [1] : vector<16x16xf32> to vector<16xf32>
    %376 = vector.shape_cast %375 : vector<16xf32> to vector<16x1xf32>
    %377 = tpu.reciprocal %376 {approx = true} : vector<16x1xf32> -> vector<16x1xf32>
    %378 = vector.broadcast %377 : vector<16x1xf32> to vector<16x16xf32>
    %379 = arith.mulf %374, %378 : vector<16x16xf32>
    %cst_118 = arith.constant dense<0.000000e+00> : vector<16x4xf32>
    %380 = tpu.matmul %379, %345, %cst_118 {dimension_numbers = #tpu.dot_dimension_numbers<[1], [0], [0], [1], [0, 0, 1, 1], [], []>} : vector<16x16xf32>, vector<16x4xf32>, vector<16x4xf32> -> vector<16x4xf32>
    %381 = vector.extract_strided_slice %341 {offsets = [0, 4], sizes = [16, 4], strides = [1, 1]} : vector<16x16xf32> to vector<16x4xf32>
    %382 = vector.extract_strided_slice %344 {offsets = [0, 4], sizes = [16, 4], strides = [1, 1]} : vector<16x16xf32> to vector<16x4xf32>
    %383 = vector.extract_strided_slice %332 {offsets = [0, 4], sizes = [1, 4], strides = [1, 1]} : vector<1x16xf32> to vector<1x4xf32>
    %384 = vector.shape_cast %383 : vector<1x4xf32> to vector<1x1x4xf32>
    %385 = vector.extract_strided_slice %333 {offsets = [1, 0], sizes = [1, 4], strides = [1, 1]} : vector<4x4xf32> to vector<1x4xf32>
    %386 = vector.shape_cast %385 : vector<1x4xf32> to vector<1x1x4xf32>
    %387 = vector.shape_cast %381 : vector<16x4xf32> to vector<1x16x4xf32>
    %388 = vector.shape_cast %382 : vector<16x4xf32> to vector<16x1x4xf32>
    %389 = vector.broadcast %387 : vector<1x16x4xf32> to vector<16x16x4xf32>
    %390 = vector.broadcast %388 : vector<16x1x4xf32> to vector<16x16x4xf32>
    %391 = arith.addf %389, %390 : vector<16x16x4xf32>
    %392 = vector.broadcast %126 : vector<16x16x1xf32> to vector<16x16x4xf32>
    %393 = vector.broadcast %384 : vector<1x1x4xf32> to vector<16x16x4xf32>
    %394 = arith.mulf %392, %393 : vector<16x16x4xf32>
    %395 = arith.addf %391, %394 : vector<16x16x4xf32>
    %cst_119 = arith.constant 0.000000e+00 : f32
    %396 = vector.broadcast %cst_119 : f32 to vector<16x16x4xf32>
    %397 = arith.cmpf ogt, %395, %396 : vector<16x16x4xf32>
    %cst_120 = arith.constant 2.000000e-01 : f32
    %398 = vector.broadcast %cst_120 : f32 to vector<16x16x4xf32>
    %399 = arith.mulf %398, %395 : vector<16x16x4xf32>
    %400 = arith.select %397, %395, %399 : vector<16x16x4xi1>, vector<16x16x4xf32>
    %401 = vector.broadcast %386 : vector<1x1x4xf32> to vector<16x16x4xf32>
    %402 = arith.mulf %400, %401 : vector<16x16x4xf32>
    %cst_121 = arith.constant dense<0.000000e+00> : vector<16x16xf32>
    %403 = vector.multi_reduction <add>, %402, %cst_121 [2] : vector<16x16x4xf32> to vector<16x16xf32>
    %cst_122 = arith.constant -1.000000e+30 : f32
    %404 = vector.broadcast %cst_122 : f32 to vector<16x16xf32>
    %405 = arith.select %129, %403, %404 : vector<16x16xi1>, vector<16x16xf32>
    %cst_123 = arith.constant dense<0xFF800000> : vector<16xf32>
    %406 = vector.multi_reduction <maximumf>, %405, %cst_123 [1] : vector<16x16xf32> to vector<16xf32>
    %407 = vector.shape_cast %406 : vector<16xf32> to vector<16x1xf32>
    %408 = vector.broadcast %407 : vector<16x1xf32> to vector<16x16xf32>
    %409 = arith.subf %405, %408 : vector<16x16xf32>
    %410 = math.exp %409 : vector<16x16xf32>
    %cst_124 = arith.constant dense<0.000000e+00> : vector<16xf32>
    %411 = vector.multi_reduction <add>, %410, %cst_124 [1] : vector<16x16xf32> to vector<16xf32>
    %412 = vector.shape_cast %411 : vector<16xf32> to vector<16x1xf32>
    %413 = tpu.reciprocal %412 {approx = true} : vector<16x1xf32> -> vector<16x1xf32>
    %414 = vector.broadcast %413 : vector<16x1xf32> to vector<16x16xf32>
    %415 = arith.mulf %410, %414 : vector<16x16xf32>
    %cst_125 = arith.constant dense<0.000000e+00> : vector<16x4xf32>
    %416 = tpu.matmul %415, %381, %cst_125 {dimension_numbers = #tpu.dot_dimension_numbers<[1], [0], [0], [1], [0, 0, 1, 1], [], []>} : vector<16x16xf32>, vector<16x4xf32>, vector<16x4xf32> -> vector<16x4xf32>
    %417 = vector.extract_strided_slice %341 {offsets = [0, 8], sizes = [16, 4], strides = [1, 1]} : vector<16x16xf32> to vector<16x4xf32>
    %418 = vector.extract_strided_slice %344 {offsets = [0, 8], sizes = [16, 4], strides = [1, 1]} : vector<16x16xf32> to vector<16x4xf32>
    %419 = vector.extract_strided_slice %332 {offsets = [0, 8], sizes = [1, 4], strides = [1, 1]} : vector<1x16xf32> to vector<1x4xf32>
    %420 = vector.shape_cast %419 : vector<1x4xf32> to vector<1x1x4xf32>
    %421 = vector.extract_strided_slice %333 {offsets = [2, 0], sizes = [1, 4], strides = [1, 1]} : vector<4x4xf32> to vector<1x4xf32>
    %422 = vector.shape_cast %421 : vector<1x4xf32> to vector<1x1x4xf32>
    %423 = vector.shape_cast %417 : vector<16x4xf32> to vector<1x16x4xf32>
    %424 = vector.shape_cast %418 : vector<16x4xf32> to vector<16x1x4xf32>
    %425 = vector.broadcast %423 : vector<1x16x4xf32> to vector<16x16x4xf32>
    %426 = vector.broadcast %424 : vector<16x1x4xf32> to vector<16x16x4xf32>
    %427 = arith.addf %425, %426 : vector<16x16x4xf32>
    %428 = vector.broadcast %126 : vector<16x16x1xf32> to vector<16x16x4xf32>
    %429 = vector.broadcast %420 : vector<1x1x4xf32> to vector<16x16x4xf32>
    %430 = arith.mulf %428, %429 : vector<16x16x4xf32>
    %431 = arith.addf %427, %430 : vector<16x16x4xf32>
    %cst_126 = arith.constant 0.000000e+00 : f32
    %432 = vector.broadcast %cst_126 : f32 to vector<16x16x4xf32>
    %433 = arith.cmpf ogt, %431, %432 : vector<16x16x4xf32>
    %cst_127 = arith.constant 2.000000e-01 : f32
    %434 = vector.broadcast %cst_127 : f32 to vector<16x16x4xf32>
    %435 = arith.mulf %434, %431 : vector<16x16x4xf32>
    %436 = arith.select %433, %431, %435 : vector<16x16x4xi1>, vector<16x16x4xf32>
    %437 = vector.broadcast %422 : vector<1x1x4xf32> to vector<16x16x4xf32>
    %438 = arith.mulf %436, %437 : vector<16x16x4xf32>
    %cst_128 = arith.constant dense<0.000000e+00> : vector<16x16xf32>
    %439 = vector.multi_reduction <add>, %438, %cst_128 [2] : vector<16x16x4xf32> to vector<16x16xf32>
    %cst_129 = arith.constant -1.000000e+30 : f32
    %440 = vector.broadcast %cst_129 : f32 to vector<16x16xf32>
    %441 = arith.select %129, %439, %440 : vector<16x16xi1>, vector<16x16xf32>
    %cst_130 = arith.constant dense<0xFF800000> : vector<16xf32>
    %442 = vector.multi_reduction <maximumf>, %441, %cst_130 [1] : vector<16x16xf32> to vector<16xf32>
    %443 = vector.shape_cast %442 : vector<16xf32> to vector<16x1xf32>
    %444 = vector.broadcast %443 : vector<16x1xf32> to vector<16x16xf32>
    %445 = arith.subf %441, %444 : vector<16x16xf32>
    %446 = math.exp %445 : vector<16x16xf32>
    %cst_131 = arith.constant dense<0.000000e+00> : vector<16xf32>
    %447 = vector.multi_reduction <add>, %446, %cst_131 [1] : vector<16x16xf32> to vector<16xf32>
    %448 = vector.shape_cast %447 : vector<16xf32> to vector<16x1xf32>
    %449 = tpu.reciprocal %448 {approx = true} : vector<16x1xf32> -> vector<16x1xf32>
    %450 = vector.broadcast %449 : vector<16x1xf32> to vector<16x16xf32>
    %451 = arith.mulf %446, %450 : vector<16x16xf32>
    %cst_132 = arith.constant dense<0.000000e+00> : vector<16x4xf32>
    %452 = tpu.matmul %451, %417, %cst_132 {dimension_numbers = #tpu.dot_dimension_numbers<[1], [0], [0], [1], [0, 0, 1, 1], [], []>} : vector<16x16xf32>, vector<16x4xf32>, vector<16x4xf32> -> vector<16x4xf32>
    %453 = vector.extract_strided_slice %341 {offsets = [0, 12], sizes = [16, 4], strides = [1, 1]} : vector<16x16xf32> to vector<16x4xf32>
    %454 = vector.extract_strided_slice %344 {offsets = [0, 12], sizes = [16, 4], strides = [1, 1]} : vector<16x16xf32> to vector<16x4xf32>
    %455 = vector.extract_strided_slice %332 {offsets = [0, 12], sizes = [1, 4], strides = [1, 1]} : vector<1x16xf32> to vector<1x4xf32>
    %456 = vector.shape_cast %455 : vector<1x4xf32> to vector<1x1x4xf32>
    %457 = vector.extract_strided_slice %333 {offsets = [3, 0], sizes = [1, 4], strides = [1, 1]} : vector<4x4xf32> to vector<1x4xf32>
    %458 = vector.shape_cast %457 : vector<1x4xf32> to vector<1x1x4xf32>
    %459 = vector.shape_cast %453 : vector<16x4xf32> to vector<1x16x4xf32>
    %460 = vector.shape_cast %454 : vector<16x4xf32> to vector<16x1x4xf32>
    %461 = vector.broadcast %459 : vector<1x16x4xf32> to vector<16x16x4xf32>
    %462 = vector.broadcast %460 : vector<16x1x4xf32> to vector<16x16x4xf32>
    %463 = arith.addf %461, %462 : vector<16x16x4xf32>
    %464 = vector.broadcast %126 : vector<16x16x1xf32> to vector<16x16x4xf32>
    %465 = vector.broadcast %456 : vector<1x1x4xf32> to vector<16x16x4xf32>
    %466 = arith.mulf %464, %465 : vector<16x16x4xf32>
    %467 = arith.addf %463, %466 : vector<16x16x4xf32>
    %cst_133 = arith.constant 0.000000e+00 : f32
    %468 = vector.broadcast %cst_133 : f32 to vector<16x16x4xf32>
    %469 = arith.cmpf ogt, %467, %468 : vector<16x16x4xf32>
    %cst_134 = arith.constant 2.000000e-01 : f32
    %470 = vector.broadcast %cst_134 : f32 to vector<16x16x4xf32>
    %471 = arith.mulf %470, %467 : vector<16x16x4xf32>
    %472 = arith.select %469, %467, %471 : vector<16x16x4xi1>, vector<16x16x4xf32>
    %473 = vector.broadcast %458 : vector<1x1x4xf32> to vector<16x16x4xf32>
    %474 = arith.mulf %472, %473 : vector<16x16x4xf32>
    %cst_135 = arith.constant dense<0.000000e+00> : vector<16x16xf32>
    %475 = vector.multi_reduction <add>, %474, %cst_135 [2] : vector<16x16x4xf32> to vector<16x16xf32>
    %cst_136 = arith.constant -1.000000e+30 : f32
    %476 = vector.broadcast %cst_136 : f32 to vector<16x16xf32>
    %477 = arith.select %129, %475, %476 : vector<16x16xi1>, vector<16x16xf32>
    %cst_137 = arith.constant dense<0xFF800000> : vector<16xf32>
    %478 = vector.multi_reduction <maximumf>, %477, %cst_137 [1] : vector<16x16xf32> to vector<16xf32>
    %479 = vector.shape_cast %478 : vector<16xf32> to vector<16x1xf32>
    %480 = vector.broadcast %479 : vector<16x1xf32> to vector<16x16xf32>
    %481 = arith.subf %477, %480 : vector<16x16xf32>
    %482 = math.exp %481 : vector<16x16xf32>
    %cst_138 = arith.constant dense<0.000000e+00> : vector<16xf32>
    %483 = vector.multi_reduction <add>, %482, %cst_138 [1] : vector<16x16xf32> to vector<16xf32>
    %484 = vector.shape_cast %483 : vector<16xf32> to vector<16x1xf32>
    %485 = tpu.reciprocal %484 {approx = true} : vector<16x1xf32> -> vector<16x1xf32>
    %486 = vector.broadcast %485 : vector<16x1xf32> to vector<16x16xf32>
    %487 = arith.mulf %482, %486 : vector<16x16xf32>
    %cst_139 = arith.constant dense<0.000000e+00> : vector<16x4xf32>
    %488 = tpu.matmul %487, %453, %cst_139 {dimension_numbers = #tpu.dot_dimension_numbers<[1], [0], [0], [1], [0, 0, 1, 1], [], []>} : vector<16x16xf32>, vector<16x4xf32>, vector<16x4xf32> -> vector<16x4xf32>
    %489 = arith.addf %380, %416 : vector<16x4xf32>
    %490 = arith.addf %489, %452 : vector<16x4xf32>
    %491 = arith.addf %490, %488 : vector<16x4xf32>
    %cst_140 = arith.constant 2.500000e-01 : f32
    %492 = vector.broadcast %cst_140 : f32 to vector<16x4xf32>
    %493 = arith.mulf %491, %492 : vector<16x4xf32>
    %494 = vector.broadcast %334 : vector<1x4xf32> to vector<16x4xf32>
    %495 = arith.addf %493, %494 : vector<16x4xf32>
    %cst_141 = arith.constant 0.000000e+00 : f32
    %496 = vector.broadcast %cst_141 : f32 to vector<16x4xf32>
    %497 = arith.cmpf ogt, %495, %496 : vector<16x4xf32>
    %cst_142 = arith.constant 0.000000e+00 : f32
    %498 = vector.broadcast %cst_142 : f32 to vector<16x4xf32>
    %499 = arith.minimumf %495, %498 : vector<16x4xf32>
    %500 = math.exp %499 : vector<16x4xf32>
    %cst_143 = arith.constant 1.000000e+00 : f32
    %501 = vector.broadcast %cst_143 : f32 to vector<16x4xf32>
    %502 = arith.subf %500, %501 : vector<16x4xf32>
    %503 = arith.select %497, %495, %502 : vector<16x4xi1>, vector<16x4xf32>
    %cst_144 = arith.constant dense<0.000000e+00> : vector<16xf32>
    %504 = vector.multi_reduction <add>, %503, %cst_144 [1] : vector<16x4xf32> to vector<16xf32>
    %505 = vector.shape_cast %504 : vector<16xf32> to vector<16x1xf32>
    %cst_145 = arith.constant 4.000000e+00 : f32
    %506 = vector.broadcast %cst_145 : f32 to vector<16x1xf32>
    %507 = arith.divf %505, %506 : vector<16x1xf32>
    %508 = vector.broadcast %507 : vector<16x1xf32> to vector<16x4xf32>
    %509 = arith.subf %503, %508 : vector<16x4xf32>
    %510 = arith.mulf %509, %509 : vector<16x4xf32>
    %cst_146 = arith.constant dense<0.000000e+00> : vector<16xf32>
    %511 = vector.multi_reduction <add>, %510, %cst_146 [1] : vector<16x4xf32> to vector<16xf32>
    %512 = vector.shape_cast %511 : vector<16xf32> to vector<16x1xf32>
    %cst_147 = arith.constant 4.000000e+00 : f32
    %513 = vector.broadcast %cst_147 : f32 to vector<16x1xf32>
    %514 = arith.divf %512, %513 : vector<16x1xf32>
    %515 = vector.broadcast %507 : vector<16x1xf32> to vector<16x4xf32>
    %516 = arith.subf %503, %515 : vector<16x4xf32>
    %cst_148 = arith.constant 9.99999974E-6 : f32
    %517 = vector.broadcast %cst_148 : f32 to vector<16x1xf32>
    %518 = arith.addf %514, %517 : vector<16x1xf32>
    %519 = math.rsqrt %518 : vector<16x1xf32>
    %520 = vector.broadcast %519 : vector<16x1xf32> to vector<16x4xf32>
    %521 = arith.mulf %516, %520 : vector<16x4xf32>
    %522 = vector.broadcast %335 : vector<1x4xf32> to vector<16x4xf32>
    %523 = arith.mulf %521, %522 : vector<16x4xf32>
    %524 = vector.broadcast %336 : vector<1x4xf32> to vector<16x4xf32>
    %525 = arith.addf %523, %524 : vector<16x4xf32>
    %cst_149 = arith.constant dense<0.000000e+00> : vector<16x4xf32>
    %526 = tpu.matmul %327, %337, %cst_149 {dimension_numbers = #tpu.dot_dimension_numbers<[1], [0], [0], [1], [0, 0, 1, 1], [], []>} : vector<16x32xf32>, vector<32x4xf32>, vector<16x4xf32> -> vector<16x4xf32>
    %527 = vector.broadcast %338 : vector<1x4xf32> to vector<16x4xf32>
    %528 = arith.addf %526, %527 : vector<16x4xf32>
    %529 = arith.addf %525, %528 : vector<16x4xf32>
    %c0_150 = arith.constant 0 : index
    %c0_151 = arith.constant 0 : index
    %530 = vector.load %arg3[%c0_150, %c0_151] : memref<32x128xf32, #tpu.memory_space<vmem>>, vector<4x2xf32>
    %c8_152 = arith.constant 8 : index
    %c0_153 = arith.constant 0 : index
    %531 = vector.load %arg3[%c8_152, %c0_153] : memref<32x128xf32, #tpu.memory_space<vmem>>, vector<1x2xf32>
    %c16_154 = arith.constant 16 : index
    %c0_155 = arith.constant 0 : index
    %532 = vector.load %arg3[%c16_154, %c0_155] : memref<32x128xf32, #tpu.memory_space<vmem>>, vector<2x1xf32>
    %c24_156 = arith.constant 24 : index
    %c0_157 = arith.constant 0 : index
    %533 = vector.load %arg3[%c24_156, %c0_157] : memref<32x128xf32, #tpu.memory_space<vmem>>, vector<1x1xf32>
    %cst_158 = arith.constant dense<0.000000e+00> : vector<16x2xf32>
    %534 = tpu.matmul %529, %530, %cst_158 {dimension_numbers = #tpu.dot_dimension_numbers<[1], [0], [0], [1], [0, 0, 1, 1], [], []>} : vector<16x4xf32>, vector<4x2xf32>, vector<16x2xf32> -> vector<16x2xf32>
    %535 = vector.broadcast %531 : vector<1x2xf32> to vector<16x2xf32>
    %536 = arith.addf %534, %535 : vector<16x2xf32>
    %537 = math.tanh %536 : vector<16x2xf32>
    %cst_159 = arith.constant dense<0.000000e+00> : vector<16x1xf32>
    %538 = tpu.matmul %537, %532, %cst_159 {dimension_numbers = #tpu.dot_dimension_numbers<[1], [0], [0], [1], [0, 0, 1, 1], [], []>} : vector<16x2xf32>, vector<2x1xf32>, vector<16x1xf32> -> vector<16x1xf32>
    %539 = vector.broadcast %533 : vector<1x1xf32> to vector<16x1xf32>
    %540 = arith.addf %538, %539 : vector<16x1xf32>
    %cst_160 = arith.constant dense<0xFF800000> : vector<1xf32>
    %541 = vector.multi_reduction <maximumf>, %540, %cst_160 [0] : vector<16x1xf32> to vector<1xf32>
    %542 = vector.shape_cast %541 : vector<1xf32> to vector<1x1xf32>
    %543 = vector.broadcast %542 : vector<1x1xf32> to vector<16x1xf32>
    %544 = arith.subf %540, %543 : vector<16x1xf32>
    %545 = math.exp %544 : vector<16x1xf32>
    %cst_161 = arith.constant dense<0.000000e+00> : vector<1xf32>
    %546 = vector.multi_reduction <add>, %545, %cst_161 [0] : vector<16x1xf32> to vector<1xf32>
    %547 = vector.shape_cast %546 : vector<1xf32> to vector<1x1xf32>
    %548 = vector.broadcast %547 : vector<1x1xf32> to vector<16x1xf32>
    %549 = arith.divf %545, %548 : vector<16x1xf32>
    %c0_162 = arith.constant 0 : index
    %c0_163 = arith.constant 0 : index
    %550 = vector.load %arg4[%c0_162, %c0_163] : memref<16x128xf32, #tpu.memory_space<vmem>>, vector<16x4xf32>
    tpu.vector_store %arg4[%c0_162, %c0_163], %529 {strides = array<i32>} : memref<16x128xf32, #tpu.memory_space<vmem>>, vector<16x4xf32>,
    %c0_164 = arith.constant 0 : index
    %c4 = arith.constant 4 : index
    %551 = vector.load %arg4[%c0_164, %c4] : memref<16x128xf32, #tpu.memory_space<vmem>>, vector<16x1xf32>
    tpu.vector_store %arg4[%c0_164, %c4], %549 {strides = array<i32>} : memref<16x128xf32, #tpu.memory_space<vmem>>, vector<16x1xf32>,
    return
  }
}

</mosaic_0001>

<bundles_post_ra>
// kernel: forward.1
= control target key start
LH: loop header
LB: loop body
LE: loop exit
PB: predicated region body
PF: predicated region fallthrough
CT: control target
= control target key end

     0   :  { %9 = vsyncpa [#allocation3], 0  ;;  %s11051_s0 = inlined_call_operand.vmem [shape: f32[16,4], index: 0, kind: input, shape index: {}]   ;;  %s11052_s1 = inlined_call_operand.hbm [shape: f32[88,128], index: 1, kind: input, shape index: {}]   ;;  %s11053_s2 = inlined_call_operand.hbm [shape: f32[160,128], index: 2, kind: input, shape index: {}]   ;;  %s11054_s3 = inlined_call_operand.hbm [shape: f32[32,128], index: 3, kind: input, shape index: {}]   ;;  %s11055_s4 = inlined_call_operand.vmem [shape: f32[16,128], index: 4, kind: output, shape index: {}]  }
   0x1   :  { %10 = vsyncpa [#allocation5], 0  ;;  %s7066_s15 = smov [#allocation4]   ;;  %s7067_s17 = smov [#allocation2]  }
   0x2   :  { %s30_s16 = sshll.u32 %s7066_s15, 4  ;;  %s18_s18 = sshll.u32 %s7067_s17, 4  ;;  %s31_s16 = int_to_ptr.vmem [resolvable:$true] %s30_s16  ;;  %s7109_s18 = int_to_ptr.vmem [resolvable:$true] %s18_s18 }
   0x3   :  { %s6996_s21 = scalar_lea.hbm %s11053_s2, 2560 }
   0x4   :  { %p6997_p0 = scmp.ne.s32.totalorder %s11053_s2, %s6996_s21  ;;  %p7000_p1 = scmp.lt.u32.totalorder %s6996_s21, %s11053_s2 }
   0x6   :  { %p7002_p2 = pnand %p7000_p1, %p6997_p0 }
   0x8   :  { %7005 = shalt.err (!%p7002_p2)
}
   0x9   :  { %s7006_s26 = scalar_lea.vmem %s31_s16, 2560  ;;  %p7011_p4 = scmp.lt.s32.totalorder %s31_s16, %s31_s16 }
   0xa   :  { %p7007_p3 = scmp.ne.s32.totalorder %s31_s16, %s7006_s26  ;;  %p7012_p5 = scmp.lt.s32.totalorder %s7006_s26, %s7006_s26 }
   0xc   :  { %p7013_p6 = por %p7012_p5, %p7011_p4 }
   0xe   :  { %p7014_p7 = pnand %p7013_p6, %p7007_p3 }
  0x10   :  { %7017 = shalt.err (!%p7014_p7)
}
  0x11   :  { %s7068_s27 = smov 128   ;;  %s7069_s28 = smov 8  }
  0x12   :  { %36 = dma.hbm_to_vmem [thread:$0]  %s11053_s2, 2560, %s31_s16, [#allocation5], %s7068_s27, %s7068_s27, %s7069_s28  }
  0x13   :  { %s7018_s7 = scalar_lea.hbm %s11052_s1, 1408 }
  0x14   :  { %p7019_p8 = scmp.ne.s32.totalorder %s11052_s1, %s7018_s7  ;;  %p7022_p9 = scmp.lt.u32.totalorder %s7018_s7, %s11052_s1 }
  0x16   :  { %p7024_p10 = pnand %p7022_p9, %p7019_p8 }
  0x18   :  { %7027 = shalt.err (!%p7024_p10)
}
  0x19   :  { %s7028_s12 = scalar_lea.vmem %s7109_s18, 1408  ;;  %p7033_p12 = scmp.lt.s32.totalorder %s7109_s18, %s7109_s18 }
  0x1a   :  { %p7029_p11 = scmp.ne.s32.totalorder %s7109_s18, %s7028_s12  ;;  %p7034_p13 = scmp.lt.s32.totalorder %s7028_s12, %s7028_s12 }
  0x1c   :  { %p7035_p0 = por %p7034_p13, %p7033_p12 }
  0x1e   :  { %p7036_p1 = pnand %p7035_p0, %p7029_p11 }
  0x20   :  { %7039 = shalt.err (!%p7036_p1)
}
  0x21   :  { %24 = dma.hbm_to_vmem [thread:$0]  %s11052_s1, 1408, %s7109_s18, [#allocation3], %s7068_s27, %s7068_s27, %s7069_s28  }
  0x22   :  { %s7070_s14 = smov [#allocation6]   ;;  %s7040_s19 = scalar_lea.hbm %s11054_s3, 512 }
  0x23   :  { %s42_s15 = sshll.u32 %s7070_s14, 4  ;;  %p7041_p2 = scmp.ne.s32.totalorder %s11054_s3, %s7040_s19  ;;  %s43_s15 = int_to_ptr.vmem [resolvable:$true] %s42_s15 }
  0x24   :  { %p7044_p3 = scmp.lt.u32.totalorder %s7040_s19, %s11054_s3 }
  0x26   :  { %p7046_p4 = pnand %p7044_p3, %p7041_p2 }
  0x28   :  { %7049 = shalt.err (!%p7046_p4)
}
  0x29   :  { %s7050_s24 = scalar_lea.vmem %s43_s15, 512  ;;  %p7055_p6 = scmp.lt.s32.totalorder %s43_s15, %s43_s15 }
  0x2a   :  { %p7051_p5 = scmp.ne.s32.totalorder %s43_s15, %s7050_s24  ;;  %p7056_p7 = scmp.lt.s32.totalorder %s7050_s24, %s7050_s24 }
  0x2c   :  { %p7057_p8 = por %p7056_p7, %p7055_p6 }
  0x2e   :  { %p7058_p9 = pnand %p7057_p8, %p7051_p5 }
  0x30   :  { %7061 = shalt.err (!%p7058_p9)
}
  0x31   :  { %48 = dma.hbm_to_vmem [thread:$0]  %s11054_s3, 512, %s43_s15, [#allocation5], %s7068_s27, %s7068_s27, %s7069_s28  }
  0x32   :  { %7062 = dma.done.wait [#allocation3], 1408  }
  0x33   :  { %7063 = vsyncadd [#allocation3], 4294965888 }
  0x34   :  { %7064 = dma.done.wait [#allocation5], 3072  }
  0x35   :  { %7065 = vsyncadd [#allocation5], 4294964224  ;;  %v7164_v0 = vld [vmem:[%s11051_s0] sm:$0xff]  ;;  %vm96_vm0 = vcmask 31744   ;;  %v7169_v1 = vld [vmem:[%s11051_s0 + $0x8] sm:$0xff]  ;;  %v60_v15 = vlaneseq  ;;  %vm11113_vm5 = vcmask 130048  }
  0x36   :  { %v94_v2 = vmul.f32 %v7164_v0, %v7164_v0  ;;  %v95_v3 = vmul.f32 %v7169_v1, %v7169_v1  ;;  %6662 = vmatprep.mubr.msk.f32.mxu1 %vm96_vm0, %v7164_v0  ;;  %vm6775_vm1 = vmpackc.low %vm96_vm0, %vm96_vm0  ;;  %v7071_v51 = vmov 0.0   ;;  %s7072_s7 = smov 24   ;;  %s7073_s8 = smov 16  }
  0x37   :  { %v7185_v16 = vshrl.u32 %v60_v15, 7  ;;  %v7188_v18 = vand.u32 127, %v60_v15  ;;  %317 = vst [vmem:[%s11055_s4] sm:$0xff] %v7071_v51  ;;  %318 = vst [vmem:[%s11055_s4 + $0x8] sm:$0xff] %v7071_v51  ;;  %s7075_s9 = smov 120   ;;  %s7076_s10 = smov 112  }
  0x38   :  { %v97_v4 = vsel %vm96_vm0, %v94_v2, 0.0  ;;  %v100_v5 = vsel %vm96_vm0, %v95_v3, 0.0  ;;  %v7244_v3 = vld [vmem:[#allocation2 + $0x18] sm:$0xf]  ;;  %s7077_s11 = smov 104   ;;  %s7078_s15 = smov 12  }
  0x39   :  { %98 = vadd.xlane.f32.xlu0 %v97_v4  ;;  %11131 = vst [vmem:[#allocation9_spill] sm:$0xff] %v7185_v16  ;;  %v62_v17 = vadd.s32 8, %v7185_v16  ;;  %11132 = vst [vmem:[#allocation10_spill] sm:$0xff] %v7188_v18  ;;  %v7193_v20 = vcvt.s32.f32 %v7188_v18  ;;  %v7196_v21 = vcvt.s32.f32 %v7185_v16  ;;  %v7242_v2 = vsub.s32 1, %v7185_v16  ;;  %s7079_s16 = smov 4   ;;  %s7082_s20 = smov 5  }
  0x3a   :  { %s7083_s1 = smov 21  }
  0x3b   :  { %v7190_v19 = vcvt.s32.f32 %v62_v17  ;;  %11134 = vst [vmem:[#allocation12_spill] sm:$0xff] %v7193_v20  ;;  %11135 = vst [vmem:[#allocation13_spill] sm:$0xff] %v7196_v21  ;;  %v80_v23 = vsub.f32 %v7196_v21, %v7193_v20  ;;  %v75_v31 = vadd.f32 0.5, %v7193_v20  ;;  %v68_v32 = vadd.f32 0.5, %v7196_v21 }
  0x3c   :  { %vm92_vm4 = vcmp.eq.f32.partialorder %v7196_v21, %v7193_v20  ;;  %11136 = vst [vmem:[#allocation14_spill] sm:$0xff] %v7242_v2  ;;  %v1583_v4 = vrot.slane %v7244_v3, %v7242_v2 }
  0x3d   :  { %101 = vadd.xlane.f32.xlu0 %v100_v5  ;;  %11133 = vst [vmem:[#allocation11_spill] sm:$0xff] %v7190_v19  ;;  %v81_v22 = vsub.f32 %v7190_v19, %v7193_v20  ;;  %v82_v25 = vand.u32 2147483647, %v80_v23  ;;  %v69_v30 = vadd.f32 0.5, %v7190_v19  ;;  %v76_v34 = vmul.f32 0.125, %v75_v31 }
  0x3e   :  { %v71_v35 = vmul.f32 0.125, %v68_v32  ;;  %vm93_vm6 = vcmp.eq.f32.partialorder %v7190_v19, %v7193_v20 }
  0x3f   :  { %v83_v24 = vand.u32 2147483647, %v81_v22  ;;  %v84_v27 = vmul.f32 -0.375, %v82_v25  ;;  %v72_v33 = vmul.f32 0.125, %v69_v30  ;;  %v77_v37 = vfloor.f32 %v76_v34 }
  0x40   :  { %v73_v38 = vfloor.f32 %v71_v35 }
  0x41   :  { %v85_v26 = vmul.f32 -0.375, %v83_v24  ;;  %v86_v29 = vmul.f32 1.442695, %v84_v27  ;;  %v74_v36 = vfloor.f32 %v72_v33 }
  0x42   :  { %vm78_vm3 = vcmp.eq.f32.partialorder %v73_v38, %v77_v37 }
  0x43   :  { %v88_v28 = vmul.f32 1.442695, %v85_v26  ;;  %vm79_vm2 = vcmp.eq.f32.partialorder %v74_v36, %v77_v37 }
  0xc6   :  { %v99_v6 = vpop.xlane.xlu0 %98 }
  0xc7   :  { %v103_v7 = vadd.f32 1e-12, %v99_v6 }
  0xc9   :  { %6895 = vrsqrt.f32 %v103_v7 }
  0xca   :  { %v102_v8 = vpop.xlane.xlu0 %101 }
  0xcb   :  { %v104_v9 = vadd.f32 1e-12, %v102_v8 }
  0xcd   :  { %6897 = vrsqrt.f32 %v104_v9 }
  0xce   :  { %6899 = vpow2.f32 %v88_v28 }
  0xcf   :  { %6901 = vpow2.f32 %v86_v29 }
  0xd3   :  { %v6896_v10 = vpop.eup %6895 }
  0xd4   :  { %v107_v11 = vmul.f32 %v6896_v10, %v7164_v0 }
  0xd6   :  { %6657 = vmatprep.mubr.msk.f32.mxu0 %vm96_vm0, %v107_v11 }
  0xd7   :  { %v6898_v12 = vpop.eup %6897 }
  0xd8   :  { %v108_v13 = vmul.f32 %v6898_v12, %v7169_v1  ;;  %v6900_v39 = vpop.eup %6899  ;;  %v7257_v12 = vsub.s32 2, %v7185_v16 }
  0xd9   :  { %v6902_v40 = vpop.eup %6901  ;;  %v91_v41 = vsel %vm79_vm2, %v6900_v39, 0.0 }
  0xda   :  { %v6774_v14 = vpack.c.bf16 %v108_v13, %v107_v11  ;;  %v90_v42 = vsel %vm78_vm3, %v6902_v40, 0.0  ;;  %v7254_v11 = vsub.s32 3, %v7185_v16  ;;  %11138 = vst [vmem:[#allocation16_spill] sm:$0xff] %v7257_v12 }
  0xdc   :  { %6776 = vmatprep.subr.msk.bf16.mxu0 %vm6775_vm1, %v6774_v14  ;;  %11137 = vst [vmem:[#allocation15_spill] sm:$0xff] %v7254_v11 }
  0xdd   :  { %6779 = vmatpush3.bf16.xpose.msk.msra.mxu0 %vm6775_vm1, %v6774_v14  ;;  %v2152_v14 = vrot.slane %v7244_v3, %v7257_v12 }
  0xe4   :  { %6658 = vmatmul.mubr.msk.f32.vlgmr.msra.gmra.mrb[0].mxu0 %vm96_vm0, %v108_v13  ;;  %v2719_v13 = vrot.slane %v7244_v3, %v7254_v11 }
 0x1b7   :  { %v6659_v43 = vpop.f32.mrb[0].mxu0 }
 0x1b8   :  { %v181_v44 = vpop.f32.mrb[1].mxu0  ;;  %v7207_v45 = vmul.f32 %v6659_v43, %v91_v41 }
 0x1b9   :  { %v7209_v46 = vmul.f32 %v181_v44, %v90_v42 }
 0x1ba   :  { %v193_v49 = vsel %vm93_vm6, -1e+30, %v7207_v45 }
 0x1bb   :  { %v192_v47 = vsel %vm92_vm4, -1e+30, %v7209_v46  ;;  %v198_v50 = vsel %vm11113_vm5, %v193_v49, -inf }
 0x1bc   :  { %v195_v48 = vsel %vm11113_vm5, %v192_v47, -inf }
 0x1bd   :  { %196 = vmax.xlane.f32.xlu1 %v195_v48 }
 0x1c1   :  { %199 = vmax.xlane.f32.xlu1 %v198_v50 }
 0x24a   :  { %v197_v52 = vpop.xlane.xlu1 %196 }
 0x24b   :  { %vm201_vm7 = vcmp.ge.f32.partialorder %v192_v47, %v197_v52 }
 0x24c   :  { %v203_v53 = vsel %vm201_vm7, %v7193_v20, 16.0 }
 0x24d   :  { %v205_v54 = vsel %vm11113_vm5, %v203_v53, inf }
 0x24e   :  { %206 = vmin.xlane.f32.xlu0 %v205_v54  ;;  %v200_v55 = vpop.xlane.xlu1 %199 }
 0x24f   :  { %vm202_vm8 = vcmp.ge.f32.partialorder %v193_v49, %v200_v55 }
 0x250   :  { %v204_v56 = vsel %vm202_vm8, %v7193_v20, 16.0 }
 0x251   :  { %v208_v57 = vsel %vm11113_vm5, %v204_v56, inf }
 0x252   :  { %209 = vmin.xlane.f32.xlu1 %v208_v57 }
 0x2db   :  { %v207_v58 = vpop.xlane.xlu0 %206 }
 0x2dc   :  { %vm211_vm9 = vcmp.eq.f32.partialorder %v7193_v20, %v207_v58 }
 0x2dd   :  { %v213_v59 = vsel %vm211_vm9, -1e+30, %v192_v47  ;;  %v215_v22 = vsel %vm211_vm9, 1.0, %v7071_v51 }
 0x2de   :  { %v217_v60 = vsel %vm11113_vm5, %v213_v59, -inf }
 0x2df   :  { %218 = vmax.xlane.f32.xlu0 %v217_v60  ;;  %v210_v61 = vpop.xlane.xlu1 %209 }
 0x2e0   :  { %vm212_vm10 = vcmp.eq.f32.partialorder %v7193_v20, %v210_v61 }
 0x2e1   :  { %v214_v62 = vsel %vm212_vm10, -1e+30, %v193_v49  ;;  %v216_v27 = vsel %vm212_vm10, 1.0, %v7071_v51 }
 0x2e2   :  { %v220_v63 = vsel %vm11113_vm5, %v214_v62, -inf }
 0x2e3   :  { %221 = vmax.xlane.f32.xlu1 %v220_v63 }
 0x2f4   :  { %1585 = vrot.lane.b32.xlu1 %v1583_v4, %s7069_s28 }
 0x36c   :  { %v219_v5 = vpop.xlane.xlu0 %218 }
 0x36d   :  { %vm223_vm11 = vcmp.ge.f32.partialorder %v213_v59, %v219_v5 }
 0x36e   :  { %v225_v6 = vsel %vm223_vm11, %v7193_v20, 16.0 }
 0x36f   :  { %v227_v7 = vsel %vm11113_vm5, %v225_v6, inf }
 0x370   :  { %228 = vmin.xlane.f32.xlu0 %v227_v7  ;;  %v222_v8 = vpop.xlane.xlu1 %221 }
 0x371   :  { %vm224_vm12 = vcmp.ge.f32.partialorder %v214_v62, %v222_v8 }
 0x372   :  { %v226_v9 = vsel %vm224_vm12, %v7193_v20, 16.0 }
 0x373   :  { %v230_v10 = vsel %vm11113_vm5, %v226_v9, inf  ;;  %v583_v9 = vld [vmem:[#allocation2] sm:$0xf] }
 0x374   :  { %231 = vmin.xlane.f32.xlu1 %v230_v10  ;;  %v7265_v15 = vpop.permute.xlu1 %1585  ;;  %v585_v10 = vld [vmem:[#allocation2 + $0x8] sm:$0xf] }
 0x385   :  { %2721 = vrot.lane.b32.xlu1 %v2719_v13, %s7072_s7 }
 0x386   :  { %2154 = vrot.lane.b32.xlu0 %v2152_v14, %s7073_s8 }
 0x3fd   :  { %v229_v17 = vpop.xlane.xlu0 %228 }
 0x3fe   :  { %vm233_vm13 = vcmp.eq.f32.partialorder %v7193_v20, %v229_v17 }
 0x3ff   :  { %v237_v23 = vsel %vm233_vm13, 1.0, %v215_v22  ;;  %v235_v24 = vsel %vm233_vm13, -1e+30, %v213_v59  ;;  %vm11111_vm13 = vcmask 1043456   ;;  %v11139_v22 = vmov 0 }
 0x400   :  { %v239_v25 = vsel %vm11113_vm5, %v235_v24, -inf  ;;  %6660 = vmatprep.subr.msk.mxu1 %vm11111_vm13, %v583_v9 }
 0x401   :  { %240 = vmax.xlane.f32.xlu0 %v239_v25  ;;  %v232_v26 = vpop.xlane.xlu1 %231  ;;  %v7275_v31 = vpop.permute.xlu0 %2154  ;;  %6661 = vmatpush3.msk.msra.mxu1 %vm11111_vm13, %v583_v9 }
 0x402   :  { %vm234_vm14 = vcmp.eq.f32.partialorder %v7193_v20, %v232_v26  ;;  %6663 = vmatmul.mubr.msk.f32.vlgmr.msra.gmra.mrb[0].mxu1 %vm96_vm0, %v7169_v1  ;;  %6665 = vmatprep.subr.msk.mxu1 %vm11111_vm13, %v585_v10  ;;  %v7074_v26 = vmov 1966171168  }
 0x403   :  { %v238_v28 = vsel %vm234_vm14, 1.0, %v216_v27  ;;  %v236_v29 = vsel %vm234_vm14, -1e+30, %v214_v62  ;;  %6666 = vmatpush3.msk.msra.mxu1 %vm11111_vm13, %v585_v10  ;;  %6667 = vmatprep.mubr.msk.f32.mxu1 %vm96_vm0, %v7164_v0  ;;  %v769_v27 = vunpack.c.l.s4 %v7074_v26  ;;  %v11056_v26 = vsub.s32 6, %v7185_v16 }
 0x404   :  { %v242_v30 = vsel %vm11113_vm5, %v236_v29, -inf }
 0x405   :  { %243 = vmax.xlane.f32.xlu1 %v242_v30  ;;  %v7277_v32 = vpop.permute.xlu1 %2721 }
 0x406   :  { %6668 = vmatmul.mubr.msk.f32.vlgmr.msra.gmra.mrb[2].mxu1 %vm96_vm0, %v7169_v1 }
 0x48e   :  { %v241_v33 = vpop.xlane.xlu0 %240 }
 0x48f   :  { %vm245_vm15 = vcmp.ge.f32.partialorder %v235_v24, %v241_v33  ;;  %v6531_v33 = vld [vmem:[#allocation2 + $0x28] ss:$0 sm:$0xff] }
 0x490   :  { %v247_v34 = vsel %vm245_vm15, %v7193_v20, 16.0 }
 0x491   :  { %v249_v35 = vsel %vm11113_vm5, %v247_v34, inf }
 0x492   :  { %250 = vmin.xlane.f32.xlu0 %v249_v35  ;;  %v244_v36 = vpop.xlane.xlu1 %243 }
 0x493   :  { %vm246_vm1 = vcmp.ge.f32.partialorder %v236_v29, %v244_v36 }
 0x494   :  { %v248_v37 = vsel %vm246_vm1, %v7193_v20, 16.0  ;;  %vm305_vm1 = vcmp.gt.f32.partialorder %v7209_v46, 0.5 }
 0x495   :  { %v252_v38 = vsel %vm11113_vm5, %v248_v37, inf }
 0x496   :  { %253 = vmin.xlane.f32.xlu1 %v252_v38 }
 0x51f   :  { %v251_v39 = vpop.xlane.xlu0 %250 }
 0x520   :  { %vm255_vm2 = vcmp.eq.f32.partialorder %v7193_v20, %v251_v39 }
 0x521   :  { %v259_v40 = vsel %vm255_vm2, 1.0, %v237_v23  ;;  %v257_v41 = vsel %vm255_vm2, -1e+30, %v235_v24  ;;  %v11143_v24 = vmov 0 }
 0x522   :  { %v261_v42 = vsel %vm11113_vm5, %v257_v41, -inf }
 0x523   :  { %262 = vmax.xlane.f32.xlu0 %v261_v42  ;;  %v254_v43 = vpop.xlane.xlu1 %253 }
 0x524   :  { %vm256_vm3 = vcmp.eq.f32.partialorder %v7193_v20, %v254_v43 }
 0x525   :  { %v260_v44 = vsel %vm256_vm3, 1.0, %v238_v28  ;;  %v258_v47 = vsel %vm256_vm3, -1e+30, %v236_v29  ;;  %v770_v28 = vunpack.c.0.s8 %v769_v27  ;;  %v6664_v29 = vpop.f32.mrb[0].mxu1 }
 0x526   :  { %v264_v48 = vsel %vm11113_vm5, %v258_v47, -inf  ;;  %v674_v30 = vpop.f32.mrb[1].mxu1 }
 0x527   :  { %265 = vmax.xlane.f32.xlu1 %v264_v48  ;;  %v6669_v34 = vpop.f32.mrb[2].mxu1  ;;  %v7340_v37 = vsub.s32 %v770_v28, %v7185_v16 }
 0x528   :  { %v762_v35 = vadd.f32 %v6669_v34, %v6531_v33  ;;  %v756_v36 = vpop.f32.mrb[3].mxu1 }
 0x529   :  { %11147 = vst [vmem:[#allocation21_spill] sm:$0xff] %v7340_v37 }
 0x52a   :  { %v816_v38 = vcombine.high %v762_v35, %v762_v35 }
 0x5b0   :  { %v263_v49 = vpop.xlane.xlu0 %262 }
 0x5b1   :  { %vm267_vm7 = vcmp.ge.f32.partialorder %v257_v41, %v263_v49  ;;  %v7348_v49 = vsub.s32 0, %v7185_v16 }
 0x5b2   :  { %v269_v50 = vsel %vm267_vm7, %v7193_v20, 16.0 }
 0x5b3   :  { %v271_v51 = vsel %vm11113_vm5, %v269_v50, inf  ;;  %11148 = vst [vmem:[#allocation22_spill] sm:$0xff] %v7348_v49 }
 0x5b4   :  { %272 = vmin.xlane.f32.xlu0 %v271_v51  ;;  %v266_v52 = vpop.xlane.xlu1 %265  ;;  %v823_v51 = vrot.slane %v762_v35, %v7340_v37 }
 0x5b5   :  { %vm268_vm8 = vcmp.ge.f32.partialorder %v258_v47, %v266_v52 }
 0x5b6   :  { %v270_v53 = vsel %vm268_vm8, %v7193_v20, 16.0  ;;  %vm306_vm8 = vcmp.gt.f32.partialorder %v7207_v45, 0.5 }
 0x5b7   :  { %v274_v54 = vsel %vm11113_vm5, %v270_v53, inf }
 0x5b8   :  { %275 = vmin.xlane.f32.xlu1 %v274_v54 }
 0x641   :  { %v273_v55 = vpop.xlane.xlu0 %272 }
 0x642   :  { %vm277_vm9 = vcmp.eq.f32.partialorder %v7193_v20, %v273_v55 }
 0x643   :  { %v281_v56 = vsel %vm277_vm9, 1.0, %v259_v40  ;;  %v279_v57 = vsel %vm277_vm9, -1e+30, %v257_v41  ;;  %v6527_v41 = vld [vmem:[#allocation2 + $0x20] ss:$0 sm:$0xff] }
 0x644   :  { %v283_v58 = vsel %vm11113_vm5, %v279_v57, -inf  ;;  %v7350_v50 = vadd.f32 %v6527_v41, %v674_v30 }
 0x645   :  { %284 = vmax.xlane.f32.xlu0 %v283_v58  ;;  %v276_v59 = vpop.xlane.xlu1 %275 }
 0x646   :  { %vm278_vm10 = vcmp.eq.f32.partialorder %v7193_v20, %v276_v59  ;;  %v7358_v59 = vadd.f32 %v6664_v29, %v6527_v41 }
 0x647   :  { %v282_v60 = vsel %vm278_vm10, 1.0, %v260_v44  ;;  %v280_v61 = vsel %vm278_vm10, -1e+30, %v258_v47  ;;  %v830_v44 = vrot.slane %v816_v38, %v7340_v37 }
 0x648   :  { %v286_v62 = vsel %vm11113_vm5, %v280_v61, -inf  ;;  %v6780_v35 = vpack.c.bf16 %v7358_v59, %v7350_v50 }
 0x649   :  { %287 = vmax.xlane.f32.xlu1 %v286_v62  ;;  %v832_v53 = vcombine.high %v830_v44, %v830_v44 }
 0x64a   :  { %6781 = vmatprep.subr.bf16.mxu1 %v6780_v35 }
 0x64b   :  { %v860_v62 = vrot.slane %v832_v53, %v7340_v37  ;;  %6783 = vmatpush3.bf16.msra.mxu1 %v6780_v35 }
 0x6d2   :  { %v285_v63 = vpop.xlane.xlu0 %284 }
 0x6d3   :  { %vm289_vm11 = vcmp.ge.f32.partialorder %v279_v57, %v285_v63  ;;  %v831_v57 = vcombine.high %v823_v51, %v823_v51 }
 0x6d4   :  { %v291_v4 = vsel %vm289_vm11, %v7193_v20, 16.0 }
 0x6d5   :  { %v293_v5 = vsel %vm11113_vm5, %v291_v4, inf }
 0x6d6   :  { %294 = vmin.xlane.f32.xlu0 %v293_v5  ;;  %v288_v6 = vpop.xlane.xlu1 %287 }
 0x6d7   :  { %vm290_vm12 = vcmp.ge.f32.partialorder %v280_v61, %v288_v6  ;;  %v846_v61 = vrot.slane %v830_v44, %v7340_v37  ;;  %v853_v6 = vrot.slane %v831_v57, %v7340_v37 }
 0x6d8   :  { %v292_v7 = vsel %vm290_vm12, %v7193_v20, 16.0 }
 0x6d9   :  { %v296_v8 = vsel %vm11113_vm5, %v292_v7, inf  ;;  %v904_v10 = vrot.slane %v853_v6, %v7348_v49 }
 0x6da   :  { %297 = vmin.xlane.f32.xlu1 %v296_v8 }
 0x763   :  { %v295_v13 = vpop.xlane.xlu0 %294 }
 0x764   :  { %vm299_vm14 = vcmp.eq.f32.partialorder %v7193_v20, %v295_v13  ;;  %v916_v13 = vrot.slane %v846_v61, %v7348_v49 }
 0x765   :  { %v301_v14 = vsel %vm299_vm14, 1.0, %v281_v56 }
 0x766   :  { %vm303_vm15 = vcmp.gt.f32.partialorder %v301_v14, 0.0 }
 0x767   :  { %v298_v17 = vpop.xlane.xlu1 %297  ;;  %vm7311_vm2 = vmand %vm303_vm15, %vm305_vm1 }
 0x768   :  { %v11140_v22 = vsel %vm7311_vm2, 4294967295, %v11139_v22  ;;  %vm300_vm3 = vcmp.eq.f32.partialorder %v7193_v20, %v298_v17  ;;  %v311_v0 = vsel %vm7311_vm2, %v7209_v46, 0.0  ;;  %v862_v17 = vcombine.high %v846_v61, %v846_v61 }
 0x769   :  { %11141 = vst [vmem:[#allocation17_spill] sm:$0xff] %v11140_v22  ;;  %v302_v23 = vsel %vm300_vm3, 1.0, %v282_v60  ;;  %v7322_v1 = vsel %vm92_vm4, 1.0, %v311_v0  ;;  %v839_v60 = vrot.slane %v823_v51, %v7340_v37  ;;  %v864_v0 = vcombine.high %v860_v62, %v860_v62 }
 0x76a   :  { %11142 = vst [vmem:[#allocation18_spill] sm:$0xff] %v7322_v1  ;;  %vm304_vm7 = vcmp.gt.f32.partialorder %v302_v23, 0.0  ;;  %341 = vxpose.xlu0.b32.start [1/2] (short) (narrow) %v7322_v1, 16  ;;  %v924_v41 = vrot.slane %v862_v17, %v7348_v49  ;;  %v11149_v1 = vsub.s32 6, %v7185_v16 }
 0x76b   :  { %vm7326_vm9 = vmand %vm304_vm7, %vm306_vm8  ;;  %v861_v8 = vcombine.high %v839_v60, %v839_v60  ;;  %v900_v27 = vrot.slane %v839_v60, %v7348_v49 }
 0x76c   :  { %v11144_v24 = vsel %vm7326_vm9, 4294967295, %v11143_v24  ;;  %v312_v25 = vsel %vm7326_vm9, %v7207_v45, 0.0  ;;  %v757_v45 = vadd.f32 %v6531_v33, %v756_v36  ;;  %v7418_v53 = vadd.f32 %v924_v41, %v7358_v59 }
 0x76d   :  { %11145 = vst [vmem:[#allocation19_spill] sm:$0xff] %v11144_v24  ;;  %v7336_v46 = vsel %vm93_vm6, 1.0, %v312_v25  ;;  %v908_v30 = vrot.slane %v861_v8, %v7348_v49  ;;  %v452_v8 = vsub.s32 7, %v7185_v16 }
 0x76e   :  { %11146 = vst [vmem:[#allocation20_spill] sm:$0xff] %v7336_v46  ;;  %342 = vxpose.xlu0.b32.end [2/2] (short) (narrow) %v7336_v46, 16  ;;  %v767_v39 = vcombine.high %v757_v45, %v757_v45  ;;  %v774_v40 = vrot.slane %v757_v45, %v7340_v37  ;;  %v7390_v45 = vadd.f32 %v904_v10, %v7358_v59  ;;  %v419_v46 = vsub.s32 4, %v7185_v16 }
 0x770   :  { %v781_v42 = vrot.slane %v767_v39, %v7340_v37  ;;  %v790_v43 = vrot.slane %v774_v40, %v7340_v37  ;;  %v782_v54 = vcombine.high %v774_v40, %v774_v40  ;;  %v7396_v39 = vadd.f32 %v916_v13, %v7358_v59 }
 0x771   :  { %v920_v40 = vrot.slane %v860_v62, %v7348_v49 }
 0x772   :  { %v783_v47 = vcombine.high %v781_v42, %v781_v42  ;;  %v797_v48 = vrot.slane %v781_v42, %v7340_v37  ;;  %v868_v52 = vrot.slane %v790_v43, %v7348_v49  ;;  %v804_v63 = vrot.slane %v782_v54, %v7340_v37 }
 0x773   :  { %v812_v7 = vcombine.high %v790_v43, %v790_v43  ;;  %v928_v43 = vrot.slane %v864_v0, %v7348_v49 }
 0x774   :  { %v811_v55 = vrot.slane %v783_v47, %v7340_v37  ;;  %v813_v56 = vcombine.high %v797_v48, %v797_v48  ;;  %v7356_v58 = vadd.f32 %v868_v52, %v7350_v50  ;;  %v872_v14 = vrot.slane %v804_v63, %v7348_v49 }
 0x775   :  { %v814_v23 = vcombine.high %v804_v63, %v804_v63  ;;  %v876_v28 = vrot.slane %v812_v7, %v7348_v49  ;;  %v884_v29 = vrot.slane %v797_v48, %v7348_v49  ;;  %v7379_v33 = vadd.f32 %v868_v52, %v7358_v59 }
 0x776   :  { %v815_v4 = vcombine.high %v811_v55, %v811_v55  ;;  %v892_v5 = vrot.slane %v813_v56, %v7348_v49  ;;  %v7387_v36 = vadd.f32 %v872_v14, %v7350_v50  ;;  %v7393_v38 = vadd.f32 %v872_v14, %v7358_v59 }
 0x777   :  { %v880_v42 = vrot.slane %v814_v23, %v7348_v49  ;;  %v7403_v44 = vadd.f32 %v876_v28, %v7350_v50  ;;  %v7406_v47 = vadd.f32 %v876_v28, %v7358_v59  ;;  %v7409_v48 = vadd.f32 %v884_v29, %v7350_v50 }
 0x778   :  { %v7367_v9 = vadd.f32 %v892_v5, %v7358_v59  ;;  %v896_v25 = vrot.slane %v815_v4, %v7348_v49  ;;  %v7412_v51 = vadd.f32 %v884_v29, %v7358_v59  ;;  %v7415_v52 = vadd.f32 %v920_v40, %v7358_v59 }
 0x779   :  { %v7421_v54 = vadd.f32 %v880_v42, %v7350_v50  ;;  %v7424_v56 = vadd.f32 %v928_v43, %v7358_v59  ;;  %v7427_v60 = vadd.f32 %v880_v42, %v7358_v59  ;;  %v888_v61 = vrot.slane %v811_v55, %v7348_v49 }
 0x77a   :  { %v7382_v34 = vadd.f32 %v896_v25, %v7358_v59  ;;  %v7431_v62 = vadd.f32 %v892_v5, %v7350_v50  ;;  %v7434_v63 = vadd.f32 %v896_v25, %v7350_v50  ;;  %v863_v14 = vcombine.high %v853_v6, %v853_v6 }
 0x77b   :  { %v7441_v17 = vadd.f32 %v888_v61, %v7350_v50  ;;  %v7444_v55 = vadd.f32 %v888_v61, %v7358_v59  ;;  %v7447_v5 = vadd.f32 %v900_v27, %v7350_v50  ;;  %v7450_v23 = vadd.f32 %v900_v27, %v7358_v59 }
 0x77c   :  { %v7453_v25 = vadd.f32 %v904_v10, %v7350_v50  ;;  %v7456_v6 = vadd.f32 %v908_v30, %v7350_v50  ;;  %v7459_v28 = vadd.f32 %v908_v30, %v7358_v59  ;;  %v912_v42 = vrot.slane %v863_v14, %v7348_v49 }
 0x77d   :  { %v7464_v61 = vadd.f32 %v916_v13, %v7350_v50  ;;  %v7467_v27 = vadd.f32 %v920_v40, %v7350_v50  ;;  %v7470_v10 = vadd.f32 %v924_v41, %v7350_v50  ;;  %v430_v40 = vsub.s32 5, %v7185_v16 }
 0x77e   :  { %v7481_v14 = vadd.f32 %v912_v42, %v7358_v59 }
 0x7ea   :  { %v357_v57 = vpop.trf.xlu0 }
 0x7eb   :  { %v442_v4 = vrot.slane %v357_v57, %v11056_v26  ;;  %v376_v7 = vrot.slane %v357_v57, %v7348_v49  ;;  %v453_v29 = vrot.slane %v357_v57, %v452_v8  ;;  %v7473_v26 = vadd.f32 %v928_v43, %v7350_v50 }
 0x7ec   :  { %v387_v30 = vrot.slane %v357_v57, %v7242_v2  ;;  %v398_v43 = vrot.slane %v357_v57, %v7257_v12  ;;  %v420_v19 = vrot.slane %v357_v57, %v419_v46  ;;  %v431_v24 = vrot.slane %v357_v57, %v430_v40 }
 0x7ed   :  { %448 = vbcast.lane.b32.xlu0 %v442_v4, 264  ;;  %378 = vbcast.lane.b32.xlu1 %v376_v7, 256 }
 0x7ee   :  { %v358_v0 = vpop.trf.xlu0 }
 0x7ef   :  { %v475_v35 = vrot.slane %v358_v0, %v7242_v2  ;;  %v508_v13 = vrot.slane %v358_v0, %v419_v46  ;;  %v519_v41 = vrot.slane %v358_v0, %v430_v40  ;;  %v530_v37 = vrot.slane %v358_v0, %v11149_v1 }
 0x7f0   :  { %v541_v2 = vrot.slane %v358_v0, %v452_v8  ;;  %v464_v1 = vrot.slane %v358_v0, %v7348_v49  ;;  %v486_v8 = vrot.slane %v358_v0, %v7257_v12 }
 0x7f1   :  { %459 = vbcast.lane.b32.xlu0 %v453_v29, 264  ;;  %382 = vbcast.lane.b32.xlu1 %v376_v7, 264  ;;  %v7478_v7 = vadd.f32 %v912_v42, %v7350_v50  ;;  %v409_v42 = vrot.slane %v357_v57, %v7254_v11 }
 0x7f5   :  { %389 = vbcast.lane.b32.xlu1 %v387_v30, 256  ;;  %481 = vbcast.lane.b32.xlu0 %v475_v35, 264 }
 0x7f9   :  { %393 = vbcast.lane.b32.xlu1 %v387_v30, 264  ;;  %514 = vbcast.lane.b32.xlu0 %v508_v13, 264  ;;  %v7490_v30 = vpack.i.bf16 %v7358_v59, %v7350_v50 }
 0x7fb   :  { %11150 = vst [vmem:[#allocation23_spill] sm:$0xff] %v7490_v30 }
 0x7fd   :  { %400 = vbcast.lane.b32.xlu1 %v398_v43, 256  ;;  %525 = vbcast.lane.b32.xlu0 %v519_v41, 264 }
 0x801   :  { %404 = vbcast.lane.b32.xlu1 %v398_v43, 264  ;;  %536 = vbcast.lane.b32.xlu0 %v530_v37, 264 }
 0x805   :  { %411 = vbcast.lane.b32.xlu1 %v409_v42, 256  ;;  %547 = vbcast.lane.b32.xlu0 %v541_v2, 264 }
 0x809   :  { %415 = vbcast.lane.b32.xlu1 %v409_v42, 264 }
 0x80d   :  { %422 = vbcast.lane.b32.xlu1 %v420_v19, 256 }
 0x811   :  { %426 = vbcast.lane.b32.xlu1 %v420_v19, 264  ;;  %v497_v19 = vrot.slane %v358_v0, %v7254_v11 }
 0x815   :  { %433 = vbcast.lane.b32.xlu1 %v431_v24, 256 }
 0x819   :  { %437 = vbcast.lane.b32.xlu1 %v431_v24, 264  ;;  %v7495_v24 = vld [vmem:[#allocation2 + $0x30] ss:$0 sm:$0xff] }
 0x81d   :  { %444 = vbcast.lane.b32.xlu1 %v442_v4, 256 }
 0x821   :  { %455 = vbcast.lane.b32.xlu1 %v453_v29, 256 }
 0x825   :  { %466 = vbcast.lane.b32.xlu1 %v464_v1, 256 }
 0x829   :  { %470 = vbcast.lane.b32.xlu1 %v464_v1, 264 }
 0x82d   :  { %477 = vbcast.lane.b32.xlu1 %v475_v35, 256 }
 0x831   :  { %488 = vbcast.lane.b32.xlu1 %v486_v8, 256 }
 0x835   :  { %492 = vbcast.lane.b32.xlu1 %v486_v8, 264 }
 0x839   :  { %499 = vbcast.lane.b32.xlu1 %v497_v19, 256 }
 0x83d   :  { %503 = vbcast.lane.b32.xlu1 %v497_v19, 264 }
 0x841   :  { %510 = vbcast.lane.b32.xlu1 %v508_v13, 256 }
 0x845   :  { %521 = vbcast.lane.b32.xlu1 %v519_v41, 256 }
 0x849   :  { %532 = vbcast.lane.b32.xlu1 %v530_v37, 256 }
 0x84d   :  { %543 = vbcast.lane.b32.xlu1 %v541_v2, 256 }
 0x85f   :  { %v7497_v46 = vpop.permute.xlu1 %378 }
 0x860   :  { %11151 = vst [vmem:[#allocation24_spill] sm:$0xff] %v7497_v46  ;;  %v981_v50 = vmul.f32 %v7495_v24, %v7497_v46 }
 0x862   :  { %v1013_v59 = vadd.f32 %v981_v50, %v7356_v58 }
 0x863   :  { %v7502_v57 = vpop.permute.xlu1 %382 }
 0x864   :  { %11152 = vst [vmem:[#allocation25_spill] sm:$0xff] %v7502_v57  ;;  %vm1045_vm10 = vcmp.gt.f32.partialorder %v1013_v59, 0.0  ;;  %v1077_v4 = vmul.f32 0.2, %v1013_v59  ;;  %v982_v0 = vmul.f32 %v7495_v24, %v7502_v57 }
 0x866   :  { %v7506_v29 = vsel %vm1045_vm10, %v1013_v59, %v1077_v4  ;;  %v1014_v2 = vadd.f32 %v982_v0, %v7379_v33 }
 0x867   :  { %v7509_v37 = vpop.permute.xlu1 %389  ;;  %v1588_v35 = vmul.f32 %v7265_v15, %v7506_v29 }
 0x868   :  { %11153 = vst [vmem:[#allocation26_spill] sm:$0xff] %v7509_v37  ;;  %v983_v13 = vmul.f32 %v7495_v24, %v7509_v37  ;;  %vm1046_vm11 = vcmp.gt.f32.partialorder %v1014_v2, 0.0  ;;  %v1078_v58 = vmul.f32 0.2, %v1014_v2 }
 0x869   :  { %1652 = vrot.lane.b32.xlu0 %v1588_v35, %s7075_s9 }
 0x86a   :  { %v1015_v40 = vadd.f32 %v983_v13, %v7387_v36  ;;  %v7519_v43 = vsel %vm1046_vm11, %v1014_v2, %v1078_v58 }
 0x86b   :  { %v7517_v41 = vpop.permute.xlu1 %393  ;;  %v1589_v1 = vmul.f32 %v7265_v15, %v7519_v43 }
 0x86c   :  { %11154 = vst [vmem:[#allocation27_spill] sm:$0xff] %v7517_v41  ;;  %vm1047_vm12 = vcmp.gt.f32.partialorder %v1015_v40, 0.0  ;;  %v1079_v33 = vmul.f32 0.2, %v1015_v40  ;;  %v984_v42 = vmul.f32 %v7495_v24, %v7517_v41 }
 0x86d   :  { %1654 = vrot.lane.b32.xlu1 %v1589_v1, %s7075_s9 }
 0x86e   :  { %v7525_v8 = vsel %vm1047_vm12, %v1015_v40, %v1079_v33  ;;  %v1016_v19 = vadd.f32 %v984_v42, %v7393_v38 }
 0x86f   :  { %v7528_v50 = vpop.permute.xlu1 %400  ;;  %v1590_v36 = vmul.f32 %v7265_v15, %v7525_v8 }
 0x870   :  { %11155 = vst [vmem:[#allocation28_spill] sm:$0xff] %v7528_v50  ;;  %v985_v59 = vmul.f32 %v7495_v24, %v7528_v50  ;;  %vm1048_vm14 = vcmp.gt.f32.partialorder %v1016_v19, 0.0  ;;  %v1080_v4 = vmul.f32 0.2, %v1016_v19 }
 0x871   :  { %1656 = vrot.lane.b32.xlu0 %v1590_v36, %s7075_s9 }
 0x872   :  { %v1017_v0 = vadd.f32 %v985_v59, %v7403_v44  ;;  %v7539_v35 = vsel %vm1048_vm14, %v1016_v19, %v1080_v4 }
 0x873   :  { %v7537_v2 = vpop.permute.xlu1 %404  ;;  %v1591_v58 = vmul.f32 %v7265_v15, %v7539_v35 }
 0x874   :  { %11156 = vst [vmem:[#allocation29_spill] sm:$0xff] %v7537_v2  ;;  %vm1049_vm15 = vcmp.gt.f32.partialorder %v1017_v0, 0.0  ;;  %v1081_v38 = vmul.f32 0.2, %v1017_v0  ;;  %v986_v13 = vmul.f32 %v7495_v24, %v7537_v2 }
 0x875   :  { %1658 = vrot.lane.b32.xlu1 %v1591_v58, %s7075_s9 }
 0x876   :  { %v7545_v40 = vsel %vm1049_vm15, %v1017_v0, %v1081_v38  ;;  %v1018_v33 = vadd.f32 %v986_v13, %v7406_v47 }
 0x877   :  { %v7548_v42 = vpop.permute.xlu1 %411  ;;  %v1592_v44 = vmul.f32 %v7265_v15, %v7545_v40 }
 0x878   :  { %11157 = vst [vmem:[#allocation30_spill] sm:$0xff] %v7548_v42  ;;  %v987_v1 = vmul.f32 %v7495_v24, %v7548_v42  ;;  %vm1050_vm1 = vcmp.gt.f32.partialorder %v1018_v33, 0.0  ;;  %v1082_v19 = vmul.f32 0.2, %v1018_v33 }
 0x879   :  { %1660 = vrot.lane.b32.xlu0 %v1592_v44, %s7075_s9 }
 0x87a   :  { %v1019_v36 = vadd.f32 %v987_v1, %v7421_v54  ;;  %v7559_v4 = vsel %vm1050_vm1, %v1018_v33, %v1082_v19 }
 0x87b   :  { %v7557_v59 = vpop.permute.xlu1 %415  ;;  %v1593_v38 = vmul.f32 %v7265_v15, %v7559_v4 }
 0x87c   :  { %11158 = vst [vmem:[#allocation31_spill] sm:$0xff] %v7557_v59  ;;  %vm1051_vm3 = vcmp.gt.f32.partialorder %v1019_v36, 0.0  ;;  %v1083_v47 = vmul.f32 0.2, %v1019_v36  ;;  %v988_v0 = vmul.f32 %v7495_v24, %v7557_v59 }
 0x87d   :  { %1662 = vrot.lane.b32.xlu1 %v1593_v38, %s7075_s9 }
 0x87e   :  { %v7565_v13 = vsel %vm1051_vm3, %v1019_v36, %v1083_v47  ;;  %v1020_v58 = vadd.f32 %v988_v0, %v7427_v60 }
 0x87f   :  { %v7569_v44 = vpop.permute.xlu1 %422  ;;  %v1594_v54 = vmul.f32 %v7265_v15, %v7565_v13 }
 0x880   :  { %11159 = vst [vmem:[#allocation32_spill] sm:$0xff] %v7569_v44  ;;  %v989_v33 = vmul.f32 %v7495_v24, %v7569_v44  ;;  %vm1052_vm7 = vcmp.gt.f32.partialorder %v1020_v58, 0.0  ;;  %v1084_v1 = vmul.f32 0.2, %v1020_v58 }
 0x881   :  { %1664 = vrot.lane.b32.xlu0 %v1594_v54, %s7075_s9 }
 0x882   :  { %v1021_v19 = vadd.f32 %v989_v33, %v7409_v48  ;;  %v7579_v47 = vsel %vm1052_vm7, %v1020_v58, %v1084_v1  ;;  %vm1177_vm7 = vcmask 64512  }
 0x883   :  { %v7577_v36 = vpop.permute.xlu1 %426  ;;  %v1595_v38 = vmul.f32 %v7265_v15, %v7579_v47 }
 0x884   :  { %11160 = vst [vmem:[#allocation33_spill] sm:$0xff] %v7577_v36  ;;  %vm1053_vm8 = vcmp.gt.f32.partialorder %v1021_v19, 0.0  ;;  %v1085_v60 = vmul.f32 0.2, %v1021_v19  ;;  %v990_v0 = vmul.f32 %v7495_v24, %v7577_v36 }
 0x885   :  { %1666 = vrot.lane.b32.xlu1 %v1595_v38, %s7075_s9 }
 0x886   :  { %v1022_v59 = vadd.f32 %v990_v0, %v7412_v51  ;;  %v7586_v42 = vsel %vm1053_vm8, %v1021_v19, %v1085_v60  ;;  %v2157_v19 = vmul.f32 %v7275_v31, %v7506_v29 }
 0x887   :  { %v7589_v54 = vpop.permute.xlu1 %433  ;;  %v1596_v48 = vmul.f32 %v7265_v15, %v7586_v42 }
 0x888   :  { %11161 = vst [vmem:[#allocation34_spill] sm:$0xff] %v7589_v54  ;;  %vm1054_vm10 = vcmp.gt.f32.partialorder %v1022_v59, 0.0  ;;  %v1086_v58 = vmul.f32 0.2, %v1022_v59  ;;  %v991_v33 = vmul.f32 %v7495_v24, %v7589_v54 }
 0x889   :  { %1668 = vrot.lane.b32.xlu0 %v1596_v48, %s7075_s9  ;;  %v2158_v48 = vmul.f32 %v7275_v31, %v7519_v43 }
 0x88a   :  { %v1023_v1 = vadd.f32 %v991_v33, %v7441_v17  ;;  %v7597_v36 = vsel %vm1054_vm10, %v1022_v59, %v1086_v58  ;;  %v2159_v59 = vmul.f32 %v7275_v31, %v7525_v8 }
 0x88b   :  { %v7599_v51 = vpop.permute.xlu1 %437  ;;  %v1597_v60 = vmul.f32 %v7265_v15, %v7597_v36 }
 0x88c   :  { %11162 = vst [vmem:[#allocation35_spill] sm:$0xff] %v7599_v51  ;;  %v1087_v0 = vmul.f32 0.2, %v1023_v1  ;;  %v992_v38 = vmul.f32 %v7495_v24, %v7599_v51  ;;  %vm1055_vm11 = vcmp.gt.f32.partialorder %v1023_v1, 0.0 }
 0x88d   :  { %2221 = vrot.lane.b32.xlu0 %v2157_v19, %s7076_s10  ;;  %1670 = vrot.lane.b32.xlu1 %v1597_v60, %s7075_s9 }
 0x88e   :  { %v1024_v17 = vadd.f32 %v992_v38, %v7444_v55  ;;  %v7614_v33 = vsel %vm1055_vm11, %v1023_v1, %v1087_v0  ;;  %v2160_v55 = vmul.f32 %v7275_v31, %v7539_v35  ;;  %v7628_v1 = vpop.permute.xlu0 %448  ;;  %v2161_v0 = vmul.f32 %v7275_v31, %v7545_v40 }
 0x88f   :  { %v7616_v54 = vpop.permute.xlu1 %444  ;;  %v1598_v19 = vmul.f32 %v7265_v15, %v7614_v33  ;;  %11164 = vst [vmem:[#allocation37_spill] sm:$0xff] %v7628_v1 }
 0x890   :  { %v1088_v58 = vmul.f32 0.2, %v1024_v17  ;;  %vm1056_vm12 = vcmp.gt.f32.partialorder %v1024_v17, 0.0  ;;  %11163 = vst [vmem:[#allocation36_spill] sm:$0xff] %v7616_v54  ;;  %v993_v60 = vmul.f32 %v7495_v24, %v7616_v54 }
 0x891   :  { %2225 = vrot.lane.b32.xlu0 %v2159_v59, %s7076_s10  ;;  %2223 = vrot.lane.b32.xlu1 %v2158_v48, %s7076_s10  ;;  %v994_v48 = vmul.f32 %v7495_v24, %v7628_v1 }
 0x892   :  { %v7626_v38 = vsel %vm1056_vm12, %v1024_v17, %v1088_v58  ;;  %v1025_v51 = vadd.f32 %v993_v60, %v7431_v62  ;;  %v2724_v17 = vmul.f32 %v7277_v32, %v7506_v29  ;;  %v2162_v58 = vmul.f32 %v7275_v31, %v7559_v4 }
 0x893   :  { %v1599_v59 = vmul.f32 %v7265_v15, %v7626_v38  ;;  %v7646_v54 = vpop.permute.xlu1 %455  ;;  %v2726_v62 = vmul.f32 %v7277_v32, %v7525_v8  ;;  %v2725_v60 = vmul.f32 %v7277_v32, %v7519_v43 }
 0x894   :  { %vm1057_vm14 = vcmp.gt.f32.partialorder %v1025_v51, 0.0  ;;  %11165 = vst [vmem:[#allocation38_spill] sm:$0xff] %v7646_v54 }
 0x895   :  { %1672 = vrot.lane.b32.xlu0 %v1598_v19, %s7075_s9  ;;  %2227 = vrot.lane.b32.xlu1 %v2160_v55, %s7076_s10  ;;  %v1026_v19 = vadd.f32 %v994_v48, %v7367_v9  ;;  %v1089_v55 = vmul.f32 0.2, %v1025_v51  ;;  %v7658_v48 = vpop.permute.xlu0 %459 }
 0x896   :  { %11166 = vst [vmem:[#allocation39_spill] sm:$0xff] %v7658_v48 }
 0x897   :  { %v7656_v9 = vsel %vm1057_vm14, %v1025_v51, %v1089_v55  ;;  %vm1058_vm15 = vcmp.gt.f32.partialorder %v1026_v19, 0.0  ;;  %v2163_v55 = vmul.f32 %v7275_v31, %v7565_v13 }
 0x899   :  { %2229 = vrot.lane.b32.xlu0 %v2161_v0, %s7076_s10  ;;  %1674 = vrot.lane.b32.xlu1 %v1599_v59, %s7075_s9  ;;  %v1090_v0 = vmul.f32 0.2, %v1026_v19  ;;  %v995_v59 = vmul.f32 %v7495_v24, %v7646_v54  ;;  %v996_v54 = vmul.f32 %v7495_v24, %v7658_v48 }
 0x89b   :  { %v7666_v1 = vsel %vm1058_vm15, %v1026_v19, %v1090_v0  ;;  %v1027_v51 = vadd.f32 %v995_v59, %v7434_v63  ;;  %v2728_v63 = vmul.f32 %v7277_v32, %v7545_v40  ;;  %v2164_v19 = vmul.f32 %v7275_v31, %v7579_v47 }
 0x89d   :  { %2788 = vrot.lane.b32.xlu0 %v2724_v17, %s7077_s11  ;;  %2231 = vrot.lane.b32.xlu1 %v2162_v58, %s7076_s10  ;;  %v1600_v17 = vmul.f32 %v7265_v15, %v7656_v9  ;;  %v2727_v58 = vmul.f32 %v7277_v32, %v7539_v35  ;;  %v1091_v44 = vmul.f32 0.2, %v1027_v51  ;;  %vm1059_vm1 = vcmp.gt.f32.partialorder %v1027_v51, 0.0 }
 0x89f   :  { %v7684_v59 = vsel %vm1059_vm1, %v1027_v51, %v1091_v44  ;;  %v2165_v44 = vmul.f32 %v7275_v31, %v7586_v42  ;;  %v2730_v51 = vmul.f32 %v7277_v32, %v7565_v13 }
 0x8a1   :  { %2792 = vrot.lane.b32.xlu0 %v2726_v62, %s7077_s11  ;;  %2790 = vrot.lane.b32.xlu1 %v2725_v60, %s7077_s11  ;;  %v1601_v62 = vmul.f32 %v7265_v15, %v7666_v1  ;;  %v1028_v60 = vadd.f32 %v996_v54, %v7382_v34  ;;  %v1602_v34 = vmul.f32 %v7265_v15, %v7684_v59 }
 0x8a2   :  { %v2729_v54 = vmul.f32 %v7277_v32, %v7559_v4 }
 0x8a3   :  { %v1092_v0 = vmul.f32 0.2, %v1028_v60  ;;  %vm1060_vm3 = vcmp.gt.f32.partialorder %v1028_v60, 0.0 }
 0x8a5   :  { %1676 = vrot.lane.b32.xlu0 %v1600_v17, %s7075_s9  ;;  %2794 = vrot.lane.b32.xlu1 %v2727_v58, %s7077_s11  ;;  %v7692_v17 = vsel %vm1060_vm3, %v1028_v60, %v1092_v0  ;;  %v2731_v60 = vmul.f32 %v7277_v32, %v7579_v47  ;;  %v2169_v0 = vmul.f32 %v7275_v31, %v7656_v9 }
 0x8a6   :  { %v1603_v58 = vmul.f32 %v7265_v15, %v7692_v17 }
 0x8a9   :  { %2233 = vrot.lane.b32.xlu0 %v2163_v55, %s7076_s10  ;;  %1678 = vrot.lane.b32.xlu1 %v1601_v62, %s7075_s9  ;;  %v2166_v55 = vmul.f32 %v7275_v31, %v7597_v36  ;;  %v2167_v62 = vmul.f32 %v7275_v31, %v7614_v33 }
 0x8ad   :  { %2796 = vrot.lane.b32.xlu0 %v2728_v63, %s7077_s11  ;;  %2235 = vrot.lane.b32.xlu1 %v2164_v19, %s7076_s10  ;;  %v2732_v63 = vmul.f32 %v7277_v32, %v7586_v42  ;;  %v2168_v19 = vmul.f32 %v7275_v31, %v7626_v38 }
 0x8b1   :  { %1680 = vrot.lane.b32.xlu0 %v1602_v34, %s7075_s9  ;;  %2798 = vrot.lane.b32.xlu1 %v2729_v54, %s7077_s11  ;;  %v2733_v34 = vmul.f32 %v7277_v32, %v7597_v36  ;;  %v7724_v54 = vpop.permute.xlu1 %466 }
 0x8b2   :  { %11167 = vst [vmem:[#allocation40_spill] sm:$0xff] %v7724_v54 }
 0x8b5   :  { %2237 = vrot.lane.b32.xlu0 %v2165_v44, %s7076_s10  ;;  %1682 = vrot.lane.b32.xlu1 %v1603_v58, %s7075_s9  ;;  %v2734_v44 = vmul.f32 %v7277_v32, %v7614_v33  ;;  %v2170_v58 = vmul.f32 %v7275_v31, %v7666_v1 }
 0x8b9   :  { %2800 = vrot.lane.b32.xlu0 %v2730_v51, %s7077_s11  ;;  %2239 = vrot.lane.b32.xlu1 %v2166_v55, %s7076_s10  ;;  %v7734_v51 = vpop.permute.xlu1 %470  ;;  %v2171_v55 = vmul.f32 %v7275_v31, %v7684_v59 }
 0x8ba   :  { %11168 = vst [vmem:[#allocation41_spill] sm:$0xff] %v7734_v51 }
 0x8bd   :  { %2241 = vrot.lane.b32.xlu0 %v2167_v62, %s7076_s10  ;;  %2802 = vrot.lane.b32.xlu1 %v2731_v60, %s7077_s11  ;;  %v2735_v62 = vmul.f32 %v7277_v32, %v7626_v38  ;;  %v2736_v60 = vmul.f32 %v7277_v32, %v7656_v9 }
 0x8c1   :  { %2804 = vrot.lane.b32.xlu0 %v2732_v63, %s7077_s11  ;;  %2243 = vrot.lane.b32.xlu1 %v2168_v19, %s7076_s10  ;;  %v2172_v63 = vmul.f32 %v7275_v31, %v7692_v17  ;;  %v7746_v19 = vpop.permute.xlu1 %477 }
 0x8c2   :  { %11169 = vst [vmem:[#allocation42_spill] sm:$0xff] %v7746_v19 }
 0x8c5   :  { %2245 = vrot.lane.b32.xlu0 %v2169_v0, %s7076_s10  ;;  %2806 = vrot.lane.b32.xlu1 %v2733_v34, %s7077_s11  ;;  %v2738_v0 = vmul.f32 %v7277_v32, %v7684_v59  ;;  %v2737_v34 = vmul.f32 %v7277_v32, %v7666_v1 }
 0x8c9   :  { %2808 = vrot.lane.b32.xlu0 %v2734_v44, %s7077_s11  ;;  %2247 = vrot.lane.b32.xlu1 %v2170_v58, %s7076_s10  ;;  %v7756_v44 = vpop.permute.xlu1 %488  ;;  %v2739_v58 = vmul.f32 %v7277_v32, %v7692_v17 }
 0x8ca   :  { %11170 = vst [vmem:[#allocation43_spill] sm:$0xff] %v7756_v44 }
 0x8cd   :  { %2249 = vrot.lane.b32.xlu0 %v2171_v55, %s7076_s10  ;;  %2810 = vrot.lane.b32.xlu1 %v2735_v62, %s7077_s11  ;;  %v7761_v55 = vpop.permute.xlu1 %492  ;;  %v7763_v62 = vpop.permute.xlu0 %481 }
 0x8ce   :  { %11171 = vst [vmem:[#allocation44_spill] sm:$0xff] %v7761_v55  ;;  %11172 = vst [vmem:[#allocation45_spill] sm:$0xff] %v7763_v62 }
 0x8d1   :  { %2812 = vrot.lane.b32.xlu0 %v2736_v60, %s7077_s11  ;;  %2251 = vrot.lane.b32.xlu1 %v2172_v63, %s7076_s10  ;;  %v7765_v60 = vpop.permute.xlu1 %499  ;;  %v7767_v63 = vpop.permute.xlu0 %514 }
 0x8d2   :  { %11173 = vst [vmem:[#allocation46_spill] sm:$0xff] %v7765_v60  ;;  %11174 = vst [vmem:[#allocation47_spill] sm:$0xff] %v7767_v63 }
 0x8d5   :  { %2816 = vrot.lane.b32.xlu0 %v2738_v0, %s7077_s11  ;;  %2814 = vrot.lane.b32.xlu1 %v2737_v34, %s7077_s11  ;;  %v7769_v48 = vpop.permute.xlu1 %503  ;;  %v7773_v0 = vrot.slane %v7244_v3, %v7348_v49  ;;  %v7775_v34 = vpop.permute.xlu0 %525 }
 0x8d6   :  { %11175 = vst [vmem:[#allocation48_spill] sm:$0xff] %v7769_v48  ;;  %11176 = vst [vmem:[#allocation49_spill] sm:$0xff] %v7775_v34 }
 0x8d7   :  { %v1147_v37 = vmul.f32 %v7773_v0, %v7525_v8  ;;  %v1148_v49 = vmul.f32 %v7773_v0, %v7539_v35  ;;  %v1151_v35 = vmul.f32 %v7773_v0, %v7565_v13 }
 0x8d9   :  { %2818 = vrot.lane.b32.xlu1 %v2739_v58, %s7077_s11  ;;  %v7777_v2 = vpop.permute.xlu1 %510  ;;  %v1145_v58 = vmul.f32 %v7773_v0, %v7506_v29  ;;  %v7781_v50 = vpop.permute.xlu0 %536  ;;  %v1184_v57 = vsel %vm1177_vm7, %v1147_v37, 0.0  ;;  %v1146_v29 = vmul.f32 %v7773_v0, %v7519_v43  ;;  %v1187_v8 = vsel %vm1177_vm7, %v1148_v49, 0.0 }
 0x8da   :  { %11177 = vst [vmem:[#allocation50_spill] sm:$0xff] %v7777_v2  ;;  %11178 = vst [vmem:[#allocation51_spill] sm:$0xff] %v7781_v50  ;;  %v1150_v37 = vmul.f32 %v7773_v0, %v7559_v4  ;;  %v1153_v4 = vmul.f32 %v7773_v0, %v7586_v42 }
 0x8db   :  { %v1178_v41 = vsel %vm1177_vm7, %v1145_v58, 0.0  ;;  %v1181_v12 = vsel %vm1177_vm7, %v1146_v29, 0.0 }
 0x8dc   :  { %v1193_v49 = vsel %vm1177_vm7, %v1150_v37, 0.0 }
 0x8dd   :  { %v7786_v46 = vpop.permute.xlu1 %521  ;;  %v7788_v3 = vpop.permute.xlu0 %547 }
 0x8de   :  { %11179 = vst [vmem:[#allocation52_spill] sm:$0xff] %v7786_v46  ;;  %11180 = vst [vmem:[#allocation53_spill] sm:$0xff] %v7788_v3 }
 0x8e1   :  { %v7795_v11 = vpop.permute.xlu1 %532  ;;  %v7797_v58 = vpop.permute.xlu0 %1652 }
 0x8e2   :  { %11181 = vst [vmem:[#allocation54_spill] sm:$0xff] %v7795_v11 }
 0x8e5   :  { %v7810_v30 = vpop.permute.xlu1 %543 }
 0x8e6   :  { %11182 = vst [vmem:[#allocation55_spill] sm:$0xff] %v7810_v30 }
 0x8f4   :  { %1179 = vadd.xlane.f32.xlu0 %v1178_v41  ;;  %v1149_v41 = vmul.f32 %v7773_v0, %v7545_v40  ;;  %v1152_v40 = vmul.f32 %v7773_v0, %v7579_v47  ;;  %v1202_v47 = vsel %vm1177_vm7, %v1153_v4, 0.0 }
 0x8f6   :  { %v1190_v43 = vsel %vm1177_vm7, %v1149_v41, 0.0  ;;  %v1199_v13 = vsel %vm1177_vm7, %v1152_v40, 0.0  ;;  %v1154_v41 = vmul.f32 %v7773_v0, %v7597_v36 }
 0x8f8   :  { %1185 = vadd.xlane.f32.xlu0 %v1184_v57  ;;  %v7805_v57 = vpop.permute.xlu0 %1656  ;;  %v1205_v42 = vsel %vm1177_vm7, %v1154_v41, 0.0 }
 0x8fc   :  { %1188 = vadd.xlane.f32.xlu0 %v1187_v8  ;;  %v7815_v29 = vpop.permute.xlu0 %1660  ;;  %v7820_v8 = vpop.permute.xlu1 %1654 }
 0x8fd   :  { %1182 = vadd.xlane.f32.xlu1 %v1181_v12  ;;  %v1196_v12 = vsel %vm1177_vm7, %v1151_v35, 0.0 }
 0x900   :  { %1191 = vadd.xlane.f32.xlu0 %v1190_v43  ;;  %v7825_v37 = vpop.permute.xlu0 %1664  ;;  %v1155_v43 = vmul.f32 %v7773_v0, %v7614_v33  ;;  %v7830_v35 = vpop.permute.xlu1 %1658 }
 0x901   :  { %1194 = vadd.xlane.f32.xlu1 %v1193_v49  ;;  %v1156_v49 = vmul.f32 %v7773_v0, %v7626_v38  ;;  %v1159_v38 = vmul.f32 %v7773_v0, %v7684_v59  ;;  %v998_v59 = vmul.f32 %v7495_v24, %v7734_v51 }
 0x902   :  { %v1208_v36 = vsel %vm1177_vm7, %v1155_v43, 0.0 }
 0x903   :  { %v1211_v33 = vsel %vm1177_vm7, %v1156_v49, 0.0  ;;  %v1220_v49 = vsel %vm1177_vm7, %v1159_v38, 0.0 }
 0x904   :  { %1197 = vadd.xlane.f32.xlu0 %v1196_v12  ;;  %v7835_v40 = vpop.permute.xlu0 %1668  ;;  %v1157_v12 = vmul.f32 %v7773_v0, %v7656_v9  ;;  %v7840_v4 = vpop.permute.xlu1 %1662  ;;  %v1160_v9 = vmul.f32 %v7773_v0, %v7692_v17  ;;  %v997_v17 = vmul.f32 %v7495_v24, %v7724_v54 }
 0x905   :  { %1200 = vadd.xlane.f32.xlu1 %v1199_v13  ;;  %v1158_v13 = vmul.f32 %v7773_v0, %v7666_v1 }
 0x906   :  { %v1214_v41 = vsel %vm1177_vm7, %v1157_v12, 0.0  ;;  %v1000_v12 = vmul.f32 %v7495_v24, %v7763_v62 }
 0x907   :  { %v1217_v43 = vsel %vm1177_vm7, %v1158_v13, 0.0  ;;  %v1030_v13 = vadd.f32 %v998_v59, %v7450_v23 }
 0x908   :  { %1203 = vadd.xlane.f32.xlu0 %v1202_v47  ;;  %v7848_v47 = vpop.permute.xlu1 %1666  ;;  %v1032_v38 = vadd.f32 %v1000_v12, %v7390_v45  ;;  %v1001_v45 = vmul.f32 %v7495_v24, %v7756_v44 }
 0x909   :  { %1206 = vadd.xlane.f32.xlu1 %v1205_v42  ;;  %v7853_v42 = vpop.permute.xlu0 %2221  ;;  %vm1062_vm8 = vcmp.gt.f32.partialorder %v1030_v13, 0.0 }
 0x90a   :  { %v1096_v51 = vmul.f32 0.2, %v1032_v38  ;;  %vm1064_vm10 = vcmp.gt.f32.partialorder %v1032_v38, 0.0  ;;  %v1033_v44 = vadd.f32 %v1001_v45, %v7456_v6 }
 0x90c   :  { %1209 = vadd.xlane.f32.xlu0 %v1208_v36  ;;  %v7856_v1 = vpop.permute.xlu1 %1670  ;;  %v1223_v36 = vsel %vm1177_vm7, %v1160_v9, 0.0  ;;  %v999_v9 = vmul.f32 %v7495_v24, %v7746_v19  ;;  %v7888_v19 = vsel %vm1064_vm10, %v1032_v38, %v1096_v51  ;;  %v1097_v6 = vmul.f32 0.2, %v1033_v44 }
 0x90d   :  { %1212 = vadd.xlane.f32.xlu1 %v1211_v33  ;;  %v7863_v33 = vpop.permute.xlu0 %2225  ;;  %v1607_v45 = vmul.f32 %v7265_v15, %v7888_v19  ;;  %vm1065_vm15 = vcmp.gt.f32.partialorder %v1033_v44, 0.0 }
 0x90e   :  { %v1031_v23 = vadd.f32 %v999_v9, %v7453_v25 }
 0x910   :  { %1215 = vadd.xlane.f32.xlu0 %v1214_v41  ;;  %v7868_v41 = vpop.permute.xlu1 %2223  ;;  %v1095_v9 = vmul.f32 0.2, %v1031_v23  ;;  %vm1063_vm12 = vcmp.gt.f32.partialorder %v1031_v23, 0.0 }
 0x911   :  { %1218 = vadd.xlane.f32.xlu1 %v1217_v43  ;;  %v1029_v43 = vadd.f32 %v997_v17, %v7447_v5  ;;  %v7876_v62 = vpop.permute.xlu0 %1672  ;;  %v1004_v17 = vmul.f32 %v7495_v24, %v7769_v48 }
 0x913   :  { %v1093_v54 = vmul.f32 0.2, %v1029_v43  ;;  %vm1061_vm11 = vcmp.gt.f32.partialorder %v1029_v43, 0.0  ;;  %v1036_v51 = vadd.f32 %v1004_v17, %v7481_v14 }
 0x914   :  { %1221 = vadd.xlane.f32.xlu0 %v1220_v49  ;;  %v1094_v49 = vmul.f32 0.2, %v1030_v13  ;;  %v7881_v59 = vpop.permute.xlu1 %2227 }
 0x915   :  { %1224 = vadd.xlane.f32.xlu1 %v1223_v36  ;;  %v1002_v36 = vmul.f32 %v7495_v24, %v7761_v55  ;;  %v1006_v55 = vmul.f32 %v7495_v24, %v7767_v63  ;;  %v7892_v20 = vpop.permute.xlu0 %2229  ;;  %v7894_v25 = vsel %vm1061_vm11, %v1029_v43, %v1093_v54  ;;  %v7906_v43 = vsel %vm1063_vm12, %v1031_v23, %v1095_v9 }
 0x916   :  { %v7883_v5 = vsel %vm1062_vm8, %v1030_v13, %v1094_v49  ;;  %v1003_v49 = vmul.f32 %v7495_v24, %v7765_v60  ;;  %v1100_v17 = vmul.f32 0.2, %v1036_v51  ;;  %v1005_v60 = vmul.f32 %v7495_v24, %v7777_v2 }
 0x917   :  { %v1034_v12 = vadd.f32 %v1002_v36, %v7459_v28  ;;  %v1605_v13 = vmul.f32 %v7265_v15, %v7883_v5  ;;  %v1038_v54 = vadd.f32 %v1006_v55, %v7396_v39  ;;  %v1604_v36 = vmul.f32 %v7265_v15, %v7894_v25 }
 0x918   :  { %v7902_v38 = vpop.permute.xlu1 %1674  ;;  %v1035_v14 = vadd.f32 %v1003_v49, %v7478_v7  ;;  %vm1068_vm1 = vcmp.gt.f32.partialorder %v1036_v51, 0.0  ;;  %v1606_v23 = vmul.f32 %v7265_v15, %v7906_v43  ;;  %v1037_v49 = vadd.f32 %v1005_v60, %v7464_v61 }
 0x919   :  { %v1098_v28 = vmul.f32 0.2, %v1034_v12  ;;  %vm1066_vm14 = vcmp.gt.f32.partialorder %v1034_v12, 0.0  ;;  %v1102_v39 = vmul.f32 0.2, %v1038_v54  ;;  %vm1070_vm3 = vcmp.gt.f32.partialorder %v1038_v54, 0.0 }
 0x91a   :  { %v1099_v9 = vmul.f32 0.2, %v1035_v14  ;;  %vm1067_vm8 = vcmp.gt.f32.partialorder %v1035_v14, 0.0  ;;  %v1101_v60 = vmul.f32 0.2, %v1037_v49  ;;  %vm1069_vm10 = vcmp.gt.f32.partialorder %v1037_v49, 0.0 }
 0x91b   :  { %v7912_v48 = vsel %vm1066_vm14, %v1034_v12, %v1098_v28  ;;  %v7927_v12 = vsel %vm1065_vm15, %v1033_v44, %v1097_v6  ;;  %v7929_v28 = vsel %vm1068_vm1, %v1036_v51, %v1100_v17  ;;  %v7940_v6 = vsel %vm1070_vm3, %v1038_v54, %v1102_v39 }
 0x91c   :  { %v7921_v55 = vpop.permute.xlu1 %2231  ;;  %v1609_v7 = vmul.f32 %v7265_v15, %v7912_v48  ;;  %v1611_v44 = vmul.f32 %v7265_v15, %v7929_v28  ;;  %v1008_v51 = vmul.f32 %v7495_v24, %v7775_v34  ;;  %v7944_v61 = vsel %vm1067_vm8, %v1035_v14, %v1099_v9 }
 0x91d   :  { %v1613_v54 = vmul.f32 %v7265_v15, %v7940_v6  ;;  %v1007_v14 = vmul.f32 %v7495_v24, %v7786_v46  ;;  %v2174_v34 = vmul.f32 %v7275_v31, %v7883_v5  ;;  %v2180_v16 = vmul.f32 %v7275_v31, %v7929_v28 }
 0x91e   :  { %v1040_v39 = vadd.f32 %v1008_v51, %v7415_v52  ;;  %vm1315_vm8 = vcmask 130112  }
 0x920   :  { %v7946_v17 = vpop.permute.xlu1 %2790  ;;  %v1104_v52 = vmul.f32 0.2, %v1040_v39  ;;  %vm1072_vm11 = vcmp.gt.f32.partialorder %v1040_v39, 0.0 }
 0x926   :  { %1686 = vrot.lane.b32.xlu1 %v1605_v13, %s7075_s9  ;;  %v7917_v13 = vpop.permute.xlu0 %2788 }
 0x92a   :  { %1684 = vrot.lane.b32.xlu0 %v1604_v36, %s7075_s9  ;;  %1690 = vrot.lane.b32.xlu1 %v1607_v45, %s7075_s9  ;;  %v7934_v36 = vpop.permute.xlu0 %2792  ;;  %v1608_v45 = vmul.f32 %v7265_v15, %v7927_v12 }
 0x92e   :  { %1688 = vrot.lane.b32.xlu0 %v1606_v23, %s7075_s9  ;;  %1694 = vrot.lane.b32.xlu1 %v1609_v7, %s7075_s9  ;;  %v1610_v23 = vmul.f32 %v7265_v15, %v7944_v61  ;;  %v7955_v7 = vsel %vm1069_vm10, %v1037_v49, %v1101_v60  ;;  %v7959_v9 = vpop.permute.xlu0 %1676  ;;  %v1039_v49 = vadd.f32 %v1007_v14, %v7467_v27  ;;  %vm1452_vm10 = vcmask 1041409  }
 0x92f   :  { %v2173_v60 = vmul.f32 %v7275_v31, %v7894_v25  ;;  %v2175_v27 = vmul.f32 %v7275_v31, %v7906_v43  ;;  %v1010_v14 = vmul.f32 %v7495_v24, %v7781_v50 }
 0x930   :  { %v1103_v46 = vmul.f32 0.2, %v1039_v49  ;;  %vm1071_vm12 = vcmp.gt.f32.partialorder %v1039_v49, 0.0 }
 0x931   :  { %v1042_v63 = vadd.f32 %v1010_v14, %v7418_v53  ;;  %v2740_v14 = vmul.f32 %v7277_v32, %v7894_v25 }
 0x932   :  { %1692 = vrot.lane.b32.xlu0 %v1608_v45, %s7075_s9  ;;  %1698 = vrot.lane.b32.xlu1 %v1611_v44, %s7075_s9  ;;  %v7963_v45 = vpop.permute.xlu1 %2794  ;;  %v1612_v44 = vmul.f32 %v7265_v15, %v7955_v7  ;;  %v7972_v51 = vpop.permute.xlu0 %2233 }
 0x933   :  { %v1106_v50 = vmul.f32 0.2, %v1042_v63  ;;  %vm1074_vm14 = vcmp.gt.f32.partialorder %v1042_v63, 0.0 }
 0x936   :  { %1696 = vrot.lane.b32.xlu0 %v1610_v23, %s7075_s9  ;;  %1702 = vrot.lane.b32.xlu1 %v1613_v54, %s7075_s9  ;;  %v2176_v23 = vmul.f32 %v7275_v31, %v7888_v19  ;;  %v7978_v54 = vsel %vm1072_vm11, %v1040_v39, %v1104_v52  ;;  %v7980_v2 = vpop.permute.xlu1 %1678  ;;  %v7992_v39 = vpop.permute.xlu0 %2796  ;;  %vm1454_vm11 = vcmask 1042434  }
 0x93a   :  { %1700 = vrot.lane.b32.xlu0 %v1612_v44, %s7075_s9  ;;  %2255 = vrot.lane.b32.xlu1 %v2174_v34, %s7076_s10  ;;  %v1615_v34 = vmul.f32 %v7265_v15, %v7978_v54  ;;  %v7990_v44 = vsel %vm1071_vm12, %v1039_v49, %v1103_v46  ;;  %v7996_v52 = vpop.permute.xlu1 %2235  ;;  %v1009_v46 = vmul.f32 %v7495_v24, %v7795_v11  ;;  %v8007_v49 = vpop.permute.xlu0 %1680  ;;  %vm1456_vm12 = vcmask 1043459  }
 0x93b   :  { %v1012_v11 = vmul.f32 %v7495_v24, %v7788_v3  ;;  %v1011_v3 = vmul.f32 %v7495_v24, %v7810_v30  ;;  %v2749_v30 = vmul.f32 %v7277_v32, %v7940_v6 }
 0x93c   :  { %v1041_v21 = vadd.f32 %v1009_v46, %v7470_v10 }
 0x93e   :  { %2253 = vrot.lane.b32.xlu0 %v2173_v60, %s7076_s10  ;;  %2259 = vrot.lane.b32.xlu1 %v2176_v23, %s7076_s10  ;;  %v1614_v60 = vmul.f32 %v7265_v15, %v7990_v44  ;;  %v2178_v23 = vmul.f32 %v7275_v31, %v7912_v48  ;;  %v8014_v53 = vpop.permute.xlu1 %2798  ;;  %v1105_v22 = vmul.f32 0.2, %v1041_v21  ;;  %v8026_v10 = vpop.permute.xlu0 %2237  ;;  %vm1073_vm15 = vcmp.gt.f32.partialorder %v1041_v21, 0.0 }
 0x942   :  { %2257 = vrot.lane.b32.xlu0 %v2175_v27, %s7076_s10  ;;  %1706 = vrot.lane.b32.xlu1 %v1615_v34, %s7075_s9  ;;  %v2177_v27 = vmul.f32 %v7275_v31, %v7927_v12  ;;  %v2741_v34 = vmul.f32 %v7277_v32, %v7883_v5  ;;  %v8030_v46 = vpop.permute.xlu1 %1682 }
 0x946   :  { %1704 = vrot.lane.b32.xlu0 %v1614_v60, %s7075_s9  ;;  %2263 = vrot.lane.b32.xlu1 %v2178_v23, %s7076_s10  ;;  %v2743_v60 = vmul.f32 %v7277_v32, %v7888_v19  ;;  %v8022_v23 = vsel %vm1074_vm14, %v1042_v63, %v1106_v50  ;;  %v1044_v63 = vadd.f32 %v1012_v11, %v7424_v56  ;;  %vm1458_vm14 = vcmask 1044484  }
 0x947   :  { %v1617_v50 = vmul.f32 %v7265_v15, %v8022_v23  ;;  %v1043_v11 = vadd.f32 %v1011_v3, %v7473_v26  ;;  %v2745_v56 = vmul.f32 %v7277_v32, %v7912_v48 }
 0x948   :  { %v1108_v18 = vmul.f32 0.2, %v1044_v63  ;;  %vm1076_vm1 = vcmp.gt.f32.partialorder %v1044_v63, 0.0 }
 0x949   :  { %vm1075_vm3 = vcmp.gt.f32.partialorder %v1043_v11, 0.0 }
 0x94a   :  { %2261 = vrot.lane.b32.xlu0 %v2177_v27, %s7076_s10  ;;  %2822 = vrot.lane.b32.xlu1 %v2741_v34, %s7077_s11  ;;  %v2742_v27 = vmul.f32 %v7277_v32, %v7906_v43  ;;  %v8037_v34 = vsel %vm1073_vm15, %v1041_v21, %v1105_v22  ;;  %v8050_v21 = vpop.permute.xlu1 %2239  ;;  %v2179_v22 = vmul.f32 %v7275_v31, %v7944_v61  ;;  %vm1460_vm15 = vcmask 1045509  }
 0x94b   :  { %v8058_v24 = vsel %vm1076_vm1, %v1044_v63, %v1108_v18  ;;  %vm11126_vm1 = vcmask 1046534  }
 0x94c   :  { %v1619_v3 = vmul.f32 %v7265_v15, %v8058_v24 }
 0x94e   :  { %2820 = vrot.lane.b32.xlu0 %v2740_v14, %s7077_s11  ;;  %2826 = vrot.lane.b32.xlu1 %v2743_v60, %s7077_s11  ;;  %v8043_v14 = vpop.permute.xlu0 %2800  ;;  %v1616_v60 = vmul.f32 %v7265_v15, %v8037_v34  ;;  %v8064_v26 = vpop.permute.xlu1 %2802 }
 0x952   :  { %2824 = vrot.lane.b32.xlu0 %v2742_v27, %s7077_s11  ;;  %1710 = vrot.lane.b32.xlu1 %v1617_v50, %s7075_s9  ;;  %v1107_v27 = vmul.f32 0.2, %v1043_v11  ;;  %v8060_v50 = vpop.permute.xlu0 %2241 }
 0x956   :  { %1708 = vrot.lane.b32.xlu0 %v1616_v60, %s7075_s9  ;;  %2267 = vrot.lane.b32.xlu1 %v2180_v16, %s7076_s10  ;;  %v2744_v16 = vmul.f32 %v7277_v32, %v7927_v12  ;;  %v8070_v60 = vsel %vm1075_vm3, %v1043_v11, %v1107_v27  ;;  %v8074_v18 = vpop.permute.xlu0 %2804  ;;  %v2747_v11 = vmul.f32 %v7277_v32, %v7929_v28  ;;  %vm11125_vm3 = vcmask 1047559  }
 0x957   :  { %11183 = vst [vmem:[#allocation56_spill] sm:$0xff] %v8074_v18  ;;  %v1618_v63 = vmul.f32 %v7265_v15, %v8070_v60  ;;  %v2181_v27 = vmul.f32 %v7275_v31, %v7955_v7 }
 0x95a   :  { %2265 = vrot.lane.b32.xlu0 %v2179_v22, %s7076_s10  ;;  %2830 = vrot.lane.b32.xlu1 %v2745_v56, %s7077_s11  ;;  %v2182_v22 = vmul.f32 %v7275_v31, %v7940_v6  ;;  %v8080_v56 = vpop.permute.xlu1 %2243 }
 0x95e   :  { %2828 = vrot.lane.b32.xlu0 %v2744_v16, %s7077_s11  ;;  %1714 = vrot.lane.b32.xlu1 %v1619_v3, %s7075_s9  ;;  %v8088_v16 = vpop.permute.xlu0 %2245  ;;  %v8092_v15 = vpop.permute.xlu1 %2806  ;;  %v2184_v3 = vmul.f32 %v7275_v31, %v7978_v54 }
 0x95f   :  { %11184 = vst [vmem:[#allocation57_spill] sm:$0xff] %v8088_v16  ;;  %11185 = vst [vmem:[#allocation58_spill] sm:$0xff] %v8092_v15  ;;  %v2186_v16 = vmul.f32 %v7275_v31, %v8022_v23 }
 0x962   :  { %1712 = vrot.lane.b32.xlu0 %v1618_v63, %s7075_s9  ;;  %2271 = vrot.lane.b32.xlu1 %v2182_v22, %s7076_s10  ;;  %v2746_v63 = vmul.f32 %v7277_v32, %v7944_v61  ;;  %v8100_v22 = vpop.permute.xlu0 %2808 }
 0x963   :  { %11186 = vst [vmem:[#allocation59_spill] sm:$0xff] %v8100_v22 }
 0x966   :  { %2834 = vrot.lane.b32.xlu1 %v2747_v11, %s7077_s11  ;;  %2269 = vrot.lane.b32.xlu0 %v2181_v27, %s7076_s10  ;;  %v2183_v11 = vmul.f32 %v7275_v31, %v7990_v44  ;;  %v8106_v27 = vpop.permute.xlu1 %2247 }
 0x967   :  { %11187 = vst [vmem:[#allocation60_spill] sm:$0xff] %v8106_v27  ;;  %v2751_v27 = vmul.f32 %v7277_v32, %v7978_v54 }
 0x96a   :  { %2275 = vrot.lane.b32.xlu1 %v2184_v3, %s7076_s10  ;;  %2832 = vrot.lane.b32.xlu0 %v2746_v63, %s7077_s11  ;;  %v2748_v3 = vmul.f32 %v7277_v32, %v7955_v7  ;;  %v8114_v63 = vpop.permute.xlu0 %2249  ;;  %v8118_v22 = vpop.permute.xlu1 %2810 }
 0x96b   :  { %11188 = vst [vmem:[#allocation61_spill] sm:$0xff] %v8114_v63  ;;  %11189 = vst [vmem:[#allocation62_spill] sm:$0xff] %v8118_v22  ;;  %v2188_v63 = vmul.f32 %v7275_v31, %v8058_v24  ;;  %v2753_v22 = vmul.f32 %v7277_v32, %v8022_v23 }
 0x96e   :  { %2838 = vrot.lane.b32.xlu1 %v2749_v30, %s7077_s11  ;;  %2273 = vrot.lane.b32.xlu0 %v2183_v11, %s7076_s10  ;;  %v2185_v30 = vmul.f32 %v7275_v31, %v8037_v34  ;;  %v8126_v11 = vpop.permute.xlu0 %2812 }
 0x96f   :  { %11190 = vst [vmem:[#allocation63_spill] sm:$0xff] %v8126_v11 }
 0x972   :  { %2279 = vrot.lane.b32.xlu1 %v2186_v16, %s7076_s10  ;;  %2836 = vrot.lane.b32.xlu0 %v2748_v3, %s7077_s11  ;;  %v2750_v16 = vmul.f32 %v7277_v32, %v7990_v44  ;;  %v8132_v3 = vpop.permute.xlu1 %2251 }
 0x973   :  { %11191 = vst [vmem:[#allocation64_spill] sm:$0xff] %v8132_v3  ;;  %v2755_v3 = vmul.f32 %v7277_v32, %v8058_v24 }
 0x976   :  { %2842 = vrot.lane.b32.xlu1 %v2751_v27, %s7077_s11  ;;  %2277 = vrot.lane.b32.xlu0 %v2185_v30, %s7076_s10  ;;  %v2187_v27 = vmul.f32 %v7275_v31, %v8070_v60  ;;  %v8140_v30 = vpop.permute.xlu0 %2816  ;;  %v8144_v11 = vpop.permute.xlu1 %2814  ;;  %v2754_v31 = vmul.f32 %v7277_v32, %v8070_v60 }
 0x977   :  { %11192 = vst [vmem:[#allocation65_spill] sm:$0xff] %v8140_v30  ;;  %11193 = vst [vmem:[#allocation66_spill] sm:$0xff] %v8144_v11 }
 0x97a   :  { %2283 = vrot.lane.b32.xlu1 %v2188_v63, %s7076_s10  ;;  %2840 = vrot.lane.b32.xlu0 %v2750_v16, %s7077_s11  ;;  %v2752_v63 = vmul.f32 %v7277_v32, %v8037_v34 }
 0x97e   :  { %2846 = vrot.lane.b32.xlu1 %v2753_v22, %s7077_s11  ;;  %2281 = vrot.lane.b32.xlu0 %v2187_v27, %s7076_s10  ;;  %v8158_v27 = vpop.permute.xlu1 %2818 }
 0x97f   :  { %11196 = vst [vmem:[#allocation69_spill] sm:$0xff] %v8158_v27 }
 0x981   :  { %v8150_v16 = vpop.xlane.xlu0 %1179 }
 0x982   :  { %11194 = vst [vmem:[#allocation67_spill] sm:$0xff] %v8150_v16  ;;  %2850 = vrot.lane.b32.xlu1 %v2755_v3, %s7077_s11  ;;  %2844 = vrot.lane.b32.xlu0 %v2752_v63, %s7077_s11 }
 0x985   :  { %v8156_v22 = vpop.xlane.xlu0 %1185 }
 0x986   :  { %11195 = vst [vmem:[#allocation68_spill] sm:$0xff] %v8156_v22  ;;  %2848 = vrot.lane.b32.xlu0 %v2754_v31, %s7077_s11 }
 0x989   :  { %v8161_v30 = vpop.xlane.xlu0 %1188 }
 0x98a   :  { %11197 = vst [vmem:[#allocation70_spill] sm:$0xff] %v8161_v30  ;;  %v8163_v11 = vpop.xlane.xlu1 %1182 }
 0x98d   :  { %v8165_v15 = vpop.xlane.xlu0 %1191 }
 0x98e   :  { %11198 = vst [vmem:[#allocation71_spill] sm:$0xff] %v8165_v15  ;;  %v8167_v16 = vpop.xlane.xlu1 %1194  ;;  %v1161_v15 = vmul.f32 %v7773_v0, %v7894_v25  ;;  %v1164_v25 = vmul.f32 %v7773_v0, %v7888_v19 }
 0x98f   :  { %11199 = vst [vmem:[#allocation72_spill] sm:$0xff] %v8167_v16 }
 0x991   :  { %v8169_v3 = vpop.xlane.xlu0 %1197 }
 0x992   :  { %11200 = vst [vmem:[#allocation73_spill] sm:$0xff] %v8169_v3  ;;  %v8171_v63 = vpop.xlane.xlu1 %1200 }
 0x993   :  { %11201 = vst [vmem:[#allocation74_spill] sm:$0xff] %v8171_v63  ;;  %v1162_v63 = vmul.f32 %v7773_v0, %v7883_v5 }
 0x995   :  { %v8173_v18 = vpop.xlane.xlu0 %1203 }
 0x996   :  { %v8175_v32 = vpop.xlane.xlu1 %1206 }
 0x997   :  { %11202 = vst [vmem:[#allocation75_spill] sm:$0xff] %v8175_v32  ;;  %v1226_v32 = vsel %vm1177_vm7, %v1161_v15, 0.0  ;;  %v1235_v15 = vsel %vm1177_vm7, %v1164_v25, 0.0 }
 0x999   :  { %v8177_v22 = vpop.xlane.xlu0 %1209 }
 0x99a   :  { %11203 = vst [vmem:[#allocation76_spill] sm:$0xff] %v8177_v22  ;;  %v8179_v27 = vpop.xlane.xlu1 %1212  ;;  %v1163_v22 = vmul.f32 %v7773_v0, %v7906_v43  ;;  %v1166_v43 = vmul.f32 %v7773_v0, %v7912_v48 }
 0x99b   :  { %11204 = vst [vmem:[#allocation77_spill] sm:$0xff] %v8179_v27 }
 0x99c   :  { %v1232_v5 = vsel %vm1177_vm7, %v1163_v22, 0.0  ;;  %v1241_v22 = vsel %vm1177_vm7, %v1166_v43, 0.0 }
 0x99d   :  { %v8181_v31 = vpop.xlane.xlu0 %1215 }
 0x99e   :  { %11205 = vst [vmem:[#allocation78_spill] sm:$0xff] %v8181_v31  ;;  %v8183_v30 = vpop.xlane.xlu1 %1218 }
 0x99f   :  { %11206 = vst [vmem:[#allocation79_spill] sm:$0xff] %v8183_v30  ;;  %v1229_v30 = vsel %vm1177_vm7, %v1162_v63, 0.0 }
 0x9a1   :  { %v8187_v16 = vpop.xlane.xlu0 %1221 }
 0x9a2   :  { %v8191_v3 = vpop.xlane.xlu1 %1224 }
 0x9a3   :  { %11207 = vst [vmem:[#allocation80_spill] sm:$0xff] %v8191_v3  ;;  %v1165_v3 = vmul.f32 %v7773_v0, %v7927_v12  ;;  %v1168_v12 = vmul.f32 %v7773_v0, %v7929_v28  ;;  %v1171_v28 = vmul.f32 %v7773_v0, %v7990_v44  ;;  %v1174_v44 = vmul.f32 %v7773_v0, %v8022_v23 }
 0x9a5   :  { %1227 = vadd.xlane.f32.xlu0 %v1226_v32  ;;  %v8196_v27 = vpop.permute.xlu0 %1684  ;;  %v1238_v19 = vsel %vm1177_vm7, %v1165_v3, 0.0  ;;  %v1247_v3 = vsel %vm1177_vm7, %v1168_v12, 0.0  ;;  %v1256_v12 = vsel %vm1177_vm7, %v1171_v28, 0.0 }
 0x9a6   :  { %v8201_v31 = vpop.permute.xlu1 %1686  ;;  %1230 = vadd.xlane.f32.xlu1 %v1229_v30  ;;  %v1167_v30 = vmul.f32 %v7773_v0, %v7944_v61  ;;  %v1170_v61 = vmul.f32 %v7773_v0, %v7940_v6  ;;  %v1173_v6 = vmul.f32 %v7773_v0, %v8037_v34  ;;  %v1176_v34 = vmul.f32 %v7773_v0, %v8058_v24 }
 0x9a7   :  { %v1754_v24 = vsel %vm1177_vm7, %v7805_v57, 0.0  ;;  %v1766_v57 = vsel %vm1177_vm7, %v7825_v37, 0.0  ;;  %v2317_v37 = vsel %vm1177_vm7, %v7853_v42, 0.0  ;;  %v1778_v42 = vsel %vm1177_vm7, %v7876_v62, 0.0 }
 0x9a8   :  { %v1244_v48 = vsel %vm1177_vm7, %v1167_v30, 0.0  ;;  %v1271_v23 = vsel %vm1177_vm7, %v1176_v34, 0.0  ;;  %v2884_v62 = vsel %vm1177_vm7, %v7917_v13, 0.0  ;;  %v1784_v13 = vsel %vm1177_vm7, %v7959_v9, 0.0 }
 0x9a9   :  { %1233 = vadd.xlane.f32.xlu0 %v1232_v5  ;;  %v8209_v32 = vpop.permute.xlu0 %1688  ;;  %v1169_v5 = vmul.f32 %v7773_v0, %v7955_v7  ;;  %v1172_v7 = vmul.f32 %v7773_v0, %v7978_v54  ;;  %v1262_v54 = vsel %vm1177_vm7, %v1173_v6, 0.0  ;;  %v2896_v9 = vsel %vm1177_vm7, %v7992_v39, 0.0 }
 0x9aa   :  { %1236 = vadd.xlane.f32.xlu1 %v1235_v15  ;;  %v8211_v63 = vpop.permute.xlu1 %1690  ;;  %v2341_v39 = vsel %vm1177_vm7, %v8026_v10, 0.0  ;;  %v2347_v10 = vsel %vm1177_vm7, %v8060_v50, 0.0  ;;  %v11210_v50 = vld [vmem:[#allocation57_spill] sm:$0xff] }
 0x9ab   :  { %v1250_v43 = vsel %vm1177_vm7, %v1169_v5, 0.0 }
 0x9ad   :  { %1239 = vadd.xlane.f32.xlu0 %v1238_v19  ;;  %v8219_v25 = vpop.permute.xlu0 %1692  ;;  %v1253_v19 = vsel %vm1177_vm7, %v1170_v61, 0.0 }
 0x9ae   :  { %1242 = vadd.xlane.f32.xlu1 %v1241_v22  ;;  %v8224_v15 = vpop.permute.xlu1 %1694 }
 0x9b1   :  { %1245 = vadd.xlane.f32.xlu0 %v1244_v48  ;;  %v8235_v30 = vpop.permute.xlu0 %1696  ;;  %v1259_v48 = vsel %vm1177_vm7, %v1172_v7, 0.0 }
 0x9b2   :  { %1248 = vadd.xlane.f32.xlu1 %v1247_v3  ;;  %v8237_v22 = vpop.permute.xlu1 %1698  ;;  %v1175_v3 = vmul.f32 %v7773_v0, %v8070_v60  ;;  %v1748_v60 = vsel %vm1177_vm7, %v7797_v58, 0.0  ;;  %v1760_v58 = vsel %vm1177_vm7, %v7815_v29, 0.0  ;;  %v1772_v29 = vsel %vm1177_vm7, %v7835_v40, 0.0 }
 0x9b3   :  { %v2323_v40 = vsel %vm1177_vm7, %v7863_v33, 0.0  ;;  %v2329_v33 = vsel %vm1177_vm7, %v7892_v20, 0.0  ;;  %v2890_v20 = vsel %vm1177_vm7, %v7934_v36, 0.0  ;;  %v2335_v36 = vsel %vm1177_vm7, %v7972_v51, 0.0 }
 0x9b4   :  { %v1268_v28 = vsel %vm1177_vm7, %v1175_v3, 0.0  ;;  %v1790_v51 = vsel %vm1177_vm7, %v8007_v49, 0.0  ;;  %v2902_v49 = vsel %vm1177_vm7, %v8043_v14, 0.0  ;;  %v11208_v14 = vld [vmem:[#allocation56_spill] sm:$0xff] }
 0x9b5   :  { %1251 = vadd.xlane.f32.xlu0 %v1250_v43  ;;  %v8245_v5 = vpop.permute.xlu0 %1700  ;;  %v1265_v43 = vsel %vm1177_vm7, %v1174_v44, 0.0 }
 0x9b6   :  { %1254 = vadd.xlane.f32.xlu1 %v1253_v19  ;;  %v8250_v61 = vpop.permute.xlu1 %1702 }
 0x9b9   :  { %1257 = vadd.xlane.f32.xlu0 %v1256_v12  ;;  %v8257_v19 = vpop.permute.xlu0 %2253  ;;  %v1751_v12 = vsel %vm1177_vm7, %v7820_v8, 0.0  ;;  %v1763_v8 = vsel %vm1177_vm7, %v7840_v4, 0.0  ;;  %v1775_v4 = vsel %vm1177_vm7, %v7856_v1, 0.0  ;;  %v2326_v1 = vsel %vm1177_vm7, %v7881_v59, 0.0 }
 0x9ba   :  { %1260 = vadd.xlane.f32.xlu1 %v1259_v48  ;;  %v8259_v7 = vpop.permute.xlu1 %2255  ;;  %v1757_v48 = vsel %vm1177_vm7, %v7830_v35, 0.0  ;;  %v1769_v35 = vsel %vm1177_vm7, %v7848_v47, 0.0  ;;  %v2320_v47 = vsel %vm1177_vm7, %v7868_v41, 0.0  ;;  %v1781_v41 = vsel %vm1177_vm7, %v7902_v38, 0.0 }
 0x9bb   :  { %v2332_v59 = vsel %vm1177_vm7, %v7921_v55, 0.0  ;;  %v2887_v38 = vsel %vm1177_vm7, %v7946_v17, 0.0  ;;  %v2893_v55 = vsel %vm1177_vm7, %v7963_v45, 0.0  ;;  %v1787_v17 = vsel %vm1177_vm7, %v7980_v2, 0.0 }
 0x9bc   :  { %v2338_v45 = vsel %vm1177_vm7, %v7996_v52, 0.0  ;;  %v2899_v2 = vsel %vm1177_vm7, %v8014_v53, 0.0  ;;  %v1793_v52 = vsel %vm1177_vm7, %v8030_v46, 0.0  ;;  %v2344_v53 = vsel %vm1177_vm7, %v8050_v21, 0.0 }
 0x9bd   :  { %1263 = vadd.xlane.f32.xlu0 %v1262_v54  ;;  %v8265_v0 = vpop.permute.xlu0 %2257  ;;  %v2905_v46 = vsel %vm1177_vm7, %v8064_v26, 0.0  ;;  %v2350_v21 = vsel %vm1177_vm7, %v8080_v56, 0.0  ;;  %v11211_v56 = vld [vmem:[#allocation60_spill] sm:$0xff] }
 0x9be   :  { %1266 = vadd.xlane.f32.xlu1 %v1265_v43  ;;  %v8269_v6 = vpop.permute.xlu1 %2259 }
 0x9c1   :  { %1269 = vadd.xlane.f32.xlu0 %v1268_v28  ;;  %v8277_v44 = vpop.permute.xlu0 %1704 }
 0x9c2   :  { %1272 = vadd.xlane.f32.xlu1 %v1271_v23  ;;  %v8279_v54 = vpop.permute.xlu1 %1706 }
 0x9c5   :  { %1749 = vadd.xlane.f32.xlu0 %v1748_v60  ;;  %v8285_v3 = vpop.permute.xlu0 %2261 }
 0x9c6   :  { %1752 = vadd.xlane.f32.xlu1 %v1751_v12  ;;  %v8289_v43 = vpop.permute.xlu1 %2263 }
 0x9c9   :  { %1755 = vadd.xlane.f32.xlu0 %v1754_v24  ;;  %v8297_v34 = vpop.permute.xlu0 %2820 }
 0x9ca   :  { %1758 = vadd.xlane.f32.xlu1 %v1757_v48  ;;  %v8299_v28 = vpop.permute.xlu1 %2822 }
 0x9cd   :  { %1761 = vadd.xlane.f32.xlu0 %v1760_v58  ;;  %v8305_v23 = vpop.permute.xlu0 %2824 }
 0x9ce   :  { %1764 = vadd.xlane.f32.xlu1 %v1763_v8  ;;  %v8309_v60 = vpop.permute.xlu1 %2826 }
 0x9d1   :  { %1767 = vadd.xlane.f32.xlu0 %v1766_v57  ;;  %v8317_v12 = vpop.permute.xlu0 %1708 }
 0x9d2   :  { %1770 = vadd.xlane.f32.xlu1 %v1769_v35  ;;  %v8319_v24 = vpop.permute.xlu1 %1710 }
 0x9d5   :  { %1773 = vadd.xlane.f32.xlu0 %v1772_v29  ;;  %v8325_v48 = vpop.permute.xlu0 %2265 }
 0x9d6   :  { %1776 = vadd.xlane.f32.xlu1 %v1775_v4  ;;  %v8329_v58 = vpop.permute.xlu1 %2267 }
 0x9d9   :  { %2318 = vadd.xlane.f32.xlu0 %v2317_v37  ;;  %v8337_v8 = vpop.permute.xlu0 %2828 }
 0x9da   :  { %2321 = vadd.xlane.f32.xlu1 %v2320_v47  ;;  %v8339_v57 = vpop.permute.xlu1 %2830 }
 0x9dd   :  { %2324 = vadd.xlane.f32.xlu0 %v2323_v40  ;;  %v8345_v35 = vpop.permute.xlu0 %1712 }
 0x9de   :  { %2327 = vadd.xlane.f32.xlu1 %v2326_v1  ;;  %v8349_v29 = vpop.permute.xlu1 %1714 }
 0x9e1   :  { %1779 = vadd.xlane.f32.xlu0 %v1778_v42  ;;  %v8357_v4 = vpop.permute.xlu0 %2269 }
 0x9e2   :  { %1782 = vadd.xlane.f32.xlu1 %v1781_v41  ;;  %v8359_v37 = vpop.permute.xlu1 %2271  ;;  %v2908_v41 = vsel %vm1177_vm7, %v11208_v14, 0.0 }
 0x9e5   :  { %2330 = vadd.xlane.f32.xlu0 %v2329_v33  ;;  %v8365_v47 = vpop.permute.xlu0 %2832  ;;  %v11209_v33 = vld [vmem:[#allocation58_spill] sm:$0xff] }
 0x9e6   :  { %2333 = vadd.xlane.f32.xlu1 %v2332_v59  ;;  %v8369_v40 = vpop.permute.xlu1 %2834  ;;  %v2911_v26 = vsel %vm1177_vm7, %v11209_v33, 0.0 }
 0x9e9   :  { %2885 = vadd.xlane.f32.xlu0 %v2884_v62  ;;  %v8377_v1 = vpop.permute.xlu0 %2273  ;;  %v2353_v62 = vsel %vm1177_vm7, %v11210_v50, 0.0 }
 0x9ea   :  { %2888 = vadd.xlane.f32.xlu1 %v2887_v38  ;;  %v8379_v42 = vpop.permute.xlu1 %2275 }
 0x9ed   :  { %2891 = vadd.xlane.f32.xlu0 %v2890_v20  ;;  %v8385_v59 = vpop.permute.xlu0 %2836  ;;  %v2356_v20 = vsel %vm1177_vm7, %v11211_v56, 0.0 }
 0x9ee   :  { %2894 = vadd.xlane.f32.xlu1 %v2893_v55  ;;  %v8389_v38 = vpop.permute.xlu1 %2838  ;;  %v11212_v55 = vld [vmem:[#allocation59_spill] sm:$0xff] }
 0x9f1   :  { %1785 = vadd.xlane.f32.xlu0 %v1784_v13  ;;  %v2914_v13 = vsel %vm1177_vm7, %v11212_v55, 0.0  ;;  %v1799_v55 = vsel %vm1177_vm7, %v8201_v31, 0.0  ;;  %v1811_v31 = vsel %vm1177_vm7, %v8224_v15, 0.0 }
 0x9f2   :  { %1788 = vadd.xlane.f32.xlu1 %v1787_v17  ;;  %v11213_v17 = vld [vmem:[#allocation62_spill] sm:$0xff] }
 0x9f5   :  { %2336 = vadd.xlane.f32.xlu0 %v2335_v36  ;;  %v2917_v36 = vsel %vm1177_vm7, %v11213_v17, 0.0  ;;  %v1802_v17 = vsel %vm1177_vm7, %v8209_v32, 0.0 }
 0x9f6   :  { %2339 = vadd.xlane.f32.xlu1 %v2338_v45  ;;  %v8397_v45 = vpop.permute.xlu0 %2277 }
 0x9f9   :  { %2897 = vadd.xlane.f32.xlu0 %v2896_v9  ;;  %v8399_v9 = vpop.permute.xlu1 %2279 }
 0x9fa   :  { %2900 = vadd.xlane.f32.xlu1 %v2899_v2  ;;  %v11214_v2 = vld [vmem:[#allocation61_spill] sm:$0xff] }
 0x9fd   :  { %1791 = vadd.xlane.f32.xlu0 %v1790_v51  ;;  %v2359_v51 = vsel %vm1177_vm7, %v11214_v2, 0.0  ;;  %v1805_v2 = vsel %vm1177_vm7, %v8211_v63, 0.0 }
 0x9fe   :  { %1794 = vadd.xlane.f32.xlu1 %v1793_v52  ;;  %v11215_v52 = vld [vmem:[#allocation64_spill] sm:$0xff] }
 0xa01   :  { %2342 = vadd.xlane.f32.xlu0 %v2341_v39  ;;  %v2362_v39 = vsel %vm1177_vm7, %v11215_v52, 0.0 }
 0xa02   :  { %2345 = vadd.xlane.f32.xlu1 %v2344_v53  ;;  %v8405_v53 = vpop.permute.xlu0 %2840 }
 0xa05   :  { %2903 = vadd.xlane.f32.xlu0 %v2902_v49  ;;  %v11216_v49 = vld [vmem:[#allocation63_spill] sm:$0xff] }
 0xa06   :  { %2906 = vadd.xlane.f32.xlu1 %v2905_v46  ;;  %v2920_v46 = vsel %vm1177_vm7, %v11216_v49, 0.0  ;;  %v1814_v49 = vsel %vm1177_vm7, %v8235_v30, 0.0  ;;  %v1820_v30 = vsel %vm1177_vm7, %v8245_v5, 0.0  ;;  %v2368_v5 = vsel %vm1177_vm7, %v8259_v7, 0.0 }
 0xa09   :  { %2348 = vadd.xlane.f32.xlu0 %v2347_v10  ;;  %v8409_v10 = vpop.permute.xlu1 %2842 }
 0xa0a   :  { %2351 = vadd.xlane.f32.xlu1 %v2350_v21  ;;  %v11217_v21 = vld [vmem:[#allocation66_spill] sm:$0xff] }
 0xa0b   :  { %v2923_v14 = vsel %vm1177_vm7, %v11217_v21, 0.0 }
 0xa0d   :  { %2909 = vadd.xlane.f32.xlu0 %v2908_v41  ;;  %v11218_v41 = vld [vmem:[#allocation65_spill] sm:$0xff]  ;;  %v8419_v56 = vpop.permute.xlu1 %2283 }
 0xa0e   :  { %2912 = vadd.xlane.f32.xlu1 %v2911_v26  ;;  %v2926_v33 = vsel %vm1177_vm7, %v11218_v41, 0.0  ;;  %v11219_v26 = vld [vmem:[#allocation69_spill] sm:$0xff] }
 0xa0f   :  { %v2929_v50 = vsel %vm1177_vm7, %v11219_v26, 0.0  ;;  %v1823_v26 = vsel %vm1177_vm7, %v8250_v61, 0.0 }
 0xa11   :  { %2354 = vadd.xlane.f32.xlu0 %v2353_v62  ;;  %v8417_v62 = vpop.permute.xlu0 %2281 }
 0xa12   :  { %2357 = vadd.xlane.f32.xlu1 %v2356_v20  ;;  %v1796_v20 = vsel %vm1177_vm7, %v8196_v27, 0.0  ;;  %v1808_v27 = vsel %vm1177_vm7, %v8219_v25, 0.0  ;;  %v1817_v25 = vsel %vm1177_vm7, %v8237_v22, 0.0 }
 0xa15   :  { %2915 = vadd.xlane.f32.xlu0 %v2914_v13  ;;  %v8425_v13 = vpop.permute.xlu0 %2844 }
 0xa16   :  { %2918 = vadd.xlane.f32.xlu1 %v2917_v36  ;;  %v8429_v36 = vpop.permute.xlu1 %2846 }
 0xa19   :  { %2360 = vadd.xlane.f32.xlu0 %v2359_v51  ;;  %v11220_v51 = vld [vmem:[#allocation10_spill] sm:$0xff] }
 0xa1a   :  { %2363 = vadd.xlane.f32.xlu1 %v2362_v39  ;;  %v1310_v52 = vadd.s32 4294967288, %v11220_v51  ;;  %v8438_v39 = vpop.permute.xlu0 %2848  ;;  %v8440_v32 = vpop.permute.xlu1 %2850 }
 0xa1d   :  { %2921 = vadd.xlane.f32.xlu0 %v2920_v46  ;;  %v11221_v46 = vld [vmem:[#allocation9_spill] sm:$0xff] }
 0xa1e   :  { %2924 = vadd.xlane.f32.xlu1 %v2923_v14  ;;  %v8446_v63 = vsub.s32 %v11220_v51, %v11221_v46  ;;  %v8451_v15 = vsub.s32 %v1310_v52, %v11221_v46  ;;  %v2371_v46 = vsel %vm1177_vm7, %v8265_v0, 0.0  ;;  %v1829_v0 = vsel %vm1177_vm7, %v8279_v54, 0.0 }
 0xa20   :  { %11222 = vst [vmem:[#allocation56_spill] sm:$0xff] %v8446_v63  ;;  %11223 = vst [vmem:[#allocation58_spill] sm:$0xff] %v8451_v15 }
 0xa21   :  { %2927 = vadd.xlane.f32.xlu0 %v2926_v33 }
 0xa22   :  { %2930 = vadd.xlane.f32.xlu1 %v2929_v50 }
 0xa25   :  { %1797 = vadd.xlane.f32.xlu0 %v1796_v20 }
 0xa26   :  { %1800 = vadd.xlane.f32.xlu1 %v1799_v55 }
 0xa29   :  { %1803 = vadd.xlane.f32.xlu0 %v1802_v17 }
 0xa2a   :  { %1806 = vadd.xlane.f32.xlu1 %v1805_v2  ;;  %v2365_v2 = vsel %vm1177_vm7, %v8257_v19, 0.0  ;;  %v2374_v19 = vsel %vm1177_vm7, %v8269_v6, 0.0 }
 0xa2d   :  { %1809 = vadd.xlane.f32.xlu0 %v1808_v27 }
 0xa2e   :  { %1812 = vadd.xlane.f32.xlu1 %v1811_v31 }
 0xa31   :  { %1815 = vadd.xlane.f32.xlu0 %v1814_v49 }
 0xa32   :  { %1818 = vadd.xlane.f32.xlu1 %v1817_v25  ;;  %v1228_v21 = vpop.xlane.xlu0 %1227 }
 0xa33   :  { %v1383_v14 = vrot.slane %v1228_v21, %v8446_v63  ;;  %v1231_v41 = vpop.xlane.xlu1 %1230 }
 0xa34   :  { %v1387_v33 = vrot.slane %v1231_v41, %v8451_v15 }
 0xa35   :  { %1821 = vadd.xlane.f32.xlu0 %v1820_v30  ;;  %v1826_v30 = vsel %vm1177_vm7, %v8277_v44, 0.0  ;;  %v2380_v44 = vsel %vm1177_vm7, %v8289_v43, 0.0 }
 0xa36   :  { %v1388_v22 = vsel %vm1315_vm8, %v1387_v33, %v1383_v14  ;;  %1824 = vadd.xlane.f32.xlu1 %v1823_v26  ;;  %v1234_v50 = vpop.xlane.xlu0 %1233 }
 0xa37   :  { %v1392_v20 = vrot.slane %v1234_v50, %v8446_v63  ;;  %v1237_v55 = vpop.xlane.xlu1 %1236 }
 0xa38   :  { %v1396_v17 = vrot.slane %v1237_v55, %v8451_v15 }
 0xa39   :  { %2366 = vadd.xlane.f32.xlu0 %v2365_v2 }
 0xa3a   :  { %v1397_v27 = vsel %vm1315_vm8, %v1396_v17, %v1392_v20  ;;  %2369 = vadd.xlane.f32.xlu1 %v2368_v5  ;;  %v1240_v61 = vpop.xlane.xlu0 %1239  ;;  %v2377_v17 = vsel %vm1177_vm7, %v8285_v3, 0.0  ;;  %v2935_v3 = vsel %vm1177_vm7, %v8299_v28, 0.0 }
 0xa3b   :  { %v1466_v31 = vsel %vm1452_vm10, %v1397_v27, %v1388_v22  ;;  %v1401_v51 = vrot.slane %v1240_v61, %v8446_v63  ;;  %v1243_v52 = vpop.xlane.xlu1 %1242 }
 0xa3c   :  { %v1405_v49 = vrot.slane %v1243_v52, %v8451_v15 }
 0xa3d   :  { %2372 = vadd.xlane.f32.xlu0 %v2371_v46 }
 0xa3e   :  { %v1406_v7 = vsel %vm1315_vm8, %v1405_v49, %v1401_v51  ;;  %2375 = vadd.xlane.f32.xlu1 %v2374_v19  ;;  %v1246_v25 = vpop.xlane.xlu0 %1245  ;;  %v2932_v51 = vsel %vm1177_vm7, %v8297_v34, 0.0  ;;  %v2941_v34 = vsel %vm1177_vm7, %v8309_v60, 0.0 }
 0xa3f   :  { %v1467_v21 = vsel %vm1454_vm11, %v1406_v7, %v1466_v31  ;;  %v1410_v14 = vrot.slane %v1246_v25, %v8446_v63  ;;  %v1249_v41 = vpop.xlane.xlu1 %1248  ;;  %v2938_v25 = vsel %vm1177_vm7, %v8305_v23, 0.0  ;;  %v1835_v23 = vsel %vm1177_vm7, %v8319_v24, 0.0 }
 0xa40   :  { %v1414_v33 = vrot.slane %v1249_v41, %v8451_v15 }
 0xa41   :  { %1827 = vadd.xlane.f32.xlu0 %v1826_v30 }
 0xa42   :  { %v1415_v6 = vsel %vm1315_vm8, %v1414_v33, %v1410_v14  ;;  %1830 = vadd.xlane.f32.xlu1 %v1829_v0  ;;  %v1252_v26 = vpop.xlane.xlu0 %1251  ;;  %v1832_v0 = vsel %vm1177_vm7, %v8317_v12, 0.0  ;;  %v2386_v12 = vsel %vm1177_vm7, %v8329_v58, 0.0  ;;  %v1838_v58 = vsel %vm1177_vm7, %v8345_v35, 0.0 }
 0xa43   :  { %v1468_v22 = vsel %vm1456_vm12, %v1415_v6, %v1467_v21  ;;  %v1419_v50 = vrot.slane %v1252_v26, %v8446_v63  ;;  %v1255_v20 = vpop.xlane.xlu1 %1254 }
 0xa44   :  { %v1423_v55 = vrot.slane %v1255_v20, %v8451_v15 }
 0xa45   :  { %2378 = vadd.xlane.f32.xlu0 %v2377_v17  ;;  %v2947_v17 = vsel %vm1177_vm7, %v8339_v57, 0.0  ;;  %v2389_v57 = vsel %vm1177_vm7, %v8357_v4, 0.0 }
 0xa46   :  { %v1424_v54 = vsel %vm1315_vm8, %v1423_v55, %v1419_v50  ;;  %2381 = vadd.xlane.f32.xlu1 %v2380_v44  ;;  %v1258_v2 = vpop.xlane.xlu0 %1257  ;;  %v2383_v50 = vsel %vm1177_vm7, %v8325_v48, 0.0  ;;  %v2944_v55 = vsel %vm1177_vm7, %v8337_v8, 0.0 }
 0xa47   :  { %v1469_v5 = vsel %vm1458_vm14, %v1424_v54, %v1468_v22  ;;  %v1428_v27 = vrot.slane %v1258_v2, %v8446_v63  ;;  %v1261_v61 = vpop.xlane.xlu1 %1260  ;;  %v1841_v54 = vsel %vm1177_vm7, %v8349_v29, 0.0  ;;  %v2950_v29 = vsel %vm1177_vm7, %v8365_v47, 0.0 }
 0xa48   :  { %v1432_v31 = vrot.slane %v1261_v61, %v8451_v15  ;;  %v2953_v61 = vsel %vm1177_vm7, %v8369_v40, 0.0  ;;  %v2956_v40 = vsel %vm1177_vm7, %v8385_v59, 0.0 }
 0xa49   :  { %2933 = vadd.xlane.f32.xlu0 %v2932_v51  ;;  %v2398_v51 = vsel %vm1177_vm7, %v8379_v42, 0.0  ;;  %v2401_v42 = vsel %vm1177_vm7, %v8397_v45, 0.0 }
 0xa4a   :  { %v1433_v43 = vsel %vm1315_vm8, %v1432_v31, %v1428_v27  ;;  %2936 = vadd.xlane.f32.xlu1 %v2935_v3  ;;  %v1264_v52 = vpop.xlane.xlu0 %1263 }
 0xa4b   :  { %v1437_v49 = vrot.slane %v1264_v52, %v8446_v63  ;;  %v1267_v46 = vpop.xlane.xlu1 %1266  ;;  %v1470_v19 = vsel %vm1460_vm15, %v1433_v43, %v1469_v5  ;;  %v2392_v5 = vsel %vm1177_vm7, %v8359_v37, 0.0  ;;  %v2395_v37 = vsel %vm1177_vm7, %v8377_v1, 0.0 }
 0xa4c   :  { %v1441_v7 = vrot.slane %v1267_v46, %v8451_v15  ;;  %v2959_v43 = vsel %vm1177_vm7, %v8389_v38, 0.0  ;;  %v2962_v38 = vsel %vm1177_vm7, %v8405_v53, 0.0 }
 0xa4d   :  { %2939 = vadd.xlane.f32.xlu0 %v2938_v25  ;;  %v2410_v25 = vsel %vm1177_vm7, %v8419_v56, 0.0  ;;  %v2974_v56 = vsel %vm1177_vm7, %v8438_v39, 0.0 }
 0xa4e   :  { %v1442_v28 = vsel %vm1315_vm8, %v1441_v7, %v1437_v49  ;;  %2942 = vadd.xlane.f32.xlu1 %v2941_v34  ;;  %v1270_v21 = vpop.xlane.xlu0 %1269  ;;  %v2404_v49 = vsel %vm1177_vm7, %v8399_v9, 0.0  ;;  %v2407_v9 = vsel %vm1177_vm7, %v8417_v62, 0.0 }
 0xa4f   :  { %v1446_v14 = vrot.slane %v1270_v21, %v8446_v63  ;;  %v1273_v41 = vpop.xlane.xlu1 %1272  ;;  %v1471_v33 = vsel %vm11126_vm1, %v1442_v28, %v1470_v19  ;;  %v2965_v19 = vsel %vm1177_vm7, %v8409_v10, 0.0  ;;  %v2968_v10 = vsel %vm1177_vm7, %v8425_v13, 0.0 }
 0xa50   :  { %v1450_v30 = vrot.slane %v1273_v41, %v8451_v15  ;;  %v2971_v28 = vsel %vm1177_vm7, %v8429_v36, 0.0 }
 0xa51   :  { %1833 = vadd.xlane.f32.xlu0 %v1832_v0 }
 0xa52   :  { %1836 = vadd.xlane.f32.xlu1 %v1835_v23  ;;  %v8514_v60 = vpop.xlane.xlu0 %1749  ;;  %v1451_v6 = vsel %vm1315_vm8, %v1450_v30, %v1446_v14  ;;  %v2977_v14 = vsel %vm1177_vm7, %v8440_v32, 0.0 }
 0xa53   :  { %v8517_v26 = vpop.xlane.xlu1 %1752  ;;  %v8520_v22 = vsel %vm11125_vm3, %v1451_v6, %v1471_v33 }
 0xa54   :  { %11224 = vst [vmem:[#allocation57_spill] sm:$0xff] %v8520_v22 }
 0xa55   :  { %2384 = vadd.xlane.f32.xlu0 %v2383_v50 }
 0xa56   :  { %2387 = vadd.xlane.f32.xlu1 %v2386_v12  ;;  %v8526_v24 = vpop.xlane.xlu0 %1755 }
 0xa57   :  { %v8528_v20 = vpop.xlane.xlu1 %1758 }
 0xa59   :  { %2945 = vadd.xlane.f32.xlu0 %v2944_v55 }
 0xa5a   :  { %2948 = vadd.xlane.f32.xlu1 %v2947_v17  ;;  %v8534_v44 = vpop.xlane.xlu0 %1761 }
 0xa5b   :  { %v8536_v48 = vpop.xlane.xlu1 %1764 }
 0xa5d   :  { %1839 = vadd.xlane.f32.xlu0 %v1838_v58 }
 0xa5e   :  { %1842 = vadd.xlane.f32.xlu1 %v1841_v54  ;;  %v8542_v2 = vpop.xlane.xlu0 %1767 }
 0xa5f   :  { %v8544_v8 = vpop.xlane.xlu1 %1770 }
 0xa61   :  { %2390 = vadd.xlane.f32.xlu0 %v2389_v57 }
 0xa62   :  { %2393 = vadd.xlane.f32.xlu1 %v2392_v5  ;;  %v8550_v27 = vpop.xlane.xlu0 %1773 }
 0xa63   :  { %v8552_v35 = vpop.xlane.xlu1 %1776 }
 0xa65   :  { %2951 = vadd.xlane.f32.xlu0 %v2950_v29 }
 0xa66   :  { %2954 = vadd.xlane.f32.xlu1 %v2953_v61  ;;  %v8558_v31 = vpop.xlane.xlu0 %2318 }
 0xa67   :  { %v8560_v4 = vpop.xlane.xlu1 %2321 }
 0xa69   :  { %2396 = vadd.xlane.f32.xlu0 %v2395_v37  ;;  %v6993_v37 = vld [vmem:[%s11055_s4] sm:$0xff] }
 0xa6a   :  { %2399 = vadd.xlane.f32.xlu1 %v2398_v51  ;;  %v8566_v3 = vpop.xlane.xlu0 %2324 }
 0xa6b   :  { %v8568_v47 = vpop.xlane.xlu1 %2327 }
 0xa6d   :  { %2957 = vadd.xlane.f32.xlu0 %v2956_v40  ;;  %v309_v40 = vsel %vm7311_vm2, 1.0, %v6993_v37  ;;  %vm3311_vm2 = vcmask 195584  }
 0xa6e   :  { %2960 = vadd.xlane.f32.xlu1 %v2959_v43  ;;  %v8574_v52 = vpop.xlane.xlu0 %1779 }
 0xa6f   :  { %v8576_v1 = vpop.xlane.xlu1 %1782 }
 0xa71   :  { %2402 = vadd.xlane.f32.xlu0 %v2401_v42 }
 0xa72   :  { %2405 = vadd.xlane.f32.xlu1 %v2404_v49  ;;  %v8582_v46 = vpop.xlane.xlu0 %2330 }
 0xa73   :  { %v8584_v59 = vpop.xlane.xlu1 %2333 }
 0xa75   :  { %2963 = vadd.xlane.f32.xlu0 %v2962_v38 }
 0xa76   :  { %2966 = vadd.xlane.f32.xlu1 %v2965_v19  ;;  %v8590_v7 = vpop.xlane.xlu0 %2885  ;;  %v8666_v19 = vsel %vm92_vm4, 1.0, %v309_v40 }
 0xa77   :  { %v8592_v45 = vpop.xlane.xlu1 %2888  ;;  %11232 = vst [vmem:[#allocation64_spill] sm:$0xff] %v8666_v19 }
 0xa79   :  { %2408 = vadd.xlane.f32.xlu0 %v2407_v9 }
 0xa7a   :  { %2411 = vadd.xlane.f32.xlu1 %v2410_v25  ;;  %v8598_v34 = vpop.xlane.xlu0 %2891 }
 0xa7b   :  { %v8600_v53 = vpop.xlane.xlu1 %2894 }
 0xa7d   :  { %2969 = vadd.xlane.f32.xlu0 %v2968_v10  ;;  %v310_v10 = vsel %vm7326_vm9, 1.0, %v6993_v37  ;;  %vm3332_vm9 = vcmask 261120  }
 0xa7e   :  { %2972 = vadd.xlane.f32.xlu1 %v2971_v28  ;;  %v8606_v21 = vpop.xlane.xlu0 %1785 }
 0xa7f   :  { %v8608_v62 = vpop.xlane.xlu1 %1788 }
 0xa81   :  { %2975 = vadd.xlane.f32.xlu0 %v2974_v56 }
 0xa82   :  { %2978 = vadd.xlane.f32.xlu1 %v2977_v14  ;;  %v8614_v41 = vpop.xlane.xlu0 %2336  ;;  %v8678_v14 = vsel %vm93_vm6, 1.0, %v310_v10 }
 0xa83   :  { %v8616_v13 = vpop.xlane.xlu1 %2339  ;;  %11237 = vst [vmem:[#allocation65_spill] sm:$0xff] %v8678_v14 }
 0xa86   :  { %v8618_v33 = vpop.xlane.xlu0 %2897 }
 0xa87   :  { %v8620_v36 = vpop.xlane.xlu1 %2900 }
 0xa8a   :  { %v8622_v30 = vpop.xlane.xlu0 %1791 }
 0xa8b   :  { %v8624_v0 = vpop.xlane.xlu1 %1794 }
 0xa8e   :  { %v8626_v23 = vpop.xlane.xlu0 %2342 }
 0xa8f   :  { %v8628_v39 = vpop.xlane.xlu1 %2345 }
 0xa92   :  { %v8630_v6 = vpop.xlane.xlu0 %2903 }
 0xa93   :  { %v8632_v32 = vpop.xlane.xlu1 %2906 }
 0xa96   :  { %v8634_v50 = vpop.xlane.xlu0 %2348 }
 0xa97   :  { %v8636_v12 = vpop.xlane.xlu1 %2351 }
 0xa9a   :  { %v8638_v55 = vpop.xlane.xlu0 %2909 }
 0xa9b   :  { %v8640_v17 = vpop.xlane.xlu1 %2912 }
 0xa9e   :  { %v8642_v58 = vpop.xlane.xlu0 %2354 }
 0xa9f   :  { %v8644_v54 = vpop.xlane.xlu1 %2357 }
 0xaa2   :  { %v8646_v57 = vpop.xlane.xlu0 %2915 }
 0xaa3   :  { %v8648_v5 = vpop.xlane.xlu1 %2918 }
 0xaa6   :  { %v8650_v29 = vpop.xlane.xlu0 %2360 }
 0xaa7   :  { %11225 = vst [vmem:[#allocation60_spill] sm:$0xff] %v8650_v29  ;;  %v8652_v61 = vpop.xlane.xlu1 %2363 }
 0xaa8   :  { %11226 = vst [vmem:[#allocation59_spill] sm:$0xff] %v8652_v61  ;;  %v11279_v61 = vld [vmem:[#allocation75_spill] sm:$0xff] }
 0xaaa   :  { %v8659_v43 = vpop.xlane.xlu0 %2921 }
 0xaab   :  { %11228 = vst [vmem:[#allocation62_spill] sm:$0xff] %v8659_v43  ;;  %v8661_v42 = vpop.xlane.xlu1 %2924 }
 0xaac   :  { %11229 = vst [vmem:[#allocation61_spill] sm:$0xff] %v8661_v42 }
 0xaae   :  { %549 = vxpose.xlu0.b32.start [1/2] (short) (narrow) %v8666_v19, 16  ;;  %v8669_v9 = vpop.xlane.xlu0 %2927 }
 0xaaf   :  { %11233 = vst [vmem:[#allocation63_spill] sm:$0xff] %v8669_v9  ;;  %v8673_v28 = vpop.xlane.xlu1 %2930 }
 0xab0   :  { %11235 = vst [vmem:[#allocation66_spill] sm:$0xff] %v8673_v28 }
 0xab2   :  { %v8680_v51 = vpop.xlane.xlu0 %1797  ;;  %550 = vxpose.xlu0.b32.end [2/2] (short) (narrow) %v8678_v14, 16 }
 0xab3   :  { %11238 = vst [vmem:[#allocation69_spill] sm:$0xff] %v8680_v51  ;;  %v8683_v40 = vpop.xlane.xlu1 %1800 }
 0xab4   :  { %11239 = vst [vmem:[#allocation10_spill] sm:$0xff] %v8683_v40 }
 0xab6   :  { %v8685_v49 = vpop.xlane.xlu0 %1803 }
 0xab7   :  { %11240 = vst [vmem:[#allocation9_spill] sm:$0xff] %v8685_v49  ;;  %v8689_v22 = vpop.xlane.xlu1 %1806 }
 0xab8   :  { %11242 = vst [vmem:[#allocation13_spill] sm:$0xff] %v8689_v22 }
 0xaba   :  { %v8687_v19 = vpop.xlane.xlu0 %1809 }
 0xabb   :  { %11241 = vst [vmem:[#allocation17_spill] sm:$0xff] %v8687_v19  ;;  %v8693_v25 = vpop.xlane.xlu1 %1812 }
 0xabc   :  { %11244 = vst [vmem:[#allocation19_spill] sm:$0xff] %v8693_v25 }
 0xabe   :  { %v8691_v37 = vpop.xlane.xlu0 %1815 }
 0xabf   :  { %11243 = vst [vmem:[#allocation12_spill] sm:$0xff] %v8691_v37  ;;  %v8699_v10 = vpop.xlane.xlu1 %1818 }
 0xac0   :  { %11247 = vst [vmem:[#allocation82_spill] sm:$0xff] %v8699_v10 }
 0xac2   :  { %v8695_v28 = vpop.xlane.xlu0 %1821 }
 0xac3   :  { %11245 = vst [vmem:[#allocation11_spill] sm:$0xff] %v8695_v28  ;;  %v8703_v14 = vpop.xlane.xlu1 %1824 }
 0xac4   :  { %11249 = vst [vmem:[#allocation84_spill] sm:$0xff] %v8703_v14 }
 0xac6   :  { %v8697_v38 = vpop.xlane.xlu0 %2366 }
 0xac7   :  { %11246 = vst [vmem:[#allocation81_spill] sm:$0xff] %v8697_v38  ;;  %v8709_v19 = vpop.xlane.xlu1 %2369 }
 0xac8   :  { %11252 = vst [vmem:[#allocation87_spill] sm:$0xff] %v8709_v19 }
 0xaca   :  { %v8701_v56 = vpop.xlane.xlu0 %2372 }
 0xacb   :  { %11248 = vst [vmem:[#allocation83_spill] sm:$0xff] %v8701_v56  ;;  %v8713_v37 = vpop.xlane.xlu1 %2375 }
 0xacc   :  { %11254 = vst [vmem:[#allocation89_spill] sm:$0xff] %v8713_v37 }
 0xace   :  { %v8705_v9 = vpop.xlane.xlu0 %1827 }
 0xacf   :  { %11250 = vst [vmem:[#allocation85_spill] sm:$0xff] %v8705_v9  ;;  %v8717_v28 = vpop.xlane.xlu1 %1830 }
 0xad0   :  { %11256 = vst [vmem:[#allocation91_spill] sm:$0xff] %v8717_v28 }
 0xad2   :  { %v8707_v49 = vpop.xlane.xlu0 %2378 }
 0xad3   :  { %11251 = vst [vmem:[#allocation86_spill] sm:$0xff] %v8707_v49  ;;  %v8721_v10 = vpop.xlane.xlu1 %2381 }
 0xad4   :  { %11258 = vst [vmem:[#allocation93_spill] sm:$0xff] %v8721_v10 }
 0xad6   :  { %v8711_v22 = vpop.xlane.xlu0 %2933 }
 0xad7   :  { %11253 = vst [vmem:[#allocation88_spill] sm:$0xff] %v8711_v22  ;;  %v8725_v14 = vpop.xlane.xlu1 %2936 }
 0xad8   :  { %11260 = vst [vmem:[#allocation95_spill] sm:$0xff] %v8725_v14 }
 0xada   :  { %v8715_v25 = vpop.xlane.xlu0 %2939 }
 0xadb   :  { %11255 = vst [vmem:[#allocation90_spill] sm:$0xff] %v8715_v25  ;;  %v8729_v49 = vpop.xlane.xlu1 %2942 }
 0xadc   :  { %11262 = vst [vmem:[#allocation97_spill] sm:$0xff] %v8729_v49 }
 0xade   :  { %v8719_v38 = vpop.xlane.xlu0 %1833 }
 0xadf   :  { %11257 = vst [vmem:[#allocation92_spill] sm:$0xff] %v8719_v38  ;;  %v8733_v22 = vpop.xlane.xlu1 %1836 }
 0xae0   :  { %11264 = vst [vmem:[#allocation99_spill] sm:$0xff] %v8733_v22  ;;  %v11272_v22 = vld [vmem:[#allocation72_spill] sm:$0xff] }
 0xae2   :  { %v8723_v56 = vpop.xlane.xlu0 %2384 }
 0xae3   :  { %11259 = vst [vmem:[#allocation94_spill] sm:$0xff] %v8723_v56  ;;  %v8737_v25 = vpop.xlane.xlu1 %2387  ;;  %v11270_v56 = vld [vmem:[#allocation70_spill] sm:$0xff] }
 0xae4   :  { %11266 = vst [vmem:[#allocation101_spill] sm:$0xff] %v8737_v25  ;;  %v1324_v14 = vrot.slane %v11270_v56, %v8451_v15 }
 0xae6   :  { %v8727_v9 = vpop.xlane.xlu0 %2945 }
 0xae7   :  { %11261 = vst [vmem:[#allocation96_spill] sm:$0xff] %v8727_v9  ;;  %v8741_v38 = vpop.xlane.xlu1 %2948  ;;  %v1314_v9 = vrot.slane %v8163_v11, %v8451_v15 }
 0xae8   :  { %11268 = vst [vmem:[#allocation103_spill] sm:$0xff] %v8741_v38  ;;  %v11275_v38 = vld [vmem:[#allocation67_spill] sm:$0xff] }
 0xaea   :  { %v8731_v19 = vpop.xlane.xlu0 %1839 }
 0xaeb   :  { %11263 = vst [vmem:[#allocation98_spill] sm:$0xff] %v8731_v19  ;;  %v11271_v19 = vld [vmem:[#allocation71_spill] sm:$0xff]  ;;  %v8753_v40 = vpop.xlane.xlu1 %1842 }
 0xaec   :  { %v1329_v49 = vrot.slane %v11271_v19, %v8446_v63  ;;  %11273 = vst [vmem:[#allocation70_spill] sm:$0xff] %v8753_v40  ;;  %v11277_v19 = vld [vmem:[#allocation73_spill] sm:$0xff] }
 0xaed   :  { %v1338_v43 = vrot.slane %v11277_v19, %v8446_v63 }
 0xaee   :  { %v8735_v37 = vpop.xlane.xlu0 %2390 }
 0xaef   :  { %11265 = vst [vmem:[#allocation100_spill] sm:$0xff] %v8735_v37  ;;  %v1333_v37 = vrot.slane %v11272_v22, %v8451_v15  ;;  %v11278_v22 = vld [vmem:[#allocation74_spill] sm:$0xff]  ;;  %v8784_v19 = vpop.xlane.xlu1 %2393 }
 0xaf0   :  { %v1342_v40 = vrot.slane %v11278_v22, %v8451_v15  ;;  %11282 = vst [vmem:[#allocation72_spill] sm:$0xff] %v8784_v19  ;;  %v11284_v19 = vld [vmem:[#allocation79_spill] sm:$0xff] }
 0xaf1   :  { %v1334_v42 = vsel %vm1315_vm8, %v1333_v37, %v1329_v49  ;;  %v1888_v49 = vrot.slane %v8526_v24, %v8446_v63  ;;  %v1892_v37 = vrot.slane %v8528_v20, %v8451_v15  ;;  %v1879_v24 = vrot.slane %v8514_v60, %v8446_v63 }
 0xaf2   :  { %v8739_v28 = vpop.xlane.xlu0 %2951  ;;  %v1883_v20 = vrot.slane %v8517_v26, %v8451_v15  ;;  %v1906_v60 = vrot.slane %v8542_v2, %v8446_v63  ;;  %v1910_v26 = vrot.slane %v8544_v8, %v8451_v15 }
 0xaf3   :  { %11267 = vst [vmem:[#allocation102_spill] sm:$0xff] %v8739_v28  ;;  %v11274_v28 = vld [vmem:[#allocation68_spill] sm:$0xff]  ;;  %v8817_v2 = vpop.xlane.xlu1 %2954 }
 0xaf4   :  { %v1320_v25 = vrot.slane %v11274_v28, %v8446_v63  ;;  %v1347_v28 = vrot.slane %v8173_v18, %v8446_v63  ;;  %v1901_v18 = vrot.slane %v8536_v48, %v8451_v15  ;;  %v11283_v48 = vld [vmem:[#allocation78_spill] sm:$0xff] }
 0xaf5   :  { %v1365_v29 = vrot.slane %v11283_v48, %v8446_v63 }
 0xaf6   :  { %v8743_v10 = vpop.xlane.xlu0 %2396  ;;  %v1325_v51 = vsel %vm1315_vm8, %v1324_v14, %v1320_v25  ;;  %v11280_v14 = vld [vmem:[#allocation76_spill] sm:$0xff] }
 0xaf7   :  { %11269 = vst [vmem:[#allocation104_spill] sm:$0xff] %v8743_v10  ;;  %v1309_v10 = vrot.slane %v11275_v38, %v8446_v63  ;;  %v1351_v38 = vrot.slane %v11279_v61, %v8451_v15  ;;  %v1356_v25 = vrot.slane %v11280_v14, %v8446_v63 }
 0xaf9   :  { %v1316_v11 = vsel %vm1315_vm8, %v1314_v9, %v1309_v10  ;;  %v1897_v10 = vrot.slane %v8534_v44, %v8446_v63  ;;  %v1352_v14 = vsel %vm1315_vm8, %v1351_v38, %v1347_v28  ;;  %v1919_v28 = vrot.slane %v8552_v35, %v8451_v15 }
 0xafa   :  { %v8760_v56 = vpop.xlane.xlu0 %2957  ;;  %v1453_v61 = vsel %vm1452_vm10, %v1325_v51, %v1316_v11  ;;  %v1369_v51 = vrot.slane %v11284_v19, %v8451_v15  ;;  %v2457_v38 = vrot.slane %v8566_v3, %v8446_v63  ;;  %v2452_v19 = vrot.slane %v8560_v4, %v8451_v15 }
 0xafb   :  { %11276 = vst [vmem:[#allocation71_spill] sm:$0xff] %v8760_v56  ;;  %v11281_v56 = vld [vmem:[#allocation77_spill] sm:$0xff]  ;;  %v1455_v22 = vsel %vm1454_vm11, %v1334_v42, %v1453_v61  ;;  %v1902_v42 = vsel %vm1315_vm8, %v1901_v18, %v1897_v10  ;;  %v1911_v10 = vsel %vm1315_vm8, %v1910_v26, %v1906_v60  ;;  %v2448_v18 = vrot.slane %v8558_v31, %v8446_v63 }
 0xafc   :  { %v1360_v9 = vrot.slane %v11281_v56, %v8451_v15  ;;  %v1343_v56 = vsel %vm1315_vm8, %v1342_v40, %v1338_v43  ;;  %v1893_v43 = vsel %vm1315_vm8, %v1892_v37, %v1888_v49  ;;  %v1915_v40 = vrot.slane %v8550_v27, %v8446_v63 }
 0xafd   :  { %v1884_v49 = vsel %vm1315_vm8, %v1883_v20, %v1879_v24  ;;  %v1370_v27 = vsel %vm1315_vm8, %v1369_v51, %v1365_v29  ;;  %v1924_v29 = vrot.slane %v8574_v52, %v8446_v63  ;;  %v2466_v24 = vrot.slane %v8582_v46, %v8446_v63 }
 0xafe   :  { %v1361_v44 = vsel %vm1315_vm8, %v1360_v9, %v1356_v25  ;;  %v8799_v11 = vpop.xlane.xlu0 %2402  ;;  %v2461_v25 = vrot.slane %v8568_v47, %v8451_v15  ;;  %v1457_v9 = vsel %vm1456_vm12, %v1343_v56, %v1455_v22  ;;  %v2020_v37 = vsel %vm1452_vm10, %v1893_v43, %v1884_v49 }
 0xaff   :  { %v1459_v8 = vsel %vm1458_vm14, %v1352_v14, %v1457_v9  ;;  %v2021_v35 = vsel %vm1454_vm11, %v1902_v42, %v2020_v37  ;;  %v1920_v47 = vsel %vm1315_vm8, %v1919_v28, %v1915_v40  ;;  %v1928_v56 = vrot.slane %v8576_v1, %v8451_v15 }
 0xb00   :  { %v1461_v3 = vsel %vm1460_vm15, %v1361_v44, %v1459_v8  ;;  %v2462_v61 = vsel %vm1315_vm8, %v2461_v25, %v2457_v38  ;;  %v2470_v20 = vrot.slane %v8584_v59, %v8451_v15  ;;  %v3015_v31 = vrot.slane %v8590_v7, %v8446_v63  ;;  %v8857_v44 = vpop.xlane.xlu1 %2399 }
 0xb01   :  { %v3019_v4 = vrot.slane %v8592_v45, %v8451_v15  ;;  %v3024_v14 = vrot.slane %v8598_v34, %v8446_v63  ;;  %v3028_v52 = vrot.slane %v8600_v53, %v8451_v15  ;;  %v1933_v1 = vrot.slane %v8606_v21, %v8446_v63 }
 0xb02   :  { %v8831_v22 = vpop.xlane.xlu0 %2963  ;;  %v1937_v46 = vrot.slane %v8608_v62, %v8451_v15  ;;  %v2475_v59 = vrot.slane %v8614_v41, %v8446_v63  ;;  %v2479_v7 = vrot.slane %v8616_v13, %v8451_v15  ;;  %v3033_v45 = vrot.slane %v8618_v33, %v8446_v63  ;;  %v11285_v41 = vld [vmem:[#allocation80_spill] sm:$0xff] }
 0xb03   :  { %v3037_v34 = vrot.slane %v8620_v36, %v8451_v15  ;;  %v2484_v53 = vrot.slane %v8626_v23, %v8446_v63  ;;  %v2488_v21 = vrot.slane %v8628_v39, %v8451_v15  ;;  %v1374_v62 = vrot.slane %v8187_v16, %v8446_v63 }
 0xb04   :  { %v1378_v13 = vrot.slane %v11285_v41, %v8451_v15  ;;  %v2022_v48 = vsel %vm1456_vm12, %v1911_v10, %v2021_v35  ;;  %v2453_v51 = vsel %vm1315_vm8, %v2452_v19, %v2448_v18  ;;  %v1929_v43 = vsel %vm1315_vm8, %v1928_v56, %v1924_v29  ;;  %v8897_v35 = vpop.xlane.xlu1 %2960  ;;  %v11293_v41 = vld [vmem:[#allocation13_spill] sm:$0xff] }
 0xb05   :  { %v2023_v33 = vsel %vm1458_vm14, %v1920_v47, %v2022_v48  ;;  %v2589_v36 = vsel %vm1452_vm10, %v2462_v61, %v2453_v51  ;;  %v2471_v23 = vsel %vm1315_vm8, %v2470_v20, %v2466_v24  ;;  %v3020_v39 = vsel %vm1315_vm8, %v3019_v4, %v3015_v31  ;;  %v11286_v31 = vld [vmem:[#allocation60_spill] sm:$0xff]  ;;  %v11294_v48 = vld [vmem:[#allocation17_spill] sm:$0xff] }
 0xb06   :  { %v8877_v42 = vpop.xlane.xlu0 %2408  ;;  %v3029_v16 = vsel %vm1315_vm8, %v3028_v52, %v3024_v14  ;;  %v1938_v60 = vsel %vm1315_vm8, %v1937_v46, %v1933_v1  ;;  %v2480_v26 = vsel %vm1315_vm8, %v2479_v7, %v2475_v59  ;;  %v3038_v40 = vsel %vm1315_vm8, %v3037_v34, %v3033_v45  ;;  %v11287_v14 = vld [vmem:[#allocation59_spill] sm:$0xff]  ;;  %v11288_v1 = vld [vmem:[#allocation62_spill] sm:$0xff]  ;;  %v11289_v59 = vld [vmem:[#allocation61_spill] sm:$0xff] }
 0xb07   :  { %v1942_v28 = vrot.slane %v8622_v30, %v8446_v63  ;;  %v1946_v38 = vrot.slane %v8624_v0, %v8451_v15  ;;  %v2489_v25 = vsel %vm1315_vm8, %v2488_v21, %v2484_v53  ;;  %v3042_v9 = vrot.slane %v8630_v6, %v8446_v63  ;;  %v11290_v34 = vld [vmem:[#allocation69_spill] sm:$0xff]  ;;  %v11291_v53 = vld [vmem:[#allocation10_spill] sm:$0xff] }
 0xb08   :  { %v3046_v49 = vrot.slane %v8632_v32, %v8451_v15  ;;  %v2493_v8 = vrot.slane %v8634_v50, %v8446_v63  ;;  %v2497_v37 = vrot.slane %v8636_v12, %v8451_v15  ;;  %v3051_v30 = vrot.slane %v8638_v55, %v8446_v63  ;;  %v8935_v45 = vpop.xlane.xlu1 %2405  ;;  %v11292_v21 = vld [vmem:[#allocation9_spill] sm:$0xff] }
 0xb09   :  { %v3055_v0 = vrot.slane %v8640_v17, %v8451_v15  ;;  %v2502_v6 = vrot.slane %v8642_v58, %v8446_v63  ;;  %v2506_v32 = vrot.slane %v8644_v54, %v8451_v15  ;;  %v2590_v10 = vsel %vm1454_vm11, %v2471_v23, %v2589_v36 }
 0xb0a   :  { %v3156_v50 = vsel %vm1452_vm10, %v3029_v16, %v3020_v39  ;;  %v1463_v12 = vsel %vm11126_vm1, %v1370_v27, %v1461_v3  ;;  %v2024_v47 = vsel %vm1460_vm15, %v1929_v43, %v2023_v33  ;;  %v2591_v18 = vsel %vm1456_vm12, %v2480_v26, %v2590_v10  ;;  %v8913_v19 = vpop.xlane.xlu0 %2969  ;;  %v11295_v33 = vld [vmem:[#allocation19_spill] sm:$0xff]  ;;  %v11296_v43 = vld [vmem:[#allocation12_spill] sm:$0xff]  ;;  %v11297_v39 = vld [vmem:[#allocation82_spill] sm:$0xff] }
 0xb0b   :  { %v3157_v55 = vsel %vm1454_vm11, %v3038_v40, %v3156_v50  ;;  %v1379_v17 = vsel %vm1315_vm8, %v1378_v13, %v1374_v62  ;;  %v2025_v58 = vsel %vm11126_vm1, %v1938_v60, %v2024_v47  ;;  %v2592_v54 = vsel %vm1458_vm14, %v2489_v25, %v2591_v18  ;;  %v11300_v18 = vld [vmem:[#allocation11_spill] sm:$0xff] }
 0xb0c   :  { %v3047_v61 = vsel %vm1315_vm8, %v3046_v49, %v3042_v9  ;;  %v2498_v29 = vsel %vm1315_vm8, %v2497_v37, %v2493_v8  ;;  %v1947_v27 = vsel %vm1315_vm8, %v1946_v38, %v1942_v28  ;;  %v3056_v3 = vsel %vm1315_vm8, %v3055_v0, %v3051_v30  ;;  %v11298_v30 = vld [vmem:[#allocation63_spill] sm:$0xff] }
 0xb0d   :  { %v2507_v56 = vsel %vm1315_vm8, %v2506_v32, %v2502_v6  ;;  %v3060_v24 = vrot.slane %v8646_v57, %v8446_v63  ;;  %v3064_v20 = vrot.slane %v8648_v5, %v8451_v15  ;;  %v2511_v4 = vrot.slane %v11286_v31, %v8446_v63  ;;  %v11299_v6 = vld [vmem:[#allocation66_spill] sm:$0xff]  ;;  %v11306_v31 = vld [vmem:[#allocation89_spill] sm:$0xff] }
 0xb0e   :  { %v2515_v52 = vrot.slane %v11287_v14, %v8451_v15  ;;  %v3069_v46 = vrot.slane %v11288_v1, %v8446_v63  ;;  %v3073_v7 = vrot.slane %v11289_v59, %v8451_v15  ;;  %v1951_v57 = vrot.slane %v11290_v34, %v8446_v63  ;;  %v8954_v26 = vpop.xlane.xlu0 %2975  ;;  %v11307_v14 = vld [vmem:[#allocation85_spill] sm:$0xff]  ;;  %v11308_v1 = vld [vmem:[#allocation91_spill] sm:$0xff] }
 0xb0f   :  { %v1955_v5 = vrot.slane %v11291_v53, %v8451_v15  ;;  %v1960_v62 = vrot.slane %v11292_v21, %v8446_v63  ;;  %v1964_v13 = vrot.slane %v11293_v41, %v8451_v15  ;;  %v1969_v51 = vrot.slane %v11294_v48, %v8446_v63 }
 0xb10   :  { %v1973_v36 = vrot.slane %v11295_v33, %v8451_v15  ;;  %v1978_v23 = vrot.slane %v11296_v43, %v8446_v63  ;;  %v1982_v16 = vrot.slane %v11297_v39, %v8451_v15  ;;  %v3158_v60 = vsel %vm1456_vm12, %v3047_v61, %v3157_v55  ;;  %v11302_v61 = vld [vmem:[#allocation81_spill] sm:$0xff] }
 0xb11   :  { %v1465_v40 = vsel %vm11125_vm3, %v1379_v17, %v1463_v12  ;;  %v2026_v28 = vsel %vm11125_vm3, %v1947_v27, %v2025_v58  ;;  %v2593_v38 = vsel %vm1460_vm15, %v2498_v29, %v2592_v54  ;;  %v3159_v25 = vsel %vm1458_vm14, %v3056_v3, %v3158_v60  ;;  %v8974_v17 = vpop.xlane.xlu1 %2966  ;;  %v11301_v58 = vld [vmem:[#allocation84_spill] sm:$0xff]  ;;  %v11303_v27 = vld [vmem:[#allocation87_spill] sm:$0xff] }
 0xb12   :  { %v3065_v9 = vsel %vm1315_vm8, %v3064_v20, %v3060_v24  ;;  %v2516_v49 = vsel %vm1315_vm8, %v2515_v52, %v2511_v4  ;;  %v2594_v8 = vsel %vm11126_vm1, %v2507_v56, %v2593_v38  ;;  %v3074_v37 = vsel %vm1315_vm8, %v3073_v7, %v3069_v46  ;;  %v11304_v56 = vld [vmem:[#allocation83_spill] sm:$0xff]  ;;  %v11309_v7 = vld [vmem:[#allocation86_spill] sm:$0xff]  ;;  %v11312_v38 = vld [vmem:[#allocation92_spill] sm:$0xff] }
 0xb13   :  { %v3078_v0 = vrot.slane %v11298_v30, %v8446_v63  ;;  %v3082_v32 = vrot.slane %v11299_v6, %v8451_v15  ;;  %v1956_v10 = vsel %vm1315_vm8, %v1955_v5, %v1951_v57  ;;  %v1965_v50 = vsel %vm1315_vm8, %v1964_v13, %v1960_v62  ;;  %v11310_v57 = vld [vmem:[#allocation93_spill] sm:$0xff]  ;;  %v11315_v30 = vld [vmem:[#allocation88_spill] sm:$0xff]  ;;  %v11316_v6 = vld [vmem:[#allocation95_spill] sm:$0xff] }
 0xb14   :  { %v1974_v12 = vsel %vm1315_vm8, %v1973_v36, %v1969_v51  ;;  %v1983_v47 = vsel %vm1315_vm8, %v1982_v16, %v1978_v23  ;;  %v1987_v55 = vrot.slane %v11300_v18, %v8446_v63  ;;  %v1991_v54 = vrot.slane %v11301_v58, %v8451_v15 }
 0xb15   :  { %v2520_v29 = vrot.slane %v11302_v61, %v8446_v63  ;;  %v2524_v3 = vrot.slane %v11303_v27, %v8451_v15  ;;  %v2529_v24 = vrot.slane %v11304_v56, %v8446_v63  ;;  %v2533_v4 = vrot.slane %v11306_v31, %v8451_v15  ;;  %v9016_v60 = vpop.xlane.xlu1 %2411  ;;  %v11321_v27 = vld [vmem:[#allocation98_spill] sm:$0xff]  ;;  %v11323_v31 = vld [vmem:[#allocation100_spill] sm:$0xff] }
 0xb16   :  { %v1996_v52 = vrot.slane %v11307_v14, %v8446_v63  ;;  %v2000_v46 = vrot.slane %v11308_v1, %v8451_v15  ;;  %v2027_v59 = vsel %vm1452_vm10, %v1965_v50, %v1956_v10  ;;  %v2538_v34 = vrot.slane %v11309_v7, %v8446_v63  ;;  %v11317_v10 = vld [vmem:[#allocation90_spill] sm:$0xff]  ;;  %v11324_v14 = vld [vmem:[#allocation72_spill] sm:$0xff] }
 0xb17   :  { %v2542_v53 = vrot.slane %v11310_v57, %v8451_v15  ;;  %v2028_v21 = vsel %vm1454_vm11, %v1974_v12, %v2027_v59  ;;  %v2595_v41 = vsel %vm11125_vm3, %v2516_v49, %v2594_v8  ;;  %v3160_v13 = vsel %vm1460_vm15, %v3065_v9, %v3159_v25  ;;  %v11313_v9 = vld [vmem:[#allocation99_spill] sm:$0xff]  ;;  %v11314_v8 = vld [vmem:[#allocation57_spill] sm:$0xff]  ;;  %v11322_v56 = vld [vmem:[#allocation70_spill] sm:$0xff] }
 0xb18   :  { %v2029_v48 = vsel %vm1456_vm12, %v1983_v47, %v2028_v21  ;;  %v1992_v51 = vsel %vm1315_vm8, %v1991_v54, %v1987_v55  ;;  %v3083_v36 = vsel %vm1315_vm8, %v3082_v32, %v3078_v0  ;;  %v3161_v43 = vsel %vm11126_vm1, %v3074_v37, %v3160_v13  ;;  %v11318_v47 = vld [vmem:[#allocation97_spill] sm:$0xff]  ;;  %v11319_v55 = vld [vmem:[#allocation94_spill] sm:$0xff]  ;;  %v11325_v13 = vld [vmem:[#allocation96_spill] sm:$0xff] }
 0xb19   :  { %v2525_v23 = vsel %vm1315_vm8, %v2524_v3, %v2520_v29  ;;  %v2534_v39 = vsel %vm1315_vm8, %v2533_v4, %v2529_v24  ;;  %v2001_v16 = vsel %vm1315_vm8, %v2000_v46, %v1996_v52  ;;  %v2005_v25 = vrot.slane %v11312_v38, %v8446_v63  ;;  %v11320_v54 = vld [vmem:[#allocation101_spill] sm:$0xff]  ;;  %v2973_v57 = vpop.xlane.xlu1 %2972  ;;  %v11327_v38 = vld [vmem:[#allocation102_spill] sm:$0xff] }
 0xb1a   :  { %v2009_v49 = vrot.slane %v11313_v9, %v8451_v15  ;;  %v3087_v0 = vrot.slane %v11315_v30, %v8446_v63  ;;  %v3091_v32 = vrot.slane %v11316_v6, %v8451_v15  ;;  %v3096_v50 = vrot.slane %v11317_v10, %v8446_v63 }
 0xb1b   :  { %v3100_v18 = vrot.slane %v11318_v47, %v8451_v15  ;;  %v2547_v58 = vrot.slane %v11319_v55, %v8446_v63  ;;  %v2551_v61 = vrot.slane %v11320_v54, %v8451_v15  ;;  %v2014_v3 = vrot.slane %v11321_v27, %v8446_v63 }
 0xb1c   :  { %v2018_v24 = vrot.slane %v11322_v56, %v8451_v15  ;;  %v2556_v4 = vrot.slane %v11323_v31, %v8446_v63  ;;  %v2560_v52 = vrot.slane %v11324_v14, %v8451_v15  ;;  %v2030_v1 = vsel %vm1458_vm14, %v1992_v51, %v2029_v48  ;;  %v11326_v51 = vld [vmem:[#allocation103_spill] sm:$0xff] }
 0xb1d   :  { %v2596_v46 = vsel %vm1452_vm10, %v2534_v39, %v2525_v23  ;;  %v2010_v59 = vsel %vm1315_vm8, %v2009_v49, %v2005_v25  ;;  %v2031_v21 = vsel %vm1460_vm15, %v2001_v16, %v2030_v1  ;;  %v3105_v48 = vrot.slane %v11325_v13, %v8446_v63  ;;  %v11328_v49 = vld [vmem:[#allocation104_spill] sm:$0xff] }
 0xb1e   :  { %v3109_v23 = vrot.slane %v11326_v51, %v8451_v15  ;;  %v2561_v39 = vsel %vm1315_vm8, %v2560_v52, %v2556_v4  ;;  %v2032_v16 = vsel %vm11126_vm1, %v2010_v59, %v2031_v21  ;;  %v3114_v25 = vrot.slane %v11327_v38, %v8446_v63 }
 0xb1f   :  { %v3118_v9 = vrot.slane %v8817_v2, %v8451_v15  ;;  %v2578_v6 = vrot.slane %v8935_v45, %v8451_v15  ;;  %v2583_v2 = vrot.slane %v8877_v42, %v8446_v63  ;;  %v11329_v45 = vld [vmem:[#allocation71_spill] sm:$0xff]  ;;  %v3127_v47 = vrot.slane %v8897_v35, %v8451_v15 }
 0xb20   :  { %v3110_v10 = vsel %vm1315_vm8, %v3109_v23, %v3105_v48  ;;  %v3136_v54 = vrot.slane %v8974_v17, %v8451_v15  ;;  %v3141_v27 = vrot.slane %v8913_v19, %v8446_v63  ;;  %v3145_v35 = vrot.slane %v2973_v57, %v8451_v15 }
 0xb21   :  { %v3119_v42 = vsel %vm1315_vm8, %v3118_v9, %v3114_v25  ;;  %v3150_v56 = vrot.slane %v8954_v26, %v8446_v63 }
 0xb2e   :  { %v8984_v20 = vpop.trf.xlu0 }
 0xb2f   :  { %11305 = vst [vmem:[#allocation68_spill] sm:$0xff] %v8984_v20  ;;  %vm11112_vm4 = vcmp.gt.f32.partialorder %v8984_v20, 0.0  ;;  %v11364_v20 = vld [vmem:[#allocation51_spill] sm:$0xff] }
 0xb30   :  { %v9000_v5 = vsel %vm11112_vm4, %v1465_v40, -1e+30  ;;  %v2543_v40 = vsel %vm1315_vm8, %v2542_v53, %v2538_v34  ;;  %v9045_v29 = vsel %vm11112_vm4, %v2026_v28, -1e+30  ;;  %v3162_v28 = vsel %vm11125_vm3, %v3083_v36, %v3161_v43 }
 0xb31   :  { %v1477_v62 = vsel %vm11113_vm5, %v9000_v5, -inf  ;;  %v2597_v7 = vsel %vm1454_vm11, %v2543_v40, %v2596_v46  ;;  %v3092_v34 = vsel %vm1315_vm8, %v3091_v32, %v3087_v0  ;;  %v2038_v53 = vsel %vm11113_vm5, %v9045_v29, -inf }
 0xb32   :  { %1478 = vmax.xlane.f32.xlu1 %v1477_v62  ;;  %v9009_v33 = vpop.trf.xlu0  ;;  %v2552_v62 = vsel %vm1315_vm8, %v2551_v61, %v2547_v58  ;;  %v9071_v36 = vsel %vm11112_vm4, %v2595_v41, -1e+30  ;;  %v3101_v43 = vsel %vm1315_vm8, %v3100_v18, %v3096_v50  ;;  %v2019_v40 = vsel %vm1315_vm8, %v2018_v24, %v2014_v3  ;;  %v2979_v18 = vpop.xlane.xlu1 %2978 }
 0xb33   :  { %11311 = vst [vmem:[#allocation67_spill] sm:$0xff] %v9009_v33  ;;  %vm11124_vm6 = vcmp.gt.f32.partialorder %v9009_v33, 0.0  ;;  %v2569_v41 = vrot.slane %v8857_v44, %v8451_v15  ;;  %v2598_v30 = vsel %vm1456_vm12, %v2552_v62, %v2597_v7  ;;  %v2574_v0 = vrot.slane %v8799_v11, %v8446_v63  ;;  %v11369_v33 = vld [vmem:[#allocation35_spill] sm:$0xff] }
 0xb34   :  { %v9027_v37 = vsel %vm11124_vm6, %v11314_v8, -1e+30  ;;  %v2565_v8 = vrot.slane %v11328_v49, %v8446_v63  ;;  %v2607_v32 = vsel %vm11113_vm5, %v9071_v36, -inf  ;;  %v2587_v50 = vrot.slane %v9016_v60, %v8451_v15 }
 0xb35   :  { %v1480_v12 = vsel %vm11113_vm5, %v9027_v37, -inf  ;;  %v9099_v44 = vsel %vm11112_vm4, %v3162_v28, -1e+30  ;;  %v2599_v11 = vsel %vm1458_vm14, %v2561_v39, %v2598_v30  ;;  %v2033_v55 = vsel %vm11125_vm3, %v2019_v40, %v2032_v16 }
 0xb36   :  { %1481 = vmax.xlane.f32.xlu1 %v1480_v12  ;;  %v3123_v12 = vrot.slane %v11329_v45, %v8446_v63  ;;  %v2570_v60 = vsel %vm1315_vm8, %v2569_v41, %v2565_v8  ;;  %v3132_v58 = vrot.slane %v8831_v22, %v8446_v63  ;;  %v2579_v61 = vsel %vm1315_vm8, %v2578_v6, %v2574_v0 }
 0xb37   :  { %v3174_v3 = vsel %vm11113_vm5, %v9099_v44, -inf  ;;  %v3154_v24 = vrot.slane %v2979_v18, %v8451_v15  ;;  %v2037_v22 = vsel %vm11124_vm6, %v2033_v55, -1e+30  ;;  %v2588_v17 = vsel %vm1315_vm8, %v2587_v50, %v2583_v2  ;;  %v11370_v15 = vld [vmem:[#allocation48_spill] sm:$0xff] }
 0xb38   :  { %v3163_v31 = vsel %vm1452_vm10, %v3101_v43, %v3092_v34  ;;  %v3128_v19 = vsel %vm1315_vm8, %v3127_v47, %v3123_v12  ;;  %v2600_v4 = vsel %vm1460_vm15, %v2570_v60, %v2599_v11  ;;  %v3137_v52 = vsel %vm1315_vm8, %v3136_v54, %v3132_v58 }
 0xb39   :  { %v3164_v14 = vsel %vm1454_vm11, %v3110_v10, %v3163_v31  ;;  %v2601_v26 = vsel %vm11126_vm1, %v2579_v61, %v2600_v4  ;;  %v3146_v46 = vsel %vm1315_vm8, %v3145_v35, %v3141_v27  ;;  %v2041_v59 = vsel %vm11113_vm5, %v2037_v22, -inf  ;;  %v11330_v35 = vld [vmem:[#allocation23_spill] sm:$0xff] }
 0xb3a   :  { %2039 = vmax.xlane.f32.xlu1 %v2038_v53  ;;  %v3165_v1 = vsel %vm1456_vm12, %v3119_v42, %v3164_v14  ;;  %v2602_v28 = vsel %vm11125_vm3, %v2588_v17, %v2601_v26  ;;  %v3155_v57 = vsel %vm1315_vm8, %v3154_v24, %v3150_v56 }
 0xb3b   :  { %v3166_v7 = vsel %vm1458_vm14, %v3128_v19, %v3165_v1  ;;  %v2606_v34 = vsel %vm11124_vm6, %v2602_v28, -1e+30 }
 0xb3c   :  { %v3167_v53 = vsel %vm1460_vm15, %v3137_v52, %v3166_v7  ;;  %v2610_v62 = vsel %vm11113_vm5, %v2606_v34, -inf }
 0xb3d   :  { %v3168_v21 = vsel %vm11126_vm1, %v3146_v46, %v3167_v53 }
 0xb3e   :  { %2608 = vmax.xlane.f32.xlu1 %v2607_v32  ;;  %v3169_v13 = vsel %vm11125_vm3, %v3155_v57, %v3168_v21 }
 0xb3f   :  { %v3173_v48 = vsel %vm11124_vm6, %v3169_v13, -1e+30 }
 0xb40   :  { %v3177_v51 = vsel %vm11113_vm5, %v3173_v48, -inf }
 0xb42   :  { %3175 = vmax.xlane.f32.xlu1 %v3174_v3 }
 0xb46   :  { %2042 = vmax.xlane.f32.xlu1 %v2041_v59 }
 0xb4a   :  { %2611 = vmax.xlane.f32.xlu1 %v2610_v62 }
 0xb4e   :  { %3178 = vmax.xlane.f32.xlu1 %v3177_v51 }
 0xbbf   :  { %v1479_v23 = vpop.xlane.xlu1 %1478 }
 0xbc0   :  { %v1483_v43 = vsub.f32 %v9000_v5, %v1479_v23 }
 0xbc2   :  { %v1485_v39 = vmul.f32 1.442695, %v1483_v43 }
 0xbc3   :  { %v1482_v40 = vpop.xlane.xlu1 %1481 }
 0xbc4   :  { %6903 = vpow2.f32 %v1485_v39  ;;  %v1484_v16 = vsub.f32 %v9027_v37, %v1482_v40 }
 0xbc6   :  { %v1487_v38 = vmul.f32 1.442695, %v1484_v16 }
 0xbc7   :  { %v2040_v25 = vpop.xlane.xlu1 %2039 }
 0xbc8   :  { %6905 = vpow2.f32 %v1487_v38  ;;  %v2044_v9 = vsub.f32 %v9045_v29, %v2040_v25 }
 0xbca   :  { %v2046_v49 = vmul.f32 1.442695, %v2044_v9 }
 0xbcb   :  { %v2609_v8 = vpop.xlane.xlu1 %2608 }
 0xbcc   :  { %6907 = vpow2.f32 %v2046_v49  ;;  %v2613_v41 = vsub.f32 %v9071_v36, %v2609_v8 }
 0xbce   :  { %v6904_v30 = vpop.eup %6903  ;;  %v2615_v0 = vmul.f32 1.442695, %v2613_v41  ;;  %v6994_v41 = vld [vmem:[%s11051_s0] sm:$0xff] }
 0xbcf   :  { %v3176_v6 = vpop.xlane.xlu1 %3175  ;;  %v1489_v5 = vsel %vm11113_vm5, %v6904_v30, 0.0 }
 0xbd0   :  { %6909 = vpow2.f32 %v2615_v0  ;;  %1490 = vadd.xlane.f32.xlu1 %v1489_v5  ;;  %v3180_v37 = vsub.f32 %v9099_v44, %v3176_v6 }
 0xbd2   :  { %v6906_v32 = vpop.eup %6905  ;;  %v3182_v11 = vmul.f32 1.442695, %v3180_v37 }
 0xbd3   :  { %v2043_v10 = vpop.xlane.xlu1 %2042  ;;  %v1492_v2 = vsel %vm11113_vm5, %v6906_v32, 0.0 }
 0xbd4   :  { %v2045_v50 = vsub.f32 %v2037_v22, %v2043_v10  ;;  %1493 = vadd.xlane.f32.xlu1 %v1492_v2  ;;  %v9177_v2 = vld [vmem:[#allocation4 + $0x60] sm:$0xf] }
 0xbd6   :  { %v6908_v29 = vpop.eup %6907  ;;  %v2048_v45 = vmul.f32 1.442695, %v2045_v50  ;;  %v11331_v50 = vld [vmem:[#allocation16_spill] sm:$0xff] }
 0xbd7   :  { %v2612_v12 = vpop.xlane.xlu1 %2611  ;;  %v2050_v36 = vsel %vm11113_vm5, %v6908_v29, 0.0 }
 0xbd8   :  { %6911 = vpow2.f32 %v2048_v45  ;;  %v2614_v47 = vsub.f32 %v2606_v34, %v2612_v12  ;;  %2051 = vadd.xlane.f32.xlu1 %v2050_v36  ;;  %v11333_v12 = vld [vmem:[#allocation14_spill] sm:$0xff] }
 0xbd9   :  { %6913 = vpow2.f32 %v3182_v11  ;;  %v11332_v11 = vld [vmem:[#allocation15_spill] sm:$0xff]  ;;  %v4367_v36 = vrot.slane %v9177_v2, %v11333_v12 }
 0xbda   :  { %v6910_v18 = vpop.eup %6909  ;;  %v2617_v55 = vmul.f32 1.442695, %v2614_v47  ;;  %v5503_v45 = vrot.slane %v9177_v2, %v11332_v11  ;;  %v3457_v11 = vld [vmem:[#allocation4 + $0x8] sm:$0xff] }
 0xbdb   :  { %v2619_v42 = vsel %vm11113_vm5, %v6910_v18, 0.0  ;;  %v3179_v3 = vpop.xlane.xlu1 %3178 }
 0xbdc   :  { %6915 = vpow2.f32 %v2617_v55  ;;  %2620 = vadd.xlane.f32.xlu1 %v2619_v42  ;;  %v3181_v56 = vsub.f32 %v3173_v48, %v3179_v3 }
 0xbde   :  { %v3184_v24 = vmul.f32 1.442695, %v3181_v56 }
 0xbe0   :  { %6917 = vpow2.f32 %v3184_v24 }
 0xbe2   :  { %v6912_v44 = vpop.eup %6911 }
 0xbe3   :  { %v2053_v60 = vsel %vm11113_vm5, %v6912_v44, 0.0  ;;  %v6914_v58 = vpop.eup %6913 }
 0xbe4   :  { %2054 = vadd.xlane.f32.xlu1 %v2053_v60  ;;  %v3186_v61 = vsel %vm11113_vm5, %v6914_v58, 0.0 }
 0xbe6   :  { %v6916_v54 = vpop.eup %6915 }
 0xbe7   :  { %v2622_v27 = vsel %vm11113_vm5, %v6916_v54, 0.0 }
 0xbe8   :  { %3187 = vadd.xlane.f32.xlu1 %v3186_v61  ;;  %2623 = vadd.xlane.f32.xlu0 %v2622_v27  ;;  %v592_v61 = vld [vmem:[#allocation2 + $0x10] sm:$0xf]  ;;  %v6995_v27 = vld [vmem:[%s11051_s0 + $0x8] sm:$0xff]  ;;  %s7080_s0 = smov 124  }
 0xbea   :  { %v6918_v22 = vpop.eup %6917 }
 0xbeb   :  { %v3189_v17 = vsel %vm11113_vm5, %v6918_v22, 0.0 }
 0xbf9   :  { %6861 = vrot.lane.b32.xlu1 %v11330_v35, %s7075_s9 }
 0xbfd   :  { %6866 = vrot.lane.b32.xlu1 %v11330_v35, %s7076_s10 }
 0xbfe   :  { %4369 = vrot.lane.b32.xlu0 %v4367_v36, %s7079_s16  ;;  %v3463_v36 = vld [vmem:[#allocation4 + $0x30] sm:$0xff] }
 0xc21   :  { %3190 = vadd.xlane.f32.xlu1 %v3189_v17 }
 0xc32   :  { %6871 = vrot.lane.b32.xlu1 %v11330_v35, %s7077_s11 }
 0xc5d   :  { %v1491_v31 = vpop.xlane.xlu1 %1490 }
 0xc5e   :  { %6919 = vrcp.f32 %v1491_v31 }
 0xc61   :  { %v1494_v19 = vpop.xlane.xlu1 %1493 }
 0xc62   :  { %6921 = vrcp.f32 %v1494_v19 }
 0xc65   :  { %v2052_v4 = vpop.xlane.xlu1 %2051 }
 0xc66   :  { %6923 = vrcp.f32 %v2052_v4  ;;  %v6544_v4 = vld [vmem:[#allocation2 + $0x38] ss:$0 sm:$0xff] }
 0xc68   :  { %v6920_v14 = vpop.eup %6919 }
 0xc69   :  { %v2621_v52 = vpop.xlane.xlu1 %2620  ;;  %v1497_v26 = vmul.f32 %v6920_v14, %v6904_v30 }
 0xc6a   :  { %6925 = vrcp.f32 %v2621_v52 }
 0xc6b   :  { %6674 = vmatprep.mubr.msk.f32.mxu1 %vm11113_vm5, %v1497_v26 }
 0xc6c   :  { %v6922_v1 = vpop.eup %6921 }
 0xc6d   :  { %v1498_v46 = vmul.f32 %v6922_v1, %v6906_v32 }
 0xc6f   :  { %6675 = vmatmul.mubr.msk.f32.vlgmr.msra.gmra.mrb[4].mxu1 %vm11113_vm5, %v1498_v46 }
 0xc70   :  { %v6924_v59 = vpop.eup %6923 }
 0xc71   :  { %v2055_v28 = vpop.xlane.xlu1 %2054  ;;  %v2058_v7 = vmul.f32 %v6924_v59, %v6908_v29  ;;  %v4936_v29 = vrot.slane %v9177_v2, %v11331_v50  ;;  %v3456_v50 = vld [vmem:[#allocation4] sm:$0xff] }
 0xc72   :  { %6927 = vrcp.f32 %v2055_v28 }
 0xc73   :  { %6681 = vmatprep.mubr.msk.f32.mxu0 %vm11113_vm5, %v2058_v7  ;;  %4938 = vrot.lane.b32.xlu1 %v4936_v29, %s7069_s28 }
 0xc74   :  { %v6926_v34 = vpop.eup %6925 }
 0xc75   :  { %v2624_v57 = vpop.xlane.xlu0 %2623  ;;  %v3188_v53 = vpop.xlane.xlu1 %3187  ;;  %v2627_v21 = vmul.f32 %v6926_v34, %v6910_v18 }
 0xc76   :  { %6929 = vrcp.f32 %v2624_v57 }
 0xc77   :  { %6931 = vrcp.f32 %v3188_v53  ;;  %6688 = vmatprep.mubr.msk.f32.mxu1 %vm11113_vm5, %v2627_v21  ;;  %5505 = vrot.lane.b32.xlu1 %v5503_v45, %s7078_s15  ;;  %v6796_v45 = vpack.c.bf16 %v3457_v11, %v3456_v50 }
 0xc79   :  { %v6862_v62 = vpop.permute.xlu1 %6861 }
 0xc7a   :  { %v6864_v13 = vunpack.i.h.bf16 %v6862_v62  ;;  %v6863_v48 = vunpack.i.l.bf16 %v6862_v62 }
 0xc7c   :  { %v6784_v51 = vpack.c.bf16 %v6864_v13, %v6863_v48  ;;  %v6928_v23 = vpop.eup %6927 }
 0xc7d   :  { %v6867_v43 = vpop.permute.xlu1 %6866  ;;  %v2059_v38 = vmul.f32 %v6928_v23, %v6912_v44 }
 0xc7e   :  { %v6869_v39 = vunpack.i.h.bf16 %v6867_v43  ;;  %v6868_v40 = vunpack.i.l.bf16 %v6867_v43  ;;  %6785 = vmatprep.subr.bf16.mxu0 %v6784_v51 }
 0xc7f   :  { %6787 = vmatpush3.bf16.msra.mxu0 %v6784_v51 }
 0xc80   :  { %v6930_v16 = vpop.eup %6929  ;;  %v6788_v25 = vpack.c.bf16 %v6869_v39, %v6868_v40 }
 0xc81   :  { %v6932_v9 = vpop.eup %6931  ;;  %v2628_v8 = vmul.f32 %v6930_v16, %v6916_v54 }
 0xc82   :  { %6682 = vmatmul.mubr.msk.f32.vlgmr.msra.gmra.mrb[2].mxu0 %vm11113_vm5, %v2059_v38  ;;  %6789 = vmatprep.subr.bf16.mxu1 %v6788_v25  ;;  %v3194_v49 = vmul.f32 %v6932_v9, %v6914_v58 }
 0xc83   :  { %6791 = vmatpush3.bf16.msra.mxu1 %v6788_v25 }
 0xc84   :  { %6695 = vmatprep.mubr.msk.f32.mxu0 %vm11113_vm5, %v3194_v49  ;;  %6698 = vmatprep.subr.msk.mxu1 %vm11111_vm13, %v592_v61 }
 0xc86   :  { %6689 = vmatmul.mubr.msk.f32.vlgmr.msra.gmra.mrb[6].mxu1 %vm11113_vm5, %v2628_v8 }
 0xc87   :  { %6700 = vmatprep.mubr.msk.f32.mxu1 %vm96_vm0, %v6994_v41  ;;  %6699 = vmatpush3.msk.msra.mxu1 %vm11111_vm13, %v592_v61 }
 0xc8a   :  { %6701 = vmatmul.mubr.msk.f32.vlgmr.msra.gmra.mrb[8].mxu1 %vm96_vm0, %v6995_v27 }
 0xcae   :  { %v3191_v30 = vpop.xlane.xlu1 %3190 }
 0xcaf   :  { %6933 = vrcp.f32 %v3191_v30 }
 0xcb2   :  { %v6872_v0 = vpop.permute.xlu1 %6871 }
 0xcb3   :  { %v6874_v6 = vunpack.i.h.bf16 %v6872_v0  ;;  %v6873_v5 = vunpack.i.l.bf16 %v6872_v0 }
 0xcb5   :  { %v6792_v32 = vpack.c.bf16 %v6874_v6, %v6873_v5 }
 0xcb7   :  { %6793 = vmatprep.subr.bf16.mxu0 %v6792_v32 }
 0xcb8   :  { %6795 = vmatpush3.bf16.msra.mxu0 %v6792_v32 }
 0xcb9   :  { %v6934_v37 = vpop.eup %6933  ;;  %6797 = vmatprep.subr.bf16.mxu0 %v6796_v45 }
 0xcba   :  { %v3195_v10 = vmul.f32 %v6934_v37, %v6918_v22  ;;  %v9203_v22 = vpop.permute.xlu0 %4369  ;;  %v3461_v37 = vld [vmem:[#allocation4 + $0x20] sm:$0xff] }
 0xcbc   :  { %6696 = vmatmul.mubr.msk.f32.vlgmr.msra.gmra.mrb[4].mxu0 %vm11113_vm5, %v3195_v10  ;;  %v3462_v10 = vld [vmem:[#allocation4 + $0x28] sm:$0xff] }
 0xcbd   :  { %v6804_v29 = vpack.c.bf16 %v3462_v10, %v3461_v37  ;;  %6799 = vmatpush3.bf16.msra.mxu0 %v6796_v45 }
 0xcbf   :  { %6805 = vmatprep.subr.bf16.mxu1 %v6804_v29 }
 0xcc0   :  { %6807 = vmatpush3.bf16.msra.mxu1 %v6804_v29 }
 0xce5   :  { %v9199_v35 = vpop.permute.xlu1 %4938 }
 0xce9   :  { %v9201_v3 = vpop.permute.xlu1 %5505 }
 0xd42   :  { %v6676_v47 = vpop.f32.mrb[4].mxu1 }
 0xd43   :  { %v1571_v18 = vpop.f32.mrb[5].mxu1 }
 0xd55   :  { %v6683_v55 = vpop.f32.mrb[2].mxu0 }
 0xd56   :  { %3287 = vrot.lane.b32.xlu1 %v6683_v55, %s7069_s28  ;;  %v2140_v42 = vpop.f32.mrb[3].mxu0 }
 0xd59   :  { %v6690_v44 = vpop.f32.mrb[6].mxu1 }
 0xd5a   :  { %3295 = vrot.lane.b32.xlu0 %v6690_v44, %s7073_s8  ;;  %v2707_v60 = vpop.f32.mrb[7].mxu1  ;;  %3285 = vrot.lane.b32.xlu1 %v2140_v42, %s7069_s28  ;;  %v3459_v42 = vld [vmem:[#allocation4 + $0x18] sm:$0xff]  ;;  %s7081_s28 = smov 116  }
 0xd5d   :  { %v6702_v32 = vpop.f32.mrb[8].mxu1 }
 0xd5e   :  { %3293 = vrot.lane.b32.xlu1 %v2707_v60, %s7073_s8  ;;  %v3445_v12 = vpop.f32.mrb[9].mxu1  ;;  %v3471_v60 = vld [vmem:[#allocation4 + $0x40] sm:$0xff] }
 0xd8f   :  { %v6697_v58 = vpop.f32.mrb[4].mxu0 }
 0xd90   :  { %3303 = vrot.lane.b32.xlu1 %v6697_v58, %s7072_s7  ;;  %v3274_v54 = vpop.f32.mrb[5].mxu0  ;;  %v3472_v58 = vld [vmem:[#allocation4 + $0x48] sm:$0xff] }
 0xd94   :  { %3301 = vrot.lane.b32.xlu1 %v3274_v54, %s7072_s7  ;;  %v6828_v54 = vpack.c.bf16 %v3472_v58, %v3471_v60 }
 0xdc8   :  { %v3288_v56 = vpop.permute.xlu1 %3287 }
 0xdc9   :  { %v3308_v19 = vsel %vm1177_vm7, %v6676_v47, %v3288_v56  ;;  %v3464_v47 = vld [vmem:[#allocation4 + $0x38] sm:$0xff] }
 0xdca   :  { %v6808_v55 = vpack.c.bf16 %v3464_v47, %v3463_v36  ;;  %v11336_v36 = vld [vmem:[#allocation22_spill] sm:$0xff] }
 0xdcc   :  { %v3286_v24 = vpop.permute.xlu1 %3285  ;;  %v3296_v31 = vpop.permute.xlu0 %3295  ;;  %6809 = vmatprep.subr.bf16.mxu1 %v6808_v55 }
 0xdcd   :  { %v3310_v14 = vsel %vm11113_vm5, %v3308_v19, %v3296_v31  ;;  %v3307_v46 = vsel %vm1177_vm7, %v1571_v18, %v3286_v24  ;;  %v3458_v18 = vld [vmem:[#allocation4 + $0x10] sm:$0xff]  ;;  %6811 = vmatpush3.bf16.msra.mxu1 %v6808_v55 }
 0xdce   :  { %v6800_v44 = vpack.c.bf16 %v3459_v42, %v3458_v18  ;;  %6829 = vmatprep.subr.bf16.mxu1 %v6828_v54 }
 0xdd0   :  { %v3294_v17 = vpop.permute.xlu1 %3293  ;;  %6801 = vmatprep.subr.bf16.mxu0 %v6800_v44 }
 0xdd1   :  { %v3309_v59 = vsel %vm11113_vm5, %v3307_v46, %v3294_v17  ;;  %6803 = vmatpush3.bf16.msra.mxu0 %v6800_v44  ;;  %v6549_v46 = vld [vmem:[#allocation2 + $0x50] ss:$0 sm:$0xff] }
 0xe02   :  { %v3304_v52 = vpop.permute.xlu1 %3303 }
 0xe03   :  { %v3313_v26 = vsel %vm3311_vm2, %v3310_v14, %v3304_v52 }
 0xe04   :  { %v3319_v1 = vadd.f32 %v6544_v4, %v3313_v26 }
 0xe06   :  { %v3323_v28 = vmin.f32 %v3319_v1, 0.0  ;;  %v3302_v7 = vpop.permute.xlu1 %3301  ;;  %vm3321_vm13 = vcmp.gt.f32.partialorder %v3319_v1, 0.0 }
 0xe07   :  { %v3312_v34 = vsel %vm3311_vm2, %v3309_v59, %v3302_v7  ;;  %v3446_v7 = vadd.f32 %v6549_v46, %v3445_v12 }
 0xe08   :  { %v3326_v57 = vmul.f32 1.442695, %v3323_v28  ;;  %v3318_v53 = vadd.f32 %v6544_v4, %v3312_v34  ;;  %v6547_v4 = vld [vmem:[#allocation2 + $0x40] ss:$0 sm:$0xff] }
 0xe0a   :  { %6935 = vpow2.f32 %v3326_v57  ;;  %v3322_v21 = vmin.f32 %v3318_v53, 0.0  ;;  %vm3320_vm7 = vcmp.gt.f32.partialorder %v3318_v53, 0.0  ;;  %v3451_v57 = vadd.f32 %v6702_v32, %v6549_v46 }
 0xe0c   :  { %v3324_v62 = vmul.f32 1.442695, %v3322_v21  ;;  %v3473_v21 = vld [vmem:[#allocation4 + $0x50] sm:$0xff] }
 0xe0e   :  { %6937 = vpow2.f32 %v3324_v62  ;;  %v3474_v62 = vld [vmem:[#allocation4 + $0x58] sm:$0xff] }
 0xe14   :  { %v6936_v13 = vpop.eup %6935 }
 0xe15   :  { %v6546_v48 = vadd.f32 -1.0, %v6936_v13 }
 0xe17   :  { %v3331_v51 = vsel %vm3321_vm13, %v3319_v1, %v6546_v48  ;;  %v6548_v1 = vld [vmem:[#allocation2 + $0x48] ss:$0 sm:$0xff] }
 0xe18   :  { %v6938_v23 = vpop.eup %6937  ;;  %v3336_v43 = vsel %vm3332_vm9, %v3331_v51, 0.0 }
 0xe19   :  { %3337 = vadd.xlane.f32.xlu0 %v3336_v43  ;;  %v6545_v39 = vadd.f32 -1.0, %v6938_v23  ;;  %v6556_v23 = vld [vmem:[#allocation4 + $0x70] ss:$0 sm:$0xff] }
 0xe1b   :  { %v3330_v40 = vsel %vm3320_vm7, %v3318_v53, %v6545_v39 }
 0xe1c   :  { %v3333_v16 = vsel %vm3332_vm9, %v3330_v40, 0.0 }
 0xe1d   :  { %3334 = vadd.xlane.f32.xlu1 %v3333_v16 }
 0xea6   :  { %v3338_v38 = vpop.xlane.xlu0 %3337 }
 0xea7   :  { %v3341_v25 = vmul.f32 0.03125, %v3338_v38 }
 0xea9   :  { %v3343_v9 = vsub.f32 %v3331_v51, %v3341_v25  ;;  %v6832_v51 = vpack.c.bf16 %v3474_v62, %v3473_v21  ;;  %v11339_v21 = vld [vmem:[#allocation41_spill] sm:$0xff] }
 0xeaa   :  { %v3335_v49 = vpop.xlane.xlu1 %3334 }
 0xeab   :  { %v3340_v8 = vmul.f32 0.03125, %v3335_v49  ;;  %v3345_v41 = vmul.f32 %v3343_v9, %v3343_v9 }
 0xead   :  { %v3342_v30 = vsub.f32 %v3330_v40, %v3340_v8  ;;  %v3349_v0 = vsel %vm3332_vm9, %v3345_v41, 0.0  ;;  %v11334_v8 = vld [vmem:[#allocation21_spill] sm:$0xff] }
 0xeae   :  { %3350 = vadd.xlane.f32.xlu1 %v3349_v0 }
 0xeaf   :  { %v3344_v6 = vmul.f32 %v3342_v30, %v3342_v30 }
 0xeb1   :  { %v3346_v5 = vsel %vm3332_vm9, %v3344_v6, 0.0 }
 0xeb2   :  { %3347 = vadd.xlane.f32.xlu1 %v3346_v5 }
 0xf3b   :  { %v3351_v61 = vpop.xlane.xlu1 %3350 }
 0xf3c   :  { %v3353_v27 = vmul.f32 0.03125, %v3351_v61 }
 0xf3e   :  { %v3355_v56 = vadd.f32 1e-05, %v3353_v27 }
 0xf3f   :  { %v3348_v24 = vpop.xlane.xlu1 %3347 }
 0xf40   :  { %6939 = vrsqrt.f32 %v3355_v56  ;;  %v3352_v17 = vmul.f32 0.03125, %v3348_v24 }
 0xf42   :  { %v3354_v31 = vadd.f32 1e-05, %v3352_v17 }
 0xf44   :  { %6941 = vrsqrt.f32 %v3354_v31 }
 0xf4a   :  { %v6940_v19 = vpop.eup %6939 }
 0xf4b   :  { %v3359_v14 = vmul.f32 %v6940_v19, %v3343_v9  ;;  %v9221_v9 = vld [vmem:[#allocation4 + $0x68] ss:$0 sm:$0xff] }
 0xf4d   :  { %v3365_v26 = vmul.f32 %v6547_v4, %v3359_v14 }
 0xf4e   :  { %v6942_v52 = vpop.eup %6941 }
 0xf4f   :  { %v3358_v59 = vmul.f32 %v6942_v52, %v3342_v30  ;;  %v3371_v34 = vadd.f32 %v6548_v1, %v3365_v26 }
 0xf51   :  { %v3364_v28 = vmul.f32 %v6547_v4, %v3358_v59  ;;  %v3455_v48 = vadd.f32 %v3451_v57, %v3371_v34 }
 0xf53   :  { %v3370_v53 = vadd.f32 %v6548_v1, %v3364_v28 }
 0xf55   :  { %v3454_v13 = vadd.f32 %v3446_v7, %v3370_v53  ;;  %v9289_v53 = vld [vmem:[#allocation4 + $0x78] ss:$0 sm:$0xff] }
 0xf56   :  { %v3873_v62 = vmul.f32 %v9289_v53, %v11339_v21  ;;  %v3867_v63 = vmul.f32 %v9289_v53, %v11369_v33 }
 0xf57   :  { %6711 = vmatprep.mubr.msk.f32.mxu0 %vm3332_vm9, %v3454_v13  ;;  %6722 = vmatprep.mubr.msk.f32.mxu1 %vm3332_vm9, %v3454_v13 }
 0xf58   :  { %6712 = vmatmul.mubr.msk.f32.vlgmr.msra.gmra.mrb[6].mxu0 %vm3332_vm9, %v3455_v48  ;;  %6723 = vmatmul.mubr.msk.f32.vlgmr.msra.gmra.mrb[10].mxu1 %vm3332_vm9, %v3455_v48 }
 0xf59   :  { %6831 = vmatpush3.bf16.msra.mxu1 %v6828_v54  ;;  %6761 = vmatprep.mubr.msk.f32.mxu1 %vm3332_vm9, %v3454_v13 }
 0xf5a   :  { %6833 = vmatprep.subr.bf16.mxu1 %v6832_v51 }
 0xf5d   :  { %6835 = vmatpush3.bf16.msra.mxu1 %v6832_v51 }
 0xf60   :  { %6762 = vmatmul.mubr.msk.f32.vlgmr.msra.gmra.mrb[12].mxu1 %vm3332_vm9, %v3455_v48 }
0x102b   :  { %v6713_v43 = vpop.f32.mrb[6].mxu0  ;;  %v6724_v39 = vpop.f32.mrb[10].mxu1 }
0x102c   :  { %v3637_v40 = vadd.f32 %v6724_v39, %v6556_v23  ;;  %v9219_v16 = vpop.f32.mrb[7].mxu0  ;;  %v3631_v38 = vpop.f32.mrb[11].mxu1  ;;  %v9228_v37 = vadd.f32 %v6713_v43, %v9221_v9 }
0x102d   :  { %v3632_v25 = vadd.f32 %v6556_v23, %v3631_v38 }
0x102e   :  { %v3691_v49 = vcombine.high %v3637_v40, %v3637_v40  ;;  %v3698_v41 = vrot.slane %v3637_v40, %v11334_v8  ;;  %11335 = vst [vmem:[#allocation73_spill] sm:$0xff] %v9228_v37 }
0x102f   :  { %v3642_v30 = vcombine.high %v3632_v25, %v3632_v25  ;;  %v3649_v0 = vrot.slane %v3632_v25, %v11334_v8 }
0x1030   :  { %v3705_v6 = vrot.slane %v3691_v49, %v11334_v8  ;;  %v3706_v5 = vcombine.high %v3698_v41, %v3698_v41  ;;  %v3714_v32 = vrot.slane %v3698_v41, %v11334_v8 }
0x1031   :  { %v3656_v10 = vrot.slane %v3642_v30, %v11334_v8  ;;  %v3657_v50 = vcombine.high %v3649_v0, %v3649_v0  ;;  %v3665_v55 = vrot.slane %v3649_v0, %v11334_v8 }
0x1032   :  { %v3707_v29 = vcombine.high %v3705_v6, %v3705_v6  ;;  %v3721_v11 = vrot.slane %v3705_v6, %v11334_v8  ;;  %v3728_v45 = vrot.slane %v3706_v5, %v11334_v8  ;;  %v3736_v12 = vcombine.high %v3714_v32, %v3714_v32 }
0x1033   :  { %v3775_v47 = vrot.slane %v3714_v32, %v11336_v36  ;;  %v3658_v18 = vcombine.high %v3656_v10, %v3656_v10  ;;  %v3672_v42 = vrot.slane %v3656_v10, %v11334_v8  ;;  %v9236_v44 = vpop.f32.mrb[12].mxu1  ;;  %v3679_v31 = vrot.slane %v3657_v50, %v11334_v8 }
0x1034   :  { %11337 = vst [vmem:[#allocation74_spill] sm:$0xff] %v9236_v44  ;;  %v3735_v60 = vrot.slane %v3707_v29, %v11334_v8  ;;  %v3737_v58 = vcombine.high %v3721_v11, %v3721_v11  ;;  %v3738_v54 = vcombine.high %v3728_v45, %v3728_v45  ;;  %v9240_v61 = vrot.slane %v3728_v45, %v11336_v36  ;;  %v9242_v27 = vpop.f32.mrb[13].mxu1 }
0x1035   :  { %11338 = vst [vmem:[#allocation75_spill] sm:$0xff] %v9242_v27  ;;  %v9245_v56 = vrot.slane %v3736_v12, %v11336_v36  ;;  %v9248_v24 = vrot.slane %v3721_v11, %v11336_v36  ;;  %v3837_v17 = vadd.f32 %v3775_v47, %v9228_v37  ;;  %v3686_v59 = vrot.slane %v3658_v18, %v11334_v8 }
0x1036   :  { %v3739_v19 = vcombine.high %v3735_v60, %v3735_v60  ;;  %v9253_v4 = vrot.slane %v3738_v54, %v11336_v36  ;;  %v9256_v14 = vrot.slane %v3735_v60, %v11336_v36  ;;  %v9259_v52 = vrot.slane %v3737_v58, %v11336_v36  ;;  %v11342_v54 = vld [vmem:[#allocation25_spill] sm:$0xff] }
0x1037   :  { %v9263_v26 = vadd.f32 %v9240_v61, %v9228_v37  ;;  %v9267_v1 = vadd.f32 %v9245_v56, %v9228_v37  ;;  %v9271_v46 = vadd.f32 %v9248_v24, %v9228_v37  ;;  %v3687_v48 = vcombine.high %v3665_v55, %v3665_v55 }
0x1038   :  { %v9275_v28 = vrot.slane %v3739_v19, %v11336_v36  ;;  %v9279_v7 = vadd.f32 %v9253_v4, %v9228_v37  ;;  %v9283_v34 = vadd.f32 %v9256_v14, %v9228_v37  ;;  %v9287_v57 = vadd.f32 %v9259_v52, %v9228_v37 }
0x1039   :  { %v3688_v51 = vcombine.high %v3672_v42, %v3672_v42  ;;  %v3689_v23 = vcombine.high %v3679_v31, %v3679_v31  ;;  %v3690_v43 = vcombine.high %v3686_v59, %v3686_v59  ;;  %v3743_v39 = vrot.slane %v3665_v55, %v11336_v36 }
0x103a   :  { %v9295_v13 = vadd.f32 %v9275_v28, %v9228_v37  ;;  %v9299_v40 = vrot.slane %v3679_v31, %v11336_v36  ;;  %v9302_v38 = vrot.slane %v3672_v42, %v11336_v36  ;;  %v9305_v25 = vrot.slane %v3686_v59, %v11336_v36  ;;  %v11341_v42 = vld [vmem:[#allocation40_spill] sm:$0xff] }
0x103b   :  { %v9308_v49 = vrot.slane %v3687_v48, %v11336_v36  ;;  %v9311_v8 = vrot.slane %v3689_v23, %v11336_v36  ;;  %v9314_v41 = vrot.slane %v3688_v51, %v11336_v36  ;;  %v9317_v30 = vrot.slane %v3690_v43, %v11336_v36 }
0x103c   :  { %v3821_v0 = vadd.f32 %v3743_v39, %v9228_v37  ;;  %v9322_v6 = vadd.f32 %v9299_v40, %v9228_v37  ;;  %v3905_v5 = vadd.f32 %v3873_v62, %v3837_v17  ;;  %v9334_v50 = vadd.f32 %v9302_v38, %v9228_v37 }
0x103d   :  { %v9326_v32 = vadd.f32 %v9308_v49, %v9228_v37  ;;  %v9330_v10 = vadd.f32 %v9311_v8, %v9228_v37  ;;  %v9338_v29 = vadd.f32 %v9305_v25, %v9228_v37  ;;  %v9342_v11 = vadd.f32 %v9314_v41, %v9228_v37 }
0x103e   :  { %v9346_v45 = vadd.f32 %v9317_v30, %v9228_v37  ;;  %v3969_v12 = vmul.f32 0.2, %v3905_v5  ;;  %v9350_v18 = vadd.f32 %v9221_v9, %v9219_v16  ;;  %v9354_v55 = vrot.slane %v9177_v2, %v11336_v36  ;;  %v11343_v36 = vld [vmem:[#allocation24_spill] sm:$0xff]  ;;  %v11361_v37 = vld [vmem:[#allocation37_spill] sm:$0xff] }
0x103f   :  { %v3872_v60 = vmul.f32 %v9289_v53, %v11341_v42  ;;  %vm3937_vm13 = vcmp.gt.f32.partialorder %v3905_v5, 0.0  ;;  %v3857_v17 = vmul.f32 %v9289_v53, %v11342_v54 }
0x1040   :  { %11340 = vst [vmem:[#allocation76_spill] sm:$0xff] %v9350_v18  ;;  %v3836_v58 = vadd.f32 %v3775_v47, %v9350_v18  ;;  %v4001_v31 = vsel %vm3937_vm13, %v3905_v5, %v3969_v12  ;;  %v3820_v16 = vadd.f32 %v3743_v39, %v9350_v18  ;;  %v3856_v47 = vmul.f32 %v9289_v53, %v11343_v36  ;;  %v11347_v36 = vld [vmem:[#allocation42_spill] sm:$0xff] }
0x1041   :  { %v4389_v19 = vmul.f32 %v9203_v22, %v4001_v31  ;;  %v3889_v9 = vadd.f32 %v3857_v17, %v3821_v0  ;;  %v9364_v21 = vmul.f32 %v9354_v55, %v4001_v31  ;;  %v4958_v48 = vmul.f32 %v9199_v35, %v4001_v31 }
0x1042   :  { %v3904_v59 = vadd.f32 %v3872_v60, %v3836_v58  ;;  %v3888_v51 = vadd.f32 %v3856_v47, %v3820_v16  ;;  %v5525_v0 = vmul.f32 %v9201_v3, %v4001_v31  ;;  %v11344_v60 = vld [vmem:[#allocation45_spill] sm:$0xff]  ;;  %v3838_v54 = vadd.f32 %v9240_v61, %v9350_v18  ;;  %v11345_v31 = vld [vmem:[#allocation47_spill] sm:$0xff] }
0x1043   :  { %4470 = vrot.lane.b32.xlu1 %v4389_v19, %s7080_s0  ;;  %v3953_v23 = vmul.f32 0.2, %v3889_v9  ;;  %vm3921_vm9 = vcmp.gt.f32.partialorder %v3889_v9, 0.0  ;;  %v3875_v58 = vmul.f32 %v9289_v53, %v11344_v60  ;;  %v3840_v17 = vadd.f32 %v9245_v56, %v9350_v18 }
0x1044   :  { %vm3936_vm2 = vcmp.gt.f32.partialorder %v3904_v59, 0.0  ;;  %v3968_v2 = vmul.f32 0.2, %v3904_v59  ;;  %v3952_v5 = vmul.f32 0.2, %v3888_v51  ;;  %vm3920_vm7 = vcmp.gt.f32.partialorder %v3888_v51, 0.0 }
0x1045   :  { %v3985_v42 = vsel %vm3921_vm9, %v3889_v9, %v3953_v23  ;;  %v3881_v19 = vmul.f32 %v9289_v53, %v11345_v31  ;;  %v3874_v47 = vmul.f32 %v9289_v53, %v11347_v36 }
0x1046   :  { %v4000_v62 = vsel %vm3936_vm2, %v3904_v59, %v3968_v2  ;;  %v11346_v59 = vld [vmem:[#allocation44_spill] sm:$0xff]  ;;  %v4373_v9 = vmul.f32 %v9203_v22, %v3985_v42  ;;  %v3844_v2 = vadd.f32 %v9248_v24, %v9350_v18  ;;  %v3984_v56 = vsel %vm3920_vm7, %v3888_v51, %v3952_v5 }
0x1047   :  { %v4388_v43 = vmul.f32 %v9203_v22, %v4000_v62  ;;  %v9372_v39 = vmul.f32 %v9354_v55, %v4000_v62  ;;  %5039 = vrot.lane.b32.xlu1 %v4958_v48, %s7075_s9  ;;  %v4957_v12 = vmul.f32 %v9199_v35, %v4000_v62  ;;  %v3877_v16 = vmul.f32 %v9289_v53, %v11346_v59  ;;  %v11348_v48 = vld [vmem:[#allocation43_spill] sm:$0xff] }
0x1048   :  { %v3876_v61 = vmul.f32 %v9289_v53, %v11348_v48  ;;  %v5524_v23 = vmul.f32 %v9201_v3, %v4000_v62  ;;  %v3913_v24 = vadd.f32 %v3881_v19, %v9271_v46  ;;  %v3906_v31 = vadd.f32 %v3874_v47, %v3838_v54 }
0x1049   :  { %4468 = vrot.lane.b32.xlu0 %v4388_v43, %s7080_s0  ;;  %v11349_v43 = vld [vmem:[#allocation50_spill] sm:$0xff]  ;;  %v3909_v60 = vadd.f32 %v3877_v16, %v9267_v1  ;;  %v9406_v36 = vmul.f32 %v9354_v55, %v3985_v42  ;;  %v4942_v62 = vmul.f32 %v9199_v35, %v3985_v42  ;;  %v9410_v5 = vmul.f32 %v9354_v55, %v3984_v56 }
0x104a   :  { %v3908_v59 = vadd.f32 %v3876_v61, %v3840_v17  ;;  %v3970_v54 = vmul.f32 0.2, %v3906_v31  ;;  %v3977_v19 = vmul.f32 0.2, %v3913_v24  ;;  %vm3938_vm9 = vcmp.gt.f32.partialorder %v3906_v31, 0.0 }
0x104b   :  { %5606 = vrot.lane.b32.xlu1 %v5525_v0, %s7081_s28  ;;  %v3880_v0 = vmul.f32 %v9289_v53, %v11349_v43  ;;  %vm3941_vm2 = vcmp.gt.f32.partialorder %v3909_v60, 0.0  ;;  %v3973_v46 = vmul.f32 0.2, %v3909_v60  ;;  %vm3945_vm4 = vcmp.gt.f32.partialorder %v3913_v24, 0.0 }
0x104c   :  { %v3972_v17 = vmul.f32 0.2, %v3908_v59  ;;  %vm3940_vm7 = vcmp.gt.f32.partialorder %v3908_v59, 0.0  ;;  %v3822_v48 = vadd.f32 %v9299_v40, %v9350_v18  ;;  %v9426_v61 = vsel %vm3938_vm9, %v3906_v31, %v3970_v54  ;;  %v11352_v40 = vld [vmem:[#allocation28_spill] sm:$0xff]  ;;  %v11353_v31 = vld [vmem:[#allocation29_spill] sm:$0xff] }
0x104d   :  { %5037 = vrot.lane.b32.xlu0 %v4957_v12, %s7075_s9  ;;  %v3907_v12 = vadd.f32 %v3875_v58, %v9263_v26  ;;  %v3912_v51 = vadd.f32 %v3880_v0, %v3844_v2  ;;  %v4372_v26 = vmul.f32 %v9203_v22, %v3984_v56  ;;  %v5509_v58 = vmul.f32 %v9201_v3, %v3985_v42  ;;  %v11350_v2 = vld [vmem:[#allocation26_spill] sm:$0xff] }
0x104e   :  { %v3858_v47 = vmul.f32 %v9289_v53, %v11350_v2  ;;  %v9431_v43 = vsel %vm3940_vm7, %v3908_v59, %v3972_v17  ;;  %v9433_v0 = vsel %vm3945_vm4, %v3913_v24, %v3977_v19  ;;  %v3861_v54 = vmul.f32 %v9289_v53, %v11353_v31  ;;  %v11359_v19 = vld [vmem:[#allocation33_spill] sm:$0xff] }
0x104f   :  { %4438 = vrot.lane.b32.xlu1 %v4373_v9, %s7080_s0  ;;  %vm3939_vm13 = vcmp.gt.f32.partialorder %v3907_v12, 0.0  ;;  %v3971_v1 = vmul.f32 0.2, %v3907_v12  ;;  %v3976_v16 = vmul.f32 0.2, %v3912_v51  ;;  %v4941_v9 = vmul.f32 %v9199_v35, %v3984_v56 }
0x1050   :  { %vm3944_vm5 = vcmp.gt.f32.partialorder %v3912_v51, 0.0  ;;  %v5508_v24 = vmul.f32 %v9201_v3, %v3984_v56  ;;  %v11358_v56 = vld [vmem:[#allocation32_spill] sm:$0xff]  ;;  %v3893_v31 = vadd.f32 %v3861_v54, %v9326_v32  ;;  %v11365_v32 = vld [vmem:[#allocation30_spill] sm:$0xff] }
0x1051   :  { %5604 = vrot.lane.b32.xlu0 %v5524_v23, %s7081_s28  ;;  %v9423_v42 = vsel %vm3939_vm13, %v3907_v12, %v3971_v1  ;;  %v9429_v23 = vsel %vm3941_vm2, %v3909_v60, %v3973_v46  ;;  %v3824_v12 = vadd.f32 %v9308_v49, %v9350_v18  ;;  %v9441_v1 = vsel %vm3944_vm5, %v3912_v51, %v3976_v16 }
0x1052   :  { %v3828_v60 = vadd.f32 %v9302_v38, %v9350_v18  ;;  %v9450_v59 = vmul.f32 %v9354_v55, %v9423_v42  ;;  %v9454_v46 = vmul.f32 %v9354_v55, %v9429_v23  ;;  %v9458_v49 = vmul.f32 %v9354_v55, %v9426_v61 }
0x1053   :  { %5007 = vrot.lane.b32.xlu1 %v4942_v62, %s7075_s9  ;;  %v11351_v62 = vld [vmem:[#allocation27_spill] sm:$0xff]  ;;  %v9462_v51 = vmul.f32 %v9354_v55, %v9433_v0  ;;  %v9466_v38 = vmul.f32 %v9354_v55, %v9431_v43  ;;  %v3864_v17 = vmul.f32 %v9289_v53, %v11358_v56  ;;  %v3865_v16 = vmul.f32 %v9289_v53, %v11359_v19 }
0x1054   :  { %11354 = vst [vmem:[#allocation77_spill] sm:$0xff] %v9454_v46  ;;  %11355 = vst [vmem:[#allocation78_spill] sm:$0xff] %v9458_v49  ;;  %v9475_v2 = vmul.f32 %v9354_v55, %v9441_v1  ;;  %v9482_v56 = vmul.f32 %v9289_v53, %v11361_v37  ;;  %v11362_v19 = vld [vmem:[#allocation39_spill] sm:$0xff]  ;;  %v3957_v54 = vmul.f32 0.2, %v3893_v31  ;;  %vm3925_vm13 = vcmp.gt.f32.partialorder %v3893_v31, 0.0 }
0x1055   :  { %4436 = vrot.lane.b32.xlu0 %v4372_v26, %s7080_s0  ;;  %v3859_v26 = vmul.f32 %v9289_v53, %v11351_v62  ;;  %11356 = vst [vmem:[#allocation79_spill] sm:$0xff] %v9462_v51  ;;  %11357 = vst [vmem:[#allocation80_spill] sm:$0xff] %v9466_v38  ;;  %v3896_v44 = vadd.f32 %v3864_v17, %v3828_v60  ;;  %v3897_v27 = vadd.f32 %v3865_v16, %v9334_v50  ;;  %v11366_v17 = vld [vmem:[#allocation53_spill] sm:$0xff] }
0x1056   :  { %11360 = vst [vmem:[#allocation60_spill] sm:$0xff] %v9475_v2  ;;  %v9496_v16 = vmul.f32 %v9289_v53, %v11366_v17  ;;  %v3879_v2 = vmul.f32 %v9289_v53, %v11370_v15  ;;  %v9511_v38 = vsel %vm3925_vm13, %v3893_v31, %v3957_v54  ;;  %v3842_v46 = vadd.f32 %v9253_v4, %v9350_v18  ;;  %v11371_v15 = vld [vmem:[#allocation36_spill] sm:$0xff]  ;;  %v11373_v31 = vld [vmem:[#allocation46_spill] sm:$0xff] }
0x1057   :  { %5574 = vrot.lane.b32.xlu1 %v5509_v58, %s7081_s28  ;;  %v3860_v58 = vmul.f32 %v9289_v53, %v11352_v40  ;;  %v3891_v62 = vadd.f32 %v3859_v26, %v9322_v6  ;;  %v3885_v6 = vmul.f32 %v9289_v53, %v11364_v20  ;;  %v3960_v37 = vmul.f32 0.2, %v3896_v44  ;;  %v11367_v20 = vld [vmem:[#allocation31_spill] sm:$0xff] }
0x1058   :  { %v3961_v60 = vmul.f32 0.2, %v3897_v27  ;;  %vm3928_vm9 = vcmp.gt.f32.partialorder %v3896_v44, 0.0  ;;  %vm3929_vm7 = vcmp.gt.f32.partialorder %v3897_v27, 0.0  ;;  %v3830_v4 = vadd.f32 %v9305_v25, %v9350_v18 }
0x1059   :  { %5005 = vrot.lane.b32.xlu0 %v4941_v9, %s7075_s9  ;;  %v3890_v9 = vadd.f32 %v3858_v47, %v3822_v48  ;;  %v3892_v40 = vadd.f32 %v3860_v58, %v3824_v12  ;;  %v9486_v47 = vmul.f32 %v9289_v53, %v11362_v19  ;;  %v11363_v48 = vld [vmem:[#allocation49_spill] sm:$0xff]  ;;  %v3862_v58 = vmul.f32 %v9289_v53, %v11365_v32 }
0x105a   :  { %v3955_v50 = vmul.f32 0.2, %v3891_v62  ;;  %vm3923_vm4 = vcmp.gt.f32.partialorder %v3891_v62, 0.0  ;;  %v3863_v19 = vmul.f32 %v9289_v53, %v11367_v20  ;;  %v3826_v20 = vadd.f32 %v9311_v8, %v9350_v18 }
0x105b   :  { %vm3922_vm5 = vcmp.gt.f32.partialorder %v3890_v9, 0.0  ;;  %v3954_v26 = vmul.f32 0.2, %v3890_v9  ;;  %v3956_v12 = vmul.f32 0.2, %v3892_v40  ;;  %vm3924_vm2 = vcmp.gt.f32.partialorder %v3892_v40, 0.0 }
0x105c   :  { %v9509_v17 = vsel %vm3923_vm4, %v3891_v62, %v3955_v50  ;;  %v9519_v49 = vsel %vm3928_vm9, %v3896_v44, %v3960_v37  ;;  %v9521_v33 = vsel %vm3929_vm7, %v3897_v27, %v3961_v60  ;;  %v3878_v50 = vmul.f32 %v9289_v53, %v11373_v31  ;;  %v11380_v31 = vld [vmem:[#allocation54_spill] sm:$0xff] }
0x105d   :  { %5572 = vrot.lane.b32.xlu0 %v5508_v24, %s7081_s28  ;;  %v3883_v24 = vmul.f32 %v9289_v53, %v11363_v48  ;;  %v11368_v48 = vld [vmem:[#allocation34_spill] sm:$0xff]  ;;  %v9507_v51 = vsel %vm3922_vm5, %v3890_v9, %v3954_v26  ;;  %v3868_v9 = vmul.f32 %v9289_v53, %v11371_v15  ;;  %v3911_v8 = vadd.f32 %v3879_v2, %v9279_v7  ;;  %v11379_v15 = vld [vmem:[#allocation52_spill] sm:$0xff] }
0x105e   :  { %v3866_v32 = vmul.f32 %v9289_v53, %v11368_v48  ;;  %v9517_v48 = vsel %vm3924_vm2, %v3892_v40, %v3956_v12  ;;  %v11372_v26 = vld [vmem:[#allocation38_spill] sm:$0xff]  ;;  %v9536_v44 = vmul.f32 %v9354_v55, %v9509_v17  ;;  %v9540_v27 = vmul.f32 %v9354_v55, %v9511_v38 }
0x105f   :  { %v9527_v62 = vmul.f32 %v9289_v53, %v11372_v26  ;;  %v9544_v40 = vmul.f32 %v9354_v55, %v9507_v51  ;;  %v3910_v12 = vadd.f32 %v3878_v50, %v3842_v46  ;;  %v9548_v54 = vmul.f32 %v9354_v55, %v9521_v33 }
0x1060   :  { %11374 = vst [vmem:[#allocation59_spill] sm:$0xff] %v9540_v27  ;;  %v9552_v7 = vmul.f32 %v9354_v55, %v9517_v48  ;;  %v9556_v25 = vmul.f32 %v9354_v55, %v9519_v49  ;;  %v3832_v2 = vadd.f32 %v9314_v41, %v9350_v18  ;;  %v3894_v37 = vadd.f32 %v3862_v58, %v3826_v20 }
0x1061   :  { %11375 = vst [vmem:[#allocation62_spill] sm:$0xff] %v9544_v40  ;;  %11376 = vst [vmem:[#allocation61_spill] sm:$0xff] %v9548_v54  ;;  %v3895_v60 = vadd.f32 %v3863_v19, %v9330_v10  ;;  %v3899_v46 = vadd.f32 %v3867_v63, %v9338_v29  ;;  %v3882_v26 = vmul.f32 %v9289_v53, %v11379_v15  ;;  %v11381_v54 = vld [vmem:[#allocation55_spill] sm:$0xff]  ;;  %vm3943_vm5 = vcmp.gt.f32.partialorder %v3911_v8, 0.0 }
0x1062   :  { %11377 = vst [vmem:[#allocation69_spill] sm:$0xff] %v9552_v7  ;;  %11378 = vst [vmem:[#allocation10_spill] sm:$0xff] %v9556_v25  ;;  %v3884_v50 = vmul.f32 %v9289_v53, %v11380_v31  ;;  %v3886_v7 = vmul.f32 %v9289_v53, %v11381_v54  ;;  %v3898_v27 = vadd.f32 %v3866_v32, %v3830_v4  ;;  %vm3942_vm4 = vcmp.gt.f32.partialorder %v3910_v12, 0.0 }
0x1063   :  { %v3915_v25 = vadd.f32 %v3883_v24, %v9283_v34  ;;  %v3917_v40 = vadd.f32 %v3885_v6, %v9287_v57  ;;  %v3846_v41 = vadd.f32 %v9256_v14, %v9350_v18  ;;  %v3974_v63 = vmul.f32 0.2, %v3910_v12 }
0x1064   :  { %v3975_v10 = vmul.f32 0.2, %v3911_v8  ;;  %v3848_v29 = vadd.f32 %v9259_v52, %v9350_v18  ;;  %v3900_v58 = vadd.f32 %v3868_v9, %v3832_v2  ;;  %v3958_v19 = vmul.f32 0.2, %v3894_v37 }
0x1065   :  { %v3959_v20 = vmul.f32 0.2, %v3895_v60  ;;  %v3963_v15 = vmul.f32 0.2, %v3899_v46  ;;  %vm3926_vm13 = vcmp.gt.f32.partialorder %v3894_v37, 0.0  ;;  %vm3927_vm2 = vcmp.gt.f32.partialorder %v3895_v60, 0.0 }
0x1066   :  { %v3962_v53 = vmul.f32 0.2, %v3898_v27  ;;  %vm3931_vm9 = vcmp.gt.f32.partialorder %v3899_v46, 0.0  ;;  %v3834_v34 = vadd.f32 %v9317_v30, %v9350_v18  ;;  %v3901_v14 = vadd.f32 %v9482_v56, %v9342_v11 }
0x1067   :  { %v3914_v57 = vadd.f32 %v3882_v26, %v3846_v41  ;;  %vm3930_vm7 = vcmp.gt.f32.partialorder %v3898_v27, 0.0  ;;  %v9579_v24 = vsel %vm3942_vm4, %v3910_v12, %v3974_v63  ;;  %v9582_v52 = vsel %vm3943_vm5, %v3911_v8, %v3975_v10 }
0x1068   :  { %vm3947_vm6 = vcmp.gt.f32.partialorder %v3915_v25, 0.0  ;;  %v3916_v6 = vadd.f32 %v3884_v50, %v3848_v29  ;;  %v9584_v32 = vsel %vm3926_vm13, %v3894_v37, %v3958_v19  ;;  %v9586_v9 = vsel %vm3927_vm2, %v3895_v60, %v3959_v20 }
0x1069   :  { %v9588_v4 = vsel %vm3931_vm9, %v3899_v46, %v3963_v15  ;;  %v3964_v30 = vmul.f32 0.2, %v3900_v58  ;;  %v3979_v54 = vmul.f32 0.2, %v3915_v25  ;;  %v3981_v2 = vmul.f32 0.2, %v3917_v40 }
0x106a   :  { %v9590_v11 = vsel %vm3930_vm7, %v3898_v27, %v3962_v53  ;;  %vm3932_vm3 = vcmp.gt.f32.partialorder %v3900_v58, 0.0  ;;  %v3978_v56 = vmul.f32 0.2, %v3914_v57  ;;  %v9594_v12 = vmul.f32 %v9354_v55, %v9582_v52 }
0x106b   :  { %v9598_v8 = vmul.f32 %v9354_v55, %v9579_v24  ;;  %v3850_v37 = vadd.f32 %v9275_v28, %v9350_v18  ;;  %v3980_v60 = vmul.f32 0.2, %v3916_v6  ;;  %v9604_v46 = vmul.f32 %v9354_v55, %v9586_v9 }
0x106c   :  { %v9608_v27 = vmul.f32 %v9354_v55, %v9588_v4  ;;  %v9612_v26 = vmul.f32 %v9354_v55, %v9584_v32  ;;  %v9614_v31 = vsel %vm3932_vm3, %v3900_v58, %v3964_v30  ;;  %v3965_v50 = vmul.f32 0.2, %v3901_v14 }
0x106d   :  { %v3918_v41 = vadd.f32 %v3886_v7, %v3850_v37  ;;  %v9618_v28 = vmul.f32 %v9354_v55, %v9590_v11  ;;  %vm3946_vm5 = vcmp.gt.f32.partialorder %v3914_v57, 0.0  ;;  %vm3948_vm4 = vcmp.gt.f32.partialorder %v3916_v6, 0.0 }
0x106e   :  { %vm3933_vm13 = vcmp.gt.f32.partialorder %v3901_v14, 0.0  ;;  %v3919_v63 = vadd.f32 %v9496_v16, %v9295_v13  ;;  %v4103_v10 = vsel %vm96_vm0, %v9364_v21, 0.0  ;;  %vm3949_vm2 = vcmp.gt.f32.partialorder %v3917_v40, 0.0 }
0x106f   :  { %vm3950_vm9 = vcmp.gt.f32.partialorder %v3918_v41, 0.0  ;;  %v3982_v29 = vmul.f32 0.2, %v3918_v41  ;;  %v4100_v58 = vsel %vm96_vm0, %v9372_v39, 0.0  ;;  %v3902_v7 = vadd.f32 %v9527_v62, %v3834_v34 }
0x1070   :  { %v3903_v19 = vadd.f32 %v9486_v47, %v9346_v45  ;;  %v9631_v20 = vmul.f32 %v9354_v55, %v9614_v31  ;;  %v9633_v15 = vsel %vm3946_vm5, %v3914_v57, %v3978_v56  ;;  %v9636_v13 = vsel %vm3947_vm6, %v3915_v25, %v3979_v54 }
0x1071   :  { %v9638_v21 = vsel %vm3948_vm4, %v3916_v6, %v3980_v60  ;;  %v9640_v16 = vsel %vm3933_vm13, %v3901_v14, %v3965_v50  ;;  %v9642_v39 = vsel %vm3949_vm2, %v3917_v40, %v3981_v2  ;;  %v9644_v62 = vsel %vm3950_vm9, %v3918_v41, %v3982_v29 }
0x1072   :  { %11382 = vst [vmem:[#allocation9_spill] sm:$0xff] %v9631_v20  ;;  %v3983_v45 = vmul.f32 0.2, %v3919_v63  ;;  %vm3934_vm3 = vcmp.gt.f32.partialorder %v3902_v7, 0.0  ;;  %vm3951_vm7 = vcmp.gt.f32.partialorder %v3919_v63, 0.0  ;;  %vm3935_vm1 = vcmp.gt.f32.partialorder %v3903_v19, 0.0 }
0x1073   :  { %v3966_v47 = vmul.f32 0.2, %v3902_v7  ;;  %v3967_v53 = vmul.f32 0.2, %v3903_v19  ;;  %v9648_v25 = vmul.f32 %v9354_v55, %v9640_v16  ;;  %v9652_v34 = vmul.f32 %v9354_v55, %v9633_v15 }
0x1074   :  { %v9656_v40 = vmul.f32 %v9354_v55, %v9636_v13  ;;  %v9660_v14 = vmul.f32 %v9354_v55, %v9638_v21  ;;  %v9668_v30 = vmul.f32 %v9354_v55, %v9642_v39  ;;  %v9672_v54 = vmul.f32 %v9354_v55, %v9644_v62 }
0x1075   :  { %11383 = vst [vmem:[#allocation13_spill] sm:$0xff] %v9648_v25  ;;  %11384 = vst [vmem:[#allocation17_spill] sm:$0xff] %v9652_v34  ;;  %v9662_v57 = vsel %vm3934_vm3, %v3902_v7, %v3966_v47  ;;  %v9664_v6 = vsel %vm3935_vm1, %v3903_v19, %v3967_v53  ;;  %v9674_v2 = vsel %vm3951_vm7, %v3919_v63, %v3983_v45  ;;  %vm11432_vm1 = vcmask 1046534  }
0x1076   :  { %11385 = vst [vmem:[#allocation19_spill] sm:$0xff] %v9656_v40  ;;  %11386 = vst [vmem:[#allocation12_spill] sm:$0xff] %v9660_v14  ;;  %v9678_v56 = vmul.f32 %v9354_v55, %v9662_v57  ;;  %v9682_v37 = vmul.f32 %v9354_v55, %v9664_v6  ;;  %v9686_v60 = vmul.f32 %v9354_v55, %v9674_v2  ;;  %vm11433_vm6 = vcmask 1047559  }
0x1077   :  { %11387 = vst [vmem:[#allocation82_spill] sm:$0xff] %v9668_v30  ;;  %11388 = vst [vmem:[#allocation63_spill] sm:$0xff] %v9672_v54  ;;  %v4391_v50 = vmul.f32 %v9203_v22, %v9423_v42  ;;  %v4393_v41 = vmul.f32 %v9203_v22, %v9429_v23  ;;  %v4390_v63 = vmul.f32 %v9203_v22, %v9426_v61  ;;  %v4085_v30 = vsel %vm96_vm0, %v9608_v27, 0.0 }
0x1078   :  { %11389 = vst [vmem:[#allocation66_spill] sm:$0xff] %v9678_v56  ;;  %11390 = vst [vmem:[#allocation11_spill] sm:$0xff] %v9682_v37  ;;  %v4392_v55 = vmul.f32 %v9203_v22, %v9431_v43  ;;  %v4960_v29 = vmul.f32 %v9199_v35, %v9423_v42  ;;  %v4962_v7 = vmul.f32 %v9199_v35, %v9429_v23  ;;  %v4082_v54 = vsel %vm96_vm0, %v9618_v28, 0.0 }
0x1079   :  { %11391 = vst [vmem:[#allocation84_spill] sm:$0xff] %v9686_v60  ;;  %v4959_v19 = vmul.f32 %v9199_v35, %v9426_v61  ;;  %v4966_v45 = vmul.f32 %v9199_v35, %v9433_v0  ;;  %v4961_v47 = vmul.f32 %v9199_v35, %v9431_v43  ;;  %v5527_v53 = vmul.f32 %v9201_v3, %v9423_v42  ;;  %vm11437_vm13 = vmmov %vm11432_vm1 }
0x107a   :  { %v5533_v42 = vmul.f32 %v9201_v3, %v9433_v0  ;;  %v4387_v27 = vmul.f32 %v9203_v22, %v9664_v6  ;;  %vm11436_vm4 = vcmask 130048   ;;  %vm11438_vm2 = vmmov %vm11433_vm6 }
0x107b   :  { %4101 = vadd.xlane.f32.xlu1 %v4100_v58  ;;  %v4396_v58 = vmul.f32 %v9203_v22, %v9441_v1  ;;  %vm11440_vm3 = vmmov %vm11436_vm4 }
0x107c   :  { %4104 = vadd.xlane.f32.xlu0 %v4103_v10  ;;  %v4397_v10 = vmul.f32 %v9203_v22, %v9433_v0  ;;  %v4377_v0 = vmul.f32 %v9203_v22, %v9511_v38  ;;  %vm11441_vm7 = vmmov %vm11432_vm1 }
0x108c   :  { %4474 = vrot.lane.b32.xlu1 %v4391_v50, %s7080_s0  ;;  %v4965_v50 = vmul.f32 %v9199_v35, %v9441_v1 }
0x1090   :  { %4478 = vrot.lane.b32.xlu1 %v4393_v41, %s7080_s0  ;;  %v5529_v41 = vmul.f32 %v9201_v3, %v9429_v23  ;;  %v5532_v23 = vmul.f32 %v9201_v3, %v9441_v1  ;;  %v4374_v1 = vmul.f32 %v9203_v22, %v9507_v51 }
0x1092   :  { %4472 = vrot.lane.b32.xlu0 %v4390_v63, %s7080_s0  ;;  %v5526_v63 = vmul.f32 %v9201_v3, %v9426_v61  ;;  %v4055_v61 = vsel %vm96_vm0, %v9406_v36, 0.0  ;;  %v4381_v36 = vmul.f32 %v9203_v22, %v9521_v33 }
0x1094   :  { %4486 = vrot.lane.b32.xlu1 %v4397_v10, %s7080_s0  ;;  %v5528_v10 = vmul.f32 %v9201_v3, %v9431_v43  ;;  %v4375_v43 = vmul.f32 %v9203_v22, %v9509_v17 }
0x1096   :  { %4476 = vrot.lane.b32.xlu0 %v4392_v55, %s7080_s0  ;;  %v4052_v55 = vsel %vm96_vm0, %v9410_v5, 0.0  ;;  %v4376_v5 = vmul.f32 %v9203_v22, %v9517_v48 }
0x1098   :  { %5043 = vrot.lane.b32.xlu1 %v4960_v29, %s7075_s9  ;;  %v4944_v29 = vmul.f32 %v9199_v35, %v9509_v17 }
0x109a   :  { %4484 = vrot.lane.b32.xlu0 %v4396_v58, %s7080_s0  ;;  %v4380_v58 = vmul.f32 %v9203_v22, %v9519_v49 }
0x109c   :  { %5047 = vrot.lane.b32.xlu1 %v4962_v7, %s7075_s9  ;;  %v4946_v7 = vmul.f32 %v9199_v35, %v9511_v38 }
0x109e   :  { %5041 = vrot.lane.b32.xlu0 %v4959_v19, %s7075_s9  ;;  %v4943_v19 = vmul.f32 %v9199_v35, %v9507_v51 }
0x10a0   :  { %5055 = vrot.lane.b32.xlu1 %v4966_v45, %s7075_s9  ;;  %v4950_v45 = vmul.f32 %v9199_v35, %v9521_v33 }
0x10a2   :  { %5045 = vrot.lane.b32.xlu0 %v4961_v47, %s7075_s9  ;;  %v4945_v47 = vmul.f32 %v9199_v35, %v9517_v48 }
0x10a4   :  { %5610 = vrot.lane.b32.xlu1 %v5527_v53, %s7081_s28  ;;  %v5511_v53 = vmul.f32 %v9201_v3, %v9509_v17  ;;  %v5517_v17 = vmul.f32 %v9201_v3, %v9521_v33  ;;  %v11393_v33 = vld [vmem:[#allocation77_spill] sm:$0xff] }
0x10a6   :  { %5053 = vrot.lane.b32.xlu0 %v4965_v50, %s7075_s9  ;;  %v4949_v50 = vmul.f32 %v9199_v35, %v9519_v49 }
0x10a8   :  { %5614 = vrot.lane.b32.xlu1 %v5529_v41, %s7081_s28  ;;  %v5513_v41 = vmul.f32 %v9201_v3, %v9511_v38  ;;  %v5516_v38 = vmul.f32 %v9201_v3, %v9519_v49 }
0x10aa   :  { %5608 = vrot.lane.b32.xlu0 %v5526_v63, %s7081_s28  ;;  %v5510_v63 = vmul.f32 %v9201_v3, %v9507_v51  ;;  %v4109_v51 = vsel %vm96_vm0, %v9450_v59, 0.0  ;;  %v4395_v59 = vmul.f32 %v9203_v22, %v9582_v52 }
0x10ac   :  { %5622 = vrot.lane.b32.xlu1 %v5533_v42, %s7081_s28  ;;  %v5512_v42 = vmul.f32 %v9201_v3, %v9517_v48  ;;  %v4115_v48 = vsel %vm96_vm0, %v11393_v33, 0.0 }
0x10ae   :  { %5612 = vrot.lane.b32.xlu0 %v5528_v10, %s7081_s28  ;;  %v11392_v10 = vld [vmem:[#allocation78_spill] sm:$0xff] }
0x10b2   :  { %5620 = vrot.lane.b32.xlu0 %v5532_v23, %s7081_s28  ;;  %v4106_v23 = vsel %vm96_vm0, %v11392_v10, 0.0 }
0x10d0   :  { %4053 = vadd.xlane.f32.xlu1 %v4052_v55 }
0x10d1   :  { %4056 = vadd.xlane.f32.xlu0 %v4055_v61  ;;  %v11394_v61 = vld [vmem:[#allocation80_spill] sm:$0xff] }
0x10d2   :  { %v4112_v55 = vsel %vm96_vm0, %v11394_v61, 0.0  ;;  %v11401_v61 = vld [vmem:[#allocation10_spill] sm:$0xff] }
0x10e1   :  { %4442 = vrot.lane.b32.xlu1 %v4375_v43, %s7080_s0  ;;  %v11395_v43 = vld [vmem:[#allocation79_spill] sm:$0xff] }
0x10e2   :  { %v4127_v49 = vsel %vm96_vm0, %v11395_v43, 0.0  ;;  %v9880_v43 = vpop.permute.xlu0 %4468 }
0x10e3   :  { %v4580_v34 = vsel %vm96_vm0, %v9880_v43, 0.0 }
0x10e5   :  { %4446 = vrot.lane.b32.xlu1 %v4377_v0, %s7080_s0  ;;  %v11396_v0 = vld [vmem:[#allocation60_spill] sm:$0xff] }
0x10e7   :  { %4440 = vrot.lane.b32.xlu0 %v4374_v1, %s7080_s0  ;;  %v4124_v1 = vsel %vm96_vm0, %v11396_v0, 0.0 }
0x10e9   :  { %4454 = vrot.lane.b32.xlu1 %v4381_v36, %s7080_s0  ;;  %v4399_v36 = vmul.f32 %v9203_v22, %v9636_v13 }
0x10eb   :  { %4444 = vrot.lane.b32.xlu0 %v4376_v5, %s7080_s0  ;;  %v4394_v5 = vmul.f32 %v9203_v22, %v9579_v24 }
0x10ed   :  { %5011 = vrot.lane.b32.xlu1 %v4944_v29, %s7075_s9  ;;  %v4401_v29 = vmul.f32 %v9203_v22, %v9642_v39 }
0x10ef   :  { %4452 = vrot.lane.b32.xlu0 %v4380_v58, %s7080_s0  ;;  %v4398_v58 = vmul.f32 %v9203_v22, %v9633_v15 }
0x10f1   :  { %5015 = vrot.lane.b32.xlu1 %v4946_v7, %s7075_s9  ;;  %v4964_v7 = vmul.f32 %v9199_v35, %v9582_v52 }
0x10f3   :  { %5009 = vrot.lane.b32.xlu0 %v4943_v19, %s7075_s9  ;;  %v4400_v19 = vmul.f32 %v9203_v22, %v9638_v21 }
0x10f5   :  { %5023 = vrot.lane.b32.xlu1 %v4950_v45, %s7075_s9  ;;  %v4968_v45 = vmul.f32 %v9199_v35, %v9636_v13 }
0x10f7   :  { %5013 = vrot.lane.b32.xlu0 %v4945_v47, %s7075_s9  ;;  %v4963_v47 = vmul.f32 %v9199_v35, %v9579_v24 }
0x10f9   :  { %5578 = vrot.lane.b32.xlu1 %v5511_v53, %s7081_s28  ;;  %v4970_v53 = vmul.f32 %v9199_v35, %v9642_v39 }
0x10fb   :  { %5021 = vrot.lane.b32.xlu0 %v4949_v50, %s7075_s9  ;;  %v4967_v50 = vmul.f32 %v9199_v35, %v9633_v15 }
0x10fd   :  { %5582 = vrot.lane.b32.xlu1 %v5513_v41, %s7081_s28  ;;  %v5531_v41 = vmul.f32 %v9201_v3, %v9582_v52  ;;  %v5537_v52 = vmul.f32 %v9201_v3, %v9642_v39  ;;  %v11398_v39 = vld [vmem:[#allocation59_spill] sm:$0xff] }
0x10ff   :  { %5576 = vrot.lane.b32.xlu0 %v5510_v63, %s7081_s28  ;;  %v4969_v63 = vmul.f32 %v9199_v35, %v9638_v21 }
0x1101   :  { %5590 = vrot.lane.b32.xlu1 %v5517_v17, %s7081_s28  ;;  %v5535_v17 = vmul.f32 %v9201_v3, %v9636_v13  ;;  %v5536_v13 = vmul.f32 %v9201_v3, %v9638_v21 }
0x1103   :  { %5580 = vrot.lane.b32.xlu0 %v5512_v42, %s7081_s28  ;;  %v5530_v42 = vmul.f32 %v9201_v3, %v9579_v24  ;;  %v4061_v24 = vsel %vm96_vm0, %v9536_v44, 0.0  ;;  %v9878_v44 = vpop.permute.xlu1 %4470 }
0x1107   :  { %5588 = vrot.lane.b32.xlu0 %v5516_v38, %s7081_s28  ;;  %v5534_v38 = vmul.f32 %v9201_v3, %v9633_v15  ;;  %v4067_v15 = vsel %vm96_vm0, %v11398_v39, 0.0  ;;  %v9885_v0 = vpop.permute.xlu1 %5039  ;;  %v5514_v39 = vmul.f32 %v9201_v3, %v9584_v32 }
0x1108   :  { %v5152_v25 = vsel %vm96_vm0, %v9885_v0, 0.0 }
0x1125   :  { %4107 = vadd.xlane.f32.xlu1 %v4106_v23  ;;  %v11399_v23 = vld [vmem:[#allocation69_spill] sm:$0xff] }
0x1126   :  { %4110 = vadd.xlane.f32.xlu0 %v4109_v51  ;;  %v11397_v51 = vld [vmem:[#allocation62_spill] sm:$0xff]  ;;  %v4064_v33 = vsel %vm96_vm0, %v11399_v23, 0.0  ;;  %v5521_v23 = vmul.f32 %v9201_v3, %v9640_v16 }
0x1127   :  { %v4058_v10 = vsel %vm96_vm0, %v11397_v51, 0.0 }
0x1129   :  { %4113 = vadd.xlane.f32.xlu1 %v4112_v55  ;;  %v4076_v55 = vsel %vm96_vm0, %v11401_v61, 0.0 }
0x112a   :  { %4116 = vadd.xlane.f32.xlu0 %v4115_v48  ;;  %v11400_v48 = vld [vmem:[#allocation61_spill] sm:$0xff] }
0x112b   :  { %v4079_v21 = vsel %vm96_vm0, %v11400_v48, 0.0  ;;  %v5520_v48 = vmul.f32 %v9201_v3, %v9614_v31 }
0x112d   :  { %4125 = vadd.xlane.f32.xlu1 %v4124_v1  ;;  %v9887_v1 = vpop.permute.xlu0 %5037 }
0x112e   :  { %4128 = vadd.xlane.f32.xlu0 %v4127_v49  ;;  %v4379_v49 = vmul.f32 %v9203_v22, %v9586_v9  ;;  %v5149_v20 = vsel %vm96_vm0, %v9887_v1, 0.0 }
0x113e   :  { %4482 = vrot.lane.b32.xlu1 %v4395_v59, %s7080_s0  ;;  %v4383_v59 = vmul.f32 %v9203_v22, %v9588_v4 }
0x1142   :  { %4490 = vrot.lane.b32.xlu1 %v4399_v36, %s7080_s0  ;;  %v4378_v36 = vmul.f32 %v9203_v22, %v9584_v32 }
0x1144   :  { %4480 = vrot.lane.b32.xlu0 %v4394_v5, %s7080_s0  ;;  %v4385_v5 = vmul.f32 %v9203_v22, %v9640_v16 }
0x1146   :  { %4494 = vrot.lane.b32.xlu1 %v4401_v29, %s7080_s0  ;;  %v9897_v29 = vpop.permute.xlu1 %5606 }
0x1148   :  { %4488 = vrot.lane.b32.xlu0 %v4398_v58, %s7080_s0  ;;  %v9899_v58 = vpop.permute.xlu0 %5604 }
0x1149   :  { %v5716_v43 = vsel %vm96_vm0, %v9899_v58, 0.0 }
0x114a   :  { %5051 = vrot.lane.b32.xlu1 %v4964_v7, %s7075_s9  ;;  %v4382_v7 = vmul.f32 %v9203_v22, %v9590_v11 }
0x114c   :  { %4492 = vrot.lane.b32.xlu0 %v4400_v19, %s7080_s0  ;;  %v4948_v19 = vmul.f32 %v9199_v35, %v9586_v9 }
0x114e   :  { %5059 = vrot.lane.b32.xlu1 %v4968_v45, %s7075_s9  ;;  %v4384_v45 = vmul.f32 %v9203_v22, %v9614_v31 }
0x1150   :  { %5049 = vrot.lane.b32.xlu0 %v4963_v47, %s7075_s9  ;;  %v9910_v47 = vpop.permute.xlu1 %4438 }
0x1152   :  { %5063 = vrot.lane.b32.xlu1 %v4970_v53, %s7075_s9  ;;  %v9912_v53 = vpop.permute.xlu0 %4436 }
0x1154   :  { %5057 = vrot.lane.b32.xlu0 %v4967_v50, %s7075_s9  ;;  %v4952_v50 = vmul.f32 %v9199_v35, %v9588_v4 }
0x1156   :  { %5618 = vrot.lane.b32.xlu1 %v5531_v41, %s7081_s28  ;;  %v4947_v41 = vmul.f32 %v9199_v35, %v9584_v32 }
0x1158   :  { %5061 = vrot.lane.b32.xlu0 %v4969_v63, %s7075_s9  ;;  %v4954_v63 = vmul.f32 %v9199_v35, %v9640_v16 }
0x115a   :  { %5626 = vrot.lane.b32.xlu1 %v5535_v17, %s7081_s28  ;;  %v9923_v17 = vpop.permute.xlu1 %5007 }
0x115b   :  { %v5104_v1 = vsel %vm96_vm0, %v9923_v17, 0.0 }
0x115c   :  { %5616 = vrot.lane.b32.xlu0 %v5530_v42, %s7081_s28  ;;  %v9925_v42 = vpop.permute.xlu0 %5005 }
0x115e   :  { %5630 = vrot.lane.b32.xlu1 %v5537_v52, %s7081_s28  ;;  %v4951_v52 = vmul.f32 %v9199_v35, %v9590_v11 }
0x1160   :  { %5624 = vrot.lane.b32.xlu0 %v5534_v38, %s7081_s28  ;;  %v5515_v38 = vmul.f32 %v9201_v3, %v9586_v9  ;;  %v9938_v51 = vpop.permute.xlu0 %5572 }
0x1164   :  { %5628 = vrot.lane.b32.xlu0 %v5536_v13, %s7081_s28  ;;  %v4953_v13 = vmul.f32 %v9199_v35, %v9614_v31  ;;  %v9946_v9 = vpop.xlane.xlu0 %4104 }
0x1165   :  { %11402 = vst [vmem:[#allocation81_spill] sm:$0xff] %v9946_v9 }
0x1182   :  { %4059 = vadd.xlane.f32.xlu1 %v4058_v10  ;;  %v5519_v10 = vmul.f32 %v9201_v3, %v9588_v4  ;;  %v9957_v4 = vpop.permute.xlu0 %4472 }
0x1183   :  { %4062 = vadd.xlane.f32.xlu0 %v4061_v24  ;;  %v9936_v24 = vpop.permute.xlu1 %5574 }
0x1186   :  { %4065 = vadd.xlane.f32.xlu1 %v4064_v33  ;;  %v5518_v33 = vmul.f32 %v9201_v3, %v9590_v11 }
0x1187   :  { %4068 = vadd.xlane.f32.xlu0 %v4067_v15  ;;  %v9948_v15 = vpop.xlane.xlu1 %4101 }
0x1188   :  { %11403 = vst [vmem:[#allocation87_spill] sm:$0xff] %v9948_v15 }
0x118a   :  { %4077 = vadd.xlane.f32.xlu1 %v4076_v55 }
0x118b   :  { %4080 = vadd.xlane.f32.xlu0 %v4079_v21  ;;  %v9959_v32 = vpop.permute.xlu1 %4474  ;;  %v9964_v21 = vpop.permute.xlu0 %4476 }
0x118f   :  { %v9966_v61 = vpop.permute.xlu1 %4478  ;;  %v9968_v16 = vpop.permute.xlu0 %4484 }
0x1193   :  { %v9970_v11 = vpop.permute.xlu1 %4486  ;;  %v9972_v55 = vpop.permute.xlu0 %5041 }
0x119b   :  { %4450 = vrot.lane.b32.xlu1 %v4379_v49, %s7080_s0  ;;  %v9974_v49 = vpop.permute.xlu1 %5043 }
0x119f   :  { %4458 = vrot.lane.b32.xlu1 %v4383_v59, %s7080_s0  ;;  %v9976_v59 = vpop.permute.xlu0 %5045 }
0x11a1   :  { %4448 = vrot.lane.b32.xlu0 %v4378_v36, %s7080_s0  ;;  %v9978_v36 = vpop.permute.xlu1 %5047 }
0x11a3   :  { %4462 = vrot.lane.b32.xlu1 %v4385_v5, %s7080_s0  ;;  %v9980_v5 = vpop.permute.xlu0 %5053 }
0x11a5   :  { %4456 = vrot.lane.b32.xlu0 %v4382_v7, %s7080_s0  ;;  %v9982_v31 = vpop.permute.xlu1 %5055  ;;  %v4121_v7 = vsel %vm96_vm0, %v9594_v12, 0.0  ;;  %v4403_v12 = vmul.f32 %v9203_v22, %v9674_v2 }
0x11a7   :  { %5019 = vrot.lane.b32.xlu1 %v4948_v19, %s7075_s9  ;;  %v4118_v19 = vsel %vm96_vm0, %v9598_v8, 0.0 }
0x11a9   :  { %4460 = vrot.lane.b32.xlu0 %v4384_v45, %s7080_s0  ;;  %v9988_v45 = vpop.permute.xlu0 %5608 }
0x11ab   :  { %5027 = vrot.lane.b32.xlu1 %v4952_v50, %s7075_s9  ;;  %v9990_v50 = vpop.permute.xlu1 %5610 }
0x11ad   :  { %5017 = vrot.lane.b32.xlu0 %v4947_v41, %s7075_s9  ;;  %v9992_v41 = vpop.permute.xlu0 %5612 }
0x11af   :  { %5031 = vrot.lane.b32.xlu1 %v4954_v63, %s7075_s9  ;;  %v9994_v63 = vpop.permute.xlu1 %5614 }
0x11b1   :  { %5025 = vrot.lane.b32.xlu0 %v4951_v52, %s7075_s9  ;;  %v9996_v52 = vpop.permute.xlu0 %5620 }
0x11b3   :  { %5586 = vrot.lane.b32.xlu1 %v5515_v38, %s7081_s28  ;;  %v9998_v38 = vpop.permute.xlu1 %5622 }
0x11b5   :  { %5029 = vrot.lane.b32.xlu0 %v4953_v13, %s7075_s9  ;;  %v10003_v8 = vpop.xlane.xlu0 %4056 }
0x11b6   :  { %11404 = vst [vmem:[#allocation83_spill] sm:$0xff] %v10003_v8  ;;  %v4070_v8 = vsel %vm96_vm0, %v9612_v26, 0.0 }
0x11b7   :  { %5594 = vrot.lane.b32.xlu1 %v5519_v10, %s7081_s28  ;;  %v10005_v13 = vpop.xlane.xlu1 %4053  ;;  %v4972_v10 = vmul.f32 %v9199_v35, %v9674_v2 }
0x11b8   :  { %11405 = vst [vmem:[#allocation89_spill] sm:$0xff] %v10005_v13 }
0x11b9   :  { %5584 = vrot.lane.b32.xlu0 %v5514_v39, %s7081_s28  ;;  %v4402_v39 = vmul.f32 %v9203_v22, %v9644_v62 }
0x11bb   :  { %5598 = vrot.lane.b32.xlu1 %v5521_v23, %s7081_s28  ;;  %v5539_v23 = vmul.f32 %v9201_v3, %v9674_v2 }
0x11bd   :  { %5592 = vrot.lane.b32.xlu0 %v5518_v33, %s7081_s28  ;;  %v4971_v33 = vmul.f32 %v9199_v35, %v9644_v62 }
0x11c1   :  { %5596 = vrot.lane.b32.xlu0 %v5520_v48, %s7081_s28  ;;  %v10017_v48 = vpop.permute.xlu0 %4440 }
0x11df   :  { %4119 = vadd.xlane.f32.xlu1 %v4118_v19  ;;  %v5538_v19 = vmul.f32 %v9201_v3, %v9644_v62 }
0x11e0   :  { %4122 = vadd.xlane.f32.xlu0 %v4121_v7  ;;  %v10019_v7 = vpop.permute.xlu1 %4442 }
0x11f0   :  { %4498 = vrot.lane.b32.xlu1 %v4403_v12, %s7080_s0  ;;  %v10026_v12 = vpop.permute.xlu0 %4444 }
0x11f4   :  { %5067 = vrot.lane.b32.xlu1 %v4972_v10, %s7075_s9  ;;  %v10028_v10 = vpop.permute.xlu1 %4446  ;;  %v10030_v2 = vpop.permute.xlu0 %4452 }
0x11f6   :  { %4496 = vrot.lane.b32.xlu0 %v4402_v39, %s7080_s0 }
0x11f8   :  { %5634 = vrot.lane.b32.xlu1 %v5539_v23, %s7081_s28  ;;  %v10032_v39 = vpop.permute.xlu1 %4454  ;;  %v10034_v18 = vpop.permute.xlu0 %5009 }
0x11fa   :  { %5065 = vrot.lane.b32.xlu0 %v4971_v33, %s7075_s9 }
0x11fc   :  { %v10036_v15 = vpop.permute.xlu1 %5011  ;;  %v10038_v23 = vpop.permute.xlu0 %5013 }
0x11fe   :  { %5632 = vrot.lane.b32.xlu0 %v5538_v19, %s7081_s28  ;;  %v4073_v19 = vsel %vm96_vm0, %v9604_v46, 0.0 }
0x1200   :  { %v10040_v33 = vpop.permute.xlu1 %5015  ;;  %v10042_v9 = vpop.permute.xlu0 %5021 }
0x1204   :  { %v10044_v62 = vpop.permute.xlu1 %5023  ;;  %v10050_v13 = vpop.permute.xlu0 %5576 }
0x1208   :  { %v10052_v60 = vpop.permute.xlu1 %5578  ;;  %v10058_v37 = vpop.permute.xlu0 %5580 }
0x120c   :  { %v10060_v46 = vpop.permute.xlu1 %5582  ;;  %v10062_v14 = vpop.permute.xlu0 %5588 }
0x1210   :  { %v10064_v26 = vpop.permute.xlu1 %5590  ;;  %v10066_v56 = vpop.xlane.xlu0 %4110 }
0x1211   :  { %11406 = vst [vmem:[#allocation85_spill] sm:$0xff] %v10066_v56  ;;  %v5523_v56 = vmul.f32 %v9201_v3, %v9664_v6 }
0x1214   :  { %v10073_v28 = vpop.xlane.xlu0 %4116 }
0x1215   :  { %11408 = vst [vmem:[#allocation86_spill] sm:$0xff] %v10073_v28 }
0x121c   :  { %4071 = vadd.xlane.f32.xlu1 %v4070_v8  ;;  %v4386_v8 = vmul.f32 %v9203_v22, %v9662_v57  ;;  %v5522_v22 = vmul.f32 %v9201_v3, %v9662_v57 }
0x121d   :  { %4074 = vadd.xlane.f32.xlu0 %v4073_v19  ;;  %v10068_v19 = vpop.xlane.xlu1 %4107 }
0x121e   :  { %11407 = vst [vmem:[#allocation91_spill] sm:$0xff] %v10068_v19  ;;  %v10085_v19 = vpop.xlane.xlu0 %4128 }
0x121f   :  { %11410 = vst [vmem:[#allocation92_spill] sm:$0xff] %v10085_v19 }
0x1220   :  { %4083 = vadd.xlane.f32.xlu1 %v4082_v54  ;;  %v4956_v54 = vmul.f32 %v9199_v35, %v9664_v6 }
0x1221   :  { %4086 = vadd.xlane.f32.xlu0 %v4085_v30  ;;  %v10075_v30 = vpop.xlane.xlu1 %4113 }
0x1222   :  { %11409 = vst [vmem:[#allocation93_spill] sm:$0xff] %v10075_v30  ;;  %v4955_v30 = vmul.f32 %v9199_v35, %v9662_v57 }
0x1231   :  { %4466 = vrot.lane.b32.xlu1 %v4387_v27, %s7080_s0  ;;  %v10087_v27 = vpop.xlane.xlu1 %4125 }
0x1232   :  { %11411 = vst [vmem:[#allocation99_spill] sm:$0xff] %v10087_v27 }
0x1235   :  { %5035 = vrot.lane.b32.xlu1 %v4956_v54, %s7075_s9  ;;  %v10095_v54 = vpop.permute.xlu0 %4480 }
0x1237   :  { %4464 = vrot.lane.b32.xlu0 %v4386_v8, %s7080_s0  ;;  %v10097_v8 = vpop.permute.xlu1 %4482 }
0x1239   :  { %5602 = vrot.lane.b32.xlu1 %v5523_v56, %s7081_s28  ;;  %v10100_v6 = vpop.permute.xlu0 %4488 }
0x123b   :  { %5033 = vrot.lane.b32.xlu0 %v4955_v30, %s7075_s9  ;;  %v10102_v19 = vpop.permute.xlu1 %4490 }
0x123d   :  { %v10104_v27 = vpop.permute.xlu0 %4492 }
0x123f   :  { %5600 = vrot.lane.b32.xlu0 %v5522_v22, %s7081_s28  ;;  %v10106_v35 = vpop.permute.xlu1 %4494  ;;  %v4583_v22 = vsel %vm96_vm0, %v9878_v44, 0.0  ;;  %v5719_v44 = vsel %vm96_vm0, %v9897_v29, 0.0  ;;  %v5101_v29 = vsel %vm96_vm0, %v9925_v42, 0.0  ;;  %v4589_v42 = vsel %vm96_vm0, %v9959_v32, 0.0 }
0x1240   :  { %v4607_v32 = vsel %vm96_vm0, %v9970_v11, 0.0 }
0x1241   :  { %v10108_v56 = vpop.permute.xlu0 %5049 }
0x1243   :  { %v10110_v30 = vpop.permute.xlu1 %5051 }
0x1245   :  { %v10112_v28 = vpop.permute.xlu0 %5057 }
0x1247   :  { %v10114_v3 = vpop.permute.xlu1 %5059 }
0x1248   :  { %11412 = vst [vmem:[#allocation57_spill] sm:$0xff] %v10114_v3 }
0x1249   :  { %v10116_v57 = vpop.permute.xlu0 %5061 }
0x124a   :  { %11413 = vst [vmem:[#allocation88_spill] sm:$0xff] %v10116_v57 }
0x124b   :  { %v10118_v40 = vpop.permute.xlu1 %5063 }
0x124d   :  { %v10128_v3 = vpop.permute.xlu0 %5616 }
0x124f   :  { %v10130_v57 = vpop.permute.xlu1 %5618 }
0x1253   :  { %v10138_v0 = vpop.permute.xlu1 %5626 }
0x125d   :  { %4581 = vadd.xlane.f32.xlu1 %v4580_v34  ;;  %v10136_v34 = vpop.permute.xlu0 %5624 }
0x125e   :  { %4584 = vadd.xlane.f32.xlu0 %v4583_v22  ;;  %v10150_v22 = vpop.permute.xlu1 %5630 }
0x1261   :  { %5150 = vadd.xlane.f32.xlu1 %v5149_v20  ;;  %v4535_v20 = vsel %vm96_vm0, %v9910_v47, 0.0  ;;  %v10148_v58 = vpop.permute.xlu0 %5628  ;;  %v5668_v47 = vsel %vm96_vm0, %v9938_v51, 0.0  ;;  %v4595_v51 = vsel %vm96_vm0, %v9966_v61, 0.0  ;;  %v5158_v61 = vsel %vm96_vm0, %v9974_v49, 0.0 }
0x1262   :  { %5153 = vadd.xlane.f32.xlu0 %v5152_v25  ;;  %v4532_v25 = vsel %vm96_vm0, %v9912_v53, 0.0  ;;  %v5671_v53 = vsel %vm96_vm0, %v9936_v24, 0.0  ;;  %v10158_v17 = vpop.xlane.xlu1 %4059  ;;  %v5176_v49 = vsel %vm96_vm0, %v9982_v31, 0.0 }
0x1265   :  { %5717 = vadd.xlane.f32.xlu1 %v5716_v43  ;;  %v4586_v43 = vsel %vm96_vm0, %v9957_v4, 0.0  ;;  %v4604_v4 = vsel %vm96_vm0, %v9968_v16, 0.0  ;;  %v5164_v16 = vsel %vm96_vm0, %v9978_v36, 0.0  ;;  %v5725_v36 = vsel %vm96_vm0, %v9990_v50, 0.0 }
0x1266   :  { %5720 = vadd.xlane.f32.xlu0 %v5719_v44  ;;  %v10156_v44 = vpop.xlane.xlu0 %4062  ;;  %v10166_v24 = vpop.xlane.xlu1 %4065  ;;  %v5743_v50 = vsel %vm96_vm0, %v9998_v38, 0.0 }
0x1269   :  { %4536 = vadd.xlane.f32.xlu1 %v4535_v20  ;;  %v4592_v20 = vsel %vm96_vm0, %v9964_v21, 0.0  ;;  %v5155_v21 = vsel %vm96_vm0, %v9972_v55, 0.0  ;;  %v5173_v55 = vsel %vm96_vm0, %v9980_v5, 0.0  ;;  %v5731_v5 = vsel %vm96_vm0, %v9994_v63, 0.0 }
0x126a   :  { %4533 = vadd.xlane.f32.xlu0 %v4532_v25  ;;  %v10164_v25 = vpop.xlane.xlu0 %4068  ;;  %v4538_v63 = vsel %vm96_vm0, %v10017_v48, 0.0  ;;  %v4547_v48 = vsel %vm96_vm0, %v10028_v10, 0.0 }
0x126d   :  { %5102 = vadd.xlane.f32.xlu1 %v5101_v29  ;;  %v10178_v29 = vpop.xlane.xlu1 %4077 }
0x126e   :  { %5105 = vadd.xlane.f32.xlu0 %v5104_v1  ;;  %v10176_v1 = vpop.xlane.xlu0 %4080 }
0x126f   :  { %11414 = vst [vmem:[#allocation95_spill] sm:$0xff] %v10176_v1 }
0x1271   :  { %5669 = vadd.xlane.f32.xlu1 %v5668_v47  ;;  %v10186_v11 = vpop.permute.xlu1 %4450  ;;  %v5161_v47 = vsel %vm96_vm0, %v9976_v59, 0.0  ;;  %v5722_v59 = vsel %vm96_vm0, %v9988_v45, 0.0  ;;  %v5740_v45 = vsel %vm96_vm0, %v9996_v52, 0.0  ;;  %v4541_v52 = vsel %vm96_vm0, %v10019_v7, 0.0 }
0x1272   :  { %5672 = vadd.xlane.f32.xlu0 %v5671_v53  ;;  %v10184_v53 = vpop.permute.xlu0 %4448  ;;  %v4559_v7 = vsel %vm96_vm0, %v10032_v39, 0.0  ;;  %v5116_v39 = vsel %vm96_vm0, %v10040_v33, 0.0 }
0x1275   :  { %4587 = vadd.xlane.f32.xlu1 %v4586_v43  ;;  %v10198_v43 = vpop.permute.xlu1 %4458 }
0x1276   :  { %4590 = vadd.xlane.f32.xlu0 %v4589_v42  ;;  %v10196_v42 = vpop.permute.xlu0 %4456 }
0x1279   :  { %4593 = vadd.xlane.f32.xlu1 %v4592_v20  ;;  %v10206_v31 = vpop.permute.xlu1 %4462  ;;  %v5728_v20 = vsel %vm96_vm0, %v9992_v41, 0.0  ;;  %v4544_v41 = vsel %vm96_vm0, %v10026_v12, 0.0  ;;  %v5107_v12 = vsel %vm96_vm0, %v10034_v18, 0.0  ;;  %v5110_v18 = vsel %vm96_vm0, %v10036_v15, 0.0 }
0x127a   :  { %4596 = vadd.xlane.f32.xlu0 %v4595_v51  ;;  %v10204_v51 = vpop.permute.xlu0 %4460  ;;  %v5128_v15 = vsel %vm96_vm0, %v10044_v62, 0.0 }
0x127d   :  { %4605 = vadd.xlane.f32.xlu1 %v4604_v4  ;;  %v10218_v4 = vpop.permute.xlu1 %5019 }
0x127e   :  { %4608 = vadd.xlane.f32.xlu0 %v4607_v32  ;;  %v10216_v32 = vpop.permute.xlu0 %5017 }
0x1281   :  { %5156 = vadd.xlane.f32.xlu1 %v5155_v21  ;;  %v10226_v38 = vpop.permute.xlu1 %5027  ;;  %v4556_v21 = vsel %vm96_vm0, %v10030_v2, 0.0  ;;  %v5113_v2 = vsel %vm96_vm0, %v10038_v23, 0.0  ;;  %v5674_v23 = vsel %vm96_vm0, %v10050_v13, 0.0  ;;  %v5677_v13 = vsel %vm96_vm0, %v10052_v60, 0.0 }
0x1282   :  { %5159 = vadd.xlane.f32.xlu0 %v5158_v61  ;;  %v10224_v61 = vpop.permute.xlu0 %5025  ;;  %v5695_v60 = vsel %vm96_vm0, %v10064_v26, 0.0 }
0x1285   :  { %5162 = vadd.xlane.f32.xlu1 %v5161_v47  ;;  %v10238_v47 = vpop.permute.xlu1 %5031 }
0x1286   :  { %5165 = vadd.xlane.f32.xlu0 %v5164_v16  ;;  %v10236_v16 = vpop.permute.xlu0 %5029 }
0x1289   :  { %5174 = vadd.xlane.f32.xlu1 %v5173_v55  ;;  %v10246_v10 = vpop.permute.xlu1 %5586  ;;  %v5125_v55 = vsel %vm96_vm0, %v10042_v9, 0.0  ;;  %v5680_v9 = vsel %vm96_vm0, %v10058_v37, 0.0  ;;  %v5683_v37 = vsel %vm96_vm0, %v10060_v46, 0.0  ;;  %v4601_v46 = vsel %vm96_vm0, %v10097_v8, 0.0 }
0x128a   :  { %5177 = vadd.xlane.f32.xlu0 %v5176_v49  ;;  %v10244_v49 = vpop.permute.xlu0 %5584  ;;  %v4619_v8 = vsel %vm96_vm0, %v10106_v35, 0.0 }
0x128d   :  { %5723 = vadd.xlane.f32.xlu1 %v5722_v59  ;;  %v10258_v59 = vpop.permute.xlu1 %5594 }
0x128e   :  { %5726 = vadd.xlane.f32.xlu0 %v5725_v36  ;;  %v10256_v36 = vpop.permute.xlu0 %5592 }
0x1291   :  { %5729 = vadd.xlane.f32.xlu1 %v5728_v20  ;;  %v10266_v33 = vpop.permute.xlu1 %5598  ;;  %v5692_v20 = vsel %vm96_vm0, %v10062_v14, 0.0  ;;  %v4610_v14 = vsel %vm96_vm0, %v10100_v6, 0.0  ;;  %v4613_v6 = vsel %vm96_vm0, %v10102_v19, 0.0  ;;  %v5170_v19 = vsel %vm96_vm0, %v10110_v30, 0.0 }
0x1292   :  { %5732 = vadd.xlane.f32.xlu0 %v5731_v5  ;;  %v10264_v5 = vpop.permute.xlu0 %5596 }
0x1295   :  { %5741 = vadd.xlane.f32.xlu1 %v5740_v45  ;;  %v10274_v62 = vpop.xlane.xlu1 %4119  ;;  %v4598_v45 = vsel %vm96_vm0, %v10095_v54, 0.0  ;;  %v4616_v54 = vsel %vm96_vm0, %v10104_v27, 0.0  ;;  %v5179_v27 = vsel %vm96_vm0, %v10112_v28, 0.0 }
0x1296   :  { %5744 = vadd.xlane.f32.xlu0 %v5743_v50  ;;  %v10272_v50 = vpop.xlane.xlu0 %4122  ;;  %11416 = vst [vmem:[#allocation97_spill] sm:$0xff] %v10274_v62 }
0x1297   :  { %11415 = vst [vmem:[#allocation90_spill] sm:$0xff] %v10272_v50 }
0x1299   :  { %4545 = vadd.xlane.f32.xlu1 %v4544_v41  ;;  %v10286_v41 = vpop.permute.xlu1 %4498 }
0x129a   :  { %4539 = vadd.xlane.f32.xlu0 %v4538_v63  ;;  %v10284_v63 = vpop.permute.xlu0 %4496 }
0x129d   :  { %4557 = vadd.xlane.f32.xlu1 %v4556_v21  ;;  %v10294_v26 = vpop.permute.xlu1 %5067  ;;  %v5167_v21 = vsel %vm96_vm0, %v10108_v56, 0.0 }
0x129e   :  { %4542 = vadd.xlane.f32.xlu0 %v4541_v52  ;;  %v10292_v52 = vpop.permute.xlu0 %5065 }
0x12a1   :  { %5108 = vadd.xlane.f32.xlu1 %v5107_v12  ;;  %v10306_v12 = vpop.permute.xlu1 %5634 }
0x12a2   :  { %4548 = vadd.xlane.f32.xlu0 %v4547_v48  ;;  %v10304_v48 = vpop.permute.xlu0 %5632 }
0x12a5   :  { %5114 = vadd.xlane.f32.xlu1 %v5113_v2 }
0x12a6   :  { %4560 = vadd.xlane.f32.xlu0 %v4559_v7  ;;  %v11417_v7 = vld [vmem:[#allocation88_spill] sm:$0xff] }
0x12a7   :  { %v5185_v56 = vsel %vm96_vm0, %v11417_v7, 0.0 }
0x12a9   :  { %5126 = vadd.xlane.f32.xlu1 %v5125_v55  ;;  %v10314_v35 = vpop.xlane.xlu1 %4071  ;;  %v5734_v55 = vsel %vm96_vm0, %v10128_v3, 0.0  ;;  %v5752_v3 = vsel %vm96_vm0, %v10148_v58, 0.0  ;;  %v5755_v58 = vsel %vm96_vm0, %v10150_v22, 0.0  ;;  %v4565_v22 = vsel %vm96_vm0, %v10198_v43, 0.0 }
0x12aa   :  { %5111 = vadd.xlane.f32.xlu0 %v5110_v18  ;;  %v10312_v2 = vpop.xlane.xlu0 %4074  ;;  %v11418_v18 = vld [vmem:[#allocation57_spill] sm:$0xff] }
0x12ab   :  { %v5182_v28 = vsel %vm96_vm0, %v11418_v18, 0.0  ;;  %v5122_v18 = vsel %vm96_vm0, %v10218_v4, 0.0  ;;  %v5686_v4 = vsel %vm96_vm0, %v10244_v49, 0.0 }
0x12ad   :  { %5675 = vadd.xlane.f32.xlu1 %v5674_v23  ;;  %v10322_v30 = vpop.xlane.xlu1 %4083  ;;  %v5188_v23 = vsel %vm96_vm0, %v10118_v40, 0.0  ;;  %v5749_v40 = vsel %vm96_vm0, %v10138_v0, 0.0  ;;  %v4553_v0 = vsel %vm96_vm0, %v10186_v11, 0.0  ;;  %v11420_v11 = vld [vmem:[#allocation58_spill] sm:$0xff] }
0x12ae   :  { %5117 = vadd.xlane.f32.xlu0 %v5116_v39  ;;  %v10320_v39 = vpop.xlane.xlu0 %4086 }
0x12af   :  { %11419 = vst [vmem:[#allocation94_spill] sm:$0xff] %v10320_v39 }
0x12b1   :  { %5681 = vadd.xlane.f32.xlu1 %v5680_v9  ;;  %v5737_v9 = vsel %vm96_vm0, %v10130_v57, 0.0 }
0x12b2   :  { %5129 = vadd.xlane.f32.xlu0 %v5128_v15  ;;  %v5746_v15 = vsel %vm96_vm0, %v10136_v34, 0.0  ;;  %v4550_v34 = vsel %vm96_vm0, %v10184_v53, 0.0  ;;  %v4568_v53 = vsel %vm96_vm0, %v10204_v51, 0.0 }
0x12b5   :  { %5693 = vadd.xlane.f32.xlu1 %v5692_v20  ;;  %v10334_v20 = vpop.permute.xlu1 %4466 }
0x12b6   :  { %5678 = vadd.xlane.f32.xlu0 %v5677_v13  ;;  %v10332_v13 = vpop.permute.xlu0 %4464 }
0x12b9   :  { %4599 = vadd.xlane.f32.xlu1 %v4598_v45  ;;  %v10342_v57 = vpop.permute.xlu1 %5035  ;;  %v4562_v45 = vsel %vm96_vm0, %v10196_v42, 0.0  ;;  %v5119_v42 = vsel %vm96_vm0, %v10216_v32, 0.0 }
0x12ba   :  { %5684 = vadd.xlane.f32.xlu0 %v5683_v37  ;;  %v10340_v37 = vpop.permute.xlu0 %5033 }
0x12bd   :  { %4611 = vadd.xlane.f32.xlu1 %v4610_v14  ;;  %v10354_v14 = vpop.permute.xlu1 %5602 }
0x12be   :  { %5696 = vadd.xlane.f32.xlu0 %v5695_v60  ;;  %v10352_v60 = vpop.permute.xlu0 %5600 }
0x12c1   :  { %4617 = vadd.xlane.f32.xlu1 %v4616_v54 }
0x12c2   :  { %4602 = vadd.xlane.f32.xlu0 %v4601_v46 }
0x12c5   :  { %5168 = vadd.xlane.f32.xlu1 %v5167_v21  ;;  %v11421_v21 = vld [vmem:[#allocation56_spill] sm:$0xff] }
0x12c6   :  { %4614 = vadd.xlane.f32.xlu0 %v4613_v6 }
0x12c9   :  { %5180 = vadd.xlane.f32.xlu1 %v5179_v27  ;;  %v5131_v27 = vsel %vm96_vm0, %v10224_v61, 0.0 }
0x12ca   :  { %4620 = vadd.xlane.f32.xlu0 %v4619_v8  ;;  %v4571_v8 = vsel %vm96_vm0, %v10206_v31, 0.0  ;;  %v5137_v31 = vsel %vm96_vm0, %v10236_v16, 0.0 }
0x12cd   :  { %5186 = vadd.xlane.f32.xlu1 %v5185_v56 }
0x12ce   :  { %5171 = vadd.xlane.f32.xlu0 %v5170_v19 }
0x12d1   :  { %5735 = vadd.xlane.f32.xlu1 %v5734_v55 }
0x12d2   :  { %5183 = vadd.xlane.f32.xlu0 %v5182_v28 }
0x12d5   :  { %5747 = vadd.xlane.f32.xlu1 %v5746_v15 }
0x12d6   :  { %5189 = vadd.xlane.f32.xlu0 %v5188_v23 }
0x12d9   :  { %5753 = vadd.xlane.f32.xlu1 %v5752_v3 }
0x12da   :  { %5738 = vadd.xlane.f32.xlu0 %v5737_v9  ;;  %v5134_v9 = vsel %vm96_vm0, %v10226_v38, 0.0 }
0x12dd   :  { %4551 = vadd.xlane.f32.xlu1 %v4550_v34  ;;  %v5140_v34 = vsel %vm96_vm0, %v10238_v47, 0.0 }
0x12de   :  { %5750 = vadd.xlane.f32.xlu0 %v5749_v40 }
0x12e1   :  { %4563 = vadd.xlane.f32.xlu1 %v4562_v45  ;;  %v5689_v45 = vsel %vm96_vm0, %v10246_v10, 0.0 }
0x12e2   :  { %5756 = vadd.xlane.f32.xlu0 %v5755_v58  ;;  %v5698_v58 = vsel %vm96_vm0, %v10256_v36, 0.0  ;;  %v5701_v36 = vsel %vm96_vm0, %v10258_v59, 0.0 }
0x12e5   :  { %4569 = vadd.xlane.f32.xlu1 %v4568_v53 }
0x12e6   :  { %4554 = vadd.xlane.f32.xlu0 %v4553_v0  ;;  %v5704_v0 = vsel %vm96_vm0, %v10264_v5, 0.0  ;;  %v5707_v5 = vsel %vm96_vm0, %v10266_v33, 0.0 }
0x12e9   :  { %5120 = vadd.xlane.f32.xlu1 %v5119_v42 }
0x12ea   :  { %4566 = vadd.xlane.f32.xlu0 %v4565_v22  ;;  %v4582_v54 = vpop.xlane.xlu1 %4581  ;;  %v4622_v22 = vsel %vm96_vm0, %v10284_v63, 0.0  ;;  %v4625_v63 = vsel %vm96_vm0, %v10286_v41, 0.0 }
0x12eb   :  { %v4585_v46 = vpop.xlane.xlu0 %4584  ;;  %v4735_v51 = vrot.slane %v4582_v54, %v11421_v21 }
0x12ec   :  { %v4739_v6 = vrot.slane %v4585_v46, %v11420_v11  ;;  %v5191_v46 = vsel %vm96_vm0, %v10292_v52, 0.0  ;;  %v5194_v52 = vsel %vm96_vm0, %v10294_v26, 0.0 }
0x12ed   :  { %5132 = vadd.xlane.f32.xlu1 %v5131_v27 }
0x12ee   :  { %4572 = vadd.xlane.f32.xlu0 %v4571_v8  ;;  %v10367_v43 = vsel %vm1315_vm8, %v4739_v6, %v4735_v51  ;;  %v5151_v19 = vpop.xlane.xlu1 %5150  ;;  %v5758_v6 = vsel %vm96_vm0, %v10304_v48, 0.0  ;;  %v4574_v8 = vsel %vm96_vm0, %v10332_v13, 0.0  ;;  %v5761_v48 = vsel %vm96_vm0, %v10306_v12, 0.0 }
0x12ef   :  { %v5154_v32 = vpop.xlane.xlu0 %5153  ;;  %v5304_v56 = vrot.slane %v5151_v19, %v11421_v21  ;;  %v4577_v13 = vsel %vm96_vm0, %v10334_v20, 0.0 }
0x12f0   :  { %v5308_v7 = vrot.slane %v5154_v32, %v11420_v11  ;;  %v11422_v32 = vld [vmem:[#allocation9_spill] sm:$0xff] }
0x12f1   :  { %5138 = vadd.xlane.f32.xlu1 %v5137_v31  ;;  %v4088_v19 = vsel %vm96_vm0, %v11422_v32, 0.0  ;;  %v11423_v31 = vld [vmem:[#allocation13_spill] sm:$0xff] }
0x12f2   :  { %5123 = vadd.xlane.f32.xlu0 %v5122_v18  ;;  %v10376_v61 = vsel %vm1315_vm8, %v5308_v7, %v5304_v56  ;;  %v5718_v55 = vpop.xlane.xlu1 %5717  ;;  %v5143_v56 = vsel %vm96_vm0, %v10340_v37, 0.0  ;;  %v5146_v37 = vsel %vm96_vm0, %v10342_v57, 0.0 }
0x12f3   :  { %v5721_v28 = vpop.xlane.xlu0 %5720  ;;  %v5871_v15 = vrot.slane %v5718_v55, %v11421_v21  ;;  %v11424_v55 = vld [vmem:[#allocation17_spill] sm:$0xff] }
0x12f4   :  { %v5875_v23 = vrot.slane %v5721_v28, %v11420_v11  ;;  %v4091_v28 = vsel %vm96_vm0, %v11423_v31, 0.0 }
0x12f5   :  { %5687 = vadd.xlane.f32.xlu1 %v5686_v4 }
0x12f6   :  { %5135 = vadd.xlane.f32.xlu0 %v5134_v9  ;;  %v10385_v16 = vsel %vm1315_vm8, %v5875_v23, %v5871_v15  ;;  %v10389_v40 = vpop.xlane.xlu1 %4536  ;;  %v4130_v23 = vsel %vm96_vm0, %v11424_v55, 0.0  ;;  %v5710_v9 = vsel %vm96_vm0, %v10352_v60, 0.0  ;;  %v5713_v60 = vsel %vm96_vm0, %v10354_v14, 0.0  ;;  %v11431_v55 = vld [vmem:[#allocation84_spill] sm:$0xff] }
0x12f7   :  { %v10387_v3 = vpop.xlane.xlu0 %4533 }
0x12f9   :  { %5699 = vadd.xlane.f32.xlu1 %v5698_v58  ;;  %v11425_v58 = vld [vmem:[#allocation19_spill] sm:$0xff] }
0x12fa   :  { %5141 = vadd.xlane.f32.xlu0 %v5140_v34  ;;  %v10397_v49 = vpop.xlane.xlu1 %5102 }
0x12fb   :  { %v10395_v38 = vpop.xlane.xlu0 %5105 }
0x12fd   :  { %5705 = vadd.xlane.f32.xlu1 %v5704_v0  ;;  %v11426_v0 = vld [vmem:[#allocation66_spill] sm:$0xff] }
0x12fe   :  { %5690 = vadd.xlane.f32.xlu0 %v5689_v45  ;;  %v10405_v47 = vpop.xlane.xlu1 %5669  ;;  %v4133_v45 = vsel %vm96_vm0, %v11425_v58, 0.0  ;;  %v5232_v58 = vrot.slane %v10397_v49, %v11421_v21 }
0x12ff   :  { %v10403_v53 = vpop.xlane.xlu0 %5672 }
0x1301   :  { %4623 = vadd.xlane.f32.xlu1 %v4622_v22 }
0x1302   :  { %5702 = vadd.xlane.f32.xlu0 %v5701_v36  ;;  %v10413_v10 = vpop.xlane.xlu1 %4587  ;;  %v4094_v36 = vsel %vm96_vm0, %v11426_v0, 0.0 }
0x1303   :  { %v10411_v42 = vpop.xlane.xlu0 %4590 }
0x1305   :  { %5192 = vadd.xlane.f32.xlu1 %v5191_v46 }
0x1306   :  { %5708 = vadd.xlane.f32.xlu0 %v5707_v5  ;;  %v10421_v59 = vpop.xlane.xlu1 %4593  ;;  %v11427_v5 = vld [vmem:[#allocation12_spill] sm:$0xff] }
0x1307   :  { %v10419_v54 = vpop.xlane.xlu0 %4596  ;;  %v4136_v46 = vsel %vm96_vm0, %v11427_v5, 0.0 }
0x1309   :  { %5759 = vadd.xlane.f32.xlu1 %v5758_v6 }
0x130a   :  { %4626 = vadd.xlane.f32.xlu0 %v4625_v63  ;;  %v10429_v33 = vpop.xlane.xlu1 %4605 }
0x130b   :  { %v10427_v51 = vpop.xlane.xlu0 %4608 }
0x130d   :  { %4575 = vadd.xlane.f32.xlu1 %v4574_v8 }
0x130e   :  { %5195 = vadd.xlane.f32.xlu0 %v5194_v52  ;;  %v10437_v41 = vpop.xlane.xlu1 %5156  ;;  %v11428_v52 = vld [vmem:[#allocation11_spill] sm:$0xff] }
0x130f   :  { %v10435_v27 = vpop.xlane.xlu0 %5159  ;;  %v4097_v8 = vsel %vm96_vm0, %v11428_v52, 0.0 }
0x1311   :  { %4089 = vadd.xlane.f32.xlu1 %v4088_v19 }
0x1312   :  { %5762 = vadd.xlane.f32.xlu0 %v5761_v48  ;;  %v10445_v26 = vpop.xlane.xlu1 %5162  ;;  %v11429_v48 = vld [vmem:[#allocation63_spill] sm:$0xff] }
0x1313   :  { %v10443_v7 = vpop.xlane.xlu0 %5165  ;;  %v4142_v32 = vsel %vm96_vm0, %v11429_v48, 0.0 }
0x1315   :  { %5144 = vadd.xlane.f32.xlu1 %v5143_v56 }
0x1316   :  { %4578 = vadd.xlane.f32.xlu0 %v4577_v13  ;;  %v10453_v12 = vpop.xlane.xlu1 %5174  ;;  %v11430_v13 = vld [vmem:[#allocation82_spill] sm:$0xff] }
0x1317   :  { %v10451_v18 = vpop.xlane.xlu0 %5177  ;;  %v4139_v56 = vsel %vm96_vm0, %v11430_v13, 0.0 }
0x1319   :  { %4131 = vadd.xlane.f32.xlu1 %v4130_v23  ;;  %v4145_v23 = vsel %vm96_vm0, %v11431_v55, 0.0 }
0x131a   :  { %4092 = vadd.xlane.f32.xlu0 %v4091_v28  ;;  %v10461_v20 = vpop.xlane.xlu1 %5723 }
0x131b   :  { %v10459_v15 = vpop.xlane.xlu0 %5726 }
0x131d   :  { %5711 = vadd.xlane.f32.xlu1 %v5710_v9 }
0x131e   :  { %5147 = vadd.xlane.f32.xlu0 %v5146_v37  ;;  %v10469_v34 = vpop.xlane.xlu1 %5729 }
0x131f   :  { %v10467_v4 = vpop.xlane.xlu0 %5732 }
0x1321   :  { %4095 = vadd.xlane.f32.xlu1 %v4094_v36  ;;  %v5236_v36 = vrot.slane %v10395_v38, %v11420_v11 }
0x1322   :  { %4134 = vadd.xlane.f32.xlu0 %v4133_v45  ;;  %v10477_v57 = vpop.xlane.xlu1 %5741 }
0x1323   :  { %v10475_v22 = vpop.xlane.xlu0 %5744 }
0x1325   :  { %4137 = vadd.xlane.f32.xlu1 %v4136_v46  ;;  %v5237_v46 = vsel %vm1315_vm8, %v5236_v36, %v5232_v58 }
0x1326   :  { %5714 = vadd.xlane.f32.xlu0 %v5713_v60  ;;  %v10485_v6 = vpop.xlane.xlu1 %4545 }
0x1327   :  { %v10483_v63 = vpop.xlane.xlu0 %4539 }
0x1329   :  { %4143 = vadd.xlane.f32.xlu1 %v4142_v32 }
0x132a   :  { %4098 = vadd.xlane.f32.xlu0 %v4097_v8  ;;  %v10493_v14 = vpop.xlane.xlu1 %4557 }
0x132b   :  { %v10491_v19 = vpop.xlane.xlu0 %4542 }
0x132e   :  { %4140 = vadd.xlane.f32.xlu0 %v4139_v56  ;;  %v5109_v28 = vpop.xlane.xlu1 %5108 }
0x132f   :  { %v10497_v31 = vpop.xlane.xlu0 %4548  ;;  %v5241_v60 = vrot.slane %v5109_v28, %v11421_v21 }
0x1332   :  { %4146 = vadd.xlane.f32.xlu0 %v4145_v23  ;;  %v5115_v9 = vpop.xlane.xlu1 %5114 }
0x1333   :  { %v10501_v37 = vpop.xlane.xlu0 %4560  ;;  %v5250_v13 = vrot.slane %v5115_v9, %v11421_v21 }
0x1336   :  { %v5127_v0 = vpop.xlane.xlu1 %5126 }
0x1337   :  { %v5112_v45 = vpop.xlane.xlu0 %5111  ;;  %v5268_v23 = vrot.slane %v5127_v0, %v11421_v21 }
0x1338   :  { %v5245_v5 = vrot.slane %v5112_v45, %v11420_v11 }
0x133a   :  { %v5246_v52 = vsel %vm1315_vm8, %v5245_v5, %v5241_v60  ;;  %v5676_v32 = vpop.xlane.xlu1 %5675 }
0x133b   :  { %v5373_v8 = vsel %vm1452_vm10, %v5246_v52, %v5237_v46  ;;  %v5118_v48 = vpop.xlane.xlu0 %5117  ;;  %v5808_v9 = vrot.slane %v5676_v32, %v11421_v21  ;;  %v5799_v46 = vrot.slane %v10405_v47, %v11421_v21  ;;  %v4744_v32 = vrot.slane %v10413_v10, %v11421_v21 }
0x133c   :  { %v5254_v49 = vrot.slane %v5118_v48, %v11420_v11  ;;  %v4757_v10 = vrot.slane %v10419_v54, %v11420_v11  ;;  %v4771_v54 = vrot.slane %v10429_v33, %v11421_v21 }
0x133e   :  { %v5255_v56 = vsel %vm1315_vm8, %v5254_v49, %v5250_v13  ;;  %v5682_v55 = vpop.xlane.xlu1 %5681 }
0x133f   :  { %v10516_v38 = vsel %vm1454_vm11, %v5255_v56, %v5373_v8  ;;  %v5130_v28 = vpop.xlane.xlu0 %5129  ;;  %v5803_v8 = vrot.slane %v10403_v53, %v11420_v11  ;;  %v5817_v13 = vrot.slane %v5682_v55, %v11421_v21  ;;  %v4748_v55 = vrot.slane %v10411_v42, %v11420_v11 }
0x1340   :  { %v5272_v58 = vrot.slane %v5130_v28, %v11420_v11 }
0x1341   :  { %v5804_v56 = vsel %vm1315_vm8, %v5803_v8, %v5799_v46  ;;  %v4749_v46 = vsel %vm1315_vm8, %v4748_v55, %v4744_v32  ;;  %v4775_v32 = vrot.slane %v10427_v51, %v11420_v11 }
0x1342   :  { %v10521_v45 = vsel %vm1315_vm8, %v5272_v58, %v5268_v23  ;;  %v5694_v60 = vpop.xlane.xlu1 %5693  ;;  %v4753_v23 = vrot.slane %v10421_v59, %v11421_v21 }
0x1343   :  { %v5679_v36 = vpop.xlane.xlu0 %5678 }
0x1344   :  { %v5812_v5 = vrot.slane %v5679_v36, %v11420_v11  ;;  %v4758_v59 = vsel %vm1315_vm8, %v4757_v10, %v4753_v23 }
0x1346   :  { %v5813_v52 = vsel %vm1315_vm8, %v5812_v5, %v5808_v9  ;;  %v4600_v48 = vpop.xlane.xlu1 %4599  ;;  %v5835_v9 = vrot.slane %v5694_v60, %v11421_v21  ;;  %v4811_v60 = vsel %vm1452_vm10, %v4749_v46, %v10367_v43  ;;  %v4776_v43 = vsel %vm1315_vm8, %v4775_v32, %v4771_v54 }
0x1347   :  { %v5685_v0 = vpop.xlane.xlu0 %5684  ;;  %v5940_v28 = vsel %vm1452_vm10, %v5813_v52, %v5804_v56  ;;  %v4685_v32 = vrot.slane %v10497_v31, %v11420_v11 }
0x1348   :  { %v5821_v49 = vrot.slane %v5685_v0, %v11420_v11 }
0x134a   :  { %v5822_v47 = vsel %vm1315_vm8, %v5821_v49, %v5817_v13  ;;  %v4612_v36 = vpop.xlane.xlu1 %4611  ;;  %v4762_v13 = vrot.slane %v4600_v48, %v11421_v21  ;;  %v4812_v49 = vsel %vm1454_vm11, %v4758_v59, %v4811_v60 }
0x134b   :  { %v10540_v53 = vsel %vm1454_vm11, %v5822_v47, %v5940_v28  ;;  %v5697_v58 = vpop.xlane.xlu0 %5696  ;;  %v4780_v48 = vrot.slane %v4612_v36, %v11421_v21 }
0x134c   :  { %v5839_v5 = vrot.slane %v5697_v58, %v11420_v11 }
0x134e   :  { %v10550_v52 = vsel %vm1315_vm8, %v5839_v5, %v5835_v9  ;;  %v10553_v0 = vpop.xlane.xlu1 %4617 }
0x134f   :  { %v4603_v8 = vpop.xlane.xlu0 %4602 }
0x1350   :  { %v4766_v42 = vrot.slane %v4603_v8, %v11420_v11 }
0x1352   :  { %v4767_v56 = vsel %vm1315_vm8, %v4766_v42, %v4762_v13  ;;  %v10566_v23 = vpop.xlane.xlu1 %5168 }
0x1353   :  { %v4813_v28 = vsel %vm1456_vm12, %v4767_v56, %v4812_v49  ;;  %v4615_v47 = vpop.xlane.xlu0 %4614  ;;  %v4676_v56 = vrot.slane %v10491_v19, %v11420_v11 }
0x1354   :  { %v4784_v58 = vrot.slane %v4615_v47, %v11420_v11  ;;  %v4814_v55 = vsel %vm1458_vm14, %v4776_v43, %v4813_v28  ;;  %v4681_v43 = vrot.slane %v10485_v6, %v11421_v21 }
0x1356   :  { %v4785_v33 = vsel %vm1315_vm8, %v4784_v58, %v4780_v48  ;;  %v10578_v51 = vpop.xlane.xlu1 %5180  ;;  %v4667_v48 = vrot.slane %v10389_v40, %v11420_v11  ;;  %v4672_v58 = vrot.slane %v10483_v63, %v11421_v21  ;;  %v4686_v31 = vsel %vm1315_vm8, %v4685_v32, %v4681_v43 }
0x1357   :  { %v10574_v9 = vsel %vm1460_vm15, %v4785_v33, %v4814_v55  ;;  %v10576_v5 = vpop.xlane.xlu0 %4620  ;;  %v4663_v33 = vrot.slane %v10387_v3, %v11421_v21  ;;  %v4703_v55 = vrot.slane %v10501_v37, %v11420_v11  ;;  %v4699_v3 = vrot.slane %v10493_v14, %v11421_v21 }
0x1358   :  { %v4677_v19 = vsel %vm1315_vm8, %v4676_v56, %v4672_v58 }
0x1359   :  { %v4668_v40 = vsel %vm1315_vm8, %v4667_v48, %v4663_v33  ;;  %v4704_v37 = vsel %vm1315_vm8, %v4703_v55, %v4699_v3 }
0x135a   :  { %v10582_v46 = vpop.xlane.xlu1 %5186  ;;  %v4804_v6 = vsel %vm1452_vm10, %v4677_v19, %v4668_v40 }
0x135b   :  { %v10580_v10 = vpop.xlane.xlu0 %5171  ;;  %v4805_v56 = vsel %vm1454_vm11, %v4686_v31, %v4804_v6 }
0x135e   :  { %v10586_v59 = vpop.xlane.xlu1 %5735 }
0x135f   :  { %v10584_v36 = vpop.xlane.xlu0 %5183 }
0x1362   :  { %v10590_v13 = vpop.xlane.xlu1 %5747 }
0x1363   :  { %v10588_v8 = vpop.xlane.xlu0 %5189 }
0x1366   :  { %v10594_v60 = vpop.xlane.xlu1 %5753 }
0x1367   :  { %v10592_v42 = vpop.xlane.xlu0 %5738 }
0x136a   :  { %v4552_v49 = vpop.xlane.xlu1 %4551 }
0x136b   :  { %v10596_v54 = vpop.xlane.xlu0 %5750  ;;  %v4690_v63 = vrot.slane %v4552_v49, %v11421_v21 }
0x136e   :  { %v10604_v47 = vpop.xlane.xlu1 %4563 }
0x136f   :  { %v10602_v28 = vpop.xlane.xlu0 %5756 }
0x1372   :  { %v10618_v62 = vpop.xlane.xlu1 %4569 }
0x1373   :  { %v4555_v50 = vpop.xlane.xlu0 %4554 }
0x1374   :  { %v4694_v1 = vrot.slane %v4555_v50, %v11420_v11 }
0x1376   :  { %v4695_v32 = vsel %vm1315_vm8, %v4694_v1, %v4690_v63  ;;  %v5121_v48 = vpop.xlane.xlu1 %5120 }
0x1377   :  { %v4806_v58 = vsel %vm1456_vm12, %v4695_v32, %v4805_v56  ;;  %v10630_v43 = vpop.xlane.xlu0 %4566  ;;  %v5259_v31 = vrot.slane %v5121_v48, %v11421_v21  ;;  %v5313_v48 = vrot.slane %v10437_v41, %v11421_v21 }
0x1378   :  { %v10633_v49 = vsel %vm1458_vm14, %v4704_v37, %v4806_v58 }
0x137a   :  { %v10637_v33 = vpop.xlane.xlu1 %5132 }
0x137b   :  { %v10635_v50 = vpop.xlane.xlu0 %4572 }
0x137e   :  { %v10639_v14 = vpop.xlane.xlu1 %5138 }
0x137f   :  { %v5124_v19 = vpop.xlane.xlu0 %5123 }
0x1380   :  { %v5263_v1 = vrot.slane %v5124_v19, %v11420_v11 }
0x1382   :  { %v5264_v55 = vsel %vm1315_vm8, %v5263_v1, %v5259_v31  ;;  %v5688_v6 = vpop.xlane.xlu1 %5687  ;;  %v5322_v31 = vrot.slane %v10445_v26, %v11421_v21  ;;  %v5889_v26 = vrot.slane %v10469_v34, %v11421_v21  ;;  %v4793_v34 = vrot.slane %v10576_v5, %v11420_v11 }
0x1383   :  { %v5375_v40 = vsel %vm1456_vm12, %v5264_v55, %v10516_v38  ;;  %v10646_v63 = vpop.xlane.xlu0 %5135  ;;  %v5826_v19 = vrot.slane %v5688_v6, %v11421_v21  ;;  %v5326_v55 = vrot.slane %v10443_v7, %v11420_v11 }
0x1384   :  { %v10650_v3 = vsel %vm1458_vm14, %v10521_v45, %v5375_v40  ;;  %v5317_v45 = vrot.slane %v10435_v27, %v11420_v11  ;;  %v5880_v40 = vrot.slane %v10461_v20, %v11421_v21  ;;  %v5335_v27 = vrot.slane %v10580_v10, %v11420_v11 }
0x1385   :  { %v5327_v20 = vsel %vm1315_vm8, %v5326_v55, %v5322_v31  ;;  %v5331_v10 = vrot.slane %v10566_v23, %v11421_v21 }
0x1386   :  { %v10654_v32 = vpop.xlane.xlu1 %5699  ;;  %v5318_v39 = vsel %vm1315_vm8, %v5317_v45, %v5313_v48  ;;  %v5893_v48 = vrot.slane %v10467_v4, %v11420_v11  ;;  %v4789_v4 = vrot.slane %v10553_v0, %v11421_v21 }
0x1387   :  { %v10652_v56 = vpop.xlane.xlu0 %5141  ;;  %v5336_v5 = vsel %vm1315_vm8, %v5335_v27, %v5331_v10 }
0x1388   :  { %v5894_v45 = vsel %vm1315_vm8, %v5893_v48, %v5889_v26  ;;  %v4794_v55 = vsel %vm1315_vm8, %v4793_v34, %v4789_v4  ;;  %v11434_v4 = vld [vmem:[#allocation67_spill] sm:$0xff] }
0x1389   :  { %v4816_v48 = vsel %vm11432_vm1, %v4794_v55, %v10574_v9  ;;  %vm11435_vm5 = vcmp.gt.f32.partialorder %v11434_v4, 0.0  ;;  %vm11442_vm1 = vmmov %vm11438_vm2 }
0x138a   :  { %v10656_v58 = vpop.xlane.xlu1 %5705  ;;  %vm11439_vm9 = vmmov %vm11435_vm5 }
0x138b   :  { %v5691_v37 = vpop.xlane.xlu0 %5690 }
0x138c   :  { %v5830_v38 = vrot.slane %v5691_v37, %v11420_v11 }
0x138e   :  { %v5831_v1 = vsel %vm1315_vm8, %v5830_v38, %v5826_v19  ;;  %v4624_v37 = vpop.xlane.xlu1 %4623  ;;  %v5340_v19 = vrot.slane %v10453_v12, %v11421_v21  ;;  %v5344_v12 = vrot.slane %v10451_v18, %v11420_v11  ;;  %v5353_v18 = vrot.slane %v10584_v36, %v11420_v11 }
0x138f   :  { %v5942_v41 = vsel %vm1456_vm12, %v5831_v1, %v10540_v53  ;;  %v10673_v6 = vpop.xlane.xlu0 %5702  ;;  %v5884_v53 = vrot.slane %v10459_v15, %v11420_v11  ;;  %v4798_v36 = vrot.slane %v4624_v37, %v11421_v21 }
0x1390   :  { %v10682_v7 = vsel %vm1458_vm14, %v10550_v52, %v5942_v41  ;;  %v5380_v52 = vsel %vm1452_vm10, %v5318_v39, %v10376_v61  ;;  %v5902_v39 = vrot.slane %v10592_v42, %v11420_v11  ;;  %v5345_v61 = vsel %vm1315_vm8, %v5344_v12, %v5340_v19 }
0x1391   :  { %v5885_v38 = vsel %vm1315_vm8, %v5884_v53, %v5880_v40  ;;  %v5381_v23 = vsel %vm1454_vm11, %v5327_v20, %v5380_v52  ;;  %v5362_v41 = vrot.slane %v10588_v8, %v11420_v11  ;;  %v5898_v42 = vrot.slane %v10586_v59, %v11421_v21 }
0x1392   :  { %v5193_v15 = vpop.xlane.xlu1 %5192  ;;  %v5947_v1 = vsel %vm1452_vm10, %v5885_v38, %v10385_v16  ;;  %v5382_v0 = vsel %vm1456_vm12, %v5336_v5, %v5381_v23  ;;  %v5911_v16 = vrot.slane %v10475_v22, %v11420_v11  ;;  %v5349_v20 = vrot.slane %v10578_v51, %v11421_v21 }
0x1393   :  { %v10698_v31 = vpop.xlane.xlu0 %5708  ;;  %v5948_v40 = vsel %vm1454_vm11, %v5894_v45, %v5947_v1  ;;  %v5907_v19 = vrot.slane %v10477_v57, %v11421_v21  ;;  %v5358_v8 = vrot.slane %v10582_v46, %v11421_v21  ;;  %v5903_v59 = vsel %vm1315_vm8, %v5902_v39, %v5898_v42 }
0x1394   :  { %v5354_v22 = vsel %vm1315_vm8, %v5353_v18, %v5349_v20  ;;  %v5383_v34 = vsel %vm1458_vm14, %v5345_v61, %v5382_v0  ;;  %v5920_v51 = vrot.slane %v10596_v54, %v11420_v11  ;;  %v5916_v57 = vrot.slane %v10590_v13, %v11421_v21 }
0x1395   :  { %v5363_v10 = vsel %vm1315_vm8, %v5362_v41, %v5358_v8  ;;  %v5929_v46 = vrot.slane %v10602_v28, %v11420_v11  ;;  %v5949_v12 = vsel %vm1456_vm12, %v5903_v59, %v5948_v40  ;;  %v5367_v45 = vrot.slane %v5193_v15, %v11421_v21 }
0x1396   :  { %v5760_v27 = vpop.xlane.xlu1 %5759  ;;  %v5912_v23 = vsel %vm1315_vm8, %v5911_v16, %v5907_v19  ;;  %v5384_v13 = vsel %vm1460_vm15, %v5354_v22, %v5383_v34  ;;  %v5925_v28 = vrot.slane %v10594_v60, %v11421_v21  ;;  %v5921_v61 = vsel %vm1315_vm8, %v5920_v51, %v5916_v57 }
0x1397   :  { %v4627_v26 = vpop.xlane.xlu0 %4626  ;;  %v4712_v15 = vrot.slane %v10630_v43, %v11420_v11  ;;  %v5385_v55 = vsel %vm11437_vm13, %v5363_v10, %v5384_v13  ;;  %v5950_v18 = vsel %vm1458_vm14, %v5912_v23, %v5949_v12  ;;  %v4721_v60 = vrot.slane %v10635_v50, %v11420_v11  ;;  %vm11446_vm13 = vmmov %vm11442_vm1  ;;  %v11448_v23 = vld [vmem:[#allocation68_spill] sm:$0xff] }
0x1398   :  { %v4802_v53 = vrot.slane %v4627_v26, %v11420_v11  ;;  %v5930_v40 = vsel %vm1315_vm8, %v5929_v46, %v5925_v28  ;;  %v4708_v43 = vrot.slane %v10604_v47, %v11421_v21  ;;  %v5934_v26 = vrot.slane %v5760_v27, %v11421_v21 }
0x1399   :  { %v4717_v50 = vrot.slane %v10618_v62, %v11421_v21  ;;  %v5281_v57 = vrot.slane %v10646_v63, %v11420_v11  ;;  %v5277_v63 = vrot.slane %v10637_v33, %v11421_v21  ;;  %v5286_v28 = vrot.slane %v10639_v14, %v11421_v21  ;;  %v11453_v33 = vld [vmem:[#allocation87_spill] sm:$0xff] }
0x139a   :  { %v4803_v37 = vsel %vm1315_vm8, %v4802_v53, %v4798_v36  ;;  %v4576_v38 = vpop.xlane.xlu1 %4575  ;;  %v5951_v36 = vsel %vm1460_vm15, %v5921_v61, %v5950_v18  ;;  %v4713_v19 = vsel %vm1315_vm8, %v4712_v15, %v4708_v43  ;;  %v4255_v18 = vrot.slane %v11453_v33, %v11421_v21 }
0x139b   :  { %v5196_v52 = vpop.xlane.xlu0 %5195  ;;  %v4817_v9 = vsel %vm11433_vm6, %v4803_v37, %v4816_v48  ;;  %v5952_v27 = vsel %vm11441_vm7, %v5930_v40, %v5951_v36  ;;  %v4722_v8 = vsel %vm1315_vm8, %v4721_v60, %v4717_v50  ;;  %v4726_v34 = vrot.slane %v4576_v38, %v11421_v21  ;;  %vm11443_vm6 = vmmov %vm11435_vm5  ;;  %v11454_v40 = vld [vmem:[#allocation91_spill] sm:$0xff]  ;;  %v11455_v50 = vld [vmem:[#allocation85_spill] sm:$0xff] }
0x139c   :  { %v5371_v54 = vrot.slane %v5196_v52, %v11420_v11  ;;  %v10750_v5 = vsel %vm11435_vm5, %v4817_v9, -1e+30  ;;  %v4808_v37 = vsel %vm1460_vm15, %v4713_v19, %v10633_v49  ;;  %vm11444_vm5 = vmmov %vm11440_vm3  ;;  %v5290_v9 = vrot.slane %v10652_v56, %v11420_v11  ;;  %v11447_v49 = vld [vmem:[#allocation89_spill] sm:$0xff] }
0x139d   :  { %v4825_v39 = vsel %vm11436_vm4, %v10750_v5, -inf  ;;  %vm11445_vm4 = vmmov %vm11441_vm7  ;;  %v5282_v15 = vsel %vm1315_vm8, %v5281_v57, %v5277_v63  ;;  %v4264_v60 = vrot.slane %v11454_v40, %v11421_v21  ;;  %v4196_v19 = vrot.slane %v10156_v44, %v11420_v11 }
0x139e   :  { %v5372_v1 = vsel %vm1315_vm8, %v5371_v54, %v5367_v45  ;;  %4826 = vmax.xlane.f32.xlu0 %v4825_v39  ;;  %v10768_v42 = vpop.xlane.xlu1 %4089  ;;  %v4809_v52 = vsel %vm11445_vm4, %v4722_v8, %v4808_v37  ;;  %v4183_v54 = vrot.slane %v11447_v49, %v11421_v21  ;;  %v11451_v39 = vld [vmem:[#allocation83_spill] sm:$0xff]  ;;  %v5291_v14 = vsel %vm1315_vm8, %v5290_v9, %v5286_v28  ;;  %vm11457_vm7 = vmmov %vm11442_vm1 }
0x139f   :  { %v5763_v0 = vpop.xlane.xlu0 %5762  ;;  %v5386_v41 = vsel %vm11438_vm2, %v5372_v1, %v5385_v55  ;;  %vm11449_vm2 = vcmp.gt.f32.partialorder %v11448_v23, 0.0  ;;  %v4187_v61 = vrot.slane %v11451_v39, %v11420_v11  ;;  %v11452_v1 = vld [vmem:[#allocation81_spill] sm:$0xff]  ;;  %v4210_v8 = vrot.slane %v10314_v35, %v11421_v21 }
0x13a0   :  { %v5938_v16 = vrot.slane %v5763_v0, %v11420_v11  ;;  %v10776_v20 = vsel %vm11439_vm9, %v5386_v41, -1e+30  ;;  %vm11450_vm9 = vmmov %vm11440_vm3  ;;  %v4259_v55 = vrot.slane %v11452_v1, %v11420_v11  ;;  %v4205_v44 = vrot.slane %v10164_v25, %v11420_v11  ;;  %v11459_v25 = vld [vmem:[#allocation86_spill] sm:$0xff] }
0x13a1   :  { %v5394_v53 = vsel %vm11440_vm3, %v10776_v20, -inf  ;;  %v4188_v43 = vsel %vm1315_vm8, %v4187_v61, %v4183_v54  ;;  %vm11456_vm3 = vmmov %vm11445_vm4  ;;  %v5853_v57 = vrot.slane %v10656_v58, %v11421_v21  ;;  %v4219_v58 = vrot.slane %v10178_v29, %v11421_v21  ;;  %v11462_v61 = vld [vmem:[#allocation94_spill] sm:$0xff] }
0x13a2   :  { %v5939_v47 = vsel %vm1315_vm8, %v5938_v16, %v5934_v26  ;;  %5395 = vmax.xlane.f32.xlu0 %v5394_v53  ;;  %v5145_v22 = vpop.xlane.xlu1 %5144  ;;  %v4192_v26 = vrot.slane %v10158_v17, %v11421_v21  ;;  %v4268_v53 = vrot.slane %v11455_v50, %v11420_v11  ;;  %v5848_v17 = vrot.slane %v10673_v6, %v11420_v11  ;;  %vm11467_vm4 = vmmov %vm11457_vm7 }
0x13a3   :  { %v4579_v59 = vpop.xlane.xlu0 %4578  ;;  %v5953_v48 = vsel %vm11442_vm1, %v5939_v47, %v5952_v27  ;;  %v5295_v16 = vrot.slane %v5145_v22, %v11421_v21  ;;  %v4201_v47 = vrot.slane %v10166_v24, %v11421_v21  ;;  %v5377_v27 = vsel %vm1460_vm15, %v5282_v15, %v10650_v3  ;;  %vm11458_vm1 = vmmov %vm11449_vm2 }
0x13a4   :  { %v4730_v62 = vrot.slane %v4579_v59, %v11420_v11  ;;  %v10792_v51 = vsel %vm11443_vm6, %v5953_v48, -1e+30  ;;  %v5378_v48 = vsel %vm11456_vm3, %v5291_v14, %v5377_v27  ;;  %v4269_v22 = vsel %vm1315_vm8, %v4268_v53, %v4264_v60  ;;  %vm11460_vm6 = vmmov %vm11444_vm5  ;;  %v11463_v60 = vld [vmem:[#allocation95_spill] sm:$0xff]  ;;  %v11466_v53 = vld [vmem:[#allocation90_spill] sm:$0xff] }
0x13a5   :  { %v5961_v10 = vsel %vm11444_vm5, %v10792_v51, -inf  ;;  %v5857_v24 = vrot.slane %v10698_v31, %v11420_v11  ;;  %v4197_v35 = vsel %vm1315_vm8, %v4196_v19, %v4192_v26  ;;  %v4214_v6 = vrot.slane %v10312_v2, %v11420_v11  ;;  %v11461_v2 = vld [vmem:[#allocation93_spill] sm:$0xff]  ;;  %vm11465_vm5 = vmmov %vm11456_vm3 }
0x13a6   :  { %v4731_v46 = vsel %vm1315_vm8, %v4730_v62, %v4726_v34  ;;  %5962 = vmax.xlane.f32.xlu0 %v5961_v10  ;;  %v10807_v45 = vpop.xlane.xlu1 %4131  ;;  %v5844_v62 = vrot.slane %v10654_v32, %v11421_v21  ;;  %v4277_v10 = vrot.slane %v11459_v25, %v11420_v11  ;;  %v4206_v31 = vsel %vm1315_vm8, %v4205_v44, %v4201_v47 }
0x13a7   :  { %v10804_v38 = vpop.xlane.xlu0 %4092  ;;  %v4810_v12 = vsel %vm11446_vm13, %v4731_v46, %v4809_v52  ;;  %v4273_v9 = vrot.slane %v11461_v2, %v11421_v21  ;;  %v4215_v32 = vsel %vm1315_vm8, %v4214_v6, %v4210_v8  ;;  %v4324_v54 = vsel %vm1452_vm10, %v4197_v35, %v4188_v43  ;;  %v11464_v43 = vld [vmem:[#allocation97_spill] sm:$0xff]  ;;  %vm11468_vm13 = vmmov %vm11458_vm1  ;;  %v11474_v2 = vld [vmem:[#allocation92_spill] sm:$0xff] }
0x13a8   :  { %v10815_v13 = vsel %vm11449_vm2, %v4810_v12, -1e+30  ;;  %v4228_v12 = vrot.slane %v10322_v30, %v11421_v21  ;;  %v5849_v49 = vsel %vm1315_vm8, %v5848_v17, %v5844_v62  ;;  %v5858_v63 = vsel %vm1315_vm8, %v5857_v24, %v5853_v57  ;;  %vm11469_vm2 = vmmov %vm11460_vm6 }
0x13a9   :  { %v4822_v56 = vsel %vm11450_vm9, %v10815_v13, -inf  ;;  %v4241_v28 = vrot.slane %v10804_v38, %v11420_v11  ;;  %v4325_v39 = vsel %vm1454_vm11, %v4206_v31, %v4324_v54  ;;  %v4232_v15 = vrot.slane %v11462_v61, %v11420_v11  ;;  %vm11470_vm9 = vmmov %vm11456_vm3 }
0x13aa   :  { %4823 = vmax.xlane.f32.xlu1 %v4822_v56  ;;  %v5712_v41 = vpop.xlane.xlu1 %5711  ;;  %v4223_v14 = vrot.slane %v11463_v60, %v11420_v11  ;;  %v4326_v29 = vsel %vm1456_vm12, %v4215_v32, %v4325_v39  ;;  %v4237_v38 = vrot.slane %v10768_v42, %v11421_v21  ;;  %v4282_v26 = vrot.slane %v11464_v43, %v11421_v21  ;;  %vm11472_vm3 = vmmov %vm11467_vm4 }
0x13ab   :  { %v5148_v0 = vpop.xlane.xlu0 %5147  ;;  %v5862_v30 = vrot.slane %v5712_v41, %v11421_v21  ;;  %v4286_v19 = vrot.slane %v11466_v53, %v11420_v11  ;;  %v4260_v44 = vsel %vm1315_vm8, %v4259_v55, %v4255_v18  ;;  %v4278_v24 = vsel %vm1315_vm8, %v4277_v10, %v4273_v9  ;;  %v11471_v55 = vld [vmem:[#allocation99_spill] sm:$0xff] }
0x13ac   :  { %v5299_v36 = vrot.slane %v5148_v0, %v11420_v11  ;;  %v5944_v0 = vsel %vm1460_vm15, %v5849_v49, %v10682_v7  ;;  %v4224_v50 = vsel %vm1315_vm8, %v4223_v14, %v4219_v58  ;;  %v4242_v47 = vsel %vm1315_vm8, %v4241_v28, %v4237_v38  ;;  %v11480_v14 = vld [vmem:[#allocation76_spill] sm:$0xff] }
0x13ad   :  { %v4287_v6 = vsel %vm1315_vm8, %v4286_v19, %v4282_v26  ;;  %v4331_v1 = vsel %vm1452_vm10, %v4269_v22, %v4260_v44  ;;  %v4291_v18 = vrot.slane %v11471_v55, %v11421_v21  ;;  %v4295_v9 = vrot.slane %v11474_v2, %v11420_v11  ;;  %vm11475_vm10 = vmmov %vm11469_vm2 }
0x13ae   :  { %v5300_v59 = vsel %vm1315_vm8, %v5299_v36, %v5295_v16  ;;  %v4096_v52 = vpop.xlane.xlu1 %4095  ;;  %v4233_v16 = vsel %vm1315_vm8, %v4232_v15, %v4228_v12  ;;  %v5945_v36 = vsel %vm11465_vm5, %v5858_v63, %v5944_v0  ;;  %v4332_v57 = vsel %vm1454_vm11, %v4278_v24, %v4331_v1  ;;  %vm11476_vm11 = vmmov %vm11465_vm5 }
0x13af   :  { %v10855_v34 = vpop.xlane.xlu0 %4134  ;;  %v5379_v3 = vsel %vm11457_vm7, %v5300_v59, %v5378_v48  ;;  %v4246_v8 = vrot.slane %v4096_v52, %v11421_v21  ;;  %v4327_v48 = vsel %vm1458_vm14, %v4224_v50, %v4326_v29  ;;  %vm11473_vm7 = vmmov %vm11458_vm1  ;;  %v4333_v22 = vsel %vm1456_vm12, %v4287_v6, %v4332_v57  ;;  %v11481_v29 = vld [vmem:[#allocation73_spill] sm:$0xff] }
0x13b0   :  { %v10865_v37 = vsel %vm11458_vm1, %v5379_v3, -1e+30  ;;  %v4328_v35 = vsel %vm1460_vm15, %v4233_v16, %v4327_v48  ;;  %v4304_v62 = vrot.slane %v10855_v34, %v11420_v11  ;;  %vm11477_vm12 = vmmov %vm11472_vm3  ;;  %vm11478_vm1 = vcmp.gt.f32.partialorder %v11434_v4, 0.0 }
0x13b1   :  { %v5391_v46 = vsel %vm11460_vm6, %v10865_v37, -inf  ;;  %v4329_v33 = vsel %vm11470_vm9, %v4242_v47, %v4328_v35  ;;  %vm11479_vm6 = vmmov %vm11469_vm2  ;;  %v10958_v0 = vpack.i.bf16 %v11481_v29, %v11480_v14 }
0x13b2   :  { %5392 = vmax.xlane.f32.xlu1 %v5391_v46  ;;  %v4138_v27 = vpop.xlane.xlu1 %4137  ;;  %v4300_v46 = vrot.slane %v10807_v45, %v11421_v21  ;;  %v4296_v45 = vsel %vm1315_vm8, %v4295_v9, %v4291_v18  ;;  %vm11485_vm5 = vmmov %vm11469_vm2 }
0x13b3   :  { %v5715_v56 = vpop.xlane.xlu0 %5714  ;;  %v4309_v32 = vrot.slane %v4138_v27, %v11421_v21  ;;  %v4334_v23 = vsel %vm1458_vm14, %v4296_v45, %v4333_v22  ;;  %vm11483_vm14 = vmmov %vm11469_vm2 }
0x13b4   :  { %v5866_v40 = vrot.slane %v5715_v56, %v11420_v11  ;;  %v4305_v54 = vsel %vm1315_vm8, %v4304_v62, %v4300_v46  ;;  %vm11488_vm9 = vmmov %vm11469_vm2 }
0x13b5   :  { %v4335_v39 = vsel %vm1460_vm15, %v4305_v54, %v4334_v23  ;;  %vm11484_vm15 = vmmov %vm11469_vm2 }
0x13b6   :  { %v5867_v41 = vsel %vm1315_vm8, %v5866_v40, %v5862_v30  ;;  %v4144_v12 = vpop.xlane.xlu1 %4143 }
0x13b7   :  { %v4099_v7 = vpop.xlane.xlu0 %4098  ;;  %v5946_v42 = vsel %vm11467_vm4, %v5867_v41, %v5945_v36  ;;  %v4318_v28 = vrot.slane %v4144_v12, %v11421_v21  ;;  %vm11486_vm4 = vmmov %vm11469_vm2 }
0x13b8   :  { %v4250_v17 = vrot.slane %v4099_v7, %v11420_v11  ;;  %v5956_v59 = vsel %vm11468_vm13, %v5946_v42, -1e+30  ;;  %vm11487_vm13 = vmmov %vm11469_vm2 }
0x13b9   :  { %v5958_v3 = vsel %vm11469_vm2, %v5956_v59, -inf }
0x13ba   :  { %v4251_v25 = vsel %vm1315_vm8, %v4250_v17, %v4246_v8  ;;  %5959 = vmax.xlane.f32.xlu1 %v5958_v3 }
0x13bb   :  { %v4141_v10 = vpop.xlane.xlu0 %4140  ;;  %v4330_v31 = vsel %vm11472_vm3, %v4251_v25, %v4329_v33  ;;  %vm11489_vm3 = vmmov %vm11469_vm2 }
0x13bc   :  { %v4313_v34 = vrot.slane %v4141_v10, %v11420_v11  ;;  %v4340_v52 = vsel %vm11473_vm7, %v4330_v31, -1e+30  ;;  %vm11490_vm7 = vmmov %vm11469_vm2 }
0x13bd   :  { %v4342_v49 = vsel %vm11475_vm10, %v4340_v52, -inf  ;;  %vm11491_vm10 = vmmov %vm11469_vm2 }
0x13be   :  { %4343 = vmax.xlane.f32.xlu1 %v4342_v49  ;;  %v4314_v58 = vsel %vm1315_vm8, %v4313_v34, %v4309_v32 }
0x13bf   :  { %v4147_v63 = vpop.xlane.xlu0 %4146  ;;  %v4336_v15 = vsel %vm11476_vm11, %v4314_v58, %v4335_v39  ;;  %vm11492_vm11 = vmmov %vm11469_vm2 }
0x13c0   :  { %v4322_v56 = vrot.slane %v4147_v63, %v11420_v11 }
0x13c2   :  { %v4323_v61 = vsel %vm1315_vm8, %v4322_v56, %v4318_v28  ;;  %vm11482_vm8 = vmmov %vm11469_vm2 }
0x13c3   :  { %v4337_v30 = vsel %vm11477_vm12, %v4323_v61, %v4336_v15  ;;  %vm11493_vm12 = vmmov %vm11469_vm2 }
0x13c4   :  { %v4341_v40 = vsel %vm11478_vm1, %v4337_v30, -1e+30  ;;  %vm11494_vm1 = vmmov %vm11469_vm2 }
0x13c5   :  { %v4345_v60 = vsel %vm11479_vm6, %v4341_v40, -inf  ;;  %vm11495_vm6 = vmmov %vm11494_vm1 }
0x13c6   :  { %4346 = vmax.xlane.f32.xlu0 %v4345_v60 }
0x13cf   :  { %6876 = vrot.lane.b32.xlu1 %v10958_v0, %s7080_s0 }
0x142b   :  { %v4827_v16 = vpop.xlane.xlu0 %4826 }
0x142c   :  { %v4829_v35 = vsub.f32 %v10750_v5, %v4827_v16 }
0x142e   :  { %v4832_v33 = vmul.f32 1.442695, %v4829_v35 }
0x142f   :  { %v5396_v19 = vpop.xlane.xlu0 %5395 }
0x1430   :  { %v5398_v1 = vsub.f32 %v10776_v20, %v5396_v19 }
0x1432   :  { %v5401_v55 = vmul.f32 1.442695, %v5398_v1 }
0x1437   :  { %v4824_v11 = vpop.xlane.xlu1 %4823 }
0x1438   :  { %v4828_v21 = vsub.f32 %v10815_v13, %v4824_v11  ;;  %v5963_v13 = vpop.xlane.xlu0 %5962 }
0x1439   :  { %v5965_v18 = vsub.f32 %v10792_v51, %v5963_v13 }
0x143a   :  { %v4830_v38 = vmul.f32 1.442695, %v4828_v21 }
0x143b   :  { %v5968_v31 = vmul.f32 1.442695, %v5965_v18  ;;  %v11497_v18 = vld [vmem:[#allocation64_spill] sm:$0xff] }
0x143c   :  { %6943 = vpow2.f32 %v4830_v38 }
0x143f   :  { %v5393_v43 = vpop.xlane.xlu1 %5392 }
0x1440   :  { %v5397_v26 = vsub.f32 %v10865_v37, %v5393_v43 }
0x1442   :  { %v5399_v4 = vmul.f32 1.442695, %v5397_v26 }
0x1444   :  { %6945 = vpow2.f32 %v5399_v4 }
0x1446   :  { %v6944_v41 = vpop.eup %6943 }
0x1447   :  { %v5960_v36 = vpop.xlane.xlu1 %5959  ;;  %v4834_v50 = vsel %vm11482_vm8, %v6944_v41, 0.0  ;;  %vm11496_vm8 = vmmov %vm11494_vm1 }
0x1448   :  { %v5964_v53 = vsub.f32 %v5956_v59, %v5960_v36  ;;  %4835 = vadd.xlane.f32.xlu1 %v4834_v50  ;;  %v6824_v36 = vpack.c.bf16 %v11481_v29, %v11480_v14  ;;  %v6568_v14 = vld [vmem:[#allocation4 + $0x80] ss:$0 sm:$0xff] }
0x144a   :  { %v5966_v47 = vmul.f32 1.442695, %v5964_v53 }
0x144b   :  { %v4344_v7 = vpop.xlane.xlu1 %4343 }
0x144c   :  { %6947 = vpow2.f32 %v5966_v47  ;;  %v4348_v48 = vsub.f32 %v4340_v52, %v4344_v7 }
0x144e   :  { %v10965_v27 = vpop.eup %6945  ;;  %v4350_v6 = vmul.f32 1.442695, %v4348_v48 }
0x144f   :  { %v6877_v42 = vpop.permute.xlu1 %6876  ;;  %v5403_v37 = vsel %vm11483_vm14, %v10965_v27, 0.0 }
0x1450   :  { %v6879_v8 = vunpack.i.h.bf16 %v6877_v42  ;;  %v6878_v17 = vunpack.i.l.bf16 %v6877_v42  ;;  %5404 = vadd.xlane.f32.xlu1 %v5403_v37 }
0x1452   :  { %v6812_v44 = vpack.c.bf16 %v6879_v8, %v6878_v17 }
0x1453   :  { %v4347_v24 = vpop.xlane.xlu0 %4346 }
0x1454   :  { %v4349_v3 = vsub.f32 %v4341_v40, %v4347_v24  ;;  %6813 = vmatprep.subr.bf16.mxu0 %v6812_v44 }
0x1455   :  { %6815 = vmatpush3.bf16.msra.mxu0 %v6812_v44 }
0x1456   :  { %v10969_v59 = vpop.eup %6947  ;;  %v4352_v62 = vmul.f32 1.442695, %v4349_v3 }
0x1457   :  { %v5970_v25 = vsel %vm11484_vm15, %v10969_v59, 0.0 }
0x1458   :  { %6949 = vpow2.f32 %v4352_v62  ;;  %5971 = vadd.xlane.f32.xlu1 %v5970_v25 }
0x1459   :  { %6951 = vpow2.f32 %v4350_v6 }
0x145a   :  { %6953 = vpow2.f32 %v4832_v33 }
0x145b   :  { %6955 = vpow2.f32 %v5401_v55 }
0x145c   :  { %6957 = vpow2.f32 %v5968_v31 }
0x1462   :  { %v10976_v10 = vpop.eup %6949 }
0x1463   :  { %v4357_v5 = vsel %vm11485_vm5, %v10976_v10, 0.0  ;;  %v10980_v57 = vpop.eup %6951  ;;  %vm327_vm5 = vcmask 171048  }
0x1464   :  { %4358 = vadd.xlane.f32.xlu0 %v4357_v5  ;;  %v4354_v46 = vsel %vm11486_vm4, %v10980_v57, 0.0  ;;  %v6954_v20 = vpop.eup %6953  ;;  %vm11501_vm4 = vcmask 1043456  }
0x1465   :  { %v4837_v51 = vsel %vm11487_vm13, %v6954_v20, 0.0  ;;  %v6956_v34 = vpop.eup %6955  ;;  %vm11502_vm13 = vmmov %vm11501_vm4 }
0x1466   :  { %v5406_v52 = vsel %vm11469_vm2, %v6956_v34, 0.0  ;;  %v6958_v2 = vpop.eup %6957  ;;  %vm338_vm2 = vcmask 302248  }
0x1467   :  { %v5973_v9 = vsel %vm11488_vm9, %v6958_v2, 0.0  ;;  %vm6397_vm9 = vcmask 1041408  }
0x1468   :  { %4355 = vadd.xlane.f32.xlu0 %v4354_v46 }
0x1469   :  { %6886 = vrot.lane.b32.xlu1 %v10958_v0, %s7081_s28 }
0x146c   :  { %4838 = vadd.xlane.f32.xlu0 %v4837_v51 }
0x1470   :  { %5407 = vadd.xlane.f32.xlu0 %v5406_v52 }
0x1474   :  { %5974 = vadd.xlane.f32.xlu0 %v5973_v9 }
0x148a   :  { %6881 = vrot.lane.b32.xlu0 %v10958_v0, %s7075_s9 }
0x14d5   :  { %v4836_v22 = vpop.xlane.xlu1 %4835 }
0x14d6   :  { %6959 = vrcp.f32 %v4836_v22 }
0x14dd   :  { %v5405_v54 = vpop.xlane.xlu1 %5404 }
0x14de   :  { %6961 = vrcp.f32 %v5405_v54  ;;  %v11499_v54 = vld [vmem:[#allocation18_spill] sm:$0xff] }
0x14e0   :  { %v6960_v32 = vpop.eup %6959 }
0x14e1   :  { %v4842_v12 = vmul.f32 %v6960_v32, %v6944_v41 }
0x14e3   :  { %6729 = vmatprep.mubr.msk.f32.mxu0 %vm11489_vm3, %v4842_v12  ;;  %vm6390_vm3 = vcmask 15360  }
0x14e5   :  { %v5972_v63 = vpop.xlane.xlu1 %5971 }
0x14e8   :  { %v6962_v56 = vpop.eup %6961 }
0x14e9   :  { %v6887_v39 = vpop.permute.xlu1 %6886  ;;  %v5411_v40 = vmul.f32 %v6962_v56, %v10965_v27 }
0x14ea   :  { %v6889_v60 = vunpack.i.h.bf16 %v6887_v39  ;;  %v6888_v0 = vunpack.i.l.bf16 %v6887_v39 }
0x14ec   :  { %v6820_v26 = vpack.c.bf16 %v6889_v60, %v6888_v0  ;;  %v6571_v60 = vld [vmem:[#allocation4 + $0x88] ss:$0 sm:$0xff] }
0x14f1   :  { %v4359_v49 = vpop.xlane.xlu0 %4358 }
0x14f5   :  { %v4356_v45 = vpop.xlane.xlu0 %4355 }
0x14f9   :  { %v4839_v58 = vpop.xlane.xlu0 %4838 }
0x14fa   :  { %6963 = vrcp.f32 %v4839_v58  ;;  %v6292_v58 = vld [vmem:[#allocation6] sm:$0xf] }
0x14fb   :  { %6764 = vmatprep.subr.msk.mxu1 %vm11501_vm4, %v6292_v58 }
0x14fc   :  { %6765 = vmatpush3.msk.msra.mxu1 %vm11502_vm13, %v6292_v58 }
0x14fd   :  { %v5408_v23 = vpop.xlane.xlu0 %5407 }
0x14fe   :  { %6965 = vrcp.f32 %v5408_v23 }
0x14ff   :  { %6967 = vrcp.f32 %v5972_v63 }
0x1501   :  { %v5975_v28 = vpop.xlane.xlu0 %5974 }
0x1502   :  { %6969 = vrcp.f32 %v5975_v28 }
0x1503   :  { %6971 = vrcp.f32 %v4356_v45  ;;  %v11500_v45 = vld [vmem:[#allocation20_spill] sm:$0xff] }
0x1504   :  { %v6964_v61 = vpop.eup %6963  ;;  %6973 = vrcp.f32 %v4359_v49 }
0x1505   :  { %v4843_v15 = vmul.f32 %v6964_v61, %v6954_v20  ;;  %v6882_v30 = vpop.permute.xlu0 %6881 }
0x1506   :  { %v6884_v11 = vunpack.i.h.bf16 %v6882_v30  ;;  %v6883_v21 = vunpack.i.l.bf16 %v6882_v30 }
0x1507   :  { %6730 = vmatmul.mubr.msk.f32.vlgmr.msra.gmra.mrb[8].mxu0 %vm11490_vm7, %v4843_v15  ;;  %vm6476_vm7 = vcmask 7168  }
0x1508   :  { %v6816_v38 = vpack.c.bf16 %v6884_v11, %v6883_v21  ;;  %6736 = vmatprep.mubr.msk.f32.mxu0 %vm11491_vm10, %v5411_v40  ;;  %v6966_v43 = vpop.eup %6965  ;;  %v6573_v11 = vld [vmem:[#allocation4 + $0x98] ss:$0 sm:$0xff]  ;;  %v6572_v21 = vld [vmem:[#allocation4 + $0x90] ss:$0 sm:$0xff] }
0x1509   :  { %v6968_v4 = vpop.eup %6967  ;;  %v5412_v16 = vmul.f32 %v6966_v43, %v6956_v34 }
0x150a   :  { %6817 = vmatprep.subr.bf16.mxu0 %v6816_v38  ;;  %v5978_v41 = vmul.f32 %v6968_v4, %v10969_v59 }
0x150b   :  { %6819 = vmatpush3.bf16.msra.mxu0 %v6816_v38 }
0x150c   :  { %6821 = vmatprep.subr.bf16.mxu0 %v6820_v26  ;;  %v6970_v50 = vpop.eup %6969 }
0x150d   :  { %v6972_v53 = vpop.eup %6971  ;;  %v5979_v19 = vmul.f32 %v6970_v50, %v6958_v2 }
0x150e   :  { %v4362_v47 = vmul.f32 %v6972_v53, %v10980_v57  ;;  %v6974_v7 = vpop.eup %6973  ;;  %v11504_v53 = vld [vmem:[#allocation74_spill] sm:$0xff] }
0x150f   :  { %6737 = vmatmul.mubr.msk.f32.vlgmr.msra.gmra.mrb[8].mxu0 %vm11492_vm11, %v5412_v16  ;;  %v4363_v27 = vmul.f32 %v6974_v7, %v10976_v10  ;;  %v11498_v10 = vld [vmem:[#allocation65_spill] sm:$0xff] }
0x1510   :  { %6823 = vmatpush3.bf16.msra.mxu0 %v6820_v26  ;;  %6743 = vmatprep.mubr.msk.f32.mxu0 %vm11493_vm12, %v5978_v41  ;;  %v6890_v31 = vpack.i.bf16 %v11498_v10, %v11497_v18  ;;  %v11503_v26 = vld [vmem:[#allocation75_spill] sm:$0xff] }
0x1511   :  { %6825 = vmatprep.subr.bf16.mxu0 %v6824_v36  ;;  %v6282_v4 = vadd.f32 %v6573_v11, %v11503_v26 }
0x1517   :  { %6744 = vmatmul.mubr.msk.f32.vlgmr.msra.gmra.mrb[8].mxu0 %vm11494_vm1, %v5979_v19  ;;  %v6287_v19 = vadd.f32 %v11504_v53, %v6573_v11 }
0x1518   :  { %6827 = vmatpush3.bf16.msra.mxu0 %v6824_v36  ;;  %6750 = vmatprep.mubr.msk.f32.mxu0 %vm11495_vm6, %v4362_v47 }
0x151f   :  { %6751 = vmatmul.mubr.msk.f32.vlgmr.msra.gmra.mrb[8].mxu0 %vm11496_vm8, %v4363_v27  ;;  %v6294_v27 = vld [vmem:[#allocation6 + $0x10] sm:$0x3] }
0x1520   :  { %6769 = vmatprep.subr.msk.mxu1 %vm6397_vm9, %v6294_v27 }
0x15f2   :  { %v6752_v29 = vpop.f32.mrb[8].mxu0 }
0x15f3   :  { %v6153_v13 = vmul.f32 0.25, %v6752_v29  ;;  %v6139_v42 = vpop.f32.mrb[9].mxu0 }
0x15f4   :  { %v6152_v37 = vmul.f32 0.25, %v6139_v42 }
0x15f5   :  { %v6159_v8 = vadd.f32 %v6568_v14, %v6153_v13 }
0x15f6   :  { %v6158_v17 = vadd.f32 %v6568_v14, %v6152_v37  ;;  %v6576_v14 = vld [vmem:[#allocation6 + $0x8] ss:$0 sm:$0xff] }
0x15f7   :  { %v6163_v48 = vmin.f32 %v6159_v8, 0.0  ;;  %vm6161_vm14 = vcmp.gt.f32.partialorder %v6159_v8, 0.0 }
0x15f8   :  { %v6162_v44 = vmin.f32 %v6158_v17, 0.0  ;;  %vm6160_vm15 = vcmp.gt.f32.partialorder %v6158_v17, 0.0 }
0x15f9   :  { %v6166_v24 = vmul.f32 1.442695, %v6163_v48  ;;  %v6580_v48 = vld [vmem:[#allocation6 + $0x18] ss:$0 sm:$0xff] }
0x15fa   :  { %v6164_v3 = vmul.f32 1.442695, %v6162_v44 }
0x15fb   :  { %6975 = vpow2.f32 %v6166_v24 }
0x15fc   :  { %6977 = vpow2.f32 %v6164_v3 }
0x1605   :  { %v6976_v59 = vpop.eup %6975 }
0x1606   :  { %v6978_v35 = vpop.eup %6977  ;;  %v6570_v6 = vadd.f32 -1.0, %v6976_v59 }
0x1607   :  { %v6569_v62 = vadd.f32 -1.0, %v6978_v35 }
0x1608   :  { %v6171_v25 = vsel %vm6161_vm14, %v6159_v8, %v6570_v6 }
0x1609   :  { %v6175_v33 = vsel %vm96_vm0, %v6171_v25, 0.0  ;;  %v6170_v1 = vsel %vm6160_vm15, %v6158_v17, %v6569_v62 }
0x160a   :  { %6176 = vadd.xlane.f32.xlu0 %v6175_v33  ;;  %v6172_v55 = vsel %vm96_vm0, %v6170_v1, 0.0 }
0x160b   :  { %6173 = vadd.xlane.f32.xlu1 %v6172_v55 }
0x1620   :  { %6891 = vrot.lane.b32.xlu0 %v6890_v31, %s7082_s20 }
0x1697   :  { %v6177_v5 = vpop.xlane.xlu0 %6176 }
0x1698   :  { %v6180_v57 = vmul.f32 0.25, %v6177_v5  ;;  %v6174_v46 = vpop.xlane.xlu1 %6173 }
0x1699   :  { %v6179_v20 = vmul.f32 0.25, %v6174_v46 }
0x169a   :  { %v6182_v51 = vsub.f32 %v6171_v25, %v6180_v57 }
0x169b   :  { %v6181_v34 = vsub.f32 %v6170_v1, %v6179_v20  ;;  %v6892_v52 = vpop.permute.xlu0 %6891 }
0x169c   :  { %v6894_v2 = vunpack.i.h.bf16 %v6892_v52  ;;  %v6893_v9 = vunpack.i.l.bf16 %v6892_v52  ;;  %v6184_v12 = vmul.f32 %v6182_v51, %v6182_v51 }
0x169d   :  { %v6183_v22 = vmul.f32 %v6181_v34, %v6181_v34 }
0x169e   :  { %328 = vst.msk [vmem:[%s11055_s4] sm:$0xff] %vm327_vm5, %v6893_v9  ;;  %329 = vst.msk [vmem:[%s11055_s4 + $0x8] sm:$0xff] %vm327_vm5, %v6894_v2  ;;  %v6188_v49 = vsel %vm96_vm0, %v6184_v12, 0.0 }
0x169f   :  { %v6185_v32 = vsel %vm96_vm0, %v6183_v22, 0.0 }
0x16a0   :  { %6186 = vadd.xlane.f32.xlu1 %v6185_v32 }
0x16a4   :  { %6189 = vadd.xlane.f32.xlu1 %v6188_v49 }
0x16b5   :  { %332 = vrot.lane.b32.xlu1 %v11499_v54, %s7083_s1 }
0x16b9   :  { %334 = vrot.lane.b32.xlu1 %v11500_v45, %s7083_s1 }
0x172d   :  { %v6187_v63 = vpop.xlane.xlu1 %6186 }
0x172e   :  { %v6191_v23 = vmul.f32 0.25, %v6187_v63 }
0x1730   :  { %v6193_v28 = vadd.f32 1e-05, %v6191_v23 }
0x1731   :  { %v6190_v56 = vpop.xlane.xlu1 %6189 }
0x1732   :  { %6979 = vrsqrt.f32 %v6193_v28  ;;  %v6192_v39 = vmul.f32 0.25, %v6190_v56 }
0x1734   :  { %v6194_v61 = vadd.f32 1e-05, %v6192_v39 }
0x1735   :  { %v333_v15 = vpop.permute.xlu1 %332 }
0x1736   :  { %6981 = vrsqrt.f32 %v6194_v61  ;;  %339 = vst.msk [vmem:[%s11055_s4] sm:$0xff] %vm338_vm2, %v333_v15 }
0x1739   :  { %v335_v30 = vpop.permute.xlu1 %334 }
0x173a   :  { %340 = vst.msk [vmem:[%s11055_s4 + $0x8] sm:$0xff] %vm338_vm2, %v335_v30 }
0x173c   :  { %v6980_v40 = vpop.eup %6979 }
0x173d   :  { %v6197_v0 = vmul.f32 %v6980_v40, %v6181_v34 }
0x173f   :  { %v6203_v38 = vmul.f32 %v6571_v60, %v6197_v0 }
0x1740   :  { %v6982_v43 = vpop.eup %6981 }
0x1741   :  { %v6198_v16 = vmul.f32 %v6982_v43, %v6182_v51  ;;  %v6209_v41 = vadd.f32 %v6572_v21, %v6203_v38 }
0x1743   :  { %v6204_v36 = vmul.f32 %v6571_v60, %v6198_v16  ;;  %v6290_v50 = vadd.f32 %v6282_v4, %v6209_v41 }
0x1745   :  { %v6210_v47 = vadd.f32 %v6572_v21, %v6204_v36  ;;  %6766 = vmatprep.mubr.msk.f32.mxu1 %vm96_vm0, %v6290_v50  ;;  %6504 = vst.msk [vmem:[%s11055_s4] sm:$0xff] %vm96_vm0, %v6290_v50 }
0x1747   :  { %v6291_v7 = vadd.f32 %v6287_v19, %v6210_v47 }
0x1749   :  { %6767 = vmatmul.mubr.msk.f32.vlgmr.msra.gmra.mrb[14].mxu1 %vm96_vm0, %v6291_v7  ;;  %6505 = vst.msk [vmem:[%s11055_s4 + $0x8] sm:$0xff] %vm96_vm0, %v6291_v7  ;;  %vm6514_vm0 = vcmask 39968  }
0x174a   :  { %6770 = vmatpush3.msk.msra.mxu1 %vm6397_vm9, %v6294_v27 }
0x181c   :  { %v6768_v29 = vpop.f32.mrb[14].mxu1 }
0x181d   :  { %v6381_v13 = vadd.f32 %v6768_v29, %v6576_v14  ;;  %v6375_v42 = vpop.f32.mrb[15].mxu1 }
0x181e   :  { %v6376_v37 = vadd.f32 %v6576_v14, %v6375_v42 }
0x1820   :  { %6983 = vtanh.f32 %v6376_v37 }
0x1821   :  { %6985 = vtanh.f32 %v6381_v13 }
0x182a   :  { %v6984_v8 = vpop.eup %6983 }
0x182b   :  { %v6986_v17 = vpop.eup %6985  ;;  %6771 = vmatprep.mubr.msk.f32.mxu1 %vm6390_vm3, %v6984_v8 }
0x182c   :  { %6772 = vmatmul.mubr.msk.f32.vlgmr.msra.gmra.mrb[16].mxu1 %vm6390_vm3, %v6986_v17 }
0x18ff   :  { %v6773_v44 = vpop.f32.mrb[16].mxu1 }
0x1900   :  { %v6473_v24 = vadd.f32 %v6773_v44, %v6580_v48  ;;  %v6467_v3 = vpop.f32.mrb[17].mxu1 }
0x1901   :  { %v6468_v59 = vadd.f32 %v6580_v48, %v6467_v3 }
0x1902   :  { %v6478_v35 = vsel %vm6476_vm7, %v6473_v24, -inf }
0x1903   :  { %v6477_v6 = vsel %vm6476_vm7, %v6468_v59, -inf }
0x1904   :  { %v6479_v62 = vmax.f32 %v6477_v6, %v6478_v35 }
0x1906   :  { %v6480_v25 = vrot.slane %v6479_v62, 4 }
0x1908   :  { %v6481_v33 = vmax.f32 %v6479_v62, %v6480_v25 }
0x190a   :  { %v6482_v1 = vrot.slane %v6481_v33, 2 }
0x190c   :  { %v6483_v55 = vmax.f32 %v6481_v33, %v6482_v1 }
0x190e   :  { %v6484_v18 = vrot.slane %v6483_v55, 1 }
0x1910   :  { %v6485_v10 = vmax.f32 %v6483_v55, %v6484_v18 }
0x1912   :  { %v6486_v31 = vsub.f32 %v6468_v59, %v6485_v10  ;;  %v6487_v5 = vsub.f32 %v6473_v24, %v6485_v10 }
0x1914   :  { %v6488_v57 = vmul.f32 1.442695, %v6486_v31  ;;  %v6490_v46 = vmul.f32 1.442695, %v6487_v5 }
0x1916   :  { %6987 = vpow2.f32 %v6488_v57 }
0x1917   :  { %6989 = vpow2.f32 %v6490_v46 }
0x1920   :  { %v6988_v20 = vpop.eup %6987 }
0x1921   :  { %v6990_v51 = vpop.eup %6989  ;;  %v6492_v34 = vsel %vm6476_vm7, %v6988_v20, 0.0 }
0x1922   :  { %v6493_v52 = vsel %vm6476_vm7, %v6990_v51, 0.0 }
0x1923   :  { %v6494_v2 = vadd.f32 %v6493_v52, %v6492_v34 }
0x1925   :  { %v6495_v9 = vrot.slane %v6494_v2, 4 }
0x1927   :  { %v6496_v22 = vadd.f32 %v6495_v9, %v6494_v2 }
0x1929   :  { %v6497_v32 = vrot.slane %v6496_v22, 2 }
0x192b   :  { %v6498_v12 = vadd.f32 %v6497_v32, %v6496_v22 }
0x192d   :  { %v6499_v49 = vrot.slane %v6498_v12, 1 }
0x192f   :  { %v6500_v54 = vadd.f32 %v6499_v49, %v6498_v12 }
0x1931   :  { %6991 = vrcp.f32 %v6500_v54 }
0x193b   :  { %v6992_v45 = vpop.eup %6991 }
0x193c   :  { %v6503_v58 = vmul.f32 %v6992_v45, %v6990_v51  ;;  %v6502_v63 = vmul.f32 %v6992_v45, %v6988_v20 }
0x193e   :  { %6510 = vrot.lane.b32.xlu1 %v6503_v58, %s7079_s16  ;;  %6508 = vrot.lane.b32.xlu0 %v6502_v63, %s7079_s16 }
0x19b0   :  { %v6509_v23 = vpop.permute.xlu0 %6508  ;;  %v6511_v28 = vpop.permute.xlu1 %6510 }
0x19b1   :  { %6515 = vst.msk [vmem:[%s11055_s4] sm:$0xff] %vm6514_vm0, %v6509_v23  ;;  %6516 = vst.msk [vmem:[%s11055_s4 + $0x8] sm:$0xff] %vm6514_vm0, %v6511_v28 }
0x19b2   :  { %6521 = vsyncpa [#allocation3], 1 }
0x19b3   :  { %6522 = vsyncpa [#allocation5], 1 }

</bundles_post_ra>
